<compile_context>
chip_gen: v6e
topology: v6e:2x2x1
jax: 0.10.0
libtpu: 0.0.40
codegen_flags: <defaults>
</compile_context>

<pallas_src>
import jax
import jax.numpy as jnp
from jax import lax
from jax.experimental import pallas as pl
from jax.experimental.pallas import tpu as pltpu

C_OUT = 12
ROW_SPLITS = 2                 # pooled rows 0..4 / 5..9 on separate parallel grid steps
ROWS_PER_SPLIT = 10 // ROW_SPLITS


def model1_kernel(xp_ref, wt_ref, cb_ref, fcw_ref, o_ref):
    # xp_ref : [22, 22, Bt]                     padded images, batch in lanes
    # wt_ref : [9, 12, 1]                       conv taps (tap-major), channels in sublanes
    # cb_ref : [12, 1]                          conv bias
    # fcw_ref: [ROWS_PER_SPLIT, 2, 10, 12, 1]   FC weights [pool_row, out, pool_col, ch, 1]
    # o_ref  : [2, Bt]                          partial FC result for this row split
    Bt = o_ref.shape[-1]
    s = pl.program_id(0)                         # which half of the pooled rows
    row0 = 2 * ROWS_PER_SPLIT * s                # first padded-image row of this split

    # Hoisted lane-broadcasts of the lane-size-1 weight operands (reused 45x per row).
    wtb = jnp.broadcast_to(wt_ref[...], (9, C_OUT, Bt))      # [9, 12, Bt]
    cbb = jnp.broadcast_to(cb_ref[...], (C_OUT, Bt))         # [12, Bt]

    def row_body(t, carry):
        acc0, acc1 = carry                       # [12, Bt] per-channel FC partials
        prow = row0 + 2 * t                      # padded row of conv row 2i

        for cc in range(5):                      # pooled cols 2cc, 2cc+1 (conv cols 4cc..4cc+3)
            c0 = 4 * cc

            def conv_row(r):
                # ReLU(conv + bias) of conv row `r`, 4 conv cols of this block,
                # as 4 separate [12, Bt] (channel x batch) values.
                acc = [None] * 4
                for kh in range(3):
                    strip = xp_ref[pl.ds(r + kh, 1), c0:c0 + 6, :][0]       # [6, Bt]
                    # splat each needed image column across the 12 channel sublanes once,
                    # reused by all kw taps below
                    cols = [jnp.broadcast_to(strip[c:c + 1, :], (C_OUT, Bt))
                            for c in range(6)]
                    for kw in range(3):
                        w = wtb[kh * 3 + kw]                                 # [12, Bt]
                        for j in range(4):
                            term = cols[j + kw] * w
                            acc[j] = term if acc[j] is None else acc[j] + term
                return [jnp.maximum(a + cbb, 0.0) for a in acc]

            a0 = conv_row(prow)                  # conv row 2i
            a1 = conv_row(prow + 1)              # conv row 2i+1
            m = [jnp.maximum(x, y) for x, y in zip(a0, a1)]
            pooled0 = jnp.maximum(m[0], m[1])    # pooled col 2cc     [12, Bt]
            pooled1 = jnp.maximum(m[2], m[3])    # pooled col 2cc+1   [12, Bt]

            f = fcw_ref[pl.ds(t, 1), :, 2 * cc:2 * cc + 2, :, :][0]          # [2, 2, 12, 1]
            acc0 = acc0 + pooled0 * f[0, 0] + pooled1 * f[0, 1]
            acc1 = acc1 + pooled0 * f[1, 0] + pooled1 * f[1, 1]
        return acc0, acc1

    init = (jnp.zeros((C_OUT, Bt), jnp.float32),
            jnp.zeros((C_OUT, Bt), jnp.float32))
    acc0, acc1 = lax.fori_loop(0, ROWS_PER_SPLIT, row_body, init)

    # single cross-sublane (channel) reduction per output feature
    r0 = jnp.sum(acc0, axis=0, keepdims=True)                                # [1, Bt]
    r1 = jnp.sum(acc1, axis=0, keepdims=True)
    o_ref[...] = jnp.concatenate([r0, r1], axis=0)                           # [2, Bt]


def model1_forward(x, conv_w, conv_b, fc_w, fc_b):
    """x: [B, 1, 20, 20] float32 (NCHW, matching the PyTorch module)."""
    B = x.shape[0]
    if B > 128:
        Bt = 128
        Bp = ((B + Bt - 1) // Bt) * Bt
    else:
        Bt = B
        Bp = B

    # Batch-in-lanes layout with a 1-pixel zero halo: [22, 22, Bp].
    # (transpose + pad fuse into a single copy under jit)
    xp = jnp.pad(jnp.transpose(x[:, 0].astype(jnp.float32), (1, 2, 0)),
                 ((1, 1), (1, 1), (0, Bp - B)))
    wt = conv_w.reshape(C_OUT, 9).T.reshape(9, C_OUT, 1).astype(jnp.float32)    # [tap, ch, 1]
    cb = conv_b.reshape(C_OUT, 1).astype(jnp.float32)
    # PyTorch .view(-1, 1200) flatten order: flat = c*100 + i*10 + j.
    # fcw[i, o, j, c, 0] = fc_w[o, c*100 + i*10 + j]
    fcw = (fc_w.reshape(2, C_OUT, 10, 10).transpose(2, 0, 3, 1)[..., None]
           .astype(jnp.float32))                                                # [10, 2, 10, 12, 1]

    out = pl.pallas_call(
        model1_kernel,
        out_shape=jax.ShapeDtypeStruct((ROW_SPLITS, 2, Bp), jnp.float32),
        grid=(ROW_SPLITS, Bp // Bt),
        in_specs=[
            pl.BlockSpec((22, 22, Bt), lambda s, b: (0, 0, b)),                  # images
            pl.BlockSpec((9, C_OUT, 1), lambda s, b: (0, 0, 0)),                 # conv taps
            pl.BlockSpec((C_OUT, 1), lambda s, b: (0, 0)),                       # conv bias
            pl.BlockSpec((ROWS_PER_SPLIT, 2, 10, C_OUT, 1),
                         lambda s, b: (s, 0, 0, 0, 0)),                          # fc weights
        ],
        out_specs=pl.BlockSpec((None, 2, Bt), lambda s, b: (s, 0, b)),
        compiler_params=pltpu.CompilerParams(
            dimension_semantics=("parallel", "parallel")),
    )(xp, wt, cb, fcw)

    res = jnp.sum(out, axis=0) + fc_b.astype(jnp.float32)[:, None]               # [2, Bp]
    return res[:, :B].T                                                           # [B, 2]


def reference(x, conv_w, conv_b, fc_w, fc_b):
    """Pure-JAX reference matching the PyTorch forward."""
    y = lax.conv_general_dilated(
        x, conv_w, window_strides=(1, 1), padding=((1, 1), (1, 1)),
        dimension_numbers=("NCHW", "OIHW", "NCHW"),
        precision=lax.Precision.HIGHEST)
    y = jnp.maximum(y + conv_b[None, :, None, None], 0.0)
    y = lax.reduce_window(y, -jnp.inf, lax.max, (1, 1, 2, 2), (1, 1, 2, 2), "VALID")
    y = y.reshape(y.shape[0], -1)
    return jnp.dot(y, fc_w.T, precision=lax.Precision.HIGHEST) + fc_b


if __name__ == "__main__":
    key = jax.random.PRNGKey(0)
    k1, k2, k3, k4, k5 = jax.random.split(key, 5)
    conv_w = jax.random.normal(k1, (12, 1, 3, 3), jnp.float32) * 0.3
    conv_b = jax.random.normal(k2, (12,), jnp.float32) * 0.1
    fc_w = jax.random.normal(k3, (2, 1200), jnp.float32) * 0.05
    fc_b = jax.random.normal(k4, (2,), jnp.float32) * 0.1
    x = jax.random.normal(k5, (8, 1, 20, 20), jnp.float32)   # B=8, C=1, 20x20

    out = jax.block_until_ready(jax.jit(model1_forward)(x, conv_w, conv_b, fc_w, fc_b))
    ref = jax.block_until_ready(reference(x, conv_w, conv_b, fc_w, fc_b))
    assert out.shape == (8, 2), out.shape
    assert jnp.allclose(out, ref, atol=1e-3, rtol=1e-3), (out, ref)
    print("KERNEL_OK")
</pallas_src>

<mosaic_0001>
module attributes {stable_mosaic.version = 11 : i64} {
  func.func @model1_kernel(%arg0: i32, %arg1: i32, %arg2: memref<22x22x8xf32, #tpu.memory_space<vmem>>, %arg3: memref<9x12x1xf32, #tpu.memory_space<vmem>>, %arg4: memref<12x1xf32, #tpu.memory_space<vmem>>, %arg5: memref<5x2x10x12x1xf32, #tpu.memory_space<vmem>>, %arg6: memref<1x2x8xf32, #tpu.memory_space<vmem>>) attributes {dimension_semantics = [#tpu.dimension_semantics<parallel>, #tpu.dimension_semantics<parallel>], iteration_bounds = array<i64: 2, 1>, scalar_prefetch = 0 : i64, scratch_operands = 0 : i64, tpu.core_type = #tpu.core_type<tc>, window_params = [{transform_indices = @transform_0, window_bounds = array<i64: 22, 22, 8>}, {pipeline_mode = #tpu.pipeline_mode<synchronous>, transform_indices = @transform_1, window_bounds = array<i64: 9, 12, 1>}, {pipeline_mode = #tpu.pipeline_mode<synchronous>, transform_indices = @transform_2, window_bounds = array<i64: 12, 1>}, {transform_indices = @transform_3, window_bounds = array<i64: 5, 2, 10, 12, 1>}, {transform_indices = @transform_4, window_bounds = array<i64: 1, 2, 8>}]} {
    %c10_i32 = arith.constant 10 : i32
    %0 = arith.muli %c10_i32, %arg0 : i32
    %c0 = arith.constant 0 : index
    %c0_0 = arith.constant 0 : index
    %c0_1 = arith.constant 0 : index
    %1 = vector.load %arg3[%c0, %c0_0, %c0_1] : memref<9x12x1xf32, #tpu.memory_space<vmem>>, vector<9x12x1xf32>
    %2 = vector.shape_cast %1 : vector<9x12x1xf32> to vector<9x12x1xf32>
    %3 = vector.broadcast %2 : vector<9x12x1xf32> to vector<9x12x8xf32>
    %c0_2 = arith.constant 0 : index
    %c0_3 = arith.constant 0 : index
    %4 = vector.load %arg4[%c0_2, %c0_3] : memref<12x1xf32, #tpu.memory_space<vmem>>, vector<12x1xf32>
    %5 = vector.shape_cast %4 : vector<12x1xf32> to vector<12x1xf32>
    %6 = vector.broadcast %5 : vector<12x1xf32> to vector<12x8xf32>
    %cst = arith.constant 0.000000e+00 : f32
    %7 = vector.broadcast %cst : f32 to vector<12x8xf32>
    %cst_4 = arith.constant 0.000000e+00 : f32
    %8 = vector.broadcast %cst_4 : f32 to vector<12x8xf32>
    %c0_i32 = arith.constant 0 : i32
    %c5_i32 = arith.constant 5 : i32
    %9 = arith.addi %c0_i32, %c5_i32 : i32
    %c1_i32 = arith.constant 1 : i32
    %10:2 = scf.for %arg7 = %c0_i32 to %9 step %c1_i32 iter_args(%arg8 = %7, %arg9 = %8) -> (vector<12x8xf32>, vector<12x8xf32>)  : i32 {
      %c2_i32 = arith.constant 2 : i32
      %19 = arith.muli %c2_i32, %arg7 : i32
      %20 = arith.addi %0, %19 : i32
      %c0_i32_11 = arith.constant 0 : i32
      %21 = arith.addi %20, %c0_i32_11 : i32
      %22 = arith.index_cast %21 : i32 to index
      %c0_12 = arith.constant 0 : index
      %c0_13 = arith.constant 0 : index
      %23 = vector.load %arg2[%22, %c0_12, %c0_13] : memref<22x22x8xf32, #tpu.memory_space<vmem>>, vector<1x6x8xf32>
      %24 = vector.shape_cast %23 : vector<1x6x8xf32> to vector<6x8xf32>
      %25 = vector.extract_strided_slice %24 {offsets = [0, 0], sizes = [1, 8], strides = [1, 1]} : vector<6x8xf32> to vector<1x8xf32>
      %26 = vector.shape_cast %25 : vector<1x8xf32> to vector<1x8xf32>
      %27 = vector.broadcast %26 : vector<1x8xf32> to vector<12x8xf32>
      %28 = vector.extract_strided_slice %24 {offsets = [1, 0], sizes = [1, 8], strides = [1, 1]} : vector<6x8xf32> to vector<1x8xf32>
      %29 = vector.shape_cast %28 : vector<1x8xf32> to vector<1x8xf32>
      %30 = vector.broadcast %29 : vector<1x8xf32> to vector<12x8xf32>
      %31 = vector.extract_strided_slice %24 {offsets = [2, 0], sizes = [1, 8], strides = [1, 1]} : vector<6x8xf32> to vector<1x8xf32>
      %32 = vector.shape_cast %31 : vector<1x8xf32> to vector<1x8xf32>
      %33 = vector.broadcast %32 : vector<1x8xf32> to vector<12x8xf32>
      %34 = vector.extract_strided_slice %24 {offsets = [3, 0], sizes = [1, 8], strides = [1, 1]} : vector<6x8xf32> to vector<1x8xf32>
      %35 = vector.shape_cast %34 : vector<1x8xf32> to vector<1x8xf32>
      %36 = vector.broadcast %35 : vector<1x8xf32> to vector<12x8xf32>
      %37 = vector.extract_strided_slice %24 {offsets = [4, 0], sizes = [1, 8], strides = [1, 1]} : vector<6x8xf32> to vector<1x8xf32>
      %38 = vector.shape_cast %37 : vector<1x8xf32> to vector<1x8xf32>
      %39 = vector.broadcast %38 : vector<1x8xf32> to vector<12x8xf32>
      %40 = vector.extract_strided_slice %24 {offsets = [5, 0], sizes = [1, 8], strides = [1, 1]} : vector<6x8xf32> to vector<1x8xf32>
      %41 = vector.shape_cast %40 : vector<1x8xf32> to vector<1x8xf32>
      %42 = vector.broadcast %41 : vector<1x8xf32> to vector<12x8xf32>
      %43 = vector.extract_strided_slice %3 {offsets = [0, 0, 0], sizes = [1, 12, 8], strides = [1, 1, 1]} : vector<9x12x8xf32> to vector<1x12x8xf32>
      %44 = vector.shape_cast %43 : vector<1x12x8xf32> to vector<12x8xf32>
      %45 = arith.mulf %27, %44 : vector<12x8xf32>
      %46 = arith.mulf %30, %44 : vector<12x8xf32>
      %47 = arith.mulf %33, %44 : vector<12x8xf32>
      %48 = arith.mulf %36, %44 : vector<12x8xf32>
      %49 = vector.extract_strided_slice %3 {offsets = [1, 0, 0], sizes = [1, 12, 8], strides = [1, 1, 1]} : vector<9x12x8xf32> to vector<1x12x8xf32>
      %50 = vector.shape_cast %49 : vector<1x12x8xf32> to vector<12x8xf32>
      %51 = arith.mulf %30, %50 : vector<12x8xf32>
      %52 = arith.addf %45, %51 : vector<12x8xf32>
      %53 = arith.mulf %33, %50 : vector<12x8xf32>
      %54 = arith.addf %46, %53 : vector<12x8xf32>
      %55 = arith.mulf %36, %50 : vector<12x8xf32>
      %56 = arith.addf %47, %55 : vector<12x8xf32>
      %57 = arith.mulf %39, %50 : vector<12x8xf32>
      %58 = arith.addf %48, %57 : vector<12x8xf32>
      %59 = vector.extract_strided_slice %3 {offsets = [2, 0, 0], sizes = [1, 12, 8], strides = [1, 1, 1]} : vector<9x12x8xf32> to vector<1x12x8xf32>
      %60 = vector.shape_cast %59 : vector<1x12x8xf32> to vector<12x8xf32>
      %61 = arith.mulf %33, %60 : vector<12x8xf32>
      %62 = arith.addf %52, %61 : vector<12x8xf32>
      %63 = arith.mulf %36, %60 : vector<12x8xf32>
      %64 = arith.addf %54, %63 : vector<12x8xf32>
      %65 = arith.mulf %39, %60 : vector<12x8xf32>
      %66 = arith.addf %56, %65 : vector<12x8xf32>
      %67 = arith.mulf %42, %60 : vector<12x8xf32>
      %68 = arith.addf %58, %67 : vector<12x8xf32>
      %c1_i32_14 = arith.constant 1 : i32
      %69 = arith.addi %20, %c1_i32_14 : i32
      %70 = arith.index_cast %69 : i32 to index
      %c0_15 = arith.constant 0 : index
      %c0_16 = arith.constant 0 : index
      %71 = vector.load %arg2[%70, %c0_15, %c0_16] : memref<22x22x8xf32, #tpu.memory_space<vmem>>, vector<1x6x8xf32>
      %72 = vector.shape_cast %71 : vector<1x6x8xf32> to vector<6x8xf32>
      %73 = vector.extract_strided_slice %72 {offsets = [0, 0], sizes = [1, 8], strides = [1, 1]} : vector<6x8xf32> to vector<1x8xf32>
      %74 = vector.shape_cast %73 : vector<1x8xf32> to vector<1x8xf32>
      %75 = vector.broadcast %74 : vector<1x8xf32> to vector<12x8xf32>
      %76 = vector.extract_strided_slice %72 {offsets = [1, 0], sizes = [1, 8], strides = [1, 1]} : vector<6x8xf32> to vector<1x8xf32>
      %77 = vector.shape_cast %76 : vector<1x8xf32> to vector<1x8xf32>
      %78 = vector.broadcast %77 : vector<1x8xf32> to vector<12x8xf32>
      %79 = vector.extract_strided_slice %72 {offsets = [2, 0], sizes = [1, 8], strides = [1, 1]} : vector<6x8xf32> to vector<1x8xf32>
      %80 = vector.shape_cast %79 : vector<1x8xf32> to vector<1x8xf32>
      %81 = vector.broadcast %80 : vector<1x8xf32> to vector<12x8xf32>
      %82 = vector.extract_strided_slice %72 {offsets = [3, 0], sizes = [1, 8], strides = [1, 1]} : vector<6x8xf32> to vector<1x8xf32>
      %83 = vector.shape_cast %82 : vector<1x8xf32> to vector<1x8xf32>
      %84 = vector.broadcast %83 : vector<1x8xf32> to vector<12x8xf32>
      %85 = vector.extract_strided_slice %72 {offsets = [4, 0], sizes = [1, 8], strides = [1, 1]} : vector<6x8xf32> to vector<1x8xf32>
      %86 = vector.shape_cast %85 : vector<1x8xf32> to vector<1x8xf32>
      %87 = vector.broadcast %86 : vector<1x8xf32> to vector<12x8xf32>
      %88 = vector.extract_strided_slice %72 {offsets = [5, 0], sizes = [1, 8], strides = [1, 1]} : vector<6x8xf32> to vector<1x8xf32>
      %89 = vector.shape_cast %88 : vector<1x8xf32> to vector<1x8xf32>
      %90 = vector.broadcast %89 : vector<1x8xf32> to vector<12x8xf32>
      %91 = vector.extract_strided_slice %3 {offsets = [3, 0, 0], sizes = [1, 12, 8], strides = [1, 1, 1]} : vector<9x12x8xf32> to vector<1x12x8xf32>
      %92 = vector.shape_cast %91 : vector<1x12x8xf32> to vector<12x8xf32>
      %93 = arith.mulf %75, %92 : vector<12x8xf32>
      %94 = arith.addf %62, %93 : vector<12x8xf32>
      %95 = arith.mulf %78, %92 : vector<12x8xf32>
      %96 = arith.addf %64, %95 : vector<12x8xf32>
      %97 = arith.mulf %81, %92 : vector<12x8xf32>
      %98 = arith.addf %66, %97 : vector<12x8xf32>
      %99 = arith.mulf %84, %92 : vector<12x8xf32>
      %100 = arith.addf %68, %99 : vector<12x8xf32>
      %101 = vector.extract_strided_slice %3 {offsets = [4, 0, 0], sizes = [1, 12, 8], strides = [1, 1, 1]} : vector<9x12x8xf32> to vector<1x12x8xf32>
      %102 = vector.shape_cast %101 : vector<1x12x8xf32> to vector<12x8xf32>
      %103 = arith.mulf %78, %102 : vector<12x8xf32>
      %104 = arith.addf %94, %103 : vector<12x8xf32>
      %105 = arith.mulf %81, %102 : vector<12x8xf32>
      %106 = arith.addf %96, %105 : vector<12x8xf32>
      %107 = arith.mulf %84, %102 : vector<12x8xf32>
      %108 = arith.addf %98, %107 : vector<12x8xf32>
      %109 = arith.mulf %87, %102 : vector<12x8xf32>
      %110 = arith.addf %100, %109 : vector<12x8xf32>
      %111 = vector.extract_strided_slice %3 {offsets = [5, 0, 0], sizes = [1, 12, 8], strides = [1, 1, 1]} : vector<9x12x8xf32> to vector<1x12x8xf32>
      %112 = vector.shape_cast %111 : vector<1x12x8xf32> to vector<12x8xf32>
      %113 = arith.mulf %81, %112 : vector<12x8xf32>
      %114 = arith.addf %104, %113 : vector<12x8xf32>
      %115 = arith.mulf %84, %112 : vector<12x8xf32>
      %116 = arith.addf %106, %115 : vector<12x8xf32>
      %117 = arith.mulf %87, %112 : vector<12x8xf32>
      %118 = arith.addf %108, %117 : vector<12x8xf32>
      %119 = arith.mulf %90, %112 : vector<12x8xf32>
      %120 = arith.addf %110, %119 : vector<12x8xf32>
      %c2_i32_17 = arith.constant 2 : i32
      %121 = arith.addi %20, %c2_i32_17 : i32
      %122 = arith.index_cast %121 : i32 to index
      %c0_18 = arith.constant 0 : index
      %c0_19 = arith.constant 0 : index
      %123 = vector.load %arg2[%122, %c0_18, %c0_19] : memref<22x22x8xf32, #tpu.memory_space<vmem>>, vector<1x6x8xf32>
      %124 = vector.shape_cast %123 : vector<1x6x8xf32> to vector<6x8xf32>
      %125 = vector.extract_strided_slice %124 {offsets = [0, 0], sizes = [1, 8], strides = [1, 1]} : vector<6x8xf32> to vector<1x8xf32>
      %126 = vector.shape_cast %125 : vector<1x8xf32> to vector<1x8xf32>
      %127 = vector.broadcast %126 : vector<1x8xf32> to vector<12x8xf32>
      %128 = vector.extract_strided_slice %124 {offsets = [1, 0], sizes = [1, 8], strides = [1, 1]} : vector<6x8xf32> to vector<1x8xf32>
      %129 = vector.shape_cast %128 : vector<1x8xf32> to vector<1x8xf32>
      %130 = vector.broadcast %129 : vector<1x8xf32> to vector<12x8xf32>
      %131 = vector.extract_strided_slice %124 {offsets = [2, 0], sizes = [1, 8], strides = [1, 1]} : vector<6x8xf32> to vector<1x8xf32>
      %132 = vector.shape_cast %131 : vector<1x8xf32> to vector<1x8xf32>
      %133 = vector.broadcast %132 : vector<1x8xf32> to vector<12x8xf32>
      %134 = vector.extract_strided_slice %124 {offsets = [3, 0], sizes = [1, 8], strides = [1, 1]} : vector<6x8xf32> to vector<1x8xf32>
      %135 = vector.shape_cast %134 : vector<1x8xf32> to vector<1x8xf32>
      %136 = vector.broadcast %135 : vector<1x8xf32> to vector<12x8xf32>
      %137 = vector.extract_strided_slice %124 {offsets = [4, 0], sizes = [1, 8], strides = [1, 1]} : vector<6x8xf32> to vector<1x8xf32>
      %138 = vector.shape_cast %137 : vector<1x8xf32> to vector<1x8xf32>
      %139 = vector.broadcast %138 : vector<1x8xf32> to vector<12x8xf32>
      %140 = vector.extract_strided_slice %124 {offsets = [5, 0], sizes = [1, 8], strides = [1, 1]} : vector<6x8xf32> to vector<1x8xf32>
      %141 = vector.shape_cast %140 : vector<1x8xf32> to vector<1x8xf32>
      %142 = vector.broadcast %141 : vector<1x8xf32> to vector<12x8xf32>
      %143 = vector.extract_strided_slice %3 {offsets = [6, 0, 0], sizes = [1, 12, 8], strides = [1, 1, 1]} : vector<9x12x8xf32> to vector<1x12x8xf32>
      %144 = vector.shape_cast %143 : vector<1x12x8xf32> to vector<12x8xf32>
      %145 = arith.mulf %127, %144 : vector<12x8xf32>
      %146 = arith.addf %114, %145 : vector<12x8xf32>
      %147 = arith.mulf %130, %144 : vector<12x8xf32>
      %148 = arith.addf %116, %147 : vector<12x8xf32>
      %149 = arith.mulf %133, %144 : vector<12x8xf32>
      %150 = arith.addf %118, %149 : vector<12x8xf32>
      %151 = arith.mulf %136, %144 : vector<12x8xf32>
      %152 = arith.addf %120, %151 : vector<12x8xf32>
      %153 = vector.extract_strided_slice %3 {offsets = [7, 0, 0], sizes = [1, 12, 8], strides = [1, 1, 1]} : vector<9x12x8xf32> to vector<1x12x8xf32>
      %154 = vector.shape_cast %153 : vector<1x12x8xf32> to vector<12x8xf32>
      %155 = arith.mulf %130, %154 : vector<12x8xf32>
      %156 = arith.addf %146, %155 : vector<12x8xf32>
      %157 = arith.mulf %133, %154 : vector<12x8xf32>
      %158 = arith.addf %148, %157 : vector<12x8xf32>
      %159 = arith.mulf %136, %154 : vector<12x8xf32>
      %160 = arith.addf %150, %159 : vector<12x8xf32>
      %161 = arith.mulf %139, %154 : vector<12x8xf32>
      %162 = arith.addf %152, %161 : vector<12x8xf32>
      %163 = vector.extract_strided_slice %3 {offsets = [8, 0, 0], sizes = [1, 12, 8], strides = [1, 1, 1]} : vector<9x12x8xf32> to vector<1x12x8xf32>
      %164 = vector.shape_cast %163 : vector<1x12x8xf32> to vector<12x8xf32>
      %165 = arith.mulf %133, %164 : vector<12x8xf32>
      %166 = arith.addf %156, %165 : vector<12x8xf32>
      %167 = arith.mulf %136, %164 : vector<12x8xf32>
      %168 = arith.addf %158, %167 : vector<12x8xf32>
      %169 = arith.mulf %139, %164 : vector<12x8xf32>
      %170 = arith.addf %160, %169 : vector<12x8xf32>
      %171 = arith.mulf %142, %164 : vector<12x8xf32>
      %172 = arith.addf %162, %171 : vector<12x8xf32>
      %173 = arith.addf %166, %6 : vector<12x8xf32>
      %cst_20 = arith.constant 0.000000e+00 : f32
      %174 = vector.broadcast %cst_20 : f32 to vector<12x8xf32>
      %175 = arith.maximumf %173, %174 : vector<12x8xf32>
      %176 = arith.addf %168, %6 : vector<12x8xf32>
      %cst_21 = arith.constant 0.000000e+00 : f32
      %177 = vector.broadcast %cst_21 : f32 to vector<12x8xf32>
      %178 = arith.maximumf %176, %177 : vector<12x8xf32>
      %179 = arith.addf %170, %6 : vector<12x8xf32>
      %cst_22 = arith.constant 0.000000e+00 : f32
      %180 = vector.broadcast %cst_22 : f32 to vector<12x8xf32>
      %181 = arith.maximumf %179, %180 : vector<12x8xf32>
      %182 = arith.addf %172, %6 : vector<12x8xf32>
      %cst_23 = arith.constant 0.000000e+00 : f32
      %183 = vector.broadcast %cst_23 : f32 to vector<12x8xf32>
      %184 = arith.maximumf %182, %183 : vector<12x8xf32>
      %c1_i32_24 = arith.constant 1 : i32
      %185 = arith.addi %20, %c1_i32_24 : i32
      %c0_i32_25 = arith.constant 0 : i32
      %186 = arith.addi %185, %c0_i32_25 : i32
      %187 = arith.index_cast %186 : i32 to index
      %c0_26 = arith.constant 0 : index
      %c0_27 = arith.constant 0 : index
      %188 = vector.load %arg2[%187, %c0_26, %c0_27] : memref<22x22x8xf32, #tpu.memory_space<vmem>>, vector<1x6x8xf32>
      %189 = vector.shape_cast %188 : vector<1x6x8xf32> to vector<6x8xf32>
      %190 = vector.extract_strided_slice %189 {offsets = [0, 0], sizes = [1, 8], strides = [1, 1]} : vector<6x8xf32> to vector<1x8xf32>
      %191 = vector.shape_cast %190 : vector<1x8xf32> to vector<1x8xf32>
      %192 = vector.broadcast %191 : vector<1x8xf32> to vector<12x8xf32>
      %193 = vector.extract_strided_slice %189 {offsets = [1, 0], sizes = [1, 8], strides = [1, 1]} : vector<6x8xf32> to vector<1x8xf32>
      %194 = vector.shape_cast %193 : vector<1x8xf32> to vector<1x8xf32>
      %195 = vector.broadcast %194 : vector<1x8xf32> to vector<12x8xf32>
      %196 = vector.extract_strided_slice %189 {offsets = [2, 0], sizes = [1, 8], strides = [1, 1]} : vector<6x8xf32> to vector<1x8xf32>
      %197 = vector.shape_cast %196 : vector<1x8xf32> to vector<1x8xf32>
      %198 = vector.broadcast %197 : vector<1x8xf32> to vector<12x8xf32>
      %199 = vector.extract_strided_slice %189 {offsets = [3, 0], sizes = [1, 8], strides = [1, 1]} : vector<6x8xf32> to vector<1x8xf32>
      %200 = vector.shape_cast %199 : vector<1x8xf32> to vector<1x8xf32>
      %201 = vector.broadcast %200 : vector<1x8xf32> to vector<12x8xf32>
      %202 = vector.extract_strided_slice %189 {offsets = [4, 0], sizes = [1, 8], strides = [1, 1]} : vector<6x8xf32> to vector<1x8xf32>
      %203 = vector.shape_cast %202 : vector<1x8xf32> to vector<1x8xf32>
      %204 = vector.broadcast %203 : vector<1x8xf32> to vector<12x8xf32>
      %205 = vector.extract_strided_slice %189 {offsets = [5, 0], sizes = [1, 8], strides = [1, 1]} : vector<6x8xf32> to vector<1x8xf32>
      %206 = vector.shape_cast %205 : vector<1x8xf32> to vector<1x8xf32>
      %207 = vector.broadcast %206 : vector<1x8xf32> to vector<12x8xf32>
      %208 = vector.extract_strided_slice %3 {offsets = [0, 0, 0], sizes = [1, 12, 8], strides = [1, 1, 1]} : vector<9x12x8xf32> to vector<1x12x8xf32>
      %209 = vector.shape_cast %208 : vector<1x12x8xf32> to vector<12x8xf32>
      %210 = arith.mulf %192, %209 : vector<12x8xf32>
      %211 = arith.mulf %195, %209 : vector<12x8xf32>
      %212 = arith.mulf %198, %209 : vector<12x8xf32>
      %213 = arith.mulf %201, %209 : vector<12x8xf32>
      %214 = vector.extract_strided_slice %3 {offsets = [1, 0, 0], sizes = [1, 12, 8], strides = [1, 1, 1]} : vector<9x12x8xf32> to vector<1x12x8xf32>
      %215 = vector.shape_cast %214 : vector<1x12x8xf32> to vector<12x8xf32>
      %216 = arith.mulf %195, %215 : vector<12x8xf32>
      %217 = arith.addf %210, %216 : vector<12x8xf32>
      %218 = arith.mulf %198, %215 : vector<12x8xf32>
      %219 = arith.addf %211, %218 : vector<12x8xf32>
      %220 = arith.mulf %201, %215 : vector<12x8xf32>
      %221 = arith.addf %212, %220 : vector<12x8xf32>
      %222 = arith.mulf %204, %215 : vector<12x8xf32>
      %223 = arith.addf %213, %222 : vector<12x8xf32>
      %224 = vector.extract_strided_slice %3 {offsets = [2, 0, 0], sizes = [1, 12, 8], strides = [1, 1, 1]} : vector<9x12x8xf32> to vector<1x12x8xf32>
      %225 = vector.shape_cast %224 : vector<1x12x8xf32> to vector<12x8xf32>
      %226 = arith.mulf %198, %225 : vector<12x8xf32>
      %227 = arith.addf %217, %226 : vector<12x8xf32>
      %228 = arith.mulf %201, %225 : vector<12x8xf32>
      %229 = arith.addf %219, %228 : vector<12x8xf32>
      %230 = arith.mulf %204, %225 : vector<12x8xf32>
      %231 = arith.addf %221, %230 : vector<12x8xf32>
      %232 = arith.mulf %207, %225 : vector<12x8xf32>
      %233 = arith.addf %223, %232 : vector<12x8xf32>
      %c1_i32_28 = arith.constant 1 : i32
      %234 = arith.addi %185, %c1_i32_28 : i32
      %235 = arith.index_cast %234 : i32 to index
      %c0_29 = arith.constant 0 : index
      %c0_30 = arith.constant 0 : index
      %236 = vector.load %arg2[%235, %c0_29, %c0_30] : memref<22x22x8xf32, #tpu.memory_space<vmem>>, vector<1x6x8xf32>
      %237 = vector.shape_cast %236 : vector<1x6x8xf32> to vector<6x8xf32>
      %238 = vector.extract_strided_slice %237 {offsets = [0, 0], sizes = [1, 8], strides = [1, 1]} : vector<6x8xf32> to vector<1x8xf32>
      %239 = vector.shape_cast %238 : vector<1x8xf32> to vector<1x8xf32>
      %240 = vector.broadcast %239 : vector<1x8xf32> to vector<12x8xf32>
      %241 = vector.extract_strided_slice %237 {offsets = [1, 0], sizes = [1, 8], strides = [1, 1]} : vector<6x8xf32> to vector<1x8xf32>
      %242 = vector.shape_cast %241 : vector<1x8xf32> to vector<1x8xf32>
      %243 = vector.broadcast %242 : vector<1x8xf32> to vector<12x8xf32>
      %244 = vector.extract_strided_slice %237 {offsets = [2, 0], sizes = [1, 8], strides = [1, 1]} : vector<6x8xf32> to vector<1x8xf32>
      %245 = vector.shape_cast %244 : vector<1x8xf32> to vector<1x8xf32>
      %246 = vector.broadcast %245 : vector<1x8xf32> to vector<12x8xf32>
      %247 = vector.extract_strided_slice %237 {offsets = [3, 0], sizes = [1, 8], strides = [1, 1]} : vector<6x8xf32> to vector<1x8xf32>
      %248 = vector.shape_cast %247 : vector<1x8xf32> to vector<1x8xf32>
      %249 = vector.broadcast %248 : vector<1x8xf32> to vector<12x8xf32>
      %250 = vector.extract_strided_slice %237 {offsets = [4, 0], sizes = [1, 8], strides = [1, 1]} : vector<6x8xf32> to vector<1x8xf32>
      %251 = vector.shape_cast %250 : vector<1x8xf32> to vector<1x8xf32>
      %252 = vector.broadcast %251 : vector<1x8xf32> to vector<12x8xf32>
      %253 = vector.extract_strided_slice %237 {offsets = [5, 0], sizes = [1, 8], strides = [1, 1]} : vector<6x8xf32> to vector<1x8xf32>
      %254 = vector.shape_cast %253 : vector<1x8xf32> to vector<1x8xf32>
      %255 = vector.broadcast %254 : vector<1x8xf32> to vector<12x8xf32>
      %256 = vector.extract_strided_slice %3 {offsets = [3, 0, 0], sizes = [1, 12, 8], strides = [1, 1, 1]} : vector<9x12x8xf32> to vector<1x12x8xf32>
      %257 = vector.shape_cast %256 : vector<1x12x8xf32> to vector<12x8xf32>
      %258 = arith.mulf %240, %257 : vector<12x8xf32>
      %259 = arith.addf %227, %258 : vector<12x8xf32>
      %260 = arith.mulf %243, %257 : vector<12x8xf32>
      %261 = arith.addf %229, %260 : vector<12x8xf32>
      %262 = arith.mulf %246, %257 : vector<12x8xf32>
      %263 = arith.addf %231, %262 : vector<12x8xf32>
      %264 = arith.mulf %249, %257 : vector<12x8xf32>
      %265 = arith.addf %233, %264 : vector<12x8xf32>
      %266 = vector.extract_strided_slice %3 {offsets = [4, 0, 0], sizes = [1, 12, 8], strides = [1, 1, 1]} : vector<9x12x8xf32> to vector<1x12x8xf32>
      %267 = vector.shape_cast %266 : vector<1x12x8xf32> to vector<12x8xf32>
      %268 = arith.mulf %243, %267 : vector<12x8xf32>
      %269 = arith.addf %259, %268 : vector<12x8xf32>
      %270 = arith.mulf %246, %267 : vector<12x8xf32>
      %271 = arith.addf %261, %270 : vector<12x8xf32>
      %272 = arith.mulf %249, %267 : vector<12x8xf32>
      %273 = arith.addf %263, %272 : vector<12x8xf32>
      %274 = arith.mulf %252, %267 : vector<12x8xf32>
      %275 = arith.addf %265, %274 : vector<12x8xf32>
      %276 = vector.extract_strided_slice %3 {offsets = [5, 0, 0], sizes = [1, 12, 8], strides = [1, 1, 1]} : vector<9x12x8xf32> to vector<1x12x8xf32>
      %277 = vector.shape_cast %276 : vector<1x12x8xf32> to vector<12x8xf32>
      %278 = arith.mulf %246, %277 : vector<12x8xf32>
      %279 = arith.addf %269, %278 : vector<12x8xf32>
      %280 = arith.mulf %249, %277 : vector<12x8xf32>
      %281 = arith.addf %271, %280 : vector<12x8xf32>
      %282 = arith.mulf %252, %277 : vector<12x8xf32>
      %283 = arith.addf %273, %282 : vector<12x8xf32>
      %284 = arith.mulf %255, %277 : vector<12x8xf32>
      %285 = arith.addf %275, %284 : vector<12x8xf32>
      %c2_i32_31 = arith.constant 2 : i32
      %286 = arith.addi %185, %c2_i32_31 : i32
      %287 = arith.index_cast %286 : i32 to index
      %c0_32 = arith.constant 0 : index
      %c0_33 = arith.constant 0 : index
      %288 = vector.load %arg2[%287, %c0_32, %c0_33] : memref<22x22x8xf32, #tpu.memory_space<vmem>>, vector<1x6x8xf32>
      %289 = vector.shape_cast %288 : vector<1x6x8xf32> to vector<6x8xf32>
      %290 = vector.extract_strided_slice %289 {offsets = [0, 0], sizes = [1, 8], strides = [1, 1]} : vector<6x8xf32> to vector<1x8xf32>
      %291 = vector.shape_cast %290 : vector<1x8xf32> to vector<1x8xf32>
      %292 = vector.broadcast %291 : vector<1x8xf32> to vector<12x8xf32>
      %293 = vector.extract_strided_slice %289 {offsets = [1, 0], sizes = [1, 8], strides = [1, 1]} : vector<6x8xf32> to vector<1x8xf32>
      %294 = vector.shape_cast %293 : vector<1x8xf32> to vector<1x8xf32>
      %295 = vector.broadcast %294 : vector<1x8xf32> to vector<12x8xf32>
      %296 = vector.extract_strided_slice %289 {offsets = [2, 0], sizes = [1, 8], strides = [1, 1]} : vector<6x8xf32> to vector<1x8xf32>
      %297 = vector.shape_cast %296 : vector<1x8xf32> to vector<1x8xf32>
      %298 = vector.broadcast %297 : vector<1x8xf32> to vector<12x8xf32>
      %299 = vector.extract_strided_slice %289 {offsets = [3, 0], sizes = [1, 8], strides = [1, 1]} : vector<6x8xf32> to vector<1x8xf32>
      %300 = vector.shape_cast %299 : vector<1x8xf32> to vector<1x8xf32>
      %301 = vector.broadcast %300 : vector<1x8xf32> to vector<12x8xf32>
      %302 = vector.extract_strided_slice %289 {offsets = [4, 0], sizes = [1, 8], strides = [1, 1]} : vector<6x8xf32> to vector<1x8xf32>
      %303 = vector.shape_cast %302 : vector<1x8xf32> to vector<1x8xf32>
      %304 = vector.broadcast %303 : vector<1x8xf32> to vector<12x8xf32>
      %305 = vector.extract_strided_slice %289 {offsets = [5, 0], sizes = [1, 8], strides = [1, 1]} : vector<6x8xf32> to vector<1x8xf32>
      %306 = vector.shape_cast %305 : vector<1x8xf32> to vector<1x8xf32>
      %307 = vector.broadcast %306 : vector<1x8xf32> to vector<12x8xf32>
      %308 = vector.extract_strided_slice %3 {offsets = [6, 0, 0], sizes = [1, 12, 8], strides = [1, 1, 1]} : vector<9x12x8xf32> to vector<1x12x8xf32>
      %309 = vector.shape_cast %308 : vector<1x12x8xf32> to vector<12x8xf32>
      %310 = arith.mulf %292, %309 : vector<12x8xf32>
      %311 = arith.addf %279, %310 : vector<12x8xf32>
      %312 = arith.mulf %295, %309 : vector<12x8xf32>
      %313 = arith.addf %281, %312 : vector<12x8xf32>
      %314 = arith.mulf %298, %309 : vector<12x8xf32>
      %315 = arith.addf %283, %314 : vector<12x8xf32>
      %316 = arith.mulf %301, %309 : vector<12x8xf32>
      %317 = arith.addf %285, %316 : vector<12x8xf32>
      %318 = vector.extract_strided_slice %3 {offsets = [7, 0, 0], sizes = [1, 12, 8], strides = [1, 1, 1]} : vector<9x12x8xf32> to vector<1x12x8xf32>
      %319 = vector.shape_cast %318 : vector<1x12x8xf32> to vector<12x8xf32>
      %320 = arith.mulf %295, %319 : vector<12x8xf32>
      %321 = arith.addf %311, %320 : vector<12x8xf32>
      %322 = arith.mulf %298, %319 : vector<12x8xf32>
      %323 = arith.addf %313, %322 : vector<12x8xf32>
      %324 = arith.mulf %301, %319 : vector<12x8xf32>
      %325 = arith.addf %315, %324 : vector<12x8xf32>
      %326 = arith.mulf %304, %319 : vector<12x8xf32>
      %327 = arith.addf %317, %326 : vector<12x8xf32>
      %328 = vector.extract_strided_slice %3 {offsets = [8, 0, 0], sizes = [1, 12, 8], strides = [1, 1, 1]} : vector<9x12x8xf32> to vector<1x12x8xf32>
      %329 = vector.shape_cast %328 : vector<1x12x8xf32> to vector<12x8xf32>
      %330 = arith.mulf %298, %329 : vector<12x8xf32>
      %331 = arith.addf %321, %330 : vector<12x8xf32>
      %332 = arith.mulf %301, %329 : vector<12x8xf32>
      %333 = arith.addf %323, %332 : vector<12x8xf32>
      %334 = arith.mulf %304, %329 : vector<12x8xf32>
      %335 = arith.addf %325, %334 : vector<12x8xf32>
      %336 = arith.mulf %307, %329 : vector<12x8xf32>
      %337 = arith.addf %327, %336 : vector<12x8xf32>
      %338 = arith.addf %331, %6 : vector<12x8xf32>
      %cst_34 = arith.constant 0.000000e+00 : f32
      %339 = vector.broadcast %cst_34 : f32 to vector<12x8xf32>
      %340 = arith.maximumf %338, %339 : vector<12x8xf32>
      %341 = arith.addf %333, %6 : vector<12x8xf32>
      %cst_35 = arith.constant 0.000000e+00 : f32
      %342 = vector.broadcast %cst_35 : f32 to vector<12x8xf32>
      %343 = arith.maximumf %341, %342 : vector<12x8xf32>
      %344 = arith.addf %335, %6 : vector<12x8xf32>
      %cst_36 = arith.constant 0.000000e+00 : f32
      %345 = vector.broadcast %cst_36 : f32 to vector<12x8xf32>
      %346 = arith.maximumf %344, %345 : vector<12x8xf32>
      %347 = arith.addf %337, %6 : vector<12x8xf32>
      %cst_37 = arith.constant 0.000000e+00 : f32
      %348 = vector.broadcast %cst_37 : f32 to vector<12x8xf32>
      %349 = arith.maximumf %347, %348 : vector<12x8xf32>
      %350 = arith.maximumf %175, %340 : vector<12x8xf32>
      %351 = arith.maximumf %178, %343 : vector<12x8xf32>
      %352 = arith.maximumf %181, %346 : vector<12x8xf32>
      %353 = arith.maximumf %184, %349 : vector<12x8xf32>
      %354 = arith.maximumf %350, %351 : vector<12x8xf32>
      %355 = arith.maximumf %352, %353 : vector<12x8xf32>
      %356 = arith.index_cast %arg7 : i32 to index
      %c0_38 = arith.constant 0 : index
      %c0_39 = arith.constant 0 : index
      %c0_40 = arith.constant 0 : index
      %c0_41 = arith.constant 0 : index
      %357 = vector.load %arg5[%356, %c0_38, %c0_39, %c0_40, %c0_41] : memref<5x2x10x12x1xf32, #tpu.memory_space<vmem>>, vector<1x2x2x12x1xf32>
      %358 = vector.shape_cast %357 : vector<1x2x2x12x1xf32> to vector<2x2x12x1xf32>
      %359 = vector.extract_strided_slice %358 {offsets = [0, 0, 0, 0], sizes = [1, 1, 12, 1], strides = [1, 1, 1, 1]} : vector<2x2x12x1xf32> to vector<1x1x12x1xf32>
      %360 = vector.shape_cast %359 : vector<1x1x12x1xf32> to vector<12x1xf32>
      %361 = vector.broadcast %360 : vector<12x1xf32> to vector<12x8xf32>
      %362 = arith.mulf %354, %361 : vector<12x8xf32>
      %363 = arith.addf %arg8, %362 : vector<12x8xf32>
      %364 = vector.extract_strided_slice %358 {offsets = [0, 1, 0, 0], sizes = [1, 1, 12, 1], strides = [1, 1, 1, 1]} : vector<2x2x12x1xf32> to vector<1x1x12x1xf32>
      %365 = vector.shape_cast %364 : vector<1x1x12x1xf32> to vector<12x1xf32>
      %366 = vector.broadcast %365 : vector<12x1xf32> to vector<12x8xf32>
      %367 = arith.mulf %355, %366 : vector<12x8xf32>
      %368 = arith.addf %363, %367 : vector<12x8xf32>
      %369 = vector.extract_strided_slice %358 {offsets = [1, 0, 0, 0], sizes = [1, 1, 12, 1], strides = [1, 1, 1, 1]} : vector<2x2x12x1xf32> to vector<1x1x12x1xf32>
      %370 = vector.shape_cast %369 : vector<1x1x12x1xf32> to vector<12x1xf32>
      %371 = vector.broadcast %370 : vector<12x1xf32> to vector<12x8xf32>
      %372 = arith.mulf %354, %371 : vector<12x8xf32>
      %373 = arith.addf %arg9, %372 : vector<12x8xf32>
      %374 = vector.extract_strided_slice %358 {offsets = [1, 1, 0, 0], sizes = [1, 1, 12, 1], strides = [1, 1, 1, 1]} : vector<2x2x12x1xf32> to vector<1x1x12x1xf32>
      %375 = vector.shape_cast %374 : vector<1x1x12x1xf32> to vector<12x1xf32>
      %376 = vector.broadcast %375 : vector<12x1xf32> to vector<12x8xf32>
      %377 = arith.mulf %355, %376 : vector<12x8xf32>
      %378 = arith.addf %373, %377 : vector<12x8xf32>
      %c0_i32_42 = arith.constant 0 : i32
      %379 = arith.addi %20, %c0_i32_42 : i32
      %380 = arith.index_cast %379 : i32 to index
      %c4 = arith.constant 4 : index
      %c0_43 = arith.constant 0 : index
      %381 = vector.load %arg2[%380, %c4, %c0_43] : memref<22x22x8xf32, #tpu.memory_space<vmem>>, vector<1x6x8xf32>
      %382 = vector.shape_cast %381 : vector<1x6x8xf32> to vector<6x8xf32>
      %383 = vector.extract_strided_slice %382 {offsets = [0, 0], sizes = [1, 8], strides = [1, 1]} : vector<6x8xf32> to vector<1x8xf32>
      %384 = vector.shape_cast %383 : vector<1x8xf32> to vector<1x8xf32>
      %385 = vector.broadcast %384 : vector<1x8xf32> to vector<12x8xf32>
      %386 = vector.extract_strided_slice %382 {offsets = [1, 0], sizes = [1, 8], strides = [1, 1]} : vector<6x8xf32> to vector<1x8xf32>
      %387 = vector.shape_cast %386 : vector<1x8xf32> to vector<1x8xf32>
      %388 = vector.broadcast %387 : vector<1x8xf32> to vector<12x8xf32>
      %389 = vector.extract_strided_slice %382 {offsets = [2, 0], sizes = [1, 8], strides = [1, 1]} : vector<6x8xf32> to vector<1x8xf32>
      %390 = vector.shape_cast %389 : vector<1x8xf32> to vector<1x8xf32>
      %391 = vector.broadcast %390 : vector<1x8xf32> to vector<12x8xf32>
      %392 = vector.extract_strided_slice %382 {offsets = [3, 0], sizes = [1, 8], strides = [1, 1]} : vector<6x8xf32> to vector<1x8xf32>
      %393 = vector.shape_cast %392 : vector<1x8xf32> to vector<1x8xf32>
      %394 = vector.broadcast %393 : vector<1x8xf32> to vector<12x8xf32>
      %395 = vector.extract_strided_slice %382 {offsets = [4, 0], sizes = [1, 8], strides = [1, 1]} : vector<6x8xf32> to vector<1x8xf32>
      %396 = vector.shape_cast %395 : vector<1x8xf32> to vector<1x8xf32>
      %397 = vector.broadcast %396 : vector<1x8xf32> to vector<12x8xf32>
      %398 = vector.extract_strided_slice %382 {offsets = [5, 0], sizes = [1, 8], strides = [1, 1]} : vector<6x8xf32> to vector<1x8xf32>
      %399 = vector.shape_cast %398 : vector<1x8xf32> to vector<1x8xf32>
      %400 = vector.broadcast %399 : vector<1x8xf32> to vector<12x8xf32>
      %401 = vector.extract_strided_slice %3 {offsets = [0, 0, 0], sizes = [1, 12, 8], strides = [1, 1, 1]} : vector<9x12x8xf32> to vector<1x12x8xf32>
      %402 = vector.shape_cast %401 : vector<1x12x8xf32> to vector<12x8xf32>
      %403 = arith.mulf %385, %402 : vector<12x8xf32>
      %404 = arith.mulf %388, %402 : vector<12x8xf32>
      %405 = arith.mulf %391, %402 : vector<12x8xf32>
      %406 = arith.mulf %394, %402 : vector<12x8xf32>
      %407 = vector.extract_strided_slice %3 {offsets = [1, 0, 0], sizes = [1, 12, 8], strides = [1, 1, 1]} : vector<9x12x8xf32> to vector<1x12x8xf32>
      %408 = vector.shape_cast %407 : vector<1x12x8xf32> to vector<12x8xf32>
      %409 = arith.mulf %388, %408 : vector<12x8xf32>
      %410 = arith.addf %403, %409 : vector<12x8xf32>
      %411 = arith.mulf %391, %408 : vector<12x8xf32>
      %412 = arith.addf %404, %411 : vector<12x8xf32>
      %413 = arith.mulf %394, %408 : vector<12x8xf32>
      %414 = arith.addf %405, %413 : vector<12x8xf32>
      %415 = arith.mulf %397, %408 : vector<12x8xf32>
      %416 = arith.addf %406, %415 : vector<12x8xf32>
      %417 = vector.extract_strided_slice %3 {offsets = [2, 0, 0], sizes = [1, 12, 8], strides = [1, 1, 1]} : vector<9x12x8xf32> to vector<1x12x8xf32>
      %418 = vector.shape_cast %417 : vector<1x12x8xf32> to vector<12x8xf32>
      %419 = arith.mulf %391, %418 : vector<12x8xf32>
      %420 = arith.addf %410, %419 : vector<12x8xf32>
      %421 = arith.mulf %394, %418 : vector<12x8xf32>
      %422 = arith.addf %412, %421 : vector<12x8xf32>
      %423 = arith.mulf %397, %418 : vector<12x8xf32>
      %424 = arith.addf %414, %423 : vector<12x8xf32>
      %425 = arith.mulf %400, %418 : vector<12x8xf32>
      %426 = arith.addf %416, %425 : vector<12x8xf32>
      %c1_i32_44 = arith.constant 1 : i32
      %427 = arith.addi %20, %c1_i32_44 : i32
      %428 = arith.index_cast %427 : i32 to index
      %c4_45 = arith.constant 4 : index
      %c0_46 = arith.constant 0 : index
      %429 = vector.load %arg2[%428, %c4_45, %c0_46] : memref<22x22x8xf32, #tpu.memory_space<vmem>>, vector<1x6x8xf32>
      %430 = vector.shape_cast %429 : vector<1x6x8xf32> to vector<6x8xf32>
      %431 = vector.extract_strided_slice %430 {offsets = [0, 0], sizes = [1, 8], strides = [1, 1]} : vector<6x8xf32> to vector<1x8xf32>
      %432 = vector.shape_cast %431 : vector<1x8xf32> to vector<1x8xf32>
      %433 = vector.broadcast %432 : vector<1x8xf32> to vector<12x8xf32>
      %434 = vector.extract_strided_slice %430 {offsets = [1, 0], sizes = [1, 8], strides = [1, 1]} : vector<6x8xf32> to vector<1x8xf32>
      %435 = vector.shape_cast %434 : vector<1x8xf32> to vector<1x8xf32>
      %436 = vector.broadcast %435 : vector<1x8xf32> to vector<12x8xf32>
      %437 = vector.extract_strided_slice %430 {offsets = [2, 0], sizes = [1, 8], strides = [1, 1]} : vector<6x8xf32> to vector<1x8xf32>
      %438 = vector.shape_cast %437 : vector<1x8xf32> to vector<1x8xf32>
      %439 = vector.broadcast %438 : vector<1x8xf32> to vector<12x8xf32>
      %440 = vector.extract_strided_slice %430 {offsets = [3, 0], sizes = [1, 8], strides = [1, 1]} : vector<6x8xf32> to vector<1x8xf32>
      %441 = vector.shape_cast %440 : vector<1x8xf32> to vector<1x8xf32>
      %442 = vector.broadcast %441 : vector<1x8xf32> to vector<12x8xf32>
      %443 = vector.extract_strided_slice %430 {offsets = [4, 0], sizes = [1, 8], strides = [1, 1]} : vector<6x8xf32> to vector<1x8xf32>
      %444 = vector.shape_cast %443 : vector<1x8xf32> to vector<1x8xf32>
      %445 = vector.broadcast %444 : vector<1x8xf32> to vector<12x8xf32>
      %446 = vector.extract_strided_slice %430 {offsets = [5, 0], sizes = [1, 8], strides = [1, 1]} : vector<6x8xf32> to vector<1x8xf32>
      %447 = vector.shape_cast %446 : vector<1x8xf32> to vector<1x8xf32>
      %448 = vector.broadcast %447 : vector<1x8xf32> to vector<12x8xf32>
      %449 = vector.extract_strided_slice %3 {offsets = [3, 0, 0], sizes = [1, 12, 8], strides = [1, 1, 1]} : vector<9x12x8xf32> to vector<1x12x8xf32>
      %450 = vector.shape_cast %449 : vector<1x12x8xf32> to vector<12x8xf32>
      %451 = arith.mulf %433, %450 : vector<12x8xf32>
      %452 = arith.addf %420, %451 : vector<12x8xf32>
      %453 = arith.mulf %436, %450 : vector<12x8xf32>
      %454 = arith.addf %422, %453 : vector<12x8xf32>
      %455 = arith.mulf %439, %450 : vector<12x8xf32>
      %456 = arith.addf %424, %455 : vector<12x8xf32>
      %457 = arith.mulf %442, %450 : vector<12x8xf32>
      %458 = arith.addf %426, %457 : vector<12x8xf32>
      %459 = vector.extract_strided_slice %3 {offsets = [4, 0, 0], sizes = [1, 12, 8], strides = [1, 1, 1]} : vector<9x12x8xf32> to vector<1x12x8xf32>
      %460 = vector.shape_cast %459 : vector<1x12x8xf32> to vector<12x8xf32>
      %461 = arith.mulf %436, %460 : vector<12x8xf32>
      %462 = arith.addf %452, %461 : vector<12x8xf32>
      %463 = arith.mulf %439, %460 : vector<12x8xf32>
      %464 = arith.addf %454, %463 : vector<12x8xf32>
      %465 = arith.mulf %442, %460 : vector<12x8xf32>
      %466 = arith.addf %456, %465 : vector<12x8xf32>
      %467 = arith.mulf %445, %460 : vector<12x8xf32>
      %468 = arith.addf %458, %467 : vector<12x8xf32>
      %469 = vector.extract_strided_slice %3 {offsets = [5, 0, 0], sizes = [1, 12, 8], strides = [1, 1, 1]} : vector<9x12x8xf32> to vector<1x12x8xf32>
      %470 = vector.shape_cast %469 : vector<1x12x8xf32> to vector<12x8xf32>
      %471 = arith.mulf %439, %470 : vector<12x8xf32>
      %472 = arith.addf %462, %471 : vector<12x8xf32>
      %473 = arith.mulf %442, %470 : vector<12x8xf32>
      %474 = arith.addf %464, %473 : vector<12x8xf32>
      %475 = arith.mulf %445, %470 : vector<12x8xf32>
      %476 = arith.addf %466, %475 : vector<12x8xf32>
      %477 = arith.mulf %448, %470 : vector<12x8xf32>
      %478 = arith.addf %468, %477 : vector<12x8xf32>
      %c2_i32_47 = arith.constant 2 : i32
      %479 = arith.addi %20, %c2_i32_47 : i32
      %480 = arith.index_cast %479 : i32 to index
      %c4_48 = arith.constant 4 : index
      %c0_49 = arith.constant 0 : index
      %481 = vector.load %arg2[%480, %c4_48, %c0_49] : memref<22x22x8xf32, #tpu.memory_space<vmem>>, vector<1x6x8xf32>
      %482 = vector.shape_cast %481 : vector<1x6x8xf32> to vector<6x8xf32>
      %483 = vector.extract_strided_slice %482 {offsets = [0, 0], sizes = [1, 8], strides = [1, 1]} : vector<6x8xf32> to vector<1x8xf32>
      %484 = vector.shape_cast %483 : vector<1x8xf32> to vector<1x8xf32>
      %485 = vector.broadcast %484 : vector<1x8xf32> to vector<12x8xf32>
      %486 = vector.extract_strided_slice %482 {offsets = [1, 0], sizes = [1, 8], strides = [1, 1]} : vector<6x8xf32> to vector<1x8xf32>
      %487 = vector.shape_cast %486 : vector<1x8xf32> to vector<1x8xf32>
      %488 = vector.broadcast %487 : vector<1x8xf32> to vector<12x8xf32>
      %489 = vector.extract_strided_slice %482 {offsets = [2, 0], sizes = [1, 8], strides = [1, 1]} : vector<6x8xf32> to vector<1x8xf32>
      %490 = vector.shape_cast %489 : vector<1x8xf32> to vector<1x8xf32>
      %491 = vector.broadcast %490 : vector<1x8xf32> to vector<12x8xf32>
      %492 = vector.extract_strided_slice %482 {offsets = [3, 0], sizes = [1, 8], strides = [1, 1]} : vector<6x8xf32> to vector<1x8xf32>
      %493 = vector.shape_cast %492 : vector<1x8xf32> to vector<1x8xf32>
      %494 = vector.broadcast %493 : vector<1x8xf32> to vector<12x8xf32>
      %495 = vector.extract_strided_slice %482 {offsets = [4, 0], sizes = [1, 8], strides = [1, 1]} : vector<6x8xf32> to vector<1x8xf32>
      %496 = vector.shape_cast %495 : vector<1x8xf32> to vector<1x8xf32>
      %497 = vector.broadcast %496 : vector<1x8xf32> to vector<12x8xf32>
      %498 = vector.extract_strided_slice %482 {offsets = [5, 0], sizes = [1, 8], strides = [1, 1]} : vector<6x8xf32> to vector<1x8xf32>
      %499 = vector.shape_cast %498 : vector<1x8xf32> to vector<1x8xf32>
      %500 = vector.broadcast %499 : vector<1x8xf32> to vector<12x8xf32>
      %501 = vector.extract_strided_slice %3 {offsets = [6, 0, 0], sizes = [1, 12, 8], strides = [1, 1, 1]} : vector<9x12x8xf32> to vector<1x12x8xf32>
      %502 = vector.shape_cast %501 : vector<1x12x8xf32> to vector<12x8xf32>
      %503 = arith.mulf %485, %502 : vector<12x8xf32>
      %504 = arith.addf %472, %503 : vector<12x8xf32>
      %505 = arith.mulf %488, %502 : vector<12x8xf32>
      %506 = arith.addf %474, %505 : vector<12x8xf32>
      %507 = arith.mulf %491, %502 : vector<12x8xf32>
      %508 = arith.addf %476, %507 : vector<12x8xf32>
      %509 = arith.mulf %494, %502 : vector<12x8xf32>
      %510 = arith.addf %478, %509 : vector<12x8xf32>
      %511 = vector.extract_strided_slice %3 {offsets = [7, 0, 0], sizes = [1, 12, 8], strides = [1, 1, 1]} : vector<9x12x8xf32> to vector<1x12x8xf32>
      %512 = vector.shape_cast %511 : vector<1x12x8xf32> to vector<12x8xf32>
      %513 = arith.mulf %488, %512 : vector<12x8xf32>
      %514 = arith.addf %504, %513 : vector<12x8xf32>
      %515 = arith.mulf %491, %512 : vector<12x8xf32>
      %516 = arith.addf %506, %515 : vector<12x8xf32>
      %517 = arith.mulf %494, %512 : vector<12x8xf32>
      %518 = arith.addf %508, %517 : vector<12x8xf32>
      %519 = arith.mulf %497, %512 : vector<12x8xf32>
      %520 = arith.addf %510, %519 : vector<12x8xf32>
      %521 = vector.extract_strided_slice %3 {offsets = [8, 0, 0], sizes = [1, 12, 8], strides = [1, 1, 1]} : vector<9x12x8xf32> to vector<1x12x8xf32>
      %522 = vector.shape_cast %521 : vector<1x12x8xf32> to vector<12x8xf32>
      %523 = arith.mulf %491, %522 : vector<12x8xf32>
      %524 = arith.addf %514, %523 : vector<12x8xf32>
      %525 = arith.mulf %494, %522 : vector<12x8xf32>
      %526 = arith.addf %516, %525 : vector<12x8xf32>
      %527 = arith.mulf %497, %522 : vector<12x8xf32>
      %528 = arith.addf %518, %527 : vector<12x8xf32>
      %529 = arith.mulf %500, %522 : vector<12x8xf32>
      %530 = arith.addf %520, %529 : vector<12x8xf32>
      %531 = arith.addf %524, %6 : vector<12x8xf32>
      %cst_50 = arith.constant 0.000000e+00 : f32
      %532 = vector.broadcast %cst_50 : f32 to vector<12x8xf32>
      %533 = arith.maximumf %531, %532 : vector<12x8xf32>
      %534 = arith.addf %526, %6 : vector<12x8xf32>
      %cst_51 = arith.constant 0.000000e+00 : f32
      %535 = vector.broadcast %cst_51 : f32 to vector<12x8xf32>
      %536 = arith.maximumf %534, %535 : vector<12x8xf32>
      %537 = arith.addf %528, %6 : vector<12x8xf32>
      %cst_52 = arith.constant 0.000000e+00 : f32
      %538 = vector.broadcast %cst_52 : f32 to vector<12x8xf32>
      %539 = arith.maximumf %537, %538 : vector<12x8xf32>
      %540 = arith.addf %530, %6 : vector<12x8xf32>
      %cst_53 = arith.constant 0.000000e+00 : f32
      %541 = vector.broadcast %cst_53 : f32 to vector<12x8xf32>
      %542 = arith.maximumf %540, %541 : vector<12x8xf32>
      %c1_i32_54 = arith.constant 1 : i32
      %543 = arith.addi %20, %c1_i32_54 : i32
      %c0_i32_55 = arith.constant 0 : i32
      %544 = arith.addi %543, %c0_i32_55 : i32
      %545 = arith.index_cast %544 : i32 to index
      %c4_56 = arith.constant 4 : index
      %c0_57 = arith.constant 0 : index
      %546 = vector.load %arg2[%545, %c4_56, %c0_57] : memref<22x22x8xf32, #tpu.memory_space<vmem>>, vector<1x6x8xf32>
      %547 = vector.shape_cast %546 : vector<1x6x8xf32> to vector<6x8xf32>
      %548 = vector.extract_strided_slice %547 {offsets = [0, 0], sizes = [1, 8], strides = [1, 1]} : vector<6x8xf32> to vector<1x8xf32>
      %549 = vector.shape_cast %548 : vector<1x8xf32> to vector<1x8xf32>
      %550 = vector.broadcast %549 : vector<1x8xf32> to vector<12x8xf32>
      %551 = vector.extract_strided_slice %547 {offsets = [1, 0], sizes = [1, 8], strides = [1, 1]} : vector<6x8xf32> to vector<1x8xf32>
      %552 = vector.shape_cast %551 : vector<1x8xf32> to vector<1x8xf32>
      %553 = vector.broadcast %552 : vector<1x8xf32> to vector<12x8xf32>
      %554 = vector.extract_strided_slice %547 {offsets = [2, 0], sizes = [1, 8], strides = [1, 1]} : vector<6x8xf32> to vector<1x8xf32>
      %555 = vector.shape_cast %554 : vector<1x8xf32> to vector<1x8xf32>
      %556 = vector.broadcast %555 : vector<1x8xf32> to vector<12x8xf32>
      %557 = vector.extract_strided_slice %547 {offsets = [3, 0], sizes = [1, 8], strides = [1, 1]} : vector<6x8xf32> to vector<1x8xf32>
      %558 = vector.shape_cast %557 : vector<1x8xf32> to vector<1x8xf32>
      %559 = vector.broadcast %558 : vector<1x8xf32> to vector<12x8xf32>
      %560 = vector.extract_strided_slice %547 {offsets = [4, 0], sizes = [1, 8], strides = [1, 1]} : vector<6x8xf32> to vector<1x8xf32>
      %561 = vector.shape_cast %560 : vector<1x8xf32> to vector<1x8xf32>
      %562 = vector.broadcast %561 : vector<1x8xf32> to vector<12x8xf32>
      %563 = vector.extract_strided_slice %547 {offsets = [5, 0], sizes = [1, 8], strides = [1, 1]} : vector<6x8xf32> to vector<1x8xf32>
      %564 = vector.shape_cast %563 : vector<1x8xf32> to vector<1x8xf32>
      %565 = vector.broadcast %564 : vector<1x8xf32> to vector<12x8xf32>
      %566 = vector.extract_strided_slice %3 {offsets = [0, 0, 0], sizes = [1, 12, 8], strides = [1, 1, 1]} : vector<9x12x8xf32> to vector<1x12x8xf32>
      %567 = vector.shape_cast %566 : vector<1x12x8xf32> to vector<12x8xf32>
      %568 = arith.mulf %550, %567 : vector<12x8xf32>
      %569 = arith.mulf %553, %567 : vector<12x8xf32>
      %570 = arith.mulf %556, %567 : vector<12x8xf32>
      %571 = arith.mulf %559, %567 : vector<12x8xf32>
      %572 = vector.extract_strided_slice %3 {offsets = [1, 0, 0], sizes = [1, 12, 8], strides = [1, 1, 1]} : vector<9x12x8xf32> to vector<1x12x8xf32>
      %573 = vector.shape_cast %572 : vector<1x12x8xf32> to vector<12x8xf32>
      %574 = arith.mulf %553, %573 : vector<12x8xf32>
      %575 = arith.addf %568, %574 : vector<12x8xf32>
      %576 = arith.mulf %556, %573 : vector<12x8xf32>
      %577 = arith.addf %569, %576 : vector<12x8xf32>
      %578 = arith.mulf %559, %573 : vector<12x8xf32>
      %579 = arith.addf %570, %578 : vector<12x8xf32>
      %580 = arith.mulf %562, %573 : vector<12x8xf32>
      %581 = arith.addf %571, %580 : vector<12x8xf32>
      %582 = vector.extract_strided_slice %3 {offsets = [2, 0, 0], sizes = [1, 12, 8], strides = [1, 1, 1]} : vector<9x12x8xf32> to vector<1x12x8xf32>
      %583 = vector.shape_cast %582 : vector<1x12x8xf32> to vector<12x8xf32>
      %584 = arith.mulf %556, %583 : vector<12x8xf32>
      %585 = arith.addf %575, %584 : vector<12x8xf32>
      %586 = arith.mulf %559, %583 : vector<12x8xf32>
      %587 = arith.addf %577, %586 : vector<12x8xf32>
      %588 = arith.mulf %562, %583 : vector<12x8xf32>
      %589 = arith.addf %579, %588 : vector<12x8xf32>
      %590 = arith.mulf %565, %583 : vector<12x8xf32>
      %591 = arith.addf %581, %590 : vector<12x8xf32>
      %c1_i32_58 = arith.constant 1 : i32
      %592 = arith.addi %543, %c1_i32_58 : i32
      %593 = arith.index_cast %592 : i32 to index
      %c4_59 = arith.constant 4 : index
      %c0_60 = arith.constant 0 : index
      %594 = vector.load %arg2[%593, %c4_59, %c0_60] : memref<22x22x8xf32, #tpu.memory_space<vmem>>, vector<1x6x8xf32>
      %595 = vector.shape_cast %594 : vector<1x6x8xf32> to vector<6x8xf32>
      %596 = vector.extract_strided_slice %595 {offsets = [0, 0], sizes = [1, 8], strides = [1, 1]} : vector<6x8xf32> to vector<1x8xf32>
      %597 = vector.shape_cast %596 : vector<1x8xf32> to vector<1x8xf32>
      %598 = vector.broadcast %597 : vector<1x8xf32> to vector<12x8xf32>
      %599 = vector.extract_strided_slice %595 {offsets = [1, 0], sizes = [1, 8], strides = [1, 1]} : vector<6x8xf32> to vector<1x8xf32>
      %600 = vector.shape_cast %599 : vector<1x8xf32> to vector<1x8xf32>
      %601 = vector.broadcast %600 : vector<1x8xf32> to vector<12x8xf32>
      %602 = vector.extract_strided_slice %595 {offsets = [2, 0], sizes = [1, 8], strides = [1, 1]} : vector<6x8xf32> to vector<1x8xf32>
      %603 = vector.shape_cast %602 : vector<1x8xf32> to vector<1x8xf32>
      %604 = vector.broadcast %603 : vector<1x8xf32> to vector<12x8xf32>
      %605 = vector.extract_strided_slice %595 {offsets = [3, 0], sizes = [1, 8], strides = [1, 1]} : vector<6x8xf32> to vector<1x8xf32>
      %606 = vector.shape_cast %605 : vector<1x8xf32> to vector<1x8xf32>
      %607 = vector.broadcast %606 : vector<1x8xf32> to vector<12x8xf32>
      %608 = vector.extract_strided_slice %595 {offsets = [4, 0], sizes = [1, 8], strides = [1, 1]} : vector<6x8xf32> to vector<1x8xf32>
      %609 = vector.shape_cast %608 : vector<1x8xf32> to vector<1x8xf32>
      %610 = vector.broadcast %609 : vector<1x8xf32> to vector<12x8xf32>
      %611 = vector.extract_strided_slice %595 {offsets = [5, 0], sizes = [1, 8], strides = [1, 1]} : vector<6x8xf32> to vector<1x8xf32>
      %612 = vector.shape_cast %611 : vector<1x8xf32> to vector<1x8xf32>
      %613 = vector.broadcast %612 : vector<1x8xf32> to vector<12x8xf32>
      %614 = vector.extract_strided_slice %3 {offsets = [3, 0, 0], sizes = [1, 12, 8], strides = [1, 1, 1]} : vector<9x12x8xf32> to vector<1x12x8xf32>
      %615 = vector.shape_cast %614 : vector<1x12x8xf32> to vector<12x8xf32>
      %616 = arith.mulf %598, %615 : vector<12x8xf32>
      %617 = arith.addf %585, %616 : vector<12x8xf32>
      %618 = arith.mulf %601, %615 : vector<12x8xf32>
      %619 = arith.addf %587, %618 : vector<12x8xf32>
      %620 = arith.mulf %604, %615 : vector<12x8xf32>
      %621 = arith.addf %589, %620 : vector<12x8xf32>
      %622 = arith.mulf %607, %615 : vector<12x8xf32>
      %623 = arith.addf %591, %622 : vector<12x8xf32>
      %624 = vector.extract_strided_slice %3 {offsets = [4, 0, 0], sizes = [1, 12, 8], strides = [1, 1, 1]} : vector<9x12x8xf32> to vector<1x12x8xf32>
      %625 = vector.shape_cast %624 : vector<1x12x8xf32> to vector<12x8xf32>
      %626 = arith.mulf %601, %625 : vector<12x8xf32>
      %627 = arith.addf %617, %626 : vector<12x8xf32>
      %628 = arith.mulf %604, %625 : vector<12x8xf32>
      %629 = arith.addf %619, %628 : vector<12x8xf32>
      %630 = arith.mulf %607, %625 : vector<12x8xf32>
      %631 = arith.addf %621, %630 : vector<12x8xf32>
      %632 = arith.mulf %610, %625 : vector<12x8xf32>
      %633 = arith.addf %623, %632 : vector<12x8xf32>
      %634 = vector.extract_strided_slice %3 {offsets = [5, 0, 0], sizes = [1, 12, 8], strides = [1, 1, 1]} : vector<9x12x8xf32> to vector<1x12x8xf32>
      %635 = vector.shape_cast %634 : vector<1x12x8xf32> to vector<12x8xf32>
      %636 = arith.mulf %604, %635 : vector<12x8xf32>
      %637 = arith.addf %627, %636 : vector<12x8xf32>
      %638 = arith.mulf %607, %635 : vector<12x8xf32>
      %639 = arith.addf %629, %638 : vector<12x8xf32>
      %640 = arith.mulf %610, %635 : vector<12x8xf32>
      %641 = arith.addf %631, %640 : vector<12x8xf32>
      %642 = arith.mulf %613, %635 : vector<12x8xf32>
      %643 = arith.addf %633, %642 : vector<12x8xf32>
      %c2_i32_61 = arith.constant 2 : i32
      %644 = arith.addi %543, %c2_i32_61 : i32
      %645 = arith.index_cast %644 : i32 to index
      %c4_62 = arith.constant 4 : index
      %c0_63 = arith.constant 0 : index
      %646 = vector.load %arg2[%645, %c4_62, %c0_63] : memref<22x22x8xf32, #tpu.memory_space<vmem>>, vector<1x6x8xf32>
      %647 = vector.shape_cast %646 : vector<1x6x8xf32> to vector<6x8xf32>
      %648 = vector.extract_strided_slice %647 {offsets = [0, 0], sizes = [1, 8], strides = [1, 1]} : vector<6x8xf32> to vector<1x8xf32>
      %649 = vector.shape_cast %648 : vector<1x8xf32> to vector<1x8xf32>
      %650 = vector.broadcast %649 : vector<1x8xf32> to vector<12x8xf32>
      %651 = vector.extract_strided_slice %647 {offsets = [1, 0], sizes = [1, 8], strides = [1, 1]} : vector<6x8xf32> to vector<1x8xf32>
      %652 = vector.shape_cast %651 : vector<1x8xf32> to vector<1x8xf32>
      %653 = vector.broadcast %652 : vector<1x8xf32> to vector<12x8xf32>
      %654 = vector.extract_strided_slice %647 {offsets = [2, 0], sizes = [1, 8], strides = [1, 1]} : vector<6x8xf32> to vector<1x8xf32>
      %655 = vector.shape_cast %654 : vector<1x8xf32> to vector<1x8xf32>
      %656 = vector.broadcast %655 : vector<1x8xf32> to vector<12x8xf32>
      %657 = vector.extract_strided_slice %647 {offsets = [3, 0], sizes = [1, 8], strides = [1, 1]} : vector<6x8xf32> to vector<1x8xf32>
      %658 = vector.shape_cast %657 : vector<1x8xf32> to vector<1x8xf32>
      %659 = vector.broadcast %658 : vector<1x8xf32> to vector<12x8xf32>
      %660 = vector.extract_strided_slice %647 {offsets = [4, 0], sizes = [1, 8], strides = [1, 1]} : vector<6x8xf32> to vector<1x8xf32>
      %661 = vector.shape_cast %660 : vector<1x8xf32> to vector<1x8xf32>
      %662 = vector.broadcast %661 : vector<1x8xf32> to vector<12x8xf32>
      %663 = vector.extract_strided_slice %647 {offsets = [5, 0], sizes = [1, 8], strides = [1, 1]} : vector<6x8xf32> to vector<1x8xf32>
      %664 = vector.shape_cast %663 : vector<1x8xf32> to vector<1x8xf32>
      %665 = vector.broadcast %664 : vector<1x8xf32> to vector<12x8xf32>
      %666 = vector.extract_strided_slice %3 {offsets = [6, 0, 0], sizes = [1, 12, 8], strides = [1, 1, 1]} : vector<9x12x8xf32> to vector<1x12x8xf32>
      %667 = vector.shape_cast %666 : vector<1x12x8xf32> to vector<12x8xf32>
      %668 = arith.mulf %650, %667 : vector<12x8xf32>
      %669 = arith.addf %637, %668 : vector<12x8xf32>
      %670 = arith.mulf %653, %667 : vector<12x8xf32>
      %671 = arith.addf %639, %670 : vector<12x8xf32>
      %672 = arith.mulf %656, %667 : vector<12x8xf32>
      %673 = arith.addf %641, %672 : vector<12x8xf32>
      %674 = arith.mulf %659, %667 : vector<12x8xf32>
      %675 = arith.addf %643, %674 : vector<12x8xf32>
      %676 = vector.extract_strided_slice %3 {offsets = [7, 0, 0], sizes = [1, 12, 8], strides = [1, 1, 1]} : vector<9x12x8xf32> to vector<1x12x8xf32>
      %677 = vector.shape_cast %676 : vector<1x12x8xf32> to vector<12x8xf32>
      %678 = arith.mulf %653, %677 : vector<12x8xf32>
      %679 = arith.addf %669, %678 : vector<12x8xf32>
      %680 = arith.mulf %656, %677 : vector<12x8xf32>
      %681 = arith.addf %671, %680 : vector<12x8xf32>
      %682 = arith.mulf %659, %677 : vector<12x8xf32>
      %683 = arith.addf %673, %682 : vector<12x8xf32>
      %684 = arith.mulf %662, %677 : vector<12x8xf32>
      %685 = arith.addf %675, %684 : vector<12x8xf32>
      %686 = vector.extract_strided_slice %3 {offsets = [8, 0, 0], sizes = [1, 12, 8], strides = [1, 1, 1]} : vector<9x12x8xf32> to vector<1x12x8xf32>
      %687 = vector.shape_cast %686 : vector<1x12x8xf32> to vector<12x8xf32>
      %688 = arith.mulf %656, %687 : vector<12x8xf32>
      %689 = arith.addf %679, %688 : vector<12x8xf32>
      %690 = arith.mulf %659, %687 : vector<12x8xf32>
      %691 = arith.addf %681, %690 : vector<12x8xf32>
      %692 = arith.mulf %662, %687 : vector<12x8xf32>
      %693 = arith.addf %683, %692 : vector<12x8xf32>
      %694 = arith.mulf %665, %687 : vector<12x8xf32>
      %695 = arith.addf %685, %694 : vector<12x8xf32>
      %696 = arith.addf %689, %6 : vector<12x8xf32>
      %cst_64 = arith.constant 0.000000e+00 : f32
      %697 = vector.broadcast %cst_64 : f32 to vector<12x8xf32>
      %698 = arith.maximumf %696, %697 : vector<12x8xf32>
      %699 = arith.addf %691, %6 : vector<12x8xf32>
      %cst_65 = arith.constant 0.000000e+00 : f32
      %700 = vector.broadcast %cst_65 : f32 to vector<12x8xf32>
      %701 = arith.maximumf %699, %700 : vector<12x8xf32>
      %702 = arith.addf %693, %6 : vector<12x8xf32>
      %cst_66 = arith.constant 0.000000e+00 : f32
      %703 = vector.broadcast %cst_66 : f32 to vector<12x8xf32>
      %704 = arith.maximumf %702, %703 : vector<12x8xf32>
      %705 = arith.addf %695, %6 : vector<12x8xf32>
      %cst_67 = arith.constant 0.000000e+00 : f32
      %706 = vector.broadcast %cst_67 : f32 to vector<12x8xf32>
      %707 = arith.maximumf %705, %706 : vector<12x8xf32>
      %708 = arith.maximumf %533, %698 : vector<12x8xf32>
      %709 = arith.maximumf %536, %701 : vector<12x8xf32>
      %710 = arith.maximumf %539, %704 : vector<12x8xf32>
      %711 = arith.maximumf %542, %707 : vector<12x8xf32>
      %712 = arith.maximumf %708, %709 : vector<12x8xf32>
      %713 = arith.maximumf %710, %711 : vector<12x8xf32>
      %714 = arith.index_cast %arg7 : i32 to index
      %c0_68 = arith.constant 0 : index
      %c2 = arith.constant 2 : index
      %c0_69 = arith.constant 0 : index
      %c0_70 = arith.constant 0 : index
      %715 = vector.load %arg5[%714, %c0_68, %c2, %c0_69, %c0_70] : memref<5x2x10x12x1xf32, #tpu.memory_space<vmem>>, vector<1x2x2x12x1xf32>
      %716 = vector.shape_cast %715 : vector<1x2x2x12x1xf32> to vector<2x2x12x1xf32>
      %717 = vector.extract_strided_slice %716 {offsets = [0, 0, 0, 0], sizes = [1, 1, 12, 1], strides = [1, 1, 1, 1]} : vector<2x2x12x1xf32> to vector<1x1x12x1xf32>
      %718 = vector.shape_cast %717 : vector<1x1x12x1xf32> to vector<12x1xf32>
      %719 = vector.broadcast %718 : vector<12x1xf32> to vector<12x8xf32>
      %720 = arith.mulf %712, %719 : vector<12x8xf32>
      %721 = arith.addf %368, %720 : vector<12x8xf32>
      %722 = vector.extract_strided_slice %716 {offsets = [0, 1, 0, 0], sizes = [1, 1, 12, 1], strides = [1, 1, 1, 1]} : vector<2x2x12x1xf32> to vector<1x1x12x1xf32>
      %723 = vector.shape_cast %722 : vector<1x1x12x1xf32> to vector<12x1xf32>
      %724 = vector.broadcast %723 : vector<12x1xf32> to vector<12x8xf32>
      %725 = arith.mulf %713, %724 : vector<12x8xf32>
      %726 = arith.addf %721, %725 : vector<12x8xf32>
      %727 = vector.extract_strided_slice %716 {offsets = [1, 0, 0, 0], sizes = [1, 1, 12, 1], strides = [1, 1, 1, 1]} : vector<2x2x12x1xf32> to vector<1x1x12x1xf32>
      %728 = vector.shape_cast %727 : vector<1x1x12x1xf32> to vector<12x1xf32>
      %729 = vector.broadcast %728 : vector<12x1xf32> to vector<12x8xf32>
      %730 = arith.mulf %712, %729 : vector<12x8xf32>
      %731 = arith.addf %378, %730 : vector<12x8xf32>
      %732 = vector.extract_strided_slice %716 {offsets = [1, 1, 0, 0], sizes = [1, 1, 12, 1], strides = [1, 1, 1, 1]} : vector<2x2x12x1xf32> to vector<1x1x12x1xf32>
      %733 = vector.shape_cast %732 : vector<1x1x12x1xf32> to vector<12x1xf32>
      %734 = vector.broadcast %733 : vector<12x1xf32> to vector<12x8xf32>
      %735 = arith.mulf %713, %734 : vector<12x8xf32>
      %736 = arith.addf %731, %735 : vector<12x8xf32>
      %c0_i32_71 = arith.constant 0 : i32
      %737 = arith.addi %20, %c0_i32_71 : i32
      %738 = arith.index_cast %737 : i32 to index
      %c8 = arith.constant 8 : index
      %c0_72 = arith.constant 0 : index
      %739 = vector.load %arg2[%738, %c8, %c0_72] : memref<22x22x8xf32, #tpu.memory_space<vmem>>, vector<1x6x8xf32>
      %740 = vector.shape_cast %739 : vector<1x6x8xf32> to vector<6x8xf32>
      %741 = vector.extract_strided_slice %740 {offsets = [0, 0], sizes = [1, 8], strides = [1, 1]} : vector<6x8xf32> to vector<1x8xf32>
      %742 = vector.shape_cast %741 : vector<1x8xf32> to vector<1x8xf32>
      %743 = vector.broadcast %742 : vector<1x8xf32> to vector<12x8xf32>
      %744 = vector.extract_strided_slice %740 {offsets = [1, 0], sizes = [1, 8], strides = [1, 1]} : vector<6x8xf32> to vector<1x8xf32>
      %745 = vector.shape_cast %744 : vector<1x8xf32> to vector<1x8xf32>
      %746 = vector.broadcast %745 : vector<1x8xf32> to vector<12x8xf32>
      %747 = vector.extract_strided_slice %740 {offsets = [2, 0], sizes = [1, 8], strides = [1, 1]} : vector<6x8xf32> to vector<1x8xf32>
      %748 = vector.shape_cast %747 : vector<1x8xf32> to vector<1x8xf32>
      %749 = vector.broadcast %748 : vector<1x8xf32> to vector<12x8xf32>
      %750 = vector.extract_strided_slice %740 {offsets = [3, 0], sizes = [1, 8], strides = [1, 1]} : vector<6x8xf32> to vector<1x8xf32>
      %751 = vector.shape_cast %750 : vector<1x8xf32> to vector<1x8xf32>
      %752 = vector.broadcast %751 : vector<1x8xf32> to vector<12x8xf32>
      %753 = vector.extract_strided_slice %740 {offsets = [4, 0], sizes = [1, 8], strides = [1, 1]} : vector<6x8xf32> to vector<1x8xf32>
      %754 = vector.shape_cast %753 : vector<1x8xf32> to vector<1x8xf32>
      %755 = vector.broadcast %754 : vector<1x8xf32> to vector<12x8xf32>
      %756 = vector.extract_strided_slice %740 {offsets = [5, 0], sizes = [1, 8], strides = [1, 1]} : vector<6x8xf32> to vector<1x8xf32>
      %757 = vector.shape_cast %756 : vector<1x8xf32> to vector<1x8xf32>
      %758 = vector.broadcast %757 : vector<1x8xf32> to vector<12x8xf32>
      %759 = vector.extract_strided_slice %3 {offsets = [0, 0, 0], sizes = [1, 12, 8], strides = [1, 1, 1]} : vector<9x12x8xf32> to vector<1x12x8xf32>
      %760 = vector.shape_cast %759 : vector<1x12x8xf32> to vector<12x8xf32>
      %761 = arith.mulf %743, %760 : vector<12x8xf32>
      %762 = arith.mulf %746, %760 : vector<12x8xf32>
      %763 = arith.mulf %749, %760 : vector<12x8xf32>
      %764 = arith.mulf %752, %760 : vector<12x8xf32>
      %765 = vector.extract_strided_slice %3 {offsets = [1, 0, 0], sizes = [1, 12, 8], strides = [1, 1, 1]} : vector<9x12x8xf32> to vector<1x12x8xf32>
      %766 = vector.shape_cast %765 : vector<1x12x8xf32> to vector<12x8xf32>
      %767 = arith.mulf %746, %766 : vector<12x8xf32>
      %768 = arith.addf %761, %767 : vector<12x8xf32>
      %769 = arith.mulf %749, %766 : vector<12x8xf32>
      %770 = arith.addf %762, %769 : vector<12x8xf32>
      %771 = arith.mulf %752, %766 : vector<12x8xf32>
      %772 = arith.addf %763, %771 : vector<12x8xf32>
      %773 = arith.mulf %755, %766 : vector<12x8xf32>
      %774 = arith.addf %764, %773 : vector<12x8xf32>
      %775 = vector.extract_strided_slice %3 {offsets = [2, 0, 0], sizes = [1, 12, 8], strides = [1, 1, 1]} : vector<9x12x8xf32> to vector<1x12x8xf32>
      %776 = vector.shape_cast %775 : vector<1x12x8xf32> to vector<12x8xf32>
      %777 = arith.mulf %749, %776 : vector<12x8xf32>
      %778 = arith.addf %768, %777 : vector<12x8xf32>
      %779 = arith.mulf %752, %776 : vector<12x8xf32>
      %780 = arith.addf %770, %779 : vector<12x8xf32>
      %781 = arith.mulf %755, %776 : vector<12x8xf32>
      %782 = arith.addf %772, %781 : vector<12x8xf32>
      %783 = arith.mulf %758, %776 : vector<12x8xf32>
      %784 = arith.addf %774, %783 : vector<12x8xf32>
      %c1_i32_73 = arith.constant 1 : i32
      %785 = arith.addi %20, %c1_i32_73 : i32
      %786 = arith.index_cast %785 : i32 to index
      %c8_74 = arith.constant 8 : index
      %c0_75 = arith.constant 0 : index
      %787 = vector.load %arg2[%786, %c8_74, %c0_75] : memref<22x22x8xf32, #tpu.memory_space<vmem>>, vector<1x6x8xf32>
      %788 = vector.shape_cast %787 : vector<1x6x8xf32> to vector<6x8xf32>
      %789 = vector.extract_strided_slice %788 {offsets = [0, 0], sizes = [1, 8], strides = [1, 1]} : vector<6x8xf32> to vector<1x8xf32>
      %790 = vector.shape_cast %789 : vector<1x8xf32> to vector<1x8xf32>
      %791 = vector.broadcast %790 : vector<1x8xf32> to vector<12x8xf32>
      %792 = vector.extract_strided_slice %788 {offsets = [1, 0], sizes = [1, 8], strides = [1, 1]} : vector<6x8xf32> to vector<1x8xf32>
      %793 = vector.shape_cast %792 : vector<1x8xf32> to vector<1x8xf32>
      %794 = vector.broadcast %793 : vector<1x8xf32> to vector<12x8xf32>
      %795 = vector.extract_strided_slice %788 {offsets = [2, 0], sizes = [1, 8], strides = [1, 1]} : vector<6x8xf32> to vector<1x8xf32>
      %796 = vector.shape_cast %795 : vector<1x8xf32> to vector<1x8xf32>
      %797 = vector.broadcast %796 : vector<1x8xf32> to vector<12x8xf32>
      %798 = vector.extract_strided_slice %788 {offsets = [3, 0], sizes = [1, 8], strides = [1, 1]} : vector<6x8xf32> to vector<1x8xf32>
      %799 = vector.shape_cast %798 : vector<1x8xf32> to vector<1x8xf32>
      %800 = vector.broadcast %799 : vector<1x8xf32> to vector<12x8xf32>
      %801 = vector.extract_strided_slice %788 {offsets = [4, 0], sizes = [1, 8], strides = [1, 1]} : vector<6x8xf32> to vector<1x8xf32>
      %802 = vector.shape_cast %801 : vector<1x8xf32> to vector<1x8xf32>
      %803 = vector.broadcast %802 : vector<1x8xf32> to vector<12x8xf32>
      %804 = vector.extract_strided_slice %788 {offsets = [5, 0], sizes = [1, 8], strides = [1, 1]} : vector<6x8xf32> to vector<1x8xf32>
      %805 = vector.shape_cast %804 : vector<1x8xf32> to vector<1x8xf32>
      %806 = vector.broadcast %805 : vector<1x8xf32> to vector<12x8xf32>
      %807 = vector.extract_strided_slice %3 {offsets = [3, 0, 0], sizes = [1, 12, 8], strides = [1, 1, 1]} : vector<9x12x8xf32> to vector<1x12x8xf32>
      %808 = vector.shape_cast %807 : vector<1x12x8xf32> to vector<12x8xf32>
      %809 = arith.mulf %791, %808 : vector<12x8xf32>
      %810 = arith.addf %778, %809 : vector<12x8xf32>
      %811 = arith.mulf %794, %808 : vector<12x8xf32>
      %812 = arith.addf %780, %811 : vector<12x8xf32>
      %813 = arith.mulf %797, %808 : vector<12x8xf32>
      %814 = arith.addf %782, %813 : vector<12x8xf32>
      %815 = arith.mulf %800, %808 : vector<12x8xf32>
      %816 = arith.addf %784, %815 : vector<12x8xf32>
      %817 = vector.extract_strided_slice %3 {offsets = [4, 0, 0], sizes = [1, 12, 8], strides = [1, 1, 1]} : vector<9x12x8xf32> to vector<1x12x8xf32>
      %818 = vector.shape_cast %817 : vector<1x12x8xf32> to vector<12x8xf32>
      %819 = arith.mulf %794, %818 : vector<12x8xf32>
      %820 = arith.addf %810, %819 : vector<12x8xf32>
      %821 = arith.mulf %797, %818 : vector<12x8xf32>
      %822 = arith.addf %812, %821 : vector<12x8xf32>
      %823 = arith.mulf %800, %818 : vector<12x8xf32>
      %824 = arith.addf %814, %823 : vector<12x8xf32>
      %825 = arith.mulf %803, %818 : vector<12x8xf32>
      %826 = arith.addf %816, %825 : vector<12x8xf32>
      %827 = vector.extract_strided_slice %3 {offsets = [5, 0, 0], sizes = [1, 12, 8], strides = [1, 1, 1]} : vector<9x12x8xf32> to vector<1x12x8xf32>
      %828 = vector.shape_cast %827 : vector<1x12x8xf32> to vector<12x8xf32>
      %829 = arith.mulf %797, %828 : vector<12x8xf32>
      %830 = arith.addf %820, %829 : vector<12x8xf32>
      %831 = arith.mulf %800, %828 : vector<12x8xf32>
      %832 = arith.addf %822, %831 : vector<12x8xf32>
      %833 = arith.mulf %803, %828 : vector<12x8xf32>
      %834 = arith.addf %824, %833 : vector<12x8xf32>
      %835 = arith.mulf %806, %828 : vector<12x8xf32>
      %836 = arith.addf %826, %835 : vector<12x8xf32>
      %c2_i32_76 = arith.constant 2 : i32
      %837 = arith.addi %20, %c2_i32_76 : i32
      %838 = arith.index_cast %837 : i32 to index
      %c8_77 = arith.constant 8 : index
      %c0_78 = arith.constant 0 : index
      %839 = vector.load %arg2[%838, %c8_77, %c0_78] : memref<22x22x8xf32, #tpu.memory_space<vmem>>, vector<1x6x8xf32>
      %840 = vector.shape_cast %839 : vector<1x6x8xf32> to vector<6x8xf32>
      %841 = vector.extract_strided_slice %840 {offsets = [0, 0], sizes = [1, 8], strides = [1, 1]} : vector<6x8xf32> to vector<1x8xf32>
      %842 = vector.shape_cast %841 : vector<1x8xf32> to vector<1x8xf32>
      %843 = vector.broadcast %842 : vector<1x8xf32> to vector<12x8xf32>
      %844 = vector.extract_strided_slice %840 {offsets = [1, 0], sizes = [1, 8], strides = [1, 1]} : vector<6x8xf32> to vector<1x8xf32>
      %845 = vector.shape_cast %844 : vector<1x8xf32> to vector<1x8xf32>
      %846 = vector.broadcast %845 : vector<1x8xf32> to vector<12x8xf32>
      %847 = vector.extract_strided_slice %840 {offsets = [2, 0], sizes = [1, 8], strides = [1, 1]} : vector<6x8xf32> to vector<1x8xf32>
      %848 = vector.shape_cast %847 : vector<1x8xf32> to vector<1x8xf32>
      %849 = vector.broadcast %848 : vector<1x8xf32> to vector<12x8xf32>
      %850 = vector.extract_strided_slice %840 {offsets = [3, 0], sizes = [1, 8], strides = [1, 1]} : vector<6x8xf32> to vector<1x8xf32>
      %851 = vector.shape_cast %850 : vector<1x8xf32> to vector<1x8xf32>
      %852 = vector.broadcast %851 : vector<1x8xf32> to vector<12x8xf32>
      %853 = vector.extract_strided_slice %840 {offsets = [4, 0], sizes = [1, 8], strides = [1, 1]} : vector<6x8xf32> to vector<1x8xf32>
      %854 = vector.shape_cast %853 : vector<1x8xf32> to vector<1x8xf32>
      %855 = vector.broadcast %854 : vector<1x8xf32> to vector<12x8xf32>
      %856 = vector.extract_strided_slice %840 {offsets = [5, 0], sizes = [1, 8], strides = [1, 1]} : vector<6x8xf32> to vector<1x8xf32>
      %857 = vector.shape_cast %856 : vector<1x8xf32> to vector<1x8xf32>
      %858 = vector.broadcast %857 : vector<1x8xf32> to vector<12x8xf32>
      %859 = vector.extract_strided_slice %3 {offsets = [6, 0, 0], sizes = [1, 12, 8], strides = [1, 1, 1]} : vector<9x12x8xf32> to vector<1x12x8xf32>
      %860 = vector.shape_cast %859 : vector<1x12x8xf32> to vector<12x8xf32>
      %861 = arith.mulf %843, %860 : vector<12x8xf32>
      %862 = arith.addf %830, %861 : vector<12x8xf32>
      %863 = arith.mulf %846, %860 : vector<12x8xf32>
      %864 = arith.addf %832, %863 : vector<12x8xf32>
      %865 = arith.mulf %849, %860 : vector<12x8xf32>
      %866 = arith.addf %834, %865 : vector<12x8xf32>
      %867 = arith.mulf %852, %860 : vector<12x8xf32>
      %868 = arith.addf %836, %867 : vector<12x8xf32>
      %869 = vector.extract_strided_slice %3 {offsets = [7, 0, 0], sizes = [1, 12, 8], strides = [1, 1, 1]} : vector<9x12x8xf32> to vector<1x12x8xf32>
      %870 = vector.shape_cast %869 : vector<1x12x8xf32> to vector<12x8xf32>
      %871 = arith.mulf %846, %870 : vector<12x8xf32>
      %872 = arith.addf %862, %871 : vector<12x8xf32>
      %873 = arith.mulf %849, %870 : vector<12x8xf32>
      %874 = arith.addf %864, %873 : vector<12x8xf32>
      %875 = arith.mulf %852, %870 : vector<12x8xf32>
      %876 = arith.addf %866, %875 : vector<12x8xf32>
      %877 = arith.mulf %855, %870 : vector<12x8xf32>
      %878 = arith.addf %868, %877 : vector<12x8xf32>
      %879 = vector.extract_strided_slice %3 {offsets = [8, 0, 0], sizes = [1, 12, 8], strides = [1, 1, 1]} : vector<9x12x8xf32> to vector<1x12x8xf32>
      %880 = vector.shape_cast %879 : vector<1x12x8xf32> to vector<12x8xf32>
      %881 = arith.mulf %849, %880 : vector<12x8xf32>
      %882 = arith.addf %872, %881 : vector<12x8xf32>
      %883 = arith.mulf %852, %880 : vector<12x8xf32>
      %884 = arith.addf %874, %883 : vector<12x8xf32>
      %885 = arith.mulf %855, %880 : vector<12x8xf32>
      %886 = arith.addf %876, %885 : vector<12x8xf32>
      %887 = arith.mulf %858, %880 : vector<12x8xf32>
      %888 = arith.addf %878, %887 : vector<12x8xf32>
      %889 = arith.addf %882, %6 : vector<12x8xf32>
      %cst_79 = arith.constant 0.000000e+00 : f32
      %890 = vector.broadcast %cst_79 : f32 to vector<12x8xf32>
      %891 = arith.maximumf %889, %890 : vector<12x8xf32>
      %892 = arith.addf %884, %6 : vector<12x8xf32>
      %cst_80 = arith.constant 0.000000e+00 : f32
      %893 = vector.broadcast %cst_80 : f32 to vector<12x8xf32>
      %894 = arith.maximumf %892, %893 : vector<12x8xf32>
      %895 = arith.addf %886, %6 : vector<12x8xf32>
      %cst_81 = arith.constant 0.000000e+00 : f32
      %896 = vector.broadcast %cst_81 : f32 to vector<12x8xf32>
      %897 = arith.maximumf %895, %896 : vector<12x8xf32>
      %898 = arith.addf %888, %6 : vector<12x8xf32>
      %cst_82 = arith.constant 0.000000e+00 : f32
      %899 = vector.broadcast %cst_82 : f32 to vector<12x8xf32>
      %900 = arith.maximumf %898, %899 : vector<12x8xf32>
      %c1_i32_83 = arith.constant 1 : i32
      %901 = arith.addi %20, %c1_i32_83 : i32
      %c0_i32_84 = arith.constant 0 : i32
      %902 = arith.addi %901, %c0_i32_84 : i32
      %903 = arith.index_cast %902 : i32 to index
      %c8_85 = arith.constant 8 : index
      %c0_86 = arith.constant 0 : index
      %904 = vector.load %arg2[%903, %c8_85, %c0_86] : memref<22x22x8xf32, #tpu.memory_space<vmem>>, vector<1x6x8xf32>
      %905 = vector.shape_cast %904 : vector<1x6x8xf32> to vector<6x8xf32>
      %906 = vector.extract_strided_slice %905 {offsets = [0, 0], sizes = [1, 8], strides = [1, 1]} : vector<6x8xf32> to vector<1x8xf32>
      %907 = vector.shape_cast %906 : vector<1x8xf32> to vector<1x8xf32>
      %908 = vector.broadcast %907 : vector<1x8xf32> to vector<12x8xf32>
      %909 = vector.extract_strided_slice %905 {offsets = [1, 0], sizes = [1, 8], strides = [1, 1]} : vector<6x8xf32> to vector<1x8xf32>
      %910 = vector.shape_cast %909 : vector<1x8xf32> to vector<1x8xf32>
      %911 = vector.broadcast %910 : vector<1x8xf32> to vector<12x8xf32>
      %912 = vector.extract_strided_slice %905 {offsets = [2, 0], sizes = [1, 8], strides = [1, 1]} : vector<6x8xf32> to vector<1x8xf32>
      %913 = vector.shape_cast %912 : vector<1x8xf32> to vector<1x8xf32>
      %914 = vector.broadcast %913 : vector<1x8xf32> to vector<12x8xf32>
      %915 = vector.extract_strided_slice %905 {offsets = [3, 0], sizes = [1, 8], strides = [1, 1]} : vector<6x8xf32> to vector<1x8xf32>
      %916 = vector.shape_cast %915 : vector<1x8xf32> to vector<1x8xf32>
      %917 = vector.broadcast %916 : vector<1x8xf32> to vector<12x8xf32>
      %918 = vector.extract_strided_slice %905 {offsets = [4, 0], sizes = [1, 8], strides = [1, 1]} : vector<6x8xf32> to vector<1x8xf32>
      %919 = vector.shape_cast %918 : vector<1x8xf32> to vector<1x8xf32>
      %920 = vector.broadcast %919 : vector<1x8xf32> to vector<12x8xf32>
      %921 = vector.extract_strided_slice %905 {offsets = [5, 0], sizes = [1, 8], strides = [1, 1]} : vector<6x8xf32> to vector<1x8xf32>
      %922 = vector.shape_cast %921 : vector<1x8xf32> to vector<1x8xf32>
      %923 = vector.broadcast %922 : vector<1x8xf32> to vector<12x8xf32>
      %924 = vector.extract_strided_slice %3 {offsets = [0, 0, 0], sizes = [1, 12, 8], strides = [1, 1, 1]} : vector<9x12x8xf32> to vector<1x12x8xf32>
      %925 = vector.shape_cast %924 : vector<1x12x8xf32> to vector<12x8xf32>
      %926 = arith.mulf %908, %925 : vector<12x8xf32>
      %927 = arith.mulf %911, %925 : vector<12x8xf32>
      %928 = arith.mulf %914, %925 : vector<12x8xf32>
      %929 = arith.mulf %917, %925 : vector<12x8xf32>
      %930 = vector.extract_strided_slice %3 {offsets = [1, 0, 0], sizes = [1, 12, 8], strides = [1, 1, 1]} : vector<9x12x8xf32> to vector<1x12x8xf32>
      %931 = vector.shape_cast %930 : vector<1x12x8xf32> to vector<12x8xf32>
      %932 = arith.mulf %911, %931 : vector<12x8xf32>
      %933 = arith.addf %926, %932 : vector<12x8xf32>
      %934 = arith.mulf %914, %931 : vector<12x8xf32>
      %935 = arith.addf %927, %934 : vector<12x8xf32>
      %936 = arith.mulf %917, %931 : vector<12x8xf32>
      %937 = arith.addf %928, %936 : vector<12x8xf32>
      %938 = arith.mulf %920, %931 : vector<12x8xf32>
      %939 = arith.addf %929, %938 : vector<12x8xf32>
      %940 = vector.extract_strided_slice %3 {offsets = [2, 0, 0], sizes = [1, 12, 8], strides = [1, 1, 1]} : vector<9x12x8xf32> to vector<1x12x8xf32>
      %941 = vector.shape_cast %940 : vector<1x12x8xf32> to vector<12x8xf32>
      %942 = arith.mulf %914, %941 : vector<12x8xf32>
      %943 = arith.addf %933, %942 : vector<12x8xf32>
      %944 = arith.mulf %917, %941 : vector<12x8xf32>
      %945 = arith.addf %935, %944 : vector<12x8xf32>
      %946 = arith.mulf %920, %941 : vector<12x8xf32>
      %947 = arith.addf %937, %946 : vector<12x8xf32>
      %948 = arith.mulf %923, %941 : vector<12x8xf32>
      %949 = arith.addf %939, %948 : vector<12x8xf32>
      %c1_i32_87 = arith.constant 1 : i32
      %950 = arith.addi %901, %c1_i32_87 : i32
      %951 = arith.index_cast %950 : i32 to index
      %c8_88 = arith.constant 8 : index
      %c0_89 = arith.constant 0 : index
      %952 = vector.load %arg2[%951, %c8_88, %c0_89] : memref<22x22x8xf32, #tpu.memory_space<vmem>>, vector<1x6x8xf32>
      %953 = vector.shape_cast %952 : vector<1x6x8xf32> to vector<6x8xf32>
      %954 = vector.extract_strided_slice %953 {offsets = [0, 0], sizes = [1, 8], strides = [1, 1]} : vector<6x8xf32> to vector<1x8xf32>
      %955 = vector.shape_cast %954 : vector<1x8xf32> to vector<1x8xf32>
      %956 = vector.broadcast %955 : vector<1x8xf32> to vector<12x8xf32>
      %957 = vector.extract_strided_slice %953 {offsets = [1, 0], sizes = [1, 8], strides = [1, 1]} : vector<6x8xf32> to vector<1x8xf32>
      %958 = vector.shape_cast %957 : vector<1x8xf32> to vector<1x8xf32>
      %959 = vector.broadcast %958 : vector<1x8xf32> to vector<12x8xf32>
      %960 = vector.extract_strided_slice %953 {offsets = [2, 0], sizes = [1, 8], strides = [1, 1]} : vector<6x8xf32> to vector<1x8xf32>
      %961 = vector.shape_cast %960 : vector<1x8xf32> to vector<1x8xf32>
      %962 = vector.broadcast %961 : vector<1x8xf32> to vector<12x8xf32>
      %963 = vector.extract_strided_slice %953 {offsets = [3, 0], sizes = [1, 8], strides = [1, 1]} : vector<6x8xf32> to vector<1x8xf32>
      %964 = vector.shape_cast %963 : vector<1x8xf32> to vector<1x8xf32>
      %965 = vector.broadcast %964 : vector<1x8xf32> to vector<12x8xf32>
      %966 = vector.extract_strided_slice %953 {offsets = [4, 0], sizes = [1, 8], strides = [1, 1]} : vector<6x8xf32> to vector<1x8xf32>
      %967 = vector.shape_cast %966 : vector<1x8xf32> to vector<1x8xf32>
      %968 = vector.broadcast %967 : vector<1x8xf32> to vector<12x8xf32>
      %969 = vector.extract_strided_slice %953 {offsets = [5, 0], sizes = [1, 8], strides = [1, 1]} : vector<6x8xf32> to vector<1x8xf32>
      %970 = vector.shape_cast %969 : vector<1x8xf32> to vector<1x8xf32>
      %971 = vector.broadcast %970 : vector<1x8xf32> to vector<12x8xf32>
      %972 = vector.extract_strided_slice %3 {offsets = [3, 0, 0], sizes = [1, 12, 8], strides = [1, 1, 1]} : vector<9x12x8xf32> to vector<1x12x8xf32>
      %973 = vector.shape_cast %972 : vector<1x12x8xf32> to vector<12x8xf32>
      %974 = arith.mulf %956, %973 : vector<12x8xf32>
      %975 = arith.addf %943, %974 : vector<12x8xf32>
      %976 = arith.mulf %959, %973 : vector<12x8xf32>
      %977 = arith.addf %945, %976 : vector<12x8xf32>
      %978 = arith.mulf %962, %973 : vector<12x8xf32>
      %979 = arith.addf %947, %978 : vector<12x8xf32>
      %980 = arith.mulf %965, %973 : vector<12x8xf32>
      %981 = arith.addf %949, %980 : vector<12x8xf32>
      %982 = vector.extract_strided_slice %3 {offsets = [4, 0, 0], sizes = [1, 12, 8], strides = [1, 1, 1]} : vector<9x12x8xf32> to vector<1x12x8xf32>
      %983 = vector.shape_cast %982 : vector<1x12x8xf32> to vector<12x8xf32>
      %984 = arith.mulf %959, %983 : vector<12x8xf32>
      %985 = arith.addf %975, %984 : vector<12x8xf32>
      %986 = arith.mulf %962, %983 : vector<12x8xf32>
      %987 = arith.addf %977, %986 : vector<12x8xf32>
      %988 = arith.mulf %965, %983 : vector<12x8xf32>
      %989 = arith.addf %979, %988 : vector<12x8xf32>
      %990 = arith.mulf %968, %983 : vector<12x8xf32>
      %991 = arith.addf %981, %990 : vector<12x8xf32>
      %992 = vector.extract_strided_slice %3 {offsets = [5, 0, 0], sizes = [1, 12, 8], strides = [1, 1, 1]} : vector<9x12x8xf32> to vector<1x12x8xf32>
      %993 = vector.shape_cast %992 : vector<1x12x8xf32> to vector<12x8xf32>
      %994 = arith.mulf %962, %993 : vector<12x8xf32>
      %995 = arith.addf %985, %994 : vector<12x8xf32>
      %996 = arith.mulf %965, %993 : vector<12x8xf32>
      %997 = arith.addf %987, %996 : vector<12x8xf32>
      %998 = arith.mulf %968, %993 : vector<12x8xf32>
      %999 = arith.addf %989, %998 : vector<12x8xf32>
      %1000 = arith.mulf %971, %993 : vector<12x8xf32>
      %1001 = arith.addf %991, %1000 : vector<12x8xf32>
      %c2_i32_90 = arith.constant 2 : i32
      %1002 = arith.addi %901, %c2_i32_90 : i32
      %1003 = arith.index_cast %1002 : i32 to index
      %c8_91 = arith.constant 8 : index
      %c0_92 = arith.constant 0 : index
      %1004 = vector.load %arg2[%1003, %c8_91, %c0_92] : memref<22x22x8xf32, #tpu.memory_space<vmem>>, vector<1x6x8xf32>
      %1005 = vector.shape_cast %1004 : vector<1x6x8xf32> to vector<6x8xf32>
      %1006 = vector.extract_strided_slice %1005 {offsets = [0, 0], sizes = [1, 8], strides = [1, 1]} : vector<6x8xf32> to vector<1x8xf32>
      %1007 = vector.shape_cast %1006 : vector<1x8xf32> to vector<1x8xf32>
      %1008 = vector.broadcast %1007 : vector<1x8xf32> to vector<12x8xf32>
      %1009 = vector.extract_strided_slice %1005 {offsets = [1, 0], sizes = [1, 8], strides = [1, 1]} : vector<6x8xf32> to vector<1x8xf32>
      %1010 = vector.shape_cast %1009 : vector<1x8xf32> to vector<1x8xf32>
      %1011 = vector.broadcast %1010 : vector<1x8xf32> to vector<12x8xf32>
      %1012 = vector.extract_strided_slice %1005 {offsets = [2, 0], sizes = [1, 8], strides = [1, 1]} : vector<6x8xf32> to vector<1x8xf32>
      %1013 = vector.shape_cast %1012 : vector<1x8xf32> to vector<1x8xf32>
      %1014 = vector.broadcast %1013 : vector<1x8xf32> to vector<12x8xf32>
      %1015 = vector.extract_strided_slice %1005 {offsets = [3, 0], sizes = [1, 8], strides = [1, 1]} : vector<6x8xf32> to vector<1x8xf32>
      %1016 = vector.shape_cast %1015 : vector<1x8xf32> to vector<1x8xf32>
      %1017 = vector.broadcast %1016 : vector<1x8xf32> to vector<12x8xf32>
      %1018 = vector.extract_strided_slice %1005 {offsets = [4, 0], sizes = [1, 8], strides = [1, 1]} : vector<6x8xf32> to vector<1x8xf32>
      %1019 = vector.shape_cast %1018 : vector<1x8xf32> to vector<1x8xf32>
      %1020 = vector.broadcast %1019 : vector<1x8xf32> to vector<12x8xf32>
      %1021 = vector.extract_strided_slice %1005 {offsets = [5, 0], sizes = [1, 8], strides = [1, 1]} : vector<6x8xf32> to vector<1x8xf32>
      %1022 = vector.shape_cast %1021 : vector<1x8xf32> to vector<1x8xf32>
      %1023 = vector.broadcast %1022 : vector<1x8xf32> to vector<12x8xf32>
      %1024 = vector.extract_strided_slice %3 {offsets = [6, 0, 0], sizes = [1, 12, 8], strides = [1, 1, 1]} : vector<9x12x8xf32> to vector<1x12x8xf32>
      %1025 = vector.shape_cast %1024 : vector<1x12x8xf32> to vector<12x8xf32>
      %1026 = arith.mulf %1008, %1025 : vector<12x8xf32>
      %1027 = arith.addf %995, %1026 : vector<12x8xf32>
      %1028 = arith.mulf %1011, %1025 : vector<12x8xf32>
      %1029 = arith.addf %997, %1028 : vector<12x8xf32>
      %1030 = arith.mulf %1014, %1025 : vector<12x8xf32>
      %1031 = arith.addf %999, %1030 : vector<12x8xf32>
      %1032 = arith.mulf %1017, %1025 : vector<12x8xf32>
      %1033 = arith.addf %1001, %1032 : vector<12x8xf32>
      %1034 = vector.extract_strided_slice %3 {offsets = [7, 0, 0], sizes = [1, 12, 8], strides = [1, 1, 1]} : vector<9x12x8xf32> to vector<1x12x8xf32>
      %1035 = vector.shape_cast %1034 : vector<1x12x8xf32> to vector<12x8xf32>
      %1036 = arith.mulf %1011, %1035 : vector<12x8xf32>
      %1037 = arith.addf %1027, %1036 : vector<12x8xf32>
      %1038 = arith.mulf %1014, %1035 : vector<12x8xf32>
      %1039 = arith.addf %1029, %1038 : vector<12x8xf32>
      %1040 = arith.mulf %1017, %1035 : vector<12x8xf32>
      %1041 = arith.addf %1031, %1040 : vector<12x8xf32>
      %1042 = arith.mulf %1020, %1035 : vector<12x8xf32>
      %1043 = arith.addf %1033, %1042 : vector<12x8xf32>
      %1044 = vector.extract_strided_slice %3 {offsets = [8, 0, 0], sizes = [1, 12, 8], strides = [1, 1, 1]} : vector<9x12x8xf32> to vector<1x12x8xf32>
      %1045 = vector.shape_cast %1044 : vector<1x12x8xf32> to vector<12x8xf32>
      %1046 = arith.mulf %1014, %1045 : vector<12x8xf32>
      %1047 = arith.addf %1037, %1046 : vector<12x8xf32>
      %1048 = arith.mulf %1017, %1045 : vector<12x8xf32>
      %1049 = arith.addf %1039, %1048 : vector<12x8xf32>
      %1050 = arith.mulf %1020, %1045 : vector<12x8xf32>
      %1051 = arith.addf %1041, %1050 : vector<12x8xf32>
      %1052 = arith.mulf %1023, %1045 : vector<12x8xf32>
      %1053 = arith.addf %1043, %1052 : vector<12x8xf32>
      %1054 = arith.addf %1047, %6 : vector<12x8xf32>
      %cst_93 = arith.constant 0.000000e+00 : f32
      %1055 = vector.broadcast %cst_93 : f32 to vector<12x8xf32>
      %1056 = arith.maximumf %1054, %1055 : vector<12x8xf32>
      %1057 = arith.addf %1049, %6 : vector<12x8xf32>
      %cst_94 = arith.constant 0.000000e+00 : f32
      %1058 = vector.broadcast %cst_94 : f32 to vector<12x8xf32>
      %1059 = arith.maximumf %1057, %1058 : vector<12x8xf32>
      %1060 = arith.addf %1051, %6 : vector<12x8xf32>
      %cst_95 = arith.constant 0.000000e+00 : f32
      %1061 = vector.broadcast %cst_95 : f32 to vector<12x8xf32>
      %1062 = arith.maximumf %1060, %1061 : vector<12x8xf32>
      %1063 = arith.addf %1053, %6 : vector<12x8xf32>
      %cst_96 = arith.constant 0.000000e+00 : f32
      %1064 = vector.broadcast %cst_96 : f32 to vector<12x8xf32>
      %1065 = arith.maximumf %1063, %1064 : vector<12x8xf32>
      %1066 = arith.maximumf %891, %1056 : vector<12x8xf32>
      %1067 = arith.maximumf %894, %1059 : vector<12x8xf32>
      %1068 = arith.maximumf %897, %1062 : vector<12x8xf32>
      %1069 = arith.maximumf %900, %1065 : vector<12x8xf32>
      %1070 = arith.maximumf %1066, %1067 : vector<12x8xf32>
      %1071 = arith.maximumf %1068, %1069 : vector<12x8xf32>
      %1072 = arith.index_cast %arg7 : i32 to index
      %c0_97 = arith.constant 0 : index
      %c4_98 = arith.constant 4 : index
      %c0_99 = arith.constant 0 : index
      %c0_100 = arith.constant 0 : index
      %1073 = vector.load %arg5[%1072, %c0_97, %c4_98, %c0_99, %c0_100] : memref<5x2x10x12x1xf32, #tpu.memory_space<vmem>>, vector<1x2x2x12x1xf32>
      %1074 = vector.shape_cast %1073 : vector<1x2x2x12x1xf32> to vector<2x2x12x1xf32>
      %1075 = vector.extract_strided_slice %1074 {offsets = [0, 0, 0, 0], sizes = [1, 1, 12, 1], strides = [1, 1, 1, 1]} : vector<2x2x12x1xf32> to vector<1x1x12x1xf32>
      %1076 = vector.shape_cast %1075 : vector<1x1x12x1xf32> to vector<12x1xf32>
      %1077 = vector.broadcast %1076 : vector<12x1xf32> to vector<12x8xf32>
      %1078 = arith.mulf %1070, %1077 : vector<12x8xf32>
      %1079 = arith.addf %726, %1078 : vector<12x8xf32>
      %1080 = vector.extract_strided_slice %1074 {offsets = [0, 1, 0, 0], sizes = [1, 1, 12, 1], strides = [1, 1, 1, 1]} : vector<2x2x12x1xf32> to vector<1x1x12x1xf32>
      %1081 = vector.shape_cast %1080 : vector<1x1x12x1xf32> to vector<12x1xf32>
      %1082 = vector.broadcast %1081 : vector<12x1xf32> to vector<12x8xf32>
      %1083 = arith.mulf %1071, %1082 : vector<12x8xf32>
      %1084 = arith.addf %1079, %1083 : vector<12x8xf32>
      %1085 = vector.extract_strided_slice %1074 {offsets = [1, 0, 0, 0], sizes = [1, 1, 12, 1], strides = [1, 1, 1, 1]} : vector<2x2x12x1xf32> to vector<1x1x12x1xf32>
      %1086 = vector.shape_cast %1085 : vector<1x1x12x1xf32> to vector<12x1xf32>
      %1087 = vector.broadcast %1086 : vector<12x1xf32> to vector<12x8xf32>
      %1088 = arith.mulf %1070, %1087 : vector<12x8xf32>
      %1089 = arith.addf %736, %1088 : vector<12x8xf32>
      %1090 = vector.extract_strided_slice %1074 {offsets = [1, 1, 0, 0], sizes = [1, 1, 12, 1], strides = [1, 1, 1, 1]} : vector<2x2x12x1xf32> to vector<1x1x12x1xf32>
      %1091 = vector.shape_cast %1090 : vector<1x1x12x1xf32> to vector<12x1xf32>
      %1092 = vector.broadcast %1091 : vector<12x1xf32> to vector<12x8xf32>
      %1093 = arith.mulf %1071, %1092 : vector<12x8xf32>
      %1094 = arith.addf %1089, %1093 : vector<12x8xf32>
      %c0_i32_101 = arith.constant 0 : i32
      %1095 = arith.addi %20, %c0_i32_101 : i32
      %1096 = arith.index_cast %1095 : i32 to index
      %c12 = arith.constant 12 : index
      %c0_102 = arith.constant 0 : index
      %1097 = vector.load %arg2[%1096, %c12, %c0_102] : memref<22x22x8xf32, #tpu.memory_space<vmem>>, vector<1x6x8xf32>
      %1098 = vector.shape_cast %1097 : vector<1x6x8xf32> to vector<6x8xf32>
      %1099 = vector.extract_strided_slice %1098 {offsets = [0, 0], sizes = [1, 8], strides = [1, 1]} : vector<6x8xf32> to vector<1x8xf32>
      %1100 = vector.shape_cast %1099 : vector<1x8xf32> to vector<1x8xf32>
      %1101 = vector.broadcast %1100 : vector<1x8xf32> to vector<12x8xf32>
      %1102 = vector.extract_strided_slice %1098 {offsets = [1, 0], sizes = [1, 8], strides = [1, 1]} : vector<6x8xf32> to vector<1x8xf32>
      %1103 = vector.shape_cast %1102 : vector<1x8xf32> to vector<1x8xf32>
      %1104 = vector.broadcast %1103 : vector<1x8xf32> to vector<12x8xf32>
      %1105 = vector.extract_strided_slice %1098 {offsets = [2, 0], sizes = [1, 8], strides = [1, 1]} : vector<6x8xf32> to vector<1x8xf32>
      %1106 = vector.shape_cast %1105 : vector<1x8xf32> to vector<1x8xf32>
      %1107 = vector.broadcast %1106 : vector<1x8xf32> to vector<12x8xf32>
      %1108 = vector.extract_strided_slice %1098 {offsets = [3, 0], sizes = [1, 8], strides = [1, 1]} : vector<6x8xf32> to vector<1x8xf32>
      %1109 = vector.shape_cast %1108 : vector<1x8xf32> to vector<1x8xf32>
      %1110 = vector.broadcast %1109 : vector<1x8xf32> to vector<12x8xf32>
      %1111 = vector.extract_strided_slice %1098 {offsets = [4, 0], sizes = [1, 8], strides = [1, 1]} : vector<6x8xf32> to vector<1x8xf32>
      %1112 = vector.shape_cast %1111 : vector<1x8xf32> to vector<1x8xf32>
      %1113 = vector.broadcast %1112 : vector<1x8xf32> to vector<12x8xf32>
      %1114 = vector.extract_strided_slice %1098 {offsets = [5, 0], sizes = [1, 8], strides = [1, 1]} : vector<6x8xf32> to vector<1x8xf32>
      %1115 = vector.shape_cast %1114 : vector<1x8xf32> to vector<1x8xf32>
      %1116 = vector.broadcast %1115 : vector<1x8xf32> to vector<12x8xf32>
      %1117 = vector.extract_strided_slice %3 {offsets = [0, 0, 0], sizes = [1, 12, 8], strides = [1, 1, 1]} : vector<9x12x8xf32> to vector<1x12x8xf32>
      %1118 = vector.shape_cast %1117 : vector<1x12x8xf32> to vector<12x8xf32>
      %1119 = arith.mulf %1101, %1118 : vector<12x8xf32>
      %1120 = arith.mulf %1104, %1118 : vector<12x8xf32>
      %1121 = arith.mulf %1107, %1118 : vector<12x8xf32>
      %1122 = arith.mulf %1110, %1118 : vector<12x8xf32>
      %1123 = vector.extract_strided_slice %3 {offsets = [1, 0, 0], sizes = [1, 12, 8], strides = [1, 1, 1]} : vector<9x12x8xf32> to vector<1x12x8xf32>
      %1124 = vector.shape_cast %1123 : vector<1x12x8xf32> to vector<12x8xf32>
      %1125 = arith.mulf %1104, %1124 : vector<12x8xf32>
      %1126 = arith.addf %1119, %1125 : vector<12x8xf32>
      %1127 = arith.mulf %1107, %1124 : vector<12x8xf32>
      %1128 = arith.addf %1120, %1127 : vector<12x8xf32>
      %1129 = arith.mulf %1110, %1124 : vector<12x8xf32>
      %1130 = arith.addf %1121, %1129 : vector<12x8xf32>
      %1131 = arith.mulf %1113, %1124 : vector<12x8xf32>
      %1132 = arith.addf %1122, %1131 : vector<12x8xf32>
      %1133 = vector.extract_strided_slice %3 {offsets = [2, 0, 0], sizes = [1, 12, 8], strides = [1, 1, 1]} : vector<9x12x8xf32> to vector<1x12x8xf32>
      %1134 = vector.shape_cast %1133 : vector<1x12x8xf32> to vector<12x8xf32>
      %1135 = arith.mulf %1107, %1134 : vector<12x8xf32>
      %1136 = arith.addf %1126, %1135 : vector<12x8xf32>
      %1137 = arith.mulf %1110, %1134 : vector<12x8xf32>
      %1138 = arith.addf %1128, %1137 : vector<12x8xf32>
      %1139 = arith.mulf %1113, %1134 : vector<12x8xf32>
      %1140 = arith.addf %1130, %1139 : vector<12x8xf32>
      %1141 = arith.mulf %1116, %1134 : vector<12x8xf32>
      %1142 = arith.addf %1132, %1141 : vector<12x8xf32>
      %c1_i32_103 = arith.constant 1 : i32
      %1143 = arith.addi %20, %c1_i32_103 : i32
      %1144 = arith.index_cast %1143 : i32 to index
      %c12_104 = arith.constant 12 : index
      %c0_105 = arith.constant 0 : index
      %1145 = vector.load %arg2[%1144, %c12_104, %c0_105] : memref<22x22x8xf32, #tpu.memory_space<vmem>>, vector<1x6x8xf32>
      %1146 = vector.shape_cast %1145 : vector<1x6x8xf32> to vector<6x8xf32>
      %1147 = vector.extract_strided_slice %1146 {offsets = [0, 0], sizes = [1, 8], strides = [1, 1]} : vector<6x8xf32> to vector<1x8xf32>
      %1148 = vector.shape_cast %1147 : vector<1x8xf32> to vector<1x8xf32>
      %1149 = vector.broadcast %1148 : vector<1x8xf32> to vector<12x8xf32>
      %1150 = vector.extract_strided_slice %1146 {offsets = [1, 0], sizes = [1, 8], strides = [1, 1]} : vector<6x8xf32> to vector<1x8xf32>
      %1151 = vector.shape_cast %1150 : vector<1x8xf32> to vector<1x8xf32>
      %1152 = vector.broadcast %1151 : vector<1x8xf32> to vector<12x8xf32>
      %1153 = vector.extract_strided_slice %1146 {offsets = [2, 0], sizes = [1, 8], strides = [1, 1]} : vector<6x8xf32> to vector<1x8xf32>
      %1154 = vector.shape_cast %1153 : vector<1x8xf32> to vector<1x8xf32>
      %1155 = vector.broadcast %1154 : vector<1x8xf32> to vector<12x8xf32>
      %1156 = vector.extract_strided_slice %1146 {offsets = [3, 0], sizes = [1, 8], strides = [1, 1]} : vector<6x8xf32> to vector<1x8xf32>
      %1157 = vector.shape_cast %1156 : vector<1x8xf32> to vector<1x8xf32>
      %1158 = vector.broadcast %1157 : vector<1x8xf32> to vector<12x8xf32>
      %1159 = vector.extract_strided_slice %1146 {offsets = [4, 0], sizes = [1, 8], strides = [1, 1]} : vector<6x8xf32> to vector<1x8xf32>
      %1160 = vector.shape_cast %1159 : vector<1x8xf32> to vector<1x8xf32>
      %1161 = vector.broadcast %1160 : vector<1x8xf32> to vector<12x8xf32>
      %1162 = vector.extract_strided_slice %1146 {offsets = [5, 0], sizes = [1, 8], strides = [1, 1]} : vector<6x8xf32> to vector<1x8xf32>
      %1163 = vector.shape_cast %1162 : vector<1x8xf32> to vector<1x8xf32>
      %1164 = vector.broadcast %1163 : vector<1x8xf32> to vector<12x8xf32>
      %1165 = vector.extract_strided_slice %3 {offsets = [3, 0, 0], sizes = [1, 12, 8], strides = [1, 1, 1]} : vector<9x12x8xf32> to vector<1x12x8xf32>
      %1166 = vector.shape_cast %1165 : vector<1x12x8xf32> to vector<12x8xf32>
      %1167 = arith.mulf %1149, %1166 : vector<12x8xf32>
      %1168 = arith.addf %1136, %1167 : vector<12x8xf32>
      %1169 = arith.mulf %1152, %1166 : vector<12x8xf32>
      %1170 = arith.addf %1138, %1169 : vector<12x8xf32>
      %1171 = arith.mulf %1155, %1166 : vector<12x8xf32>
      %1172 = arith.addf %1140, %1171 : vector<12x8xf32>
      %1173 = arith.mulf %1158, %1166 : vector<12x8xf32>
      %1174 = arith.addf %1142, %1173 : vector<12x8xf32>
      %1175 = vector.extract_strided_slice %3 {offsets = [4, 0, 0], sizes = [1, 12, 8], strides = [1, 1, 1]} : vector<9x12x8xf32> to vector<1x12x8xf32>
      %1176 = vector.shape_cast %1175 : vector<1x12x8xf32> to vector<12x8xf32>
      %1177 = arith.mulf %1152, %1176 : vector<12x8xf32>
      %1178 = arith.addf %1168, %1177 : vector<12x8xf32>
      %1179 = arith.mulf %1155, %1176 : vector<12x8xf32>
      %1180 = arith.addf %1170, %1179 : vector<12x8xf32>
      %1181 = arith.mulf %1158, %1176 : vector<12x8xf32>
      %1182 = arith.addf %1172, %1181 : vector<12x8xf32>
      %1183 = arith.mulf %1161, %1176 : vector<12x8xf32>
      %1184 = arith.addf %1174, %1183 : vector<12x8xf32>
      %1185 = vector.extract_strided_slice %3 {offsets = [5, 0, 0], sizes = [1, 12, 8], strides = [1, 1, 1]} : vector<9x12x8xf32> to vector<1x12x8xf32>
      %1186 = vector.shape_cast %1185 : vector<1x12x8xf32> to vector<12x8xf32>
      %1187 = arith.mulf %1155, %1186 : vector<12x8xf32>
      %1188 = arith.addf %1178, %1187 : vector<12x8xf32>
      %1189 = arith.mulf %1158, %1186 : vector<12x8xf32>
      %1190 = arith.addf %1180, %1189 : vector<12x8xf32>
      %1191 = arith.mulf %1161, %1186 : vector<12x8xf32>
      %1192 = arith.addf %1182, %1191 : vector<12x8xf32>
      %1193 = arith.mulf %1164, %1186 : vector<12x8xf32>
      %1194 = arith.addf %1184, %1193 : vector<12x8xf32>
      %c2_i32_106 = arith.constant 2 : i32
      %1195 = arith.addi %20, %c2_i32_106 : i32
      %1196 = arith.index_cast %1195 : i32 to index
      %c12_107 = arith.constant 12 : index
      %c0_108 = arith.constant 0 : index
      %1197 = vector.load %arg2[%1196, %c12_107, %c0_108] : memref<22x22x8xf32, #tpu.memory_space<vmem>>, vector<1x6x8xf32>
      %1198 = vector.shape_cast %1197 : vector<1x6x8xf32> to vector<6x8xf32>
      %1199 = vector.extract_strided_slice %1198 {offsets = [0, 0], sizes = [1, 8], strides = [1, 1]} : vector<6x8xf32> to vector<1x8xf32>
      %1200 = vector.shape_cast %1199 : vector<1x8xf32> to vector<1x8xf32>
      %1201 = vector.broadcast %1200 : vector<1x8xf32> to vector<12x8xf32>
      %1202 = vector.extract_strided_slice %1198 {offsets = [1, 0], sizes = [1, 8], strides = [1, 1]} : vector<6x8xf32> to vector<1x8xf32>
      %1203 = vector.shape_cast %1202 : vector<1x8xf32> to vector<1x8xf32>
      %1204 = vector.broadcast %1203 : vector<1x8xf32> to vector<12x8xf32>
      %1205 = vector.extract_strided_slice %1198 {offsets = [2, 0], sizes = [1, 8], strides = [1, 1]} : vector<6x8xf32> to vector<1x8xf32>
      %1206 = vector.shape_cast %1205 : vector<1x8xf32> to vector<1x8xf32>
      %1207 = vector.broadcast %1206 : vector<1x8xf32> to vector<12x8xf32>
      %1208 = vector.extract_strided_slice %1198 {offsets = [3, 0], sizes = [1, 8], strides = [1, 1]} : vector<6x8xf32> to vector<1x8xf32>
      %1209 = vector.shape_cast %1208 : vector<1x8xf32> to vector<1x8xf32>
      %1210 = vector.broadcast %1209 : vector<1x8xf32> to vector<12x8xf32>
      %1211 = vector.extract_strided_slice %1198 {offsets = [4, 0], sizes = [1, 8], strides = [1, 1]} : vector<6x8xf32> to vector<1x8xf32>
      %1212 = vector.shape_cast %1211 : vector<1x8xf32> to vector<1x8xf32>
      %1213 = vector.broadcast %1212 : vector<1x8xf32> to vector<12x8xf32>
      %1214 = vector.extract_strided_slice %1198 {offsets = [5, 0], sizes = [1, 8], strides = [1, 1]} : vector<6x8xf32> to vector<1x8xf32>
      %1215 = vector.shape_cast %1214 : vector<1x8xf32> to vector<1x8xf32>
      %1216 = vector.broadcast %1215 : vector<1x8xf32> to vector<12x8xf32>
      %1217 = vector.extract_strided_slice %3 {offsets = [6, 0, 0], sizes = [1, 12, 8], strides = [1, 1, 1]} : vector<9x12x8xf32> to vector<1x12x8xf32>
      %1218 = vector.shape_cast %1217 : vector<1x12x8xf32> to vector<12x8xf32>
      %1219 = arith.mulf %1201, %1218 : vector<12x8xf32>
      %1220 = arith.addf %1188, %1219 : vector<12x8xf32>
      %1221 = arith.mulf %1204, %1218 : vector<12x8xf32>
      %1222 = arith.addf %1190, %1221 : vector<12x8xf32>
      %1223 = arith.mulf %1207, %1218 : vector<12x8xf32>
      %1224 = arith.addf %1192, %1223 : vector<12x8xf32>
      %1225 = arith.mulf %1210, %1218 : vector<12x8xf32>
      %1226 = arith.addf %1194, %1225 : vector<12x8xf32>
      %1227 = vector.extract_strided_slice %3 {offsets = [7, 0, 0], sizes = [1, 12, 8], strides = [1, 1, 1]} : vector<9x12x8xf32> to vector<1x12x8xf32>
      %1228 = vector.shape_cast %1227 : vector<1x12x8xf32> to vector<12x8xf32>
      %1229 = arith.mulf %1204, %1228 : vector<12x8xf32>
      %1230 = arith.addf %1220, %1229 : vector<12x8xf32>
      %1231 = arith.mulf %1207, %1228 : vector<12x8xf32>
      %1232 = arith.addf %1222, %1231 : vector<12x8xf32>
      %1233 = arith.mulf %1210, %1228 : vector<12x8xf32>
      %1234 = arith.addf %1224, %1233 : vector<12x8xf32>
      %1235 = arith.mulf %1213, %1228 : vector<12x8xf32>
      %1236 = arith.addf %1226, %1235 : vector<12x8xf32>
      %1237 = vector.extract_strided_slice %3 {offsets = [8, 0, 0], sizes = [1, 12, 8], strides = [1, 1, 1]} : vector<9x12x8xf32> to vector<1x12x8xf32>
      %1238 = vector.shape_cast %1237 : vector<1x12x8xf32> to vector<12x8xf32>
      %1239 = arith.mulf %1207, %1238 : vector<12x8xf32>
      %1240 = arith.addf %1230, %1239 : vector<12x8xf32>
      %1241 = arith.mulf %1210, %1238 : vector<12x8xf32>
      %1242 = arith.addf %1232, %1241 : vector<12x8xf32>
      %1243 = arith.mulf %1213, %1238 : vector<12x8xf32>
      %1244 = arith.addf %1234, %1243 : vector<12x8xf32>
      %1245 = arith.mulf %1216, %1238 : vector<12x8xf32>
      %1246 = arith.addf %1236, %1245 : vector<12x8xf32>
      %1247 = arith.addf %1240, %6 : vector<12x8xf32>
      %cst_109 = arith.constant 0.000000e+00 : f32
      %1248 = vector.broadcast %cst_109 : f32 to vector<12x8xf32>
      %1249 = arith.maximumf %1247, %1248 : vector<12x8xf32>
      %1250 = arith.addf %1242, %6 : vector<12x8xf32>
      %cst_110 = arith.constant 0.000000e+00 : f32
      %1251 = vector.broadcast %cst_110 : f32 to vector<12x8xf32>
      %1252 = arith.maximumf %1250, %1251 : vector<12x8xf32>
      %1253 = arith.addf %1244, %6 : vector<12x8xf32>
      %cst_111 = arith.constant 0.000000e+00 : f32
      %1254 = vector.broadcast %cst_111 : f32 to vector<12x8xf32>
      %1255 = arith.maximumf %1253, %1254 : vector<12x8xf32>
      %1256 = arith.addf %1246, %6 : vector<12x8xf32>
      %cst_112 = arith.constant 0.000000e+00 : f32
      %1257 = vector.broadcast %cst_112 : f32 to vector<12x8xf32>
      %1258 = arith.maximumf %1256, %1257 : vector<12x8xf32>
      %c1_i32_113 = arith.constant 1 : i32
      %1259 = arith.addi %20, %c1_i32_113 : i32
      %c0_i32_114 = arith.constant 0 : i32
      %1260 = arith.addi %1259, %c0_i32_114 : i32
      %1261 = arith.index_cast %1260 : i32 to index
      %c12_115 = arith.constant 12 : index
      %c0_116 = arith.constant 0 : index
      %1262 = vector.load %arg2[%1261, %c12_115, %c0_116] : memref<22x22x8xf32, #tpu.memory_space<vmem>>, vector<1x6x8xf32>
      %1263 = vector.shape_cast %1262 : vector<1x6x8xf32> to vector<6x8xf32>
      %1264 = vector.extract_strided_slice %1263 {offsets = [0, 0], sizes = [1, 8], strides = [1, 1]} : vector<6x8xf32> to vector<1x8xf32>
      %1265 = vector.shape_cast %1264 : vector<1x8xf32> to vector<1x8xf32>
      %1266 = vector.broadcast %1265 : vector<1x8xf32> to vector<12x8xf32>
      %1267 = vector.extract_strided_slice %1263 {offsets = [1, 0], sizes = [1, 8], strides = [1, 1]} : vector<6x8xf32> to vector<1x8xf32>
      %1268 = vector.shape_cast %1267 : vector<1x8xf32> to vector<1x8xf32>
      %1269 = vector.broadcast %1268 : vector<1x8xf32> to vector<12x8xf32>
      %1270 = vector.extract_strided_slice %1263 {offsets = [2, 0], sizes = [1, 8], strides = [1, 1]} : vector<6x8xf32> to vector<1x8xf32>
      %1271 = vector.shape_cast %1270 : vector<1x8xf32> to vector<1x8xf32>
      %1272 = vector.broadcast %1271 : vector<1x8xf32> to vector<12x8xf32>
      %1273 = vector.extract_strided_slice %1263 {offsets = [3, 0], sizes = [1, 8], strides = [1, 1]} : vector<6x8xf32> to vector<1x8xf32>
      %1274 = vector.shape_cast %1273 : vector<1x8xf32> to vector<1x8xf32>
      %1275 = vector.broadcast %1274 : vector<1x8xf32> to vector<12x8xf32>
      %1276 = vector.extract_strided_slice %1263 {offsets = [4, 0], sizes = [1, 8], strides = [1, 1]} : vector<6x8xf32> to vector<1x8xf32>
      %1277 = vector.shape_cast %1276 : vector<1x8xf32> to vector<1x8xf32>
      %1278 = vector.broadcast %1277 : vector<1x8xf32> to vector<12x8xf32>
      %1279 = vector.extract_strided_slice %1263 {offsets = [5, 0], sizes = [1, 8], strides = [1, 1]} : vector<6x8xf32> to vector<1x8xf32>
      %1280 = vector.shape_cast %1279 : vector<1x8xf32> to vector<1x8xf32>
      %1281 = vector.broadcast %1280 : vector<1x8xf32> to vector<12x8xf32>
      %1282 = vector.extract_strided_slice %3 {offsets = [0, 0, 0], sizes = [1, 12, 8], strides = [1, 1, 1]} : vector<9x12x8xf32> to vector<1x12x8xf32>
      %1283 = vector.shape_cast %1282 : vector<1x12x8xf32> to vector<12x8xf32>
      %1284 = arith.mulf %1266, %1283 : vector<12x8xf32>
      %1285 = arith.mulf %1269, %1283 : vector<12x8xf32>
      %1286 = arith.mulf %1272, %1283 : vector<12x8xf32>
      %1287 = arith.mulf %1275, %1283 : vector<12x8xf32>
      %1288 = vector.extract_strided_slice %3 {offsets = [1, 0, 0], sizes = [1, 12, 8], strides = [1, 1, 1]} : vector<9x12x8xf32> to vector<1x12x8xf32>
      %1289 = vector.shape_cast %1288 : vector<1x12x8xf32> to vector<12x8xf32>
      %1290 = arith.mulf %1269, %1289 : vector<12x8xf32>
      %1291 = arith.addf %1284, %1290 : vector<12x8xf32>
      %1292 = arith.mulf %1272, %1289 : vector<12x8xf32>
      %1293 = arith.addf %1285, %1292 : vector<12x8xf32>
      %1294 = arith.mulf %1275, %1289 : vector<12x8xf32>
      %1295 = arith.addf %1286, %1294 : vector<12x8xf32>
      %1296 = arith.mulf %1278, %1289 : vector<12x8xf32>
      %1297 = arith.addf %1287, %1296 : vector<12x8xf32>
      %1298 = vector.extract_strided_slice %3 {offsets = [2, 0, 0], sizes = [1, 12, 8], strides = [1, 1, 1]} : vector<9x12x8xf32> to vector<1x12x8xf32>
      %1299 = vector.shape_cast %1298 : vector<1x12x8xf32> to vector<12x8xf32>
      %1300 = arith.mulf %1272, %1299 : vector<12x8xf32>
      %1301 = arith.addf %1291, %1300 : vector<12x8xf32>
      %1302 = arith.mulf %1275, %1299 : vector<12x8xf32>
      %1303 = arith.addf %1293, %1302 : vector<12x8xf32>
      %1304 = arith.mulf %1278, %1299 : vector<12x8xf32>
      %1305 = arith.addf %1295, %1304 : vector<12x8xf32>
      %1306 = arith.mulf %1281, %1299 : vector<12x8xf32>
      %1307 = arith.addf %1297, %1306 : vector<12x8xf32>
      %c1_i32_117 = arith.constant 1 : i32
      %1308 = arith.addi %1259, %c1_i32_117 : i32
      %1309 = arith.index_cast %1308 : i32 to index
      %c12_118 = arith.constant 12 : index
      %c0_119 = arith.constant 0 : index
      %1310 = vector.load %arg2[%1309, %c12_118, %c0_119] : memref<22x22x8xf32, #tpu.memory_space<vmem>>, vector<1x6x8xf32>
      %1311 = vector.shape_cast %1310 : vector<1x6x8xf32> to vector<6x8xf32>
      %1312 = vector.extract_strided_slice %1311 {offsets = [0, 0], sizes = [1, 8], strides = [1, 1]} : vector<6x8xf32> to vector<1x8xf32>
      %1313 = vector.shape_cast %1312 : vector<1x8xf32> to vector<1x8xf32>
      %1314 = vector.broadcast %1313 : vector<1x8xf32> to vector<12x8xf32>
      %1315 = vector.extract_strided_slice %1311 {offsets = [1, 0], sizes = [1, 8], strides = [1, 1]} : vector<6x8xf32> to vector<1x8xf32>
      %1316 = vector.shape_cast %1315 : vector<1x8xf32> to vector<1x8xf32>
      %1317 = vector.broadcast %1316 : vector<1x8xf32> to vector<12x8xf32>
      %1318 = vector.extract_strided_slice %1311 {offsets = [2, 0], sizes = [1, 8], strides = [1, 1]} : vector<6x8xf32> to vector<1x8xf32>
      %1319 = vector.shape_cast %1318 : vector<1x8xf32> to vector<1x8xf32>
      %1320 = vector.broadcast %1319 : vector<1x8xf32> to vector<12x8xf32>
      %1321 = vector.extract_strided_slice %1311 {offsets = [3, 0], sizes = [1, 8], strides = [1, 1]} : vector<6x8xf32> to vector<1x8xf32>
      %1322 = vector.shape_cast %1321 : vector<1x8xf32> to vector<1x8xf32>
      %1323 = vector.broadcast %1322 : vector<1x8xf32> to vector<12x8xf32>
      %1324 = vector.extract_strided_slice %1311 {offsets = [4, 0], sizes = [1, 8], strides = [1, 1]} : vector<6x8xf32> to vector<1x8xf32>
      %1325 = vector.shape_cast %1324 : vector<1x8xf32> to vector<1x8xf32>
      %1326 = vector.broadcast %1325 : vector<1x8xf32> to vector<12x8xf32>
      %1327 = vector.extract_strided_slice %1311 {offsets = [5, 0], sizes = [1, 8], strides = [1, 1]} : vector<6x8xf32> to vector<1x8xf32>
      %1328 = vector.shape_cast %1327 : vector<1x8xf32> to vector<1x8xf32>
      %1329 = vector.broadcast %1328 : vector<1x8xf32> to vector<12x8xf32>
      %1330 = vector.extract_strided_slice %3 {offsets = [3, 0, 0], sizes = [1, 12, 8], strides = [1, 1, 1]} : vector<9x12x8xf32> to vector<1x12x8xf32>
      %1331 = vector.shape_cast %1330 : vector<1x12x8xf32> to vector<12x8xf32>
      %1332 = arith.mulf %1314, %1331 : vector<12x8xf32>
      %1333 = arith.addf %1301, %1332 : vector<12x8xf32>
      %1334 = arith.mulf %1317, %1331 : vector<12x8xf32>
      %1335 = arith.addf %1303, %1334 : vector<12x8xf32>
      %1336 = arith.mulf %1320, %1331 : vector<12x8xf32>
      %1337 = arith.addf %1305, %1336 : vector<12x8xf32>
      %1338 = arith.mulf %1323, %1331 : vector<12x8xf32>
      %1339 = arith.addf %1307, %1338 : vector<12x8xf32>
      %1340 = vector.extract_strided_slice %3 {offsets = [4, 0, 0], sizes = [1, 12, 8], strides = [1, 1, 1]} : vector<9x12x8xf32> to vector<1x12x8xf32>
      %1341 = vector.shape_cast %1340 : vector<1x12x8xf32> to vector<12x8xf32>
      %1342 = arith.mulf %1317, %1341 : vector<12x8xf32>
      %1343 = arith.addf %1333, %1342 : vector<12x8xf32>
      %1344 = arith.mulf %1320, %1341 : vector<12x8xf32>
      %1345 = arith.addf %1335, %1344 : vector<12x8xf32>
      %1346 = arith.mulf %1323, %1341 : vector<12x8xf32>
      %1347 = arith.addf %1337, %1346 : vector<12x8xf32>
      %1348 = arith.mulf %1326, %1341 : vector<12x8xf32>
      %1349 = arith.addf %1339, %1348 : vector<12x8xf32>
      %1350 = vector.extract_strided_slice %3 {offsets = [5, 0, 0], sizes = [1, 12, 8], strides = [1, 1, 1]} : vector<9x12x8xf32> to vector<1x12x8xf32>
      %1351 = vector.shape_cast %1350 : vector<1x12x8xf32> to vector<12x8xf32>
      %1352 = arith.mulf %1320, %1351 : vector<12x8xf32>
      %1353 = arith.addf %1343, %1352 : vector<12x8xf32>
      %1354 = arith.mulf %1323, %1351 : vector<12x8xf32>
      %1355 = arith.addf %1345, %1354 : vector<12x8xf32>
      %1356 = arith.mulf %1326, %1351 : vector<12x8xf32>
      %1357 = arith.addf %1347, %1356 : vector<12x8xf32>
      %1358 = arith.mulf %1329, %1351 : vector<12x8xf32>
      %1359 = arith.addf %1349, %1358 : vector<12x8xf32>
      %c2_i32_120 = arith.constant 2 : i32
      %1360 = arith.addi %1259, %c2_i32_120 : i32
      %1361 = arith.index_cast %1360 : i32 to index
      %c12_121 = arith.constant 12 : index
      %c0_122 = arith.constant 0 : index
      %1362 = vector.load %arg2[%1361, %c12_121, %c0_122] : memref<22x22x8xf32, #tpu.memory_space<vmem>>, vector<1x6x8xf32>
      %1363 = vector.shape_cast %1362 : vector<1x6x8xf32> to vector<6x8xf32>
      %1364 = vector.extract_strided_slice %1363 {offsets = [0, 0], sizes = [1, 8], strides = [1, 1]} : vector<6x8xf32> to vector<1x8xf32>
      %1365 = vector.shape_cast %1364 : vector<1x8xf32> to vector<1x8xf32>
      %1366 = vector.broadcast %1365 : vector<1x8xf32> to vector<12x8xf32>
      %1367 = vector.extract_strided_slice %1363 {offsets = [1, 0], sizes = [1, 8], strides = [1, 1]} : vector<6x8xf32> to vector<1x8xf32>
      %1368 = vector.shape_cast %1367 : vector<1x8xf32> to vector<1x8xf32>
      %1369 = vector.broadcast %1368 : vector<1x8xf32> to vector<12x8xf32>
      %1370 = vector.extract_strided_slice %1363 {offsets = [2, 0], sizes = [1, 8], strides = [1, 1]} : vector<6x8xf32> to vector<1x8xf32>
      %1371 = vector.shape_cast %1370 : vector<1x8xf32> to vector<1x8xf32>
      %1372 = vector.broadcast %1371 : vector<1x8xf32> to vector<12x8xf32>
      %1373 = vector.extract_strided_slice %1363 {offsets = [3, 0], sizes = [1, 8], strides = [1, 1]} : vector<6x8xf32> to vector<1x8xf32>
      %1374 = vector.shape_cast %1373 : vector<1x8xf32> to vector<1x8xf32>
      %1375 = vector.broadcast %1374 : vector<1x8xf32> to vector<12x8xf32>
      %1376 = vector.extract_strided_slice %1363 {offsets = [4, 0], sizes = [1, 8], strides = [1, 1]} : vector<6x8xf32> to vector<1x8xf32>
      %1377 = vector.shape_cast %1376 : vector<1x8xf32> to vector<1x8xf32>
      %1378 = vector.broadcast %1377 : vector<1x8xf32> to vector<12x8xf32>
      %1379 = vector.extract_strided_slice %1363 {offsets = [5, 0], sizes = [1, 8], strides = [1, 1]} : vector<6x8xf32> to vector<1x8xf32>
      %1380 = vector.shape_cast %1379 : vector<1x8xf32> to vector<1x8xf32>
      %1381 = vector.broadcast %1380 : vector<1x8xf32> to vector<12x8xf32>
      %1382 = vector.extract_strided_slice %3 {offsets = [6, 0, 0], sizes = [1, 12, 8], strides = [1, 1, 1]} : vector<9x12x8xf32> to vector<1x12x8xf32>
      %1383 = vector.shape_cast %1382 : vector<1x12x8xf32> to vector<12x8xf32>
      %1384 = arith.mulf %1366, %1383 : vector<12x8xf32>
      %1385 = arith.addf %1353, %1384 : vector<12x8xf32>
      %1386 = arith.mulf %1369, %1383 : vector<12x8xf32>
      %1387 = arith.addf %1355, %1386 : vector<12x8xf32>
      %1388 = arith.mulf %1372, %1383 : vector<12x8xf32>
      %1389 = arith.addf %1357, %1388 : vector<12x8xf32>
      %1390 = arith.mulf %1375, %1383 : vector<12x8xf32>
      %1391 = arith.addf %1359, %1390 : vector<12x8xf32>
      %1392 = vector.extract_strided_slice %3 {offsets = [7, 0, 0], sizes = [1, 12, 8], strides = [1, 1, 1]} : vector<9x12x8xf32> to vector<1x12x8xf32>
      %1393 = vector.shape_cast %1392 : vector<1x12x8xf32> to vector<12x8xf32>
      %1394 = arith.mulf %1369, %1393 : vector<12x8xf32>
      %1395 = arith.addf %1385, %1394 : vector<12x8xf32>
      %1396 = arith.mulf %1372, %1393 : vector<12x8xf32>
      %1397 = arith.addf %1387, %1396 : vector<12x8xf32>
      %1398 = arith.mulf %1375, %1393 : vector<12x8xf32>
      %1399 = arith.addf %1389, %1398 : vector<12x8xf32>
      %1400 = arith.mulf %1378, %1393 : vector<12x8xf32>
      %1401 = arith.addf %1391, %1400 : vector<12x8xf32>
      %1402 = vector.extract_strided_slice %3 {offsets = [8, 0, 0], sizes = [1, 12, 8], strides = [1, 1, 1]} : vector<9x12x8xf32> to vector<1x12x8xf32>
      %1403 = vector.shape_cast %1402 : vector<1x12x8xf32> to vector<12x8xf32>
      %1404 = arith.mulf %1372, %1403 : vector<12x8xf32>
      %1405 = arith.addf %1395, %1404 : vector<12x8xf32>
      %1406 = arith.mulf %1375, %1403 : vector<12x8xf32>
      %1407 = arith.addf %1397, %1406 : vector<12x8xf32>
      %1408 = arith.mulf %1378, %1403 : vector<12x8xf32>
      %1409 = arith.addf %1399, %1408 : vector<12x8xf32>
      %1410 = arith.mulf %1381, %1403 : vector<12x8xf32>
      %1411 = arith.addf %1401, %1410 : vector<12x8xf32>
      %1412 = arith.addf %1405, %6 : vector<12x8xf32>
      %cst_123 = arith.constant 0.000000e+00 : f32
      %1413 = vector.broadcast %cst_123 : f32 to vector<12x8xf32>
      %1414 = arith.maximumf %1412, %1413 : vector<12x8xf32>
      %1415 = arith.addf %1407, %6 : vector<12x8xf32>
      %cst_124 = arith.constant 0.000000e+00 : f32
      %1416 = vector.broadcast %cst_124 : f32 to vector<12x8xf32>
      %1417 = arith.maximumf %1415, %1416 : vector<12x8xf32>
      %1418 = arith.addf %1409, %6 : vector<12x8xf32>
      %cst_125 = arith.constant 0.000000e+00 : f32
      %1419 = vector.broadcast %cst_125 : f32 to vector<12x8xf32>
      %1420 = arith.maximumf %1418, %1419 : vector<12x8xf32>
      %1421 = arith.addf %1411, %6 : vector<12x8xf32>
      %cst_126 = arith.constant 0.000000e+00 : f32
      %1422 = vector.broadcast %cst_126 : f32 to vector<12x8xf32>
      %1423 = arith.maximumf %1421, %1422 : vector<12x8xf32>
      %1424 = arith.maximumf %1249, %1414 : vector<12x8xf32>
      %1425 = arith.maximumf %1252, %1417 : vector<12x8xf32>
      %1426 = arith.maximumf %1255, %1420 : vector<12x8xf32>
      %1427 = arith.maximumf %1258, %1423 : vector<12x8xf32>
      %1428 = arith.maximumf %1424, %1425 : vector<12x8xf32>
      %1429 = arith.maximumf %1426, %1427 : vector<12x8xf32>
      %1430 = arith.index_cast %arg7 : i32 to index
      %c0_127 = arith.constant 0 : index
      %c6 = arith.constant 6 : index
      %c0_128 = arith.constant 0 : index
      %c0_129 = arith.constant 0 : index
      %1431 = vector.load %arg5[%1430, %c0_127, %c6, %c0_128, %c0_129] : memref<5x2x10x12x1xf32, #tpu.memory_space<vmem>>, vector<1x2x2x12x1xf32>
      %1432 = vector.shape_cast %1431 : vector<1x2x2x12x1xf32> to vector<2x2x12x1xf32>
      %1433 = vector.extract_strided_slice %1432 {offsets = [0, 0, 0, 0], sizes = [1, 1, 12, 1], strides = [1, 1, 1, 1]} : vector<2x2x12x1xf32> to vector<1x1x12x1xf32>
      %1434 = vector.shape_cast %1433 : vector<1x1x12x1xf32> to vector<12x1xf32>
      %1435 = vector.broadcast %1434 : vector<12x1xf32> to vector<12x8xf32>
      %1436 = arith.mulf %1428, %1435 : vector<12x8xf32>
      %1437 = arith.addf %1084, %1436 : vector<12x8xf32>
      %1438 = vector.extract_strided_slice %1432 {offsets = [0, 1, 0, 0], sizes = [1, 1, 12, 1], strides = [1, 1, 1, 1]} : vector<2x2x12x1xf32> to vector<1x1x12x1xf32>
      %1439 = vector.shape_cast %1438 : vector<1x1x12x1xf32> to vector<12x1xf32>
      %1440 = vector.broadcast %1439 : vector<12x1xf32> to vector<12x8xf32>
      %1441 = arith.mulf %1429, %1440 : vector<12x8xf32>
      %1442 = arith.addf %1437, %1441 : vector<12x8xf32>
      %1443 = vector.extract_strided_slice %1432 {offsets = [1, 0, 0, 0], sizes = [1, 1, 12, 1], strides = [1, 1, 1, 1]} : vector<2x2x12x1xf32> to vector<1x1x12x1xf32>
      %1444 = vector.shape_cast %1443 : vector<1x1x12x1xf32> to vector<12x1xf32>
      %1445 = vector.broadcast %1444 : vector<12x1xf32> to vector<12x8xf32>
      %1446 = arith.mulf %1428, %1445 : vector<12x8xf32>
      %1447 = arith.addf %1094, %1446 : vector<12x8xf32>
      %1448 = vector.extract_strided_slice %1432 {offsets = [1, 1, 0, 0], sizes = [1, 1, 12, 1], strides = [1, 1, 1, 1]} : vector<2x2x12x1xf32> to vector<1x1x12x1xf32>
      %1449 = vector.shape_cast %1448 : vector<1x1x12x1xf32> to vector<12x1xf32>
      %1450 = vector.broadcast %1449 : vector<12x1xf32> to vector<12x8xf32>
      %1451 = arith.mulf %1429, %1450 : vector<12x8xf32>
      %1452 = arith.addf %1447, %1451 : vector<12x8xf32>
      %c0_i32_130 = arith.constant 0 : i32
      %1453 = arith.addi %20, %c0_i32_130 : i32
      %1454 = arith.index_cast %1453 : i32 to index
      %c16 = arith.constant 16 : index
      %c0_131 = arith.constant 0 : index
      %1455 = vector.load %arg2[%1454, %c16, %c0_131] : memref<22x22x8xf32, #tpu.memory_space<vmem>>, vector<1x6x8xf32>
      %1456 = vector.shape_cast %1455 : vector<1x6x8xf32> to vector<6x8xf32>
      %1457 = vector.extract_strided_slice %1456 {offsets = [0, 0], sizes = [1, 8], strides = [1, 1]} : vector<6x8xf32> to vector<1x8xf32>
      %1458 = vector.shape_cast %1457 : vector<1x8xf32> to vector<1x8xf32>
      %1459 = vector.broadcast %1458 : vector<1x8xf32> to vector<12x8xf32>
      %1460 = vector.extract_strided_slice %1456 {offsets = [1, 0], sizes = [1, 8], strides = [1, 1]} : vector<6x8xf32> to vector<1x8xf32>
      %1461 = vector.shape_cast %1460 : vector<1x8xf32> to vector<1x8xf32>
      %1462 = vector.broadcast %1461 : vector<1x8xf32> to vector<12x8xf32>
      %1463 = vector.extract_strided_slice %1456 {offsets = [2, 0], sizes = [1, 8], strides = [1, 1]} : vector<6x8xf32> to vector<1x8xf32>
      %1464 = vector.shape_cast %1463 : vector<1x8xf32> to vector<1x8xf32>
      %1465 = vector.broadcast %1464 : vector<1x8xf32> to vector<12x8xf32>
      %1466 = vector.extract_strided_slice %1456 {offsets = [3, 0], sizes = [1, 8], strides = [1, 1]} : vector<6x8xf32> to vector<1x8xf32>
      %1467 = vector.shape_cast %1466 : vector<1x8xf32> to vector<1x8xf32>
      %1468 = vector.broadcast %1467 : vector<1x8xf32> to vector<12x8xf32>
      %1469 = vector.extract_strided_slice %1456 {offsets = [4, 0], sizes = [1, 8], strides = [1, 1]} : vector<6x8xf32> to vector<1x8xf32>
      %1470 = vector.shape_cast %1469 : vector<1x8xf32> to vector<1x8xf32>
      %1471 = vector.broadcast %1470 : vector<1x8xf32> to vector<12x8xf32>
      %1472 = vector.extract_strided_slice %1456 {offsets = [5, 0], sizes = [1, 8], strides = [1, 1]} : vector<6x8xf32> to vector<1x8xf32>
      %1473 = vector.shape_cast %1472 : vector<1x8xf32> to vector<1x8xf32>
      %1474 = vector.broadcast %1473 : vector<1x8xf32> to vector<12x8xf32>
      %1475 = vector.extract_strided_slice %3 {offsets = [0, 0, 0], sizes = [1, 12, 8], strides = [1, 1, 1]} : vector<9x12x8xf32> to vector<1x12x8xf32>
      %1476 = vector.shape_cast %1475 : vector<1x12x8xf32> to vector<12x8xf32>
      %1477 = arith.mulf %1459, %1476 : vector<12x8xf32>
      %1478 = arith.mulf %1462, %1476 : vector<12x8xf32>
      %1479 = arith.mulf %1465, %1476 : vector<12x8xf32>
      %1480 = arith.mulf %1468, %1476 : vector<12x8xf32>
      %1481 = vector.extract_strided_slice %3 {offsets = [1, 0, 0], sizes = [1, 12, 8], strides = [1, 1, 1]} : vector<9x12x8xf32> to vector<1x12x8xf32>
      %1482 = vector.shape_cast %1481 : vector<1x12x8xf32> to vector<12x8xf32>
      %1483 = arith.mulf %1462, %1482 : vector<12x8xf32>
      %1484 = arith.addf %1477, %1483 : vector<12x8xf32>
      %1485 = arith.mulf %1465, %1482 : vector<12x8xf32>
      %1486 = arith.addf %1478, %1485 : vector<12x8xf32>
      %1487 = arith.mulf %1468, %1482 : vector<12x8xf32>
      %1488 = arith.addf %1479, %1487 : vector<12x8xf32>
      %1489 = arith.mulf %1471, %1482 : vector<12x8xf32>
      %1490 = arith.addf %1480, %1489 : vector<12x8xf32>
      %1491 = vector.extract_strided_slice %3 {offsets = [2, 0, 0], sizes = [1, 12, 8], strides = [1, 1, 1]} : vector<9x12x8xf32> to vector<1x12x8xf32>
      %1492 = vector.shape_cast %1491 : vector<1x12x8xf32> to vector<12x8xf32>
      %1493 = arith.mulf %1465, %1492 : vector<12x8xf32>
      %1494 = arith.addf %1484, %1493 : vector<12x8xf32>
      %1495 = arith.mulf %1468, %1492 : vector<12x8xf32>
      %1496 = arith.addf %1486, %1495 : vector<12x8xf32>
      %1497 = arith.mulf %1471, %1492 : vector<12x8xf32>
      %1498 = arith.addf %1488, %1497 : vector<12x8xf32>
      %1499 = arith.mulf %1474, %1492 : vector<12x8xf32>
      %1500 = arith.addf %1490, %1499 : vector<12x8xf32>
      %c1_i32_132 = arith.constant 1 : i32
      %1501 = arith.addi %20, %c1_i32_132 : i32
      %1502 = arith.index_cast %1501 : i32 to index
      %c16_133 = arith.constant 16 : index
      %c0_134 = arith.constant 0 : index
      %1503 = vector.load %arg2[%1502, %c16_133, %c0_134] : memref<22x22x8xf32, #tpu.memory_space<vmem>>, vector<1x6x8xf32>
      %1504 = vector.shape_cast %1503 : vector<1x6x8xf32> to vector<6x8xf32>
      %1505 = vector.extract_strided_slice %1504 {offsets = [0, 0], sizes = [1, 8], strides = [1, 1]} : vector<6x8xf32> to vector<1x8xf32>
      %1506 = vector.shape_cast %1505 : vector<1x8xf32> to vector<1x8xf32>
      %1507 = vector.broadcast %1506 : vector<1x8xf32> to vector<12x8xf32>
      %1508 = vector.extract_strided_slice %1504 {offsets = [1, 0], sizes = [1, 8], strides = [1, 1]} : vector<6x8xf32> to vector<1x8xf32>
      %1509 = vector.shape_cast %1508 : vector<1x8xf32> to vector<1x8xf32>
      %1510 = vector.broadcast %1509 : vector<1x8xf32> to vector<12x8xf32>
      %1511 = vector.extract_strided_slice %1504 {offsets = [2, 0], sizes = [1, 8], strides = [1, 1]} : vector<6x8xf32> to vector<1x8xf32>
      %1512 = vector.shape_cast %1511 : vector<1x8xf32> to vector<1x8xf32>
      %1513 = vector.broadcast %1512 : vector<1x8xf32> to vector<12x8xf32>
      %1514 = vector.extract_strided_slice %1504 {offsets = [3, 0], sizes = [1, 8], strides = [1, 1]} : vector<6x8xf32> to vector<1x8xf32>
      %1515 = vector.shape_cast %1514 : vector<1x8xf32> to vector<1x8xf32>
      %1516 = vector.broadcast %1515 : vector<1x8xf32> to vector<12x8xf32>
      %1517 = vector.extract_strided_slice %1504 {offsets = [4, 0], sizes = [1, 8], strides = [1, 1]} : vector<6x8xf32> to vector<1x8xf32>
      %1518 = vector.shape_cast %1517 : vector<1x8xf32> to vector<1x8xf32>
      %1519 = vector.broadcast %1518 : vector<1x8xf32> to vector<12x8xf32>
      %1520 = vector.extract_strided_slice %1504 {offsets = [5, 0], sizes = [1, 8], strides = [1, 1]} : vector<6x8xf32> to vector<1x8xf32>
      %1521 = vector.shape_cast %1520 : vector<1x8xf32> to vector<1x8xf32>
      %1522 = vector.broadcast %1521 : vector<1x8xf32> to vector<12x8xf32>
      %1523 = vector.extract_strided_slice %3 {offsets = [3, 0, 0], sizes = [1, 12, 8], strides = [1, 1, 1]} : vector<9x12x8xf32> to vector<1x12x8xf32>
      %1524 = vector.shape_cast %1523 : vector<1x12x8xf32> to vector<12x8xf32>
      %1525 = arith.mulf %1507, %1524 : vector<12x8xf32>
      %1526 = arith.addf %1494, %1525 : vector<12x8xf32>
      %1527 = arith.mulf %1510, %1524 : vector<12x8xf32>
      %1528 = arith.addf %1496, %1527 : vector<12x8xf32>
      %1529 = arith.mulf %1513, %1524 : vector<12x8xf32>
      %1530 = arith.addf %1498, %1529 : vector<12x8xf32>
      %1531 = arith.mulf %1516, %1524 : vector<12x8xf32>
      %1532 = arith.addf %1500, %1531 : vector<12x8xf32>
      %1533 = vector.extract_strided_slice %3 {offsets = [4, 0, 0], sizes = [1, 12, 8], strides = [1, 1, 1]} : vector<9x12x8xf32> to vector<1x12x8xf32>
      %1534 = vector.shape_cast %1533 : vector<1x12x8xf32> to vector<12x8xf32>
      %1535 = arith.mulf %1510, %1534 : vector<12x8xf32>
      %1536 = arith.addf %1526, %1535 : vector<12x8xf32>
      %1537 = arith.mulf %1513, %1534 : vector<12x8xf32>
      %1538 = arith.addf %1528, %1537 : vector<12x8xf32>
      %1539 = arith.mulf %1516, %1534 : vector<12x8xf32>
      %1540 = arith.addf %1530, %1539 : vector<12x8xf32>
      %1541 = arith.mulf %1519, %1534 : vector<12x8xf32>
      %1542 = arith.addf %1532, %1541 : vector<12x8xf32>
      %1543 = vector.extract_strided_slice %3 {offsets = [5, 0, 0], sizes = [1, 12, 8], strides = [1, 1, 1]} : vector<9x12x8xf32> to vector<1x12x8xf32>
      %1544 = vector.shape_cast %1543 : vector<1x12x8xf32> to vector<12x8xf32>
      %1545 = arith.mulf %1513, %1544 : vector<12x8xf32>
      %1546 = arith.addf %1536, %1545 : vector<12x8xf32>
      %1547 = arith.mulf %1516, %1544 : vector<12x8xf32>
      %1548 = arith.addf %1538, %1547 : vector<12x8xf32>
      %1549 = arith.mulf %1519, %1544 : vector<12x8xf32>
      %1550 = arith.addf %1540, %1549 : vector<12x8xf32>
      %1551 = arith.mulf %1522, %1544 : vector<12x8xf32>
      %1552 = arith.addf %1542, %1551 : vector<12x8xf32>
      %c2_i32_135 = arith.constant 2 : i32
      %1553 = arith.addi %20, %c2_i32_135 : i32
      %1554 = arith.index_cast %1553 : i32 to index
      %c16_136 = arith.constant 16 : index
      %c0_137 = arith.constant 0 : index
      %1555 = vector.load %arg2[%1554, %c16_136, %c0_137] : memref<22x22x8xf32, #tpu.memory_space<vmem>>, vector<1x6x8xf32>
      %1556 = vector.shape_cast %1555 : vector<1x6x8xf32> to vector<6x8xf32>
      %1557 = vector.extract_strided_slice %1556 {offsets = [0, 0], sizes = [1, 8], strides = [1, 1]} : vector<6x8xf32> to vector<1x8xf32>
      %1558 = vector.shape_cast %1557 : vector<1x8xf32> to vector<1x8xf32>
      %1559 = vector.broadcast %1558 : vector<1x8xf32> to vector<12x8xf32>
      %1560 = vector.extract_strided_slice %1556 {offsets = [1, 0], sizes = [1, 8], strides = [1, 1]} : vector<6x8xf32> to vector<1x8xf32>
      %1561 = vector.shape_cast %1560 : vector<1x8xf32> to vector<1x8xf32>
      %1562 = vector.broadcast %1561 : vector<1x8xf32> to vector<12x8xf32>
      %1563 = vector.extract_strided_slice %1556 {offsets = [2, 0], sizes = [1, 8], strides = [1, 1]} : vector<6x8xf32> to vector<1x8xf32>
      %1564 = vector.shape_cast %1563 : vector<1x8xf32> to vector<1x8xf32>
      %1565 = vector.broadcast %1564 : vector<1x8xf32> to vector<12x8xf32>
      %1566 = vector.extract_strided_slice %1556 {offsets = [3, 0], sizes = [1, 8], strides = [1, 1]} : vector<6x8xf32> to vector<1x8xf32>
      %1567 = vector.shape_cast %1566 : vector<1x8xf32> to vector<1x8xf32>
      %1568 = vector.broadcast %1567 : vector<1x8xf32> to vector<12x8xf32>
      %1569 = vector.extract_strided_slice %1556 {offsets = [4, 0], sizes = [1, 8], strides = [1, 1]} : vector<6x8xf32> to vector<1x8xf32>
      %1570 = vector.shape_cast %1569 : vector<1x8xf32> to vector<1x8xf32>
      %1571 = vector.broadcast %1570 : vector<1x8xf32> to vector<12x8xf32>
      %1572 = vector.extract_strided_slice %1556 {offsets = [5, 0], sizes = [1, 8], strides = [1, 1]} : vector<6x8xf32> to vector<1x8xf32>
      %1573 = vector.shape_cast %1572 : vector<1x8xf32> to vector<1x8xf32>
      %1574 = vector.broadcast %1573 : vector<1x8xf32> to vector<12x8xf32>
      %1575 = vector.extract_strided_slice %3 {offsets = [6, 0, 0], sizes = [1, 12, 8], strides = [1, 1, 1]} : vector<9x12x8xf32> to vector<1x12x8xf32>
      %1576 = vector.shape_cast %1575 : vector<1x12x8xf32> to vector<12x8xf32>
      %1577 = arith.mulf %1559, %1576 : vector<12x8xf32>
      %1578 = arith.addf %1546, %1577 : vector<12x8xf32>
      %1579 = arith.mulf %1562, %1576 : vector<12x8xf32>
      %1580 = arith.addf %1548, %1579 : vector<12x8xf32>
      %1581 = arith.mulf %1565, %1576 : vector<12x8xf32>
      %1582 = arith.addf %1550, %1581 : vector<12x8xf32>
      %1583 = arith.mulf %1568, %1576 : vector<12x8xf32>
      %1584 = arith.addf %1552, %1583 : vector<12x8xf32>
      %1585 = vector.extract_strided_slice %3 {offsets = [7, 0, 0], sizes = [1, 12, 8], strides = [1, 1, 1]} : vector<9x12x8xf32> to vector<1x12x8xf32>
      %1586 = vector.shape_cast %1585 : vector<1x12x8xf32> to vector<12x8xf32>
      %1587 = arith.mulf %1562, %1586 : vector<12x8xf32>
      %1588 = arith.addf %1578, %1587 : vector<12x8xf32>
      %1589 = arith.mulf %1565, %1586 : vector<12x8xf32>
      %1590 = arith.addf %1580, %1589 : vector<12x8xf32>
      %1591 = arith.mulf %1568, %1586 : vector<12x8xf32>
      %1592 = arith.addf %1582, %1591 : vector<12x8xf32>
      %1593 = arith.mulf %1571, %1586 : vector<12x8xf32>
      %1594 = arith.addf %1584, %1593 : vector<12x8xf32>
      %1595 = vector.extract_strided_slice %3 {offsets = [8, 0, 0], sizes = [1, 12, 8], strides = [1, 1, 1]} : vector<9x12x8xf32> to vector<1x12x8xf32>
      %1596 = vector.shape_cast %1595 : vector<1x12x8xf32> to vector<12x8xf32>
      %1597 = arith.mulf %1565, %1596 : vector<12x8xf32>
      %1598 = arith.addf %1588, %1597 : vector<12x8xf32>
      %1599 = arith.mulf %1568, %1596 : vector<12x8xf32>
      %1600 = arith.addf %1590, %1599 : vector<12x8xf32>
      %1601 = arith.mulf %1571, %1596 : vector<12x8xf32>
      %1602 = arith.addf %1592, %1601 : vector<12x8xf32>
      %1603 = arith.mulf %1574, %1596 : vector<12x8xf32>
      %1604 = arith.addf %1594, %1603 : vector<12x8xf32>
      %1605 = arith.addf %1598, %6 : vector<12x8xf32>
      %cst_138 = arith.constant 0.000000e+00 : f32
      %1606 = vector.broadcast %cst_138 : f32 to vector<12x8xf32>
      %1607 = arith.maximumf %1605, %1606 : vector<12x8xf32>
      %1608 = arith.addf %1600, %6 : vector<12x8xf32>
      %cst_139 = arith.constant 0.000000e+00 : f32
      %1609 = vector.broadcast %cst_139 : f32 to vector<12x8xf32>
      %1610 = arith.maximumf %1608, %1609 : vector<12x8xf32>
      %1611 = arith.addf %1602, %6 : vector<12x8xf32>
      %cst_140 = arith.constant 0.000000e+00 : f32
      %1612 = vector.broadcast %cst_140 : f32 to vector<12x8xf32>
      %1613 = arith.maximumf %1611, %1612 : vector<12x8xf32>
      %1614 = arith.addf %1604, %6 : vector<12x8xf32>
      %cst_141 = arith.constant 0.000000e+00 : f32
      %1615 = vector.broadcast %cst_141 : f32 to vector<12x8xf32>
      %1616 = arith.maximumf %1614, %1615 : vector<12x8xf32>
      %c1_i32_142 = arith.constant 1 : i32
      %1617 = arith.addi %20, %c1_i32_142 : i32
      %c0_i32_143 = arith.constant 0 : i32
      %1618 = arith.addi %1617, %c0_i32_143 : i32
      %1619 = arith.index_cast %1618 : i32 to index
      %c16_144 = arith.constant 16 : index
      %c0_145 = arith.constant 0 : index
      %1620 = vector.load %arg2[%1619, %c16_144, %c0_145] : memref<22x22x8xf32, #tpu.memory_space<vmem>>, vector<1x6x8xf32>
      %1621 = vector.shape_cast %1620 : vector<1x6x8xf32> to vector<6x8xf32>
      %1622 = vector.extract_strided_slice %1621 {offsets = [0, 0], sizes = [1, 8], strides = [1, 1]} : vector<6x8xf32> to vector<1x8xf32>
      %1623 = vector.shape_cast %1622 : vector<1x8xf32> to vector<1x8xf32>
      %1624 = vector.broadcast %1623 : vector<1x8xf32> to vector<12x8xf32>
      %1625 = vector.extract_strided_slice %1621 {offsets = [1, 0], sizes = [1, 8], strides = [1, 1]} : vector<6x8xf32> to vector<1x8xf32>
      %1626 = vector.shape_cast %1625 : vector<1x8xf32> to vector<1x8xf32>
      %1627 = vector.broadcast %1626 : vector<1x8xf32> to vector<12x8xf32>
      %1628 = vector.extract_strided_slice %1621 {offsets = [2, 0], sizes = [1, 8], strides = [1, 1]} : vector<6x8xf32> to vector<1x8xf32>
      %1629 = vector.shape_cast %1628 : vector<1x8xf32> to vector<1x8xf32>
      %1630 = vector.broadcast %1629 : vector<1x8xf32> to vector<12x8xf32>
      %1631 = vector.extract_strided_slice %1621 {offsets = [3, 0], sizes = [1, 8], strides = [1, 1]} : vector<6x8xf32> to vector<1x8xf32>
      %1632 = vector.shape_cast %1631 : vector<1x8xf32> to vector<1x8xf32>
      %1633 = vector.broadcast %1632 : vector<1x8xf32> to vector<12x8xf32>
      %1634 = vector.extract_strided_slice %1621 {offsets = [4, 0], sizes = [1, 8], strides = [1, 1]} : vector<6x8xf32> to vector<1x8xf32>
      %1635 = vector.shape_cast %1634 : vector<1x8xf32> to vector<1x8xf32>
      %1636 = vector.broadcast %1635 : vector<1x8xf32> to vector<12x8xf32>
      %1637 = vector.extract_strided_slice %1621 {offsets = [5, 0], sizes = [1, 8], strides = [1, 1]} : vector<6x8xf32> to vector<1x8xf32>
      %1638 = vector.shape_cast %1637 : vector<1x8xf32> to vector<1x8xf32>
      %1639 = vector.broadcast %1638 : vector<1x8xf32> to vector<12x8xf32>
      %1640 = vector.extract_strided_slice %3 {offsets = [0, 0, 0], sizes = [1, 12, 8], strides = [1, 1, 1]} : vector<9x12x8xf32> to vector<1x12x8xf32>
      %1641 = vector.shape_cast %1640 : vector<1x12x8xf32> to vector<12x8xf32>
      %1642 = arith.mulf %1624, %1641 : vector<12x8xf32>
      %1643 = arith.mulf %1627, %1641 : vector<12x8xf32>
      %1644 = arith.mulf %1630, %1641 : vector<12x8xf32>
      %1645 = arith.mulf %1633, %1641 : vector<12x8xf32>
      %1646 = vector.extract_strided_slice %3 {offsets = [1, 0, 0], sizes = [1, 12, 8], strides = [1, 1, 1]} : vector<9x12x8xf32> to vector<1x12x8xf32>
      %1647 = vector.shape_cast %1646 : vector<1x12x8xf32> to vector<12x8xf32>
      %1648 = arith.mulf %1627, %1647 : vector<12x8xf32>
      %1649 = arith.addf %1642, %1648 : vector<12x8xf32>
      %1650 = arith.mulf %1630, %1647 : vector<12x8xf32>
      %1651 = arith.addf %1643, %1650 : vector<12x8xf32>
      %1652 = arith.mulf %1633, %1647 : vector<12x8xf32>
      %1653 = arith.addf %1644, %1652 : vector<12x8xf32>
      %1654 = arith.mulf %1636, %1647 : vector<12x8xf32>
      %1655 = arith.addf %1645, %1654 : vector<12x8xf32>
      %1656 = vector.extract_strided_slice %3 {offsets = [2, 0, 0], sizes = [1, 12, 8], strides = [1, 1, 1]} : vector<9x12x8xf32> to vector<1x12x8xf32>
      %1657 = vector.shape_cast %1656 : vector<1x12x8xf32> to vector<12x8xf32>
      %1658 = arith.mulf %1630, %1657 : vector<12x8xf32>
      %1659 = arith.addf %1649, %1658 : vector<12x8xf32>
      %1660 = arith.mulf %1633, %1657 : vector<12x8xf32>
      %1661 = arith.addf %1651, %1660 : vector<12x8xf32>
      %1662 = arith.mulf %1636, %1657 : vector<12x8xf32>
      %1663 = arith.addf %1653, %1662 : vector<12x8xf32>
      %1664 = arith.mulf %1639, %1657 : vector<12x8xf32>
      %1665 = arith.addf %1655, %1664 : vector<12x8xf32>
      %c1_i32_146 = arith.constant 1 : i32
      %1666 = arith.addi %1617, %c1_i32_146 : i32
      %1667 = arith.index_cast %1666 : i32 to index
      %c16_147 = arith.constant 16 : index
      %c0_148 = arith.constant 0 : index
      %1668 = vector.load %arg2[%1667, %c16_147, %c0_148] : memref<22x22x8xf32, #tpu.memory_space<vmem>>, vector<1x6x8xf32>
      %1669 = vector.shape_cast %1668 : vector<1x6x8xf32> to vector<6x8xf32>
      %1670 = vector.extract_strided_slice %1669 {offsets = [0, 0], sizes = [1, 8], strides = [1, 1]} : vector<6x8xf32> to vector<1x8xf32>
      %1671 = vector.shape_cast %1670 : vector<1x8xf32> to vector<1x8xf32>
      %1672 = vector.broadcast %1671 : vector<1x8xf32> to vector<12x8xf32>
      %1673 = vector.extract_strided_slice %1669 {offsets = [1, 0], sizes = [1, 8], strides = [1, 1]} : vector<6x8xf32> to vector<1x8xf32>
      %1674 = vector.shape_cast %1673 : vector<1x8xf32> to vector<1x8xf32>
      %1675 = vector.broadcast %1674 : vector<1x8xf32> to vector<12x8xf32>
      %1676 = vector.extract_strided_slice %1669 {offsets = [2, 0], sizes = [1, 8], strides = [1, 1]} : vector<6x8xf32> to vector<1x8xf32>
      %1677 = vector.shape_cast %1676 : vector<1x8xf32> to vector<1x8xf32>
      %1678 = vector.broadcast %1677 : vector<1x8xf32> to vector<12x8xf32>
      %1679 = vector.extract_strided_slice %1669 {offsets = [3, 0], sizes = [1, 8], strides = [1, 1]} : vector<6x8xf32> to vector<1x8xf32>
      %1680 = vector.shape_cast %1679 : vector<1x8xf32> to vector<1x8xf32>
      %1681 = vector.broadcast %1680 : vector<1x8xf32> to vector<12x8xf32>
      %1682 = vector.extract_strided_slice %1669 {offsets = [4, 0], sizes = [1, 8], strides = [1, 1]} : vector<6x8xf32> to vector<1x8xf32>
      %1683 = vector.shape_cast %1682 : vector<1x8xf32> to vector<1x8xf32>
      %1684 = vector.broadcast %1683 : vector<1x8xf32> to vector<12x8xf32>
      %1685 = vector.extract_strided_slice %1669 {offsets = [5, 0], sizes = [1, 8], strides = [1, 1]} : vector<6x8xf32> to vector<1x8xf32>
      %1686 = vector.shape_cast %1685 : vector<1x8xf32> to vector<1x8xf32>
      %1687 = vector.broadcast %1686 : vector<1x8xf32> to vector<12x8xf32>
      %1688 = vector.extract_strided_slice %3 {offsets = [3, 0, 0], sizes = [1, 12, 8], strides = [1, 1, 1]} : vector<9x12x8xf32> to vector<1x12x8xf32>
      %1689 = vector.shape_cast %1688 : vector<1x12x8xf32> to vector<12x8xf32>
      %1690 = arith.mulf %1672, %1689 : vector<12x8xf32>
      %1691 = arith.addf %1659, %1690 : vector<12x8xf32>
      %1692 = arith.mulf %1675, %1689 : vector<12x8xf32>
      %1693 = arith.addf %1661, %1692 : vector<12x8xf32>
      %1694 = arith.mulf %1678, %1689 : vector<12x8xf32>
      %1695 = arith.addf %1663, %1694 : vector<12x8xf32>
      %1696 = arith.mulf %1681, %1689 : vector<12x8xf32>
      %1697 = arith.addf %1665, %1696 : vector<12x8xf32>
      %1698 = vector.extract_strided_slice %3 {offsets = [4, 0, 0], sizes = [1, 12, 8], strides = [1, 1, 1]} : vector<9x12x8xf32> to vector<1x12x8xf32>
      %1699 = vector.shape_cast %1698 : vector<1x12x8xf32> to vector<12x8xf32>
      %1700 = arith.mulf %1675, %1699 : vector<12x8xf32>
      %1701 = arith.addf %1691, %1700 : vector<12x8xf32>
      %1702 = arith.mulf %1678, %1699 : vector<12x8xf32>
      %1703 = arith.addf %1693, %1702 : vector<12x8xf32>
      %1704 = arith.mulf %1681, %1699 : vector<12x8xf32>
      %1705 = arith.addf %1695, %1704 : vector<12x8xf32>
      %1706 = arith.mulf %1684, %1699 : vector<12x8xf32>
      %1707 = arith.addf %1697, %1706 : vector<12x8xf32>
      %1708 = vector.extract_strided_slice %3 {offsets = [5, 0, 0], sizes = [1, 12, 8], strides = [1, 1, 1]} : vector<9x12x8xf32> to vector<1x12x8xf32>
      %1709 = vector.shape_cast %1708 : vector<1x12x8xf32> to vector<12x8xf32>
      %1710 = arith.mulf %1678, %1709 : vector<12x8xf32>
      %1711 = arith.addf %1701, %1710 : vector<12x8xf32>
      %1712 = arith.mulf %1681, %1709 : vector<12x8xf32>
      %1713 = arith.addf %1703, %1712 : vector<12x8xf32>
      %1714 = arith.mulf %1684, %1709 : vector<12x8xf32>
      %1715 = arith.addf %1705, %1714 : vector<12x8xf32>
      %1716 = arith.mulf %1687, %1709 : vector<12x8xf32>
      %1717 = arith.addf %1707, %1716 : vector<12x8xf32>
      %c2_i32_149 = arith.constant 2 : i32
      %1718 = arith.addi %1617, %c2_i32_149 : i32
      %1719 = arith.index_cast %1718 : i32 to index
      %c16_150 = arith.constant 16 : index
      %c0_151 = arith.constant 0 : index
      %1720 = vector.load %arg2[%1719, %c16_150, %c0_151] : memref<22x22x8xf32, #tpu.memory_space<vmem>>, vector<1x6x8xf32>
      %1721 = vector.shape_cast %1720 : vector<1x6x8xf32> to vector<6x8xf32>
      %1722 = vector.extract_strided_slice %1721 {offsets = [0, 0], sizes = [1, 8], strides = [1, 1]} : vector<6x8xf32> to vector<1x8xf32>
      %1723 = vector.shape_cast %1722 : vector<1x8xf32> to vector<1x8xf32>
      %1724 = vector.broadcast %1723 : vector<1x8xf32> to vector<12x8xf32>
      %1725 = vector.extract_strided_slice %1721 {offsets = [1, 0], sizes = [1, 8], strides = [1, 1]} : vector<6x8xf32> to vector<1x8xf32>
      %1726 = vector.shape_cast %1725 : vector<1x8xf32> to vector<1x8xf32>
      %1727 = vector.broadcast %1726 : vector<1x8xf32> to vector<12x8xf32>
      %1728 = vector.extract_strided_slice %1721 {offsets = [2, 0], sizes = [1, 8], strides = [1, 1]} : vector<6x8xf32> to vector<1x8xf32>
      %1729 = vector.shape_cast %1728 : vector<1x8xf32> to vector<1x8xf32>
      %1730 = vector.broadcast %1729 : vector<1x8xf32> to vector<12x8xf32>
      %1731 = vector.extract_strided_slice %1721 {offsets = [3, 0], sizes = [1, 8], strides = [1, 1]} : vector<6x8xf32> to vector<1x8xf32>
      %1732 = vector.shape_cast %1731 : vector<1x8xf32> to vector<1x8xf32>
      %1733 = vector.broadcast %1732 : vector<1x8xf32> to vector<12x8xf32>
      %1734 = vector.extract_strided_slice %1721 {offsets = [4, 0], sizes = [1, 8], strides = [1, 1]} : vector<6x8xf32> to vector<1x8xf32>
      %1735 = vector.shape_cast %1734 : vector<1x8xf32> to vector<1x8xf32>
      %1736 = vector.broadcast %1735 : vector<1x8xf32> to vector<12x8xf32>
      %1737 = vector.extract_strided_slice %1721 {offsets = [5, 0], sizes = [1, 8], strides = [1, 1]} : vector<6x8xf32> to vector<1x8xf32>
      %1738 = vector.shape_cast %1737 : vector<1x8xf32> to vector<1x8xf32>
      %1739 = vector.broadcast %1738 : vector<1x8xf32> to vector<12x8xf32>
      %1740 = vector.extract_strided_slice %3 {offsets = [6, 0, 0], sizes = [1, 12, 8], strides = [1, 1, 1]} : vector<9x12x8xf32> to vector<1x12x8xf32>
      %1741 = vector.shape_cast %1740 : vector<1x12x8xf32> to vector<12x8xf32>
      %1742 = arith.mulf %1724, %1741 : vector<12x8xf32>
      %1743 = arith.addf %1711, %1742 : vector<12x8xf32>
      %1744 = arith.mulf %1727, %1741 : vector<12x8xf32>
      %1745 = arith.addf %1713, %1744 : vector<12x8xf32>
      %1746 = arith.mulf %1730, %1741 : vector<12x8xf32>
      %1747 = arith.addf %1715, %1746 : vector<12x8xf32>
      %1748 = arith.mulf %1733, %1741 : vector<12x8xf32>
      %1749 = arith.addf %1717, %1748 : vector<12x8xf32>
      %1750 = vector.extract_strided_slice %3 {offsets = [7, 0, 0], sizes = [1, 12, 8], strides = [1, 1, 1]} : vector<9x12x8xf32> to vector<1x12x8xf32>
      %1751 = vector.shape_cast %1750 : vector<1x12x8xf32> to vector<12x8xf32>
      %1752 = arith.mulf %1727, %1751 : vector<12x8xf32>
      %1753 = arith.addf %1743, %1752 : vector<12x8xf32>
      %1754 = arith.mulf %1730, %1751 : vector<12x8xf32>
      %1755 = arith.addf %1745, %1754 : vector<12x8xf32>
      %1756 = arith.mulf %1733, %1751 : vector<12x8xf32>
      %1757 = arith.addf %1747, %1756 : vector<12x8xf32>
      %1758 = arith.mulf %1736, %1751 : vector<12x8xf32>
      %1759 = arith.addf %1749, %1758 : vector<12x8xf32>
      %1760 = vector.extract_strided_slice %3 {offsets = [8, 0, 0], sizes = [1, 12, 8], strides = [1, 1, 1]} : vector<9x12x8xf32> to vector<1x12x8xf32>
      %1761 = vector.shape_cast %1760 : vector<1x12x8xf32> to vector<12x8xf32>
      %1762 = arith.mulf %1730, %1761 : vector<12x8xf32>
      %1763 = arith.addf %1753, %1762 : vector<12x8xf32>
      %1764 = arith.mulf %1733, %1761 : vector<12x8xf32>
      %1765 = arith.addf %1755, %1764 : vector<12x8xf32>
      %1766 = arith.mulf %1736, %1761 : vector<12x8xf32>
      %1767 = arith.addf %1757, %1766 : vector<12x8xf32>
      %1768 = arith.mulf %1739, %1761 : vector<12x8xf32>
      %1769 = arith.addf %1759, %1768 : vector<12x8xf32>
      %1770 = arith.addf %1763, %6 : vector<12x8xf32>
      %cst_152 = arith.constant 0.000000e+00 : f32
      %1771 = vector.broadcast %cst_152 : f32 to vector<12x8xf32>
      %1772 = arith.maximumf %1770, %1771 : vector<12x8xf32>
      %1773 = arith.addf %1765, %6 : vector<12x8xf32>
      %cst_153 = arith.constant 0.000000e+00 : f32
      %1774 = vector.broadcast %cst_153 : f32 to vector<12x8xf32>
      %1775 = arith.maximumf %1773, %1774 : vector<12x8xf32>
      %1776 = arith.addf %1767, %6 : vector<12x8xf32>
      %cst_154 = arith.constant 0.000000e+00 : f32
      %1777 = vector.broadcast %cst_154 : f32 to vector<12x8xf32>
      %1778 = arith.maximumf %1776, %1777 : vector<12x8xf32>
      %1779 = arith.addf %1769, %6 : vector<12x8xf32>
      %cst_155 = arith.constant 0.000000e+00 : f32
      %1780 = vector.broadcast %cst_155 : f32 to vector<12x8xf32>
      %1781 = arith.maximumf %1779, %1780 : vector<12x8xf32>
      %1782 = arith.maximumf %1607, %1772 : vector<12x8xf32>
      %1783 = arith.maximumf %1610, %1775 : vector<12x8xf32>
      %1784 = arith.maximumf %1613, %1778 : vector<12x8xf32>
      %1785 = arith.maximumf %1616, %1781 : vector<12x8xf32>
      %1786 = arith.maximumf %1782, %1783 : vector<12x8xf32>
      %1787 = arith.maximumf %1784, %1785 : vector<12x8xf32>
      %1788 = arith.index_cast %arg7 : i32 to index
      %c0_156 = arith.constant 0 : index
      %c8_157 = arith.constant 8 : index
      %c0_158 = arith.constant 0 : index
      %c0_159 = arith.constant 0 : index
      %1789 = vector.load %arg5[%1788, %c0_156, %c8_157, %c0_158, %c0_159] : memref<5x2x10x12x1xf32, #tpu.memory_space<vmem>>, vector<1x2x2x12x1xf32>
      %1790 = vector.shape_cast %1789 : vector<1x2x2x12x1xf32> to vector<2x2x12x1xf32>
      %1791 = vector.extract_strided_slice %1790 {offsets = [0, 0, 0, 0], sizes = [1, 1, 12, 1], strides = [1, 1, 1, 1]} : vector<2x2x12x1xf32> to vector<1x1x12x1xf32>
      %1792 = vector.shape_cast %1791 : vector<1x1x12x1xf32> to vector<12x1xf32>
      %1793 = vector.broadcast %1792 : vector<12x1xf32> to vector<12x8xf32>
      %1794 = arith.mulf %1786, %1793 : vector<12x8xf32>
      %1795 = arith.addf %1442, %1794 : vector<12x8xf32>
      %1796 = vector.extract_strided_slice %1790 {offsets = [0, 1, 0, 0], sizes = [1, 1, 12, 1], strides = [1, 1, 1, 1]} : vector<2x2x12x1xf32> to vector<1x1x12x1xf32>
      %1797 = vector.shape_cast %1796 : vector<1x1x12x1xf32> to vector<12x1xf32>
      %1798 = vector.broadcast %1797 : vector<12x1xf32> to vector<12x8xf32>
      %1799 = arith.mulf %1787, %1798 : vector<12x8xf32>
      %1800 = arith.addf %1795, %1799 : vector<12x8xf32>
      %1801 = vector.extract_strided_slice %1790 {offsets = [1, 0, 0, 0], sizes = [1, 1, 12, 1], strides = [1, 1, 1, 1]} : vector<2x2x12x1xf32> to vector<1x1x12x1xf32>
      %1802 = vector.shape_cast %1801 : vector<1x1x12x1xf32> to vector<12x1xf32>
      %1803 = vector.broadcast %1802 : vector<12x1xf32> to vector<12x8xf32>
      %1804 = arith.mulf %1786, %1803 : vector<12x8xf32>
      %1805 = arith.addf %1452, %1804 : vector<12x8xf32>
      %1806 = vector.extract_strided_slice %1790 {offsets = [1, 1, 0, 0], sizes = [1, 1, 12, 1], strides = [1, 1, 1, 1]} : vector<2x2x12x1xf32> to vector<1x1x12x1xf32>
      %1807 = vector.shape_cast %1806 : vector<1x1x12x1xf32> to vector<12x1xf32>
      %1808 = vector.broadcast %1807 : vector<12x1xf32> to vector<12x8xf32>
      %1809 = arith.mulf %1787, %1808 : vector<12x8xf32>
      %1810 = arith.addf %1805, %1809 : vector<12x8xf32>
      scf.yield %1800, %1810 : vector<12x8xf32>, vector<12x8xf32>
    }
    %c5_i32_5 = arith.constant 5 : i32
    %cst_6 = arith.constant dense<0.000000e+00> : vector<8xf32>
    %11 = vector.multi_reduction <add>, %10#0, %cst_6 [0] : vector<12x8xf32> to vector<8xf32>
    %12 = vector.shape_cast %11 : vector<8xf32> to vector<1x8xf32>
    %cst_7 = arith.constant dense<0.000000e+00> : vector<8xf32>
    %13 = vector.multi_reduction <add>, %10#1, %cst_7 [0] : vector<12x8xf32> to vector<8xf32>
    %14 = vector.shape_cast %13 : vector<8xf32> to vector<1x8xf32>
    %15 = tpu.concatenate %12, %14 in 0 : vector<1x8xf32>, vector<1x8xf32> -> vector<2x8xf32>
    %c0_8 = arith.constant 0 : index
    %c0_9 = arith.constant 0 : index
    %c0_10 = arith.constant 0 : index
    %16 = vector.load %arg6[%c0_8, %c0_9, %c0_10] : memref<1x2x8xf32, #tpu.memory_space<vmem>>, vector<1x2x8xf32>
    %17 = vector.shape_cast %16 : vector<1x2x8xf32> to vector<2x8xf32>
    %18 = vector.shape_cast %15 : vector<2x8xf32> to vector<1x2x8xf32>
    tpu.vector_store %arg6[%c0_8, %c0_9, %c0_10], %18 {strides = array<i32>} : memref<1x2x8xf32, #tpu.memory_space<vmem>>, vector<1x2x8xf32>,
    return
  }
  func.func @transform_0(%arg0: i32, %arg1: i32) -> (i32, i32, i32) {
    %c0_i32 = arith.constant 0 : i32
    %c0_i32_0 = arith.constant 0 : i32
    %c0_i32_1 = arith.constant 0 : i32
    return %c0_i32, %c0_i32_0, %arg1 : i32, i32, i32
  }
  func.func @transform_1(%arg0: i32, %arg1: i32) -> (i32, i32, i32) {
    %c0_i32 = arith.constant 0 : i32
    %c0_i32_0 = arith.constant 0 : i32
    %c0_i32_1 = arith.constant 0 : i32
    %c0_i32_2 = arith.constant 0 : i32
    return %c0_i32, %c0_i32_0, %c0_i32_1 : i32, i32, i32
  }
  func.func @transform_2(%arg0: i32, %arg1: i32) -> (i32, i32) {
    %c0_i32 = arith.constant 0 : i32
    %c0_i32_0 = arith.constant 0 : i32
    %c0_i32_1 = arith.constant 0 : i32
    return %c0_i32, %c0_i32_0 : i32, i32
  }
  func.func @transform_3(%arg0: i32, %arg1: i32) -> (i32, i32, i32, i32, i32) {
    %c0_i32 = arith.constant 0 : i32
    %c0_i32_0 = arith.constant 0 : i32
    %c0_i32_1 = arith.constant 0 : i32
    %c0_i32_2 = arith.constant 0 : i32
    %c0_i32_3 = arith.constant 0 : i32
    return %arg0, %c0_i32, %c0_i32_0, %c0_i32_1, %c0_i32_2 : i32, i32, i32, i32, i32
  }
  func.func @transform_4(%arg0: i32, %arg1: i32) -> (i32, i32, i32) {
    %c0_i32 = arith.constant 0 : i32
    %c0_i32_0 = arith.constant 0 : i32
    return %arg0, %c0_i32, %arg1 : i32, i32, i32
  }
}

</mosaic_0001>

<bundles_post_ra>
// kernel: model1_forward.1
= control target key start
LH: loop header
LB: loop body
LE: loop exit
PB: predicated region body
PF: predicated region fallthrough
CT: control target
= control target key end

     0   :  { %s3181_s15 = smov 0   ;;  %s3183_s16 = smov 0   ;;  %s5856_s0 = inlined_call_operand.vmem [shape: f32[22,22,8], index: 0, kind: input, shape index: {}]   ;;  %s5857_s1 = inlined_call_operand.vmem [shape: f32[9,12,1], index: 1, kind: input, shape index: {}]   ;;  %s5858_s2 = inlined_call_operand.vmem [shape: f32[12,1], index: 2, kind: input, shape index: {}]   ;;  %s5859_s3 = inlined_call_operand.vmem [shape: f32[10,2,10,12,1], index: 3, kind: input, shape index: {}]   ;;  %s5860_s4 = inlined_call_operand.vmem [shape: f32[2,2,8], index: 4, kind: output, shape index: {}]  }
   0x1   :  { %s3185_s17 = smov 0  }
   0x2 LB: > { %s26_s18 = sadd.s32 1, %s3128_s16  ;;  %p2962_p0 = scmp.ge.s32.totalorder %s3132_s17, 1  ;;  %s3132_s17 = sphi %s3185_s17, %s14_s17   ;;  %s3128_s16 = sphi %s3183_s16, %s6316_s16   ;;  %s3124_s15 = sphi %s3181_s15, %s6315_s15  }
   0x3   : > { %p28_p1 = scmp.ge.s32.totalorder %s26_s18, 2  ;;  %p187_p2 = scmp.lt.s32.totalorder %s3132_s17, 3 }
   0x5   : > { %s6318_s18 = smov (%p28_p1, %s26_s18), 0  ;;  %p188_p3 = pnand %p2962_p0, %p187_p2 }
   0x7   : > { %191 = sbr.rel (%p188_p3) target bundleno = 731 (0x2db), region = 36 }
   0xc   : > { %v257_v0 = vld [vmem:[%s5858_s2] sm:$0xff]  ;;  %s224_s21 = smul.u32 5, %s3124_s15  ;;  %p231_p4 = scmp.lt.s32.totalorder %s3124_s15, 1  ;;  %v3154_v1 = vmov 0   ;;  %v258_v2 = vld [vmem:[%s5858_s2 + $0x8] sm:$0xf] }
   0xd   : > { %3085 = vset.pattern.permute.xlu0 %v3154_v1  ;;  %s238_s24 = smul.u32 10, %s3124_s15  ;;  %v3213_v3 = vld [vmem:[%s5857_s1] sm:$0xff]  ;;  %v3218_v4 = vld [vmem:[%s5857_s1 + $0x8] sm:$0xf]  ;;  %v3223_v5 = vld [vmem:[%s5857_s1 + $0x10] sm:$0xff]  ;;  %v3315_v23 = vmov 0.0  }
   0xe   : > { %6008 = vst [vmem:[#allocation2_spill] sm:$0xff] %v3213_v3  ;;  %6009 = vst [vmem:[#allocation3_spill] sm:$0xff] %v3218_v4  ;;  %261 = vperm.xlu0 %3085, %v257_v0   ;;  %p225_p5 = scmp.lt.s32.totalorder %s224_s21, 9  ;;  %v3228_v6 = vld [vmem:[%s5857_s1 + $0x18] sm:$0xf]  ;;  %v3233_v7 = vld [vmem:[%s5857_s1 + $0x20] sm:$0xff] }
   0xf   : > { %6010 = vst [vmem:[#allocation4_spill] sm:$0xff] %v3223_v5  ;;  %6011 = vst [vmem:[#allocation5_spill] sm:$0xff] %v3228_v6  ;;  %v3238_v8 = vld [vmem:[%s5857_s1 + $0x28] sm:$0xf]  ;;  %s232_s11 = scalar_select %p231_p4, %s3124_s15, 1  ;;  %v3244_v9 = vld [vmem:[%s5857_s1 + $0x30] sm:$0xff] }
  0x10   : > { %6012 = vst [vmem:[#allocation6_spill] sm:$0xff] %v3233_v7  ;;  %6013 = vst [vmem:[#allocation7_spill] sm:$0xff] %v3238_v8  ;;  %v3249_v10 = vld [vmem:[%s5857_s1 + $0x38] sm:$0xf]  ;;  %v3254_v11 = vld [vmem:[%s5857_s1 + $0x40] sm:$0xff]  ;;  %s6320_s21 = smov (!%p225_p5, %s224_s21), 9 }
  0x11   : > { %6014 = vst [vmem:[#allocation8_spill] sm:$0xff] %v3244_v9  ;;  %6015 = vst [vmem:[#allocation9_spill] sm:$0xff] %v3249_v10  ;;  %v3259_v12 = vld [vmem:[%s5857_s1 + $0x48] sm:$0xf]  ;;  %v3264_v13 = vld [vmem:[%s5857_s1 + $0x50] sm:$0xff]  ;;  %s2964_s30 = sshll.u32 %s232_s11, 1 }
  0x12   : > { %6016 = vst [vmem:[#allocation10_spill] sm:$0xff] %v3254_v11  ;;  %6017 = vst [vmem:[#allocation11_spill] sm:$0xff] %v3259_v12  ;;  %v3269_v14 = vld [vmem:[%s5857_s1 + $0x58] sm:$0xf]  ;;  %v3274_v15 = vld [vmem:[%s5857_s1 + $0x60] sm:$0xff]  ;;  %266 = vperm.xlu0 %3085, %v258_v2   ;;  %s3018_s12 = smul.u32 320, %s6320_s21  ;;  %s3289_s11 = scalar_lea.vmem %s5860_s4, %s2964_s30 }
  0x13   : > { %6018 = vst [vmem:[#allocation12_spill] sm:$0xff] %v3264_v13  ;;  %6019 = vst [vmem:[#allocation13_spill] sm:$0xff] %v3269_v14  ;;  %v3279_v16 = vld [vmem:[%s5857_s1 + $0x68] sm:$0xf]  ;;  %v3284_v17 = vld [vmem:[%s5857_s1 + $0x70] sm:$0xff]  ;;  %v3317_v24 = vmov 0.0  }
  0x14   : > { %6020 = vst [vmem:[#allocation14_spill] sm:$0xff] %v3274_v15  ;;  %6021 = vst [vmem:[#allocation15_spill] sm:$0xff] %v3279_v16  ;;  %v3294_v18 = vld [vmem:[%s5857_s1 + $0x78] sm:$0xf]  ;;  %v3299_v19 = vld [vmem:[%s5857_s1 + $0x80] sm:$0xff]  ;;  %s3309_s28 = scalar_lea.vmem %s5859_s3, %s3018_s12  ;;  %v3319_v25 = vmov 0.0  }
  0x15   : > { %6022 = vst [vmem:[#allocation16_spill] sm:$0xff] %v3284_v17  ;;  %6023 = vst [vmem:[#allocation17_spill] sm:$0xff] %v3294_v18  ;;  %v3304_v20 = vld [vmem:[%s5857_s1 + $0x88] sm:$0xf]  ;;  %v3321_v26 = vmov 0.0   ;;  %s3323_s29 = smov 0  }
  0x16   : > { %6024 = vst [vmem:[#allocation18_spill] sm:$0xff] %v3299_v19  ;;  %6025 = vst [vmem:[#allocation19_spill] sm:$0xff] %v3304_v20 }
  0x89   : > { %v3311_v21 = vpop.permute.xlu0 %261 }
  0x8a   : > { %6026 = vst [vmem:[#allocation20_spill] sm:$0xff] %v3311_v21 }
  0x8d   : > { %v3313_v22 = vpop.permute.xlu0 %266 }
  0x8e   : > { %6027 = vst [vmem:[#allocation21_spill] sm:$0xff] %v3313_v22 }
  0x8f LB: >> { %6030 = vst [vmem:[#allocation22_spill] sm:$0xff] %v3136_v23  ;;  %6031 = vst [vmem:[#allocation23_spill] sm:$0xff] %v3140_v24  ;;  %v3155_v27 = vmov 0   ;;  %v6034_v5 = vld [vmem:[#allocation4_spill] sm:$0xff]  ;;  %v6035_v3 = vld [vmem:[#allocation2_spill] sm:$0xff]  ;;  %s798_s30 = smul.u32 320, %s3152_s29  ;;  %v284_v2 = vlaneseq  ;;  %v3140_v24 = vphi %v3317_v24, %v6312_v24   ;;  %v3136_v23 = vphi %v3315_v23, %v6311_v23   ;;  %s3152_s29 = sphi %s3323_s29, %s274_s29   ;;  %v3148_v26 = vphi %v3321_v26, %v6314_v26   ;;  %v3144_v25 = vphi %v3319_v25, %v6313_v25  }
  0x90   : >> { %6032 = vst [vmem:[#allocation24_spill] sm:$0xff] %v3144_v25  ;;  %6033 = vst [vmem:[#allocation25_spill] sm:$0xff] %v3148_v26  ;;  %3087 = vset.pattern.permute.xlu1 %v3155_v27  ;;  %3086 = vset.pattern.permute.xlu0 %v3155_v27  ;;  %v6036_v6 = vld [vmem:[#allocation5_spill] sm:$0xff]  ;;  %v6037_v4 = vld [vmem:[#allocation3_spill] sm:$0xff]  ;;  %s2965_s6 = sshll.u32 %s3152_s29, 1  ;;  %s274_s29 = sadd.s32 1, %s3152_s29  }
  0x91   : >> { %v6029_v21 = vld [vmem:[#allocation20_spill] sm:$0xff]  ;;  %328 = vperm.xlu1 %3087, %v6034_v5   ;;  %310 = vperm.xlu0 %3086, %v6035_v3   ;;  %v6038_v8 = vld [vmem:[#allocation7_spill] sm:$0xff]  ;;  %v6039_v7 = vld [vmem:[#allocation6_spill] sm:$0xff]  ;;  %s3358_s5 = scalar_lea.vmem %s3309_s28, %s798_s30  ;;  %s280_s7 = sadd.s32 %s2965_s6, %s238_s24 }
  0x92   : >> { %v6040_v10 = vld [vmem:[#allocation9_spill] sm:$0xff]  ;;  %v6041_v9 = vld [vmem:[#allocation8_spill] sm:$0xff]  ;;  %v6042_v12 = vld [vmem:[#allocation11_spill] sm:$0xff]  ;;  %s281_s8 = smul.u32 24, %s280_s7  ;;  %p271_p6 = scmp.ge.s32.totalorder %s274_s29, 5  }
  0x93   : >> { %v6043_v11 = vld [vmem:[#allocation10_spill] sm:$0xff]  ;;  %v6044_v14 = vld [vmem:[#allocation13_spill] sm:$0xff]  ;;  %v6045_v13 = vld [vmem:[#allocation12_spill] sm:$0xff]  ;;  %vm2792_vm0 = vcmask (%p271_p6), 64512   ;;  %vm2794_vm1 = vcmask (%p271_p6), 60416   ;;  %vm2812_vm2 = vcmask (%p271_p6), 1040384  }
  0x94   : >> { %v6046_v16 = vld [vmem:[#allocation15_spill] sm:$0xff]  ;;  %v6047_v15 = vld [vmem:[#allocation14_spill] sm:$0xff]  ;;  %v6048_v18 = vld [vmem:[#allocation17_spill] sm:$0xff]  ;;  %s3408_s12 = scalar_lea.vmem %s5856_s0, %s281_s8  ;;  %vm2814_vm3 = vcmask (%p271_p6), 58368  }
  0x95   : >> { %v6028_v22 = vld [vmem:[#allocation21_spill] sm:$0xff]  ;;  %333 = vperm.xlu1 %3087, %v6036_v6   ;;  %315 = vperm.xlu0 %3086, %v6037_v4   ;;  %v6049_v17 = vld [vmem:[#allocation16_spill] sm:$0xff]  ;;  %v6050_v20 = vld [vmem:[#allocation19_spill] sm:$0xff] }
  0x96   : >> { %v6051_v19 = vld [vmem:[#allocation18_spill] sm:$0xff]  ;;  %v801_v28 = vld [vmem:[%s3358_s5 + $0x8] sm:$0xf]  ;;  %v803_v30 = vld [vmem:[%s3358_s5 + $0x18] sm:$0xf] }
  0x97   : >> { %v800_v29 = vld [vmem:[%s3358_s5] sm:$0xff]  ;;  %v802_v31 = vld [vmem:[%s3358_s5 + $0x10] sm:$0xff]  ;;  %v805_v32 = vld [vmem:[%s3358_s5 + $0xa8] sm:$0xf] }
  0x98   : >> { %v804_v33 = vld [vmem:[%s3358_s5 + $0xa0] sm:$0xff]  ;;  %v807_v34 = vld [vmem:[%s3358_s5 + $0xb8] sm:$0xf]  ;;  %v806_v35 = vld [vmem:[%s3358_s5 + $0xb0] sm:$0xff] }
  0x99   : >> { %359 = vperm.xlu1 %3087, %v6038_v8   ;;  %354 = vperm.xlu0 %3086, %v6039_v7   ;;  %v2976_v36 = vld [vmem:[%s3358_s5 + $0x28] sm:$0xf]  ;;  %v2975_v37 = vld [vmem:[%s3358_s5 + $0x20] sm:$0xff]  ;;  %v2978_v38 = vld [vmem:[%s3358_s5 + $0x38] sm:$0xf] }
  0x9a   : >> { %v2977_v39 = vld [vmem:[%s3358_s5 + $0x30] sm:$0xff]  ;;  %v2980_v40 = vld [vmem:[%s3358_s5 + $0xc8] sm:$0xf]  ;;  %v2979_v41 = vld [vmem:[%s3358_s5 + $0xc0] sm:$0xff] }
  0x9b   : >> { %v2982_v42 = vld [vmem:[%s3358_s5 + $0xd8] sm:$0xf]  ;;  %v2981_v43 = vld [vmem:[%s3358_s5 + $0xd0] sm:$0xff]  ;;  %v2987_v44 = vld [vmem:[%s3358_s5 + $0x48] sm:$0xf] }
  0x9c   : >> { %v2986_v45 = vld [vmem:[%s3358_s5 + $0x40] sm:$0xff]  ;;  %v2989_v46 = vld [vmem:[%s3358_s5 + $0x58] sm:$0xf]  ;;  %v2988_v47 = vld [vmem:[%s3358_s5 + $0x50] sm:$0xff] }
  0x9d   : >> { %413 = vperm.xlu1 %3087, %v6040_v10   ;;  %408 = vperm.xlu0 %3086, %v6041_v9   ;;  %v2991_v48 = vld [vmem:[%s3358_s5 + $0xe8] sm:$0xf]  ;;  %v2990_v49 = vld [vmem:[%s3358_s5 + $0xe0] sm:$0xff]  ;;  %v2993_v50 = vld [vmem:[%s3358_s5 + $0xf8] sm:$0xf] }
  0x9e   : >> { %v2992_v51 = vld [vmem:[%s3358_s5 + $0xf0] sm:$0xff]  ;;  %v2998_v52 = vld [vmem:[%s3358_s5 + $0x68] sm:$0xf]  ;;  %v2997_v53 = vld [vmem:[%s3358_s5 + $0x60] sm:$0xff] }
  0x9f   : >> { %v3002_v54 = vld [vmem:[%s3358_s5 + $0x108] sm:$0xf]  ;;  %v3001_v55 = vld [vmem:[%s3358_s5 + $0x100] sm:$0xff]  ;;  %v3000_v56 = vld [vmem:[%s3358_s5 + $0x78] sm:$0xf] }
  0xa0   : >> { %v2999_v57 = vld [vmem:[%s3358_s5 + $0x70] sm:$0xff]  ;;  %v3004_v58 = vld [vmem:[%s3358_s5 + $0x118] sm:$0xf]  ;;  %v3009_v60 = vld [vmem:[%s3358_s5 + $0x88] sm:$0xf] }
  0xa1   : >> { %439 = vperm.xlu1 %3087, %v6042_v12   ;;  %434 = vperm.xlu0 %3086, %v6043_v11   ;;  %v3003_v59 = vld [vmem:[%s3358_s5 + $0x110] sm:$0xff]  ;;  %v3008_v61 = vld [vmem:[%s3358_s5 + $0x80] sm:$0xff]  ;;  %v3013_v62 = vld [vmem:[%s3358_s5 + $0x128] sm:$0xf] }
  0xa2   : >> { %v3012_v63 = vld [vmem:[%s3358_s5 + $0x120] sm:$0xff]  ;;  %v3011_v0 = vld [vmem:[%s3358_s5 + $0x98] sm:$0xf]  ;;  %v3010_v1 = vld [vmem:[%s3358_s5 + $0x90] sm:$0xff] }
  0xa3   : >> { %v3015_v27 = vld [vmem:[%s3358_s5 + $0x138] sm:$0xf]  ;;  %v2974_v8 = vld [vmem:[%s3408_s12 + $0x4c] sm:$0x3f] }
  0xa5   : >> { %465 = vperm.xlu1 %3087, %v6044_v14   ;;  %460 = vperm.xlu0 %3086, %v6045_v13  }
  0xa9   : >> { %519 = vperm.xlu1 %3087, %v6046_v16   ;;  %514 = vperm.xlu0 %3086, %v6047_v15  }
  0xad   : >> { %545 = vperm.xlu1 %3087, %v6048_v18   ;;  %540 = vperm.xlu0 %3086, %v6049_v17  }
  0xb1   : >> { %571 = vperm.xlu1 %3087, %v6050_v20   ;;  %566 = vperm.xlu0 %3086, %v6051_v19  }
  0xb5   : >> { %815 = vperm.xlu1 %3087, %v801_v28   ;;  %810 = vperm.xlu0 %3086, %v800_v29   ;;  %v3014_v28 = vld [vmem:[%s3358_s5 + $0x130] sm:$0xff]  ;;  %v285_v29 = vshrl.u32 %v284_v2, 7 }
  0xb9   : >> { %829 = vperm.xlu1 %3087, %v803_v30   ;;  %824 = vperm.xlu0 %3086, %v802_v31   ;;  %v3410_v30 = vsub.s32 0, %v285_v29  ;;  %v3412_v31 = vsub.s32 1, %v285_v29 }
  0xbb   : >> { %6052 = vst [vmem:[#allocation26_spill] sm:$0xff] %v3410_v30  ;;  %6053 = vst [vmem:[#allocation27_spill] sm:$0xff] %v3412_v31  ;;  %v3568_v17 = vrot.slane %v2974_v8, %v3410_v30  ;;  %v3571_v18 = vrot.slane %v2974_v8, %v3412_v31 }
  0xbd   : >> { %843 = vperm.xlu1 %3087, %v805_v32   ;;  %838 = vperm.xlu0 %3086, %v804_v33   ;;  %v3414_v32 = vsub.s32 2, %v285_v29  ;;  %v3416_v33 = vsub.s32 3, %v285_v29  ;;  %6081 = vst [vmem:[#allocation55_spill] sm:$0xff] %v3568_v17  ;;  %6082 = vst [vmem:[#allocation56_spill] sm:$0xff] %v3571_v18 }
  0xbf   : >> { %6054 = vst [vmem:[#allocation28_spill] sm:$0xff] %v3414_v32  ;;  %6055 = vst [vmem:[#allocation29_spill] sm:$0xff] %v3416_v33  ;;  %v3574_v19 = vrot.slane %v2974_v8, %v3414_v32  ;;  %v3577_v20 = vrot.slane %v2974_v8, %v3416_v33 }
  0xc1   : >> { %857 = vperm.xlu1 %3087, %v807_v34   ;;  %852 = vperm.xlu0 %3086, %v806_v35   ;;  %v283_v34 = vld [vmem:[%s3408_s12] sm:$0x3f]  ;;  %v3419_v35 = vsub.s32 4, %v285_v29  ;;  %6083 = vst [vmem:[#allocation57_spill] sm:$0xff] %v3574_v19  ;;  %6084 = vst [vmem:[#allocation58_spill] sm:$0xff] %v3577_v20 }
  0xc3   : >> { %6056 = vst [vmem:[#allocation30_spill] sm:$0xff] %v3419_v35 }
  0xc5   : >> { %1297 = vperm.xlu1 %3087, %v2976_v36   ;;  %1292 = vperm.xlu0 %3086, %v2975_v37   ;;  %v2967_v36 = vld [vmem:[%s3408_s12 + $0x18] sm:$0x3f]  ;;  %v2969_v37 = vld [vmem:[%s3408_s12 + $0x30] sm:$0x3f] }
  0xc9   : >> { %1311 = vperm.xlu1 %3087, %v2978_v38   ;;  %1306 = vperm.xlu0 %3086, %v2977_v39   ;;  %v287_v38 = vrot.slane %v283_v34, %v3410_v30  ;;  %v3425_v39 = vrot.slane %v283_v34, %v3412_v31 }
  0xcd   : >> { %1325 = vperm.xlu1 %3087, %v2980_v40   ;;  %1320 = vperm.xlu0 %3086, %v2979_v41   ;;  %v3427_v40 = vsub.s32 5, %v285_v29  ;;  %v3430_v41 = vrot.slane %v283_v34, %v3414_v32 }
  0xcf   : >> { %6057 = vst [vmem:[#allocation31_spill] sm:$0xff] %v3427_v40 }
  0xd1   : >> { %1339 = vperm.xlu1 %3087, %v2982_v42   ;;  %1334 = vperm.xlu0 %3086, %v2981_v43   ;;  %v3433_v42 = vrot.slane %v283_v34, %v3416_v33  ;;  %v3436_v43 = vrot.slane %v2967_v36, %v3410_v30 }
  0xd5   : >> { %1779 = vperm.xlu1 %3087, %v2987_v44   ;;  %1774 = vperm.xlu0 %3086, %v2986_v45   ;;  %v3439_v44 = vrot.slane %v2967_v36, %v3412_v31  ;;  %v2971_v45 = vld [vmem:[%s3408_s12 + $0x48] sm:$0x3f] }
  0xd6   : >> { %v3501_v2 = vrot.slane %v2971_v45, %v3419_v35 }
  0xd9   : >> { %1793 = vperm.xlu1 %3087, %v2989_v46   ;;  %1788 = vperm.xlu0 %3086, %v2988_v47   ;;  %v3443_v46 = vrot.slane %v2967_v36, %v3414_v32  ;;  %v3446_v47 = vrot.slane %v2967_v36, %v3416_v33 }
  0xdd   : >> { %1807 = vperm.xlu1 %3087, %v2991_v48   ;;  %1802 = vperm.xlu0 %3086, %v2990_v49   ;;  %v3449_v48 = vrot.slane %v2967_v36, %v3419_v35  ;;  %v3452_v49 = vrot.slane %v2969_v37, %v3410_v30 }
  0xe1   : >> { %1821 = vperm.xlu1 %3087, %v2993_v50   ;;  %1816 = vperm.xlu0 %3086, %v2992_v51   ;;  %v3455_v50 = vrot.slane %v2969_v37, %v3412_v31  ;;  %v3458_v51 = vrot.slane %v2969_v37, %v3414_v32 }
  0xe5   : >> { %2261 = vperm.xlu1 %3087, %v2998_v52   ;;  %2256 = vperm.xlu0 %3086, %v2997_v53  }
  0xe9   : >> { %2289 = vperm.xlu1 %3087, %v3002_v54   ;;  %2284 = vperm.xlu0 %3086, %v3001_v55   ;;  %v3465_v54 = vrot.slane %v2969_v37, %v3416_v33  ;;  %v3468_v55 = vrot.slane %v2969_v37, %v3419_v35 }
  0xed   : >> { %2275 = vperm.xlu1 %3087, %v3000_v56   ;;  %2270 = vperm.xlu0 %3086, %v2999_v57   ;;  %v3471_v56 = vrot.slane %v2971_v45, %v3410_v30  ;;  %v3474_v57 = vrot.slane %v2971_v45, %v3412_v31 }
  0xf1   : >> { %2303 = vperm.xlu1 %3087, %v3004_v58   ;;  %2298 = vperm.xlu0 %3086, %v3003_v59   ;;  %v3477_v58 = vld [vmem:[%s3408_s12 + $0x4] sm:$0x3f]  ;;  %v3480_v59 = vrot.slane %v2971_v45, %v3414_v32 }
  0xf2   : >> { %6060 = vst [vmem:[#allocation34_spill] sm:$0xff] %v3477_v58  ;;  %v3512_v29 = vrot.slane %v3477_v58, %v3412_v31  ;;  %v3521_v3 = vrot.slane %v3477_v58, %v3414_v32 }
  0xf4   : >> { %6064 = vst [vmem:[#allocation38_spill] sm:$0xff] %v3512_v29  ;;  %6067 = vst [vmem:[#allocation41_spill] sm:$0xff] %v3521_v3 }
  0xf5   : >> { %2743 = vperm.xlu1 %3087, %v3009_v60   ;;  %2738 = vperm.xlu0 %3086, %v3008_v61   ;;  %v3483_v60 = vrot.slane %v2971_v45, %v3416_v33  ;;  %v3486_v61 = vrot.slane %v283_v34, %v3419_v35 }
  0xf9   : >> { %2771 = vperm.xlu1 %3087, %v3013_v62   ;;  %2766 = vperm.xlu0 %3086, %v3012_v63   ;;  %v3489_v62 = vrot.slane %v283_v34, %v3427_v40  ;;  %v3492_v63 = vrot.slane %v2967_v36, %v3427_v40  ;;  %v2973_v34 = vld [vmem:[%s3408_s12 + $0x34] sm:$0x3f] }
  0xfa   : >> { %v3549_v10 = vrot.slane %v2973_v34, %v3410_v30  ;;  %v3552_v11 = vrot.slane %v2973_v34, %v3412_v31  ;;  %v3555_v12 = vrot.slane %v2973_v34, %v3414_v32  ;;  %v3558_v13 = vrot.slane %v2973_v34, %v3416_v33 }
  0xfb   : >> { %v3561_v14 = vrot.slane %v2973_v34, %v3419_v35 }
  0xfc   : >> { %6074 = vst [vmem:[#allocation48_spill] sm:$0xff] %v3549_v10  ;;  %6075 = vst [vmem:[#allocation49_spill] sm:$0xff] %v3552_v11 }
  0xfd   : >> { %2757 = vperm.xlu1 %3087, %v3011_v0   ;;  %2752 = vperm.xlu0 %3086, %v3010_v1   ;;  %v3495_v0 = vrot.slane %v2969_v37, %v3427_v40  ;;  %v3498_v1 = vld [vmem:[%s3408_s12 + $0x1c] sm:$0x3f]  ;;  %6076 = vst [vmem:[#allocation50_spill] sm:$0xff] %v3555_v12  ;;  %6077 = vst [vmem:[#allocation51_spill] sm:$0xff] %v3558_v13 }
  0xfe   : >> { %6061 = vst [vmem:[#allocation35_spill] sm:$0xff] %v3498_v1  ;;  %v3529_v4 = vrot.slane %v3498_v1, %v3410_v30  ;;  %v3533_v5 = vrot.slane %v3498_v1, %v3412_v31  ;;  %v3537_v6 = vrot.slane %v3498_v1, %v3414_v32  ;;  %v3541_v7 = vrot.slane %v3498_v1, %v3416_v33 }
  0xff   : >> { %v3546_v9 = vrot.slane %v3498_v1, %v3419_v35  ;;  %6078 = vst [vmem:[#allocation52_spill] sm:$0xff] %v3561_v14 }
 0x100   : >> { %6069 = vst [vmem:[#allocation43_spill] sm:$0xff] %v3529_v4  ;;  %6070 = vst [vmem:[#allocation44_spill] sm:$0xff] %v3533_v5 }
 0x101   : >> { %2785 = vperm.xlu1 %3087, %v3015_v27   ;;  %2780 = vperm.xlu0 %3086, %v3014_v28   ;;  %v3504_v27 = vrot.slane %v2971_v45, %v3427_v40  ;;  %v3508_v28 = vrot.slane %v3477_v58, %v3410_v30  ;;  %v3525_v45 = vrot.slane %v3477_v58, %v3416_v33 }
 0x102   : >> { %6071 = vst [vmem:[#allocation45_spill] sm:$0xff] %v3537_v6  ;;  %6072 = vst [vmem:[#allocation46_spill] sm:$0xff] %v3541_v7 }
 0x103   : >> { %6062 = vst [vmem:[#allocation36_spill] sm:$0xff] %v3504_v27  ;;  %6063 = vst [vmem:[#allocation37_spill] sm:$0xff] %v3508_v28 }
 0x104   : >> { %6068 = vst [vmem:[#allocation42_spill] sm:$0xff] %v3525_v45  ;;  %6073 = vst [vmem:[#allocation47_spill] sm:$0xff] %v3546_v9 }
 0x10c   : >> { %v3460_v52 = vpop.permute.xlu1 %328  ;;  %v3462_v53 = vpop.permute.xlu0 %310 }
 0x10d   : >> { %6058 = vst [vmem:[#allocation32_spill] sm:$0xff] %v3460_v52  ;;  %6059 = vst [vmem:[#allocation33_spill] sm:$0xff] %v3462_v53  ;;  %v318_v24 = vmul.f32 %v3462_v53, %v287_v38  ;;  %v320_v34 = vmul.f32 %v3462_v53, %v3425_v39  ;;  %v336_v23 = vmul.f32 %v3460_v52, %v3425_v39 }
 0x10e   : >> { %v340_v30 = vmul.f32 %v3460_v52, %v3430_v41  ;;  %v606_v31 = vmul.f32 %v3436_v43, %v3462_v53  ;;  %v608_v32 = vmul.f32 %v3439_v44, %v3462_v53  ;;  %v614_v8 = vmul.f32 %v3439_v44, %v3460_v52 }
 0x10f   : >> { %v618_v33 = vmul.f32 %v3443_v46, %v3460_v52  ;;  %v338_v7 = vadd.f32 %v336_v23, %v318_v24 }
 0x110   : >> { %v3515_v36 = vpop.permute.xlu1 %333  ;;  %v3517_v37 = vpop.permute.xlu0 %315  ;;  %v342_v6 = vadd.f32 %v340_v30, %v320_v34  ;;  %v616_v3 = vadd.f32 %v614_v8, %v606_v31 }
 0x111   : >> { %6065 = vst [vmem:[#allocation39_spill] sm:$0xff] %v3515_v36  ;;  %6066 = vst [vmem:[#allocation40_spill] sm:$0xff] %v3517_v37  ;;  %v319_v14 = vmul.f32 %v3517_v37, %v287_v38  ;;  %v321_v9 = vmul.f32 %v3517_v37, %v3425_v39  ;;  %v337_v20 = vmul.f32 %v3515_v36, %v3425_v39 }
 0x112   : >> { %v341_v19 = vmul.f32 %v3515_v36, %v3430_v41  ;;  %v607_v13 = vmul.f32 %v3436_v43, %v3517_v37  ;;  %v609_v12 = vmul.f32 %v3439_v44, %v3517_v37  ;;  %v615_v38 = vmul.f32 %v3439_v44, %v3515_v36 }
 0x113   : >> { %v619_v11 = vmul.f32 %v3443_v46, %v3515_v36  ;;  %v339_v45 = vadd.f32 %v337_v20, %v319_v14  ;;  %v620_v29 = vadd.f32 %v618_v33, %v608_v32 }
 0x114   : >> { %v3563_v15 = vpop.permute.xlu1 %359  ;;  %v3565_v16 = vpop.permute.xlu0 %354  ;;  %v343_v1 = vadd.f32 %v341_v19, %v321_v9  ;;  %v617_v24 = vadd.f32 %v615_v38, %v607_v13 }
 0x115   : >> { %6079 = vst [vmem:[#allocation53_spill] sm:$0xff] %v3563_v15  ;;  %6080 = vst [vmem:[#allocation54_spill] sm:$0xff] %v3565_v16  ;;  %v363_v39 = vmul.f32 %v3563_v15, %v3430_v41  ;;  %v367_v10 = vmul.f32 %v3563_v15, %v3433_v42  ;;  %v631_v5 = vmul.f32 %v3443_v46, %v3563_v15 }
 0x116   : >> { %v635_v4 = vmul.f32 %v3446_v47, %v3563_v15  ;;  %v362_v26 = vmul.f32 %v3565_v16, %v3430_v41  ;;  %v366_v25 = vmul.f32 %v3565_v16, %v3433_v42  ;;  %v621_v30 = vadd.f32 %v619_v11, %v609_v12 }
 0x117   : >> { %v630_v34 = vmul.f32 %v3443_v46, %v3565_v16  ;;  %v634_v40 = vmul.f32 %v3446_v47, %v3565_v16  ;;  %v365_v58 = vadd.f32 %v363_v39, %v339_v45  ;;  %v369_v35 = vadd.f32 %v367_v10, %v343_v1 }
 0x118   : >> { %v3601_v18 = vpop.permute.xlu1 %413  ;;  %v3603_v17 = vpop.permute.xlu0 %408  ;;  %v633_v19 = vadd.f32 %v631_v5, %v617_v24  ;;  %v637_v20 = vadd.f32 %v635_v4, %v621_v30  ;;  %v364_v31 = vadd.f32 %v362_v26, %v338_v7  ;;  %v368_v32 = vadd.f32 %v366_v25, %v342_v6 }
 0x119   : >> { %6085 = vst [vmem:[#allocation59_spill] sm:$0xff] %v3601_v18  ;;  %6086 = vst [vmem:[#allocation60_spill] sm:$0xff] %v3603_v17  ;;  %v417_v14 = vmul.f32 %v3601_v18, %v3436_v43  ;;  %v421_v9 = vmul.f32 %v3601_v18, %v3439_v44  ;;  %v647_v11 = vmul.f32 %v3452_v49, %v3601_v18 }
 0x11a   : >> { %v651_v12 = vmul.f32 %v3455_v50, %v3601_v18  ;;  %v416_v13 = vmul.f32 %v3603_v17, %v3436_v43  ;;  %v420_v10 = vmul.f32 %v3603_v17, %v3439_v44  ;;  %v632_v5 = vadd.f32 %v630_v34, %v616_v3 }
 0x11b   : >> { %v636_v4 = vadd.f32 %v634_v40, %v620_v29  ;;  %v646_v6 = vmul.f32 %v3452_v49, %v3603_v17  ;;  %v650_v7 = vmul.f32 %v3455_v50, %v3603_v17  ;;  %v419_v25 = vadd.f32 %v417_v14, %v365_v58 }
 0x11c   : >> { %v3625_v28 = vpop.permute.xlu1 %439  ;;  %v3627_v23 = vpop.permute.xlu0 %434  ;;  %v423_v26 = vadd.f32 %v421_v9, %v369_v35  ;;  %v649_v58 = vadd.f32 %v647_v11, %v633_v19  ;;  %v653_v35 = vadd.f32 %v651_v12, %v637_v20  ;;  %v418_v38 = vadd.f32 %v416_v13, %v364_v31 }
 0x11d   : >> { %6087 = vst [vmem:[#allocation61_spill] sm:$0xff] %v3625_v28  ;;  %6088 = vst [vmem:[#allocation62_spill] sm:$0xff] %v3627_v23  ;;  %v443_v43 = vmul.f32 %v3625_v28, %v3439_v44  ;;  %v447_v45 = vmul.f32 %v3625_v28, %v3443_v46  ;;  %v663_v8 = vmul.f32 %v3455_v50, %v3625_v28 }
 0x11e   : >> { %v667_v3 = vmul.f32 %v3458_v51, %v3625_v28  ;;  %v442_v40 = vmul.f32 %v3627_v23, %v3439_v44  ;;  %v446_v29 = vmul.f32 %v3627_v23, %v3443_v46  ;;  %v422_v39 = vadd.f32 %v420_v10, %v368_v32 }
 0x11f   : >> { %v648_v34 = vadd.f32 %v646_v6, %v632_v5  ;;  %v652_v14 = vadd.f32 %v650_v7, %v636_v4  ;;  %v662_v9 = vmul.f32 %v3455_v50, %v3627_v23  ;;  %v666_v17 = vmul.f32 %v3458_v51, %v3627_v23 }
 0x120   : >> { %v3645_v33 = vpop.permute.xlu1 %465  ;;  %v3647_v1 = vpop.permute.xlu0 %460  ;;  %v445_v44 = vadd.f32 %v443_v43, %v419_v25  ;;  %v449_v16 = vadd.f32 %v447_v45, %v423_v26  ;;  %v665_v31 = vadd.f32 %v663_v8, %v649_v58  ;;  %v669_v32 = vadd.f32 %v667_v3, %v653_v35 }
 0x121   : >> { %6089 = vst [vmem:[#allocation63_spill] sm:$0xff] %v3645_v33  ;;  %6090 = vst [vmem:[#allocation64_spill] sm:$0xff] %v3647_v1  ;;  %v469_v19 = vmul.f32 %v3645_v33, %v3443_v46  ;;  %v473_v20 = vmul.f32 %v3645_v33, %v3446_v47  ;;  %v444_v11 = vadd.f32 %v442_v40, %v418_v38 }
 0x122   : >> { %v448_v12 = vadd.f32 %v446_v29, %v422_v39  ;;  %v679_v13 = vmul.f32 %v3458_v51, %v3645_v33  ;;  %v683_v10 = vmul.f32 %v3465_v54, %v3645_v33  ;;  %v468_v5 = vmul.f32 %v3647_v1, %v3443_v46 }
 0x123   : >> { %v472_v4 = vmul.f32 %v3647_v1, %v3446_v47  ;;  %v664_v7 = vadd.f32 %v662_v9, %v648_v34  ;;  %v668_v25 = vadd.f32 %v666_v17, %v652_v14  ;;  %v678_v26 = vmul.f32 %v3458_v51, %v3647_v1 }
 0x124   : >> { %v3665_v24 = vpop.permute.xlu1 %519  ;;  %v3667_v30 = vpop.permute.xlu0 %514  ;;  %v682_v43 = vmul.f32 %v3465_v54, %v3647_v1  ;;  %v471_v8 = vadd.f32 %v469_v19, %v445_v44  ;;  %v475_v3 = vadd.f32 %v473_v20, %v449_v16  ;;  %v681_v39 = vadd.f32 %v679_v13, %v665_v31 }
 0x125   : >> { %6091 = vst [vmem:[#allocation65_spill] sm:$0xff] %v3665_v24  ;;  %6092 = vst [vmem:[#allocation66_spill] sm:$0xff] %v3667_v30  ;;  %v523_v40 = vmul.f32 %v3665_v24, %v3452_v49  ;;  %v527_v29 = vmul.f32 %v3665_v24, %v3455_v50  ;;  %v723_v58 = vmul.f32 %v3471_v56, %v3665_v24 }
 0x126   : >> { %v727_v17 = vmul.f32 %v3474_v57, %v3665_v24  ;;  %v522_v35 = vmul.f32 %v3667_v30, %v3452_v49  ;;  %v526_v38 = vmul.f32 %v3667_v30, %v3455_v50  ;;  %v685_v16 = vadd.f32 %v683_v10, %v669_v32 }
 0x127   : >> { %v470_v34 = vadd.f32 %v468_v5, %v444_v11  ;;  %v474_v14 = vadd.f32 %v472_v4, %v448_v12  ;;  %v680_v9 = vadd.f32 %v678_v26, %v664_v7  ;;  %v684_v44 = vadd.f32 %v682_v43, %v668_v25 }
 0x128   : >> { %v3685_v6 = vpop.permute.xlu1 %545  ;;  %v3691_v45 = vpop.permute.xlu0 %540  ;;  %v722_v19 = vmul.f32 %v3471_v56, %v3667_v30  ;;  %v726_v20 = vmul.f32 %v3474_v57, %v3667_v30  ;;  %v525_v23 = vadd.f32 %v523_v40, %v471_v8  ;;  %v529_v27 = vadd.f32 %v527_v29, %v475_v3 }
 0x129   : >> { %6093 = vst [vmem:[#allocation67_spill] sm:$0xff] %v3685_v6  ;;  %6094 = vst [vmem:[#allocation68_spill] sm:$0xff] %v3691_v45  ;;  %v549_v49 = vmul.f32 %v3685_v6, %v3455_v50  ;;  %v553_v31 = vmul.f32 %v3685_v6, %v3458_v51  ;;  %v725_v32 = vadd.f32 %v723_v58, %v681_v39 }
 0x12a   : >> { %v729_v11 = vadd.f32 %v727_v17, %v685_v16  ;;  %v524_v12 = vadd.f32 %v522_v35, %v470_v34  ;;  %v528_v13 = vadd.f32 %v526_v38, %v474_v14  ;;  %v739_v56 = vmul.f32 %v3474_v57, %v3685_v6 }
 0x12b   : >> { %v743_v5 = vmul.f32 %v3480_v59, %v3685_v6  ;;  %v548_v4 = vmul.f32 %v3691_v45, %v3455_v50  ;;  %v552_v7 = vmul.f32 %v3691_v45, %v3458_v51  ;;  %v724_v43 = vadd.f32 %v722_v19, %v680_v9 }
 0x12c   : >> { %v3709_v1 = vpop.permute.xlu1 %571  ;;  %v3715_v10 = vpop.permute.xlu0 %566  ;;  %v728_v8 = vadd.f32 %v726_v20, %v684_v44  ;;  %v551_v3 = vadd.f32 %v549_v49, %v525_v23  ;;  %v555_v40 = vadd.f32 %v553_v31, %v529_v27  ;;  %v738_v29 = vmul.f32 %v3474_v57, %v3691_v45 }
 0x12d   : >> { %6095 = vst [vmem:[#allocation69_spill] sm:$0xff] %v3709_v1  ;;  %6096 = vst [vmem:[#allocation70_spill] sm:$0xff] %v3715_v10  ;;  %v575_v25 = vmul.f32 %v3709_v1, %v3458_v51  ;;  %v579_v26 = vmul.f32 %v3709_v1, %v3465_v54  ;;  %v742_v58 = vmul.f32 %v3480_v59, %v3691_v45 }
 0x12e   : >> { %v755_v50 = vmul.f32 %v3480_v59, %v3709_v1  ;;  %v759_v17 = vmul.f32 %v3483_v60, %v3709_v1  ;;  %v574_v35 = vmul.f32 %v3715_v10, %v3458_v51  ;;  %v578_v38 = vmul.f32 %v3715_v10, %v3465_v54 }
 0x12f   : >> { %v741_v23 = vadd.f32 %v739_v56, %v725_v32  ;;  %v745_v27 = vadd.f32 %v743_v5, %v729_v11  ;;  %v550_v39 = vadd.f32 %v548_v4, %v524_v12  ;;  %v554_v16 = vadd.f32 %v552_v7, %v528_v13 }
 0x130   : >> { %v577_v57 = vadd.f32 %v575_v25, %v551_v3  ;;  %v581_v34 = vadd.f32 %v579_v26, %v555_v40  ;;  %v754_v14 = vmul.f32 %v3480_v59, %v3715_v10  ;;  %v758_v9 = vmul.f32 %v3483_v60, %v3715_v10 }
 0x131   : >> { %v740_v44 = vadd.f32 %v738_v29, %v724_v43  ;;  %v744_v19 = vadd.f32 %v742_v58, %v728_v8  ;;  %v3747_v20 = vmul.f32 %v3462_v53, %v3430_v41  ;;  %v3751_v49 = vmul.f32 %v3462_v53, %v3433_v42 }
 0x132   : >> { %v757_v31 = vadd.f32 %v755_v50, %v741_v23  ;;  %v761_v32 = vadd.f32 %v759_v17, %v745_v27  ;;  %v576_v11 = vadd.f32 %v574_v35, %v550_v39  ;;  %v580_v12 = vadd.f32 %v578_v38, %v554_v16 }
 0x133   : >> { %v323_v13 = vmul.f32 %v3517_v37, %v3430_v41  ;;  %v325_v56 = vmul.f32 %v3517_v37, %v3433_v42  ;;  %v345_v5 = vmul.f32 %v3515_v36, %v3433_v42  ;;  %v349_v4 = vmul.f32 %v3515_v36, %v3486_v61 }
 0x134   : >> { %v591_v7 = vadd.f32 %v577_v57, %v6028_v22  ;;  %v595_v25 = vadd.f32 %v581_v34, %v6028_v22  ;;  %v756_v26 = vadd.f32 %v754_v14, %v740_v44  ;;  %v760_v43 = vadd.f32 %v758_v9, %v744_v19 }
 0x135   : >> { %v371_v8 = vmul.f32 %v3563_v15, %v3486_v61  ;;  %v375_v41 = vmul.f32 %v3563_v15, %v3489_v62  ;;  %v3769_v3 = vmul.f32 %v3460_v52, %v3433_v42  ;;  %v3773_v40 = vmul.f32 %v3460_v52, %v3486_v61 }
 0x136   : >> { %v771_v29 = vadd.f32 %v757_v31, %v6028_v22  ;;  %v775_v58 = vadd.f32 %v761_v32, %v6028_v22  ;;  %v590_v50 = vadd.f32 %v576_v11, %v6029_v21  ;;  %v594_v17 = vadd.f32 %v580_v12, %v6029_v21 }
 0x137   : >> { %v347_v35 = vadd.f32 %v345_v5, %v323_v13  ;;  %v351_v38 = vadd.f32 %v349_v4, %v325_v56  ;;  %v425_v23 = vmul.f32 %v3601_v18, %v3443_v46  ;;  %v429_v42 = vmul.f32 %v3601_v18, %v3446_v47 }
 0x138   : >> { %v593_v27 = vmax.f32 %v591_v7, 0.0  ;;  %v597_v39 = vmax.f32 %v595_v25, 0.0  ;;  %v770_v16 = vadd.f32 %v756_v26, %v6029_v21  ;;  %v774_v57 = vadd.f32 %v760_v43, %v6029_v21 }
 0x139   : >> { %v373_v34 = vadd.f32 %v371_v8, %v347_v35  ;;  %v377_v14 = vadd.f32 %v375_v41, %v351_v38  ;;  %v451_v9 = vmul.f32 %v3625_v28, %v3446_v47  ;;  %v455_v44 = vmul.f32 %v3625_v28, %v3449_v48 }
 0x13a   : >> { %v773_v19 = vmax.f32 %v771_v29, 0.0  ;;  %v777_v31 = vmax.f32 %v775_v58, 0.0  ;;  %v592_v32 = vmax.f32 %v590_v50, 0.0  ;;  %v596_v11 = vmax.f32 %v594_v17, 0.0 }
 0x13b   : >> { %v427_v12 = vadd.f32 %v425_v23, %v373_v34  ;;  %v431_v13 = vadd.f32 %v429_v42, %v377_v14  ;;  %v477_v56 = vmul.f32 %v3645_v33, %v3449_v48  ;;  %v481_v5 = vmul.f32 %v3645_v33, %v3492_v63 }
 0x13c   : >> { %v611_v4 = vmul.f32 %v3443_v46, %v3517_v37  ;;  %v613_v7 = vmul.f32 %v3446_v47, %v3517_v37  ;;  %v623_v25 = vmul.f32 %v3446_v47, %v3515_v36  ;;  %v627_v26 = vmul.f32 %v3449_v48, %v3515_v36 }
 0x13d   : >> { %v453_v43 = vadd.f32 %v451_v9, %v427_v12  ;;  %v457_v8 = vadd.f32 %v455_v44, %v431_v13  ;;  %v531_v41 = vmul.f32 %v3665_v24, %v3458_v51  ;;  %v535_v29 = vmul.f32 %v3665_v24, %v3465_v54 }
 0x13e   : >> { %v772_v58 = vmax.f32 %v770_v16, 0.0  ;;  %v776_v50 = vmax.f32 %v774_v57, 0.0  ;;  %v639_v17 = vmul.f32 %v3449_v48, %v3563_v15  ;;  %v643_v35 = vmul.f32 %v3492_v63, %v3563_v15 }
 0x13f   : >> { %v479_v38 = vadd.f32 %v477_v56, %v453_v43  ;;  %v483_v23 = vadd.f32 %v481_v5, %v457_v8  ;;  %v557_v42 = vmul.f32 %v3685_v6, %v3465_v54  ;;  %v561_v34 = vmul.f32 %v3685_v6, %v3468_v55 }
 0x140   : >> { %v625_v14 = vadd.f32 %v623_v25, %v611_v4  ;;  %v629_v9 = vadd.f32 %v627_v26, %v613_v7  ;;  %v655_v16 = vmul.f32 %v3458_v51, %v3601_v18  ;;  %v659_v57 = vmul.f32 %v3465_v54, %v3601_v18 }
 0x141   : >> { %v533_v44 = vadd.f32 %v531_v41, %v479_v38  ;;  %v537_v12 = vadd.f32 %v535_v29, %v483_v23  ;;  %v583_v13 = vmul.f32 %v3709_v1, %v3468_v55  ;;  %v587_v56 = vmul.f32 %v3709_v1, %v3495_v0 }
 0x142   : >> { %v641_v5 = vadd.f32 %v639_v17, %v625_v14  ;;  %v645_v43 = vadd.f32 %v643_v35, %v629_v9  ;;  %v671_v4 = vmul.f32 %v3465_v54, %v3625_v28  ;;  %v675_v7 = vmul.f32 %v3468_v55, %v3625_v28 }
 0x143   : >> { %v787_v25 = vmax.f32 %v593_v27, %v773_v19  ;;  %v789_v26 = vmax.f32 %v597_v39, %v777_v31  ;;  %v559_v8 = vadd.f32 %v557_v42, %v533_v44  ;;  %v563_v18 = vadd.f32 %v561_v34, %v537_v12  ;;  %v6098_v42 = vld [vmem:[#allocation54_spill] sm:$0xff] }
 0x144   : >> { %v657_v41 = vadd.f32 %v655_v16, %v641_v5  ;;  %v661_v29 = vadd.f32 %v659_v57, %v645_v43  ;;  %v687_v38 = vmul.f32 %v3468_v55, %v3645_v33  ;;  %v691_v23 = vmul.f32 %v3495_v0, %v3645_v33 }
 0x145   : >> { %v786_v17 = vmax.f32 %v592_v32, %v772_v58  ;;  %v788_v35 = vmax.f32 %v596_v11, %v776_v50  ;;  %v585_v14 = vadd.f32 %v583_v13, %v559_v8  ;;  %v589_v9 = vadd.f32 %v587_v56, %v563_v18  ;;  %v6097_v11 = vld [vmem:[#allocation36_spill] sm:$0xff] }
 0x146   : >> { %v673_v15 = vadd.f32 %v671_v4, %v657_v41  ;;  %v677_v21 = vadd.f32 %v675_v7, %v661_v29  ;;  %v731_v27 = vmul.f32 %v3480_v59, %v3665_v24  ;;  %v735_v39 = vmul.f32 %v3483_v60, %v3665_v24  ;;  %v6099_v56 = vld [vmem:[#allocation60_spill] sm:$0xff]  ;;  %v6100_v4 = vld [vmem:[#allocation30_spill] sm:$0xff] }
 0x147   : >> { %v747_v19 = vmul.f32 %v3483_v60, %v3685_v6  ;;  %v751_v31 = vmul.f32 %v3501_v2, %v3685_v6  ;;  %v763_v32 = vmul.f32 %v3501_v2, %v3709_v1  ;;  %v767_v18 = vmul.f32 %v6097_v11, %v3709_v1  ;;  %v6101_v7 = vld [vmem:[#allocation34_spill] sm:$0xff] }
 0x148   : >> { %v689_v58 = vadd.f32 %v687_v38, %v673_v15  ;;  %v693_v50 = vadd.f32 %v691_v23, %v677_v21  ;;  %v370_v34 = vmul.f32 %v6098_v42, %v3486_v61  ;;  %v374_v16 = vmul.f32 %v6098_v42, %v3489_v62 }
 0x149   : >> { %v3846_v57 = vadd.f32 %v585_v14, %v6028_v22  ;;  %v3849_v44 = vadd.f32 %v589_v9, %v6028_v22  ;;  %v346_v12 = vadd.f32 %v3769_v3, %v3747_v20  ;;  %v350_v13 = vadd.f32 %v3773_v40, %v3751_v49  ;;  %v6102_v20 = vld [vmem:[#allocation31_spill] sm:$0xff] }
 0x14a   : >> { %v733_v15 = vadd.f32 %v731_v27, %v689_v58  ;;  %v737_v21 = vadd.f32 %v735_v39, %v693_v50  ;;  %v424_v61 = vmul.f32 %v6099_v56, %v3443_v46  ;;  %v428_v62 = vmul.f32 %v6099_v56, %v3446_v47  ;;  %v6104_v50 = vld [vmem:[#allocation64_spill] sm:$0xff] }
 0x14b   : >> { %v3859_v5 = vmax.f32 %v787_v25, %v789_v26  ;;  %v3861_v43 = vmax.f32 %v786_v17, %v788_v35  ;;  %v3865_v8 = vrot.slane %v6101_v7, %v6100_v4  ;;  %v3869_v3 = vrot.slane %v6101_v7, %v6102_v20  ;;  %v6103_v25 = vld [vmem:[#allocation62_spill] sm:$0xff] }
 0x14c   : >> { %v749_v49 = vadd.f32 %v747_v19, %v733_v15  ;;  %v753_v40 = vadd.f32 %v751_v31, %v737_v21  ;;  %v372_v41 = vadd.f32 %v370_v34, %v346_v12  ;;  %v376_v29 = vadd.f32 %v374_v16, %v350_v13 }
 0x14d   : >> { %v601_v38 = vmax.f32 %v3846_v57, 0.0  ;;  %v605_v23 = vmax.f32 %v3849_v44, 0.0  ;;  %v450_v26 = vmul.f32 %v6103_v25, %v3446_v47  ;;  %v454_v17 = vmul.f32 %v6103_v25, %v3449_v48 }
 0x14e   : >> { %v765_v35 = vadd.f32 %v763_v32, %v749_v49  ;;  %v769_v14 = vadd.f32 %v767_v18, %v753_v40  ;;  %v426_v9 = vadd.f32 %v424_v61, %v372_v41  ;;  %v430_v27 = vadd.f32 %v428_v62, %v376_v29  ;;  %v816_v49 = vpop.permute.xlu1 %815 }
 0x14f   : >> { %v610_v39 = vmul.f32 %v3443_v46, %v3462_v53  ;;  %v612_v19 = vmul.f32 %v3446_v47, %v3462_v53  ;;  %v622_v31 = vmul.f32 %v3446_v47, %v3460_v52  ;;  %v626_v58 = vmul.f32 %v3449_v48, %v3460_v52 }
 0x150   : >> { %v476_v34 = vmul.f32 %v6104_v50, %v3449_v48  ;;  %v480_v32 = vmul.f32 %v6104_v50, %v3492_v63  ;;  %v530_v18 = vmul.f32 %v3667_v30, %v3458_v51  ;;  %v534_v46 = vmul.f32 %v3667_v30, %v3465_v54 }
 0x151   : >> { %v452_v16 = vadd.f32 %v450_v26, %v426_v9  ;;  %v456_v57 = vadd.f32 %v454_v17, %v430_v27  ;;  %v638_v47 = vmul.f32 %v3449_v48, %v6098_v42  ;;  %v642_v44 = vmul.f32 %v3492_v63, %v6098_v42 }
 0x152   : >> { %v779_v12 = vadd.f32 %v765_v35, %v6028_v22  ;;  %v783_v13 = vadd.f32 %v769_v14, %v6028_v22  ;;  %v556_v15 = vmul.f32 %v3691_v45, %v3465_v54  ;;  %v560_v21 = vmul.f32 %v3691_v45, %v3468_v55 }
 0x153   : >> { %v624_v61 = vadd.f32 %v622_v31, %v610_v39  ;;  %v628_v62 = vadd.f32 %v626_v58, %v612_v19  ;;  %v654_v7 = vmul.f32 %v3458_v51, %v6099_v56  ;;  %v658_v48 = vmul.f32 %v3465_v54, %v6099_v56  ;;  %v811_v19 = vpop.permute.xlu0 %810 }
 0x154   : >> { %v478_v63 = vadd.f32 %v476_v34, %v452_v16  ;;  %v482_v40 = vadd.f32 %v480_v32, %v456_v57  ;;  %v582_v41 = vmul.f32 %v3715_v10, %v3468_v55  ;;  %v586_v29 = vmul.f32 %v3715_v10, %v3495_v0 }
 0x155   : >> { %v640_v26 = vadd.f32 %v638_v47, %v624_v61  ;;  %v644_v17 = vadd.f32 %v642_v44, %v628_v62  ;;  %v670_v35 = vmul.f32 %v3465_v54, %v6103_v25  ;;  %v674_v51 = vmul.f32 %v3468_v55, %v6103_v25 }
 0x156   : >> { %v781_v14 = vmax.f32 %v779_v12, 0.0  ;;  %v785_v9 = vmax.f32 %v783_v13, 0.0  ;;  %v532_v27 = vadd.f32 %v530_v18, %v478_v63  ;;  %v536_v39 = vadd.f32 %v534_v46, %v482_v40  ;;  %v830_v13 = vpop.permute.xlu1 %829  ;;  %v6105_v63 = vld [vmem:[#allocation37_spill] sm:$0xff] }
 0x157   : >> { %v656_v31 = vadd.f32 %v654_v7, %v640_v26  ;;  %v660_v58 = vadd.f32 %v658_v48, %v644_v17  ;;  %v686_v34 = vmul.f32 %v3468_v55, %v6104_v50  ;;  %v690_v32 = vmul.f32 %v3495_v0, %v6104_v50  ;;  %v6108_v17 = vld [vmem:[#allocation41_spill] sm:$0xff] }
 0x158   : >> { %v819_v16 = vmul.f32 %v816_v49, %v3859_v5  ;;  %v818_v54 = vmul.f32 %v811_v19, %v3861_v43  ;;  %v558_v57 = vadd.f32 %v556_v15, %v532_v27  ;;  %v562_v47 = vadd.f32 %v560_v21, %v536_v39  ;;  %v6112_v27 = vld [vmem:[#allocation35_spill] sm:$0xff] }
 0x159   : >> { %v672_v44 = vadd.f32 %v670_v35, %v656_v31  ;;  %v676_v12 = vadd.f32 %v674_v51, %v660_v58  ;;  %v730_v18 = vmul.f32 %v3480_v59, %v3667_v30  ;;  %v734_v46 = vmul.f32 %v3483_v60, %v3667_v30  ;;  %v6110_v51 = vld [vmem:[#allocation20_spill] sm:$0xff] }
 0x15a   : >> { %v791_v61 = vmax.f32 %v601_v38, %v781_v14  ;;  %v793_v55 = vmax.f32 %v605_v23, %v785_v9  ;;  %v584_v62 = vadd.f32 %v582_v41, %v558_v57  ;;  %v588_v7 = vadd.f32 %v586_v29, %v562_v47  ;;  %v6106_v23 = vld [vmem:[#allocation38_spill] sm:$0xff]  ;;  %v3937_v41 = vpop.permute.xlu0 %824  ;;  %v6111_v14 = vld [vmem:[#allocation53_spill] sm:$0xff]  ;;  %v6115_v57 = vld [vmem:[#allocation24_spill] sm:$0xff] }
 0x15b   : >> { %v688_v0 = vadd.f32 %v686_v34, %v672_v44  ;;  %v692_v48 = vadd.f32 %v690_v32, %v676_v12  ;;  %v746_v49 = vmul.f32 %v3483_v60, %v3691_v45  ;;  %v750_v15 = vmul.f32 %v3501_v2, %v3691_v45  ;;  %6107 = vst [vmem:[#allocation36_spill] sm:$0xff] %v3937_v41  ;;  %v6114_v34 = vld [vmem:[#allocation42_spill] sm:$0xff]  ;;  %v6117_v44 = vld [vmem:[#allocation25_spill] sm:$0xff] }
 0x15c   : >> { %v762_v21 = vmul.f32 %v3501_v2, %v3715_v10  ;;  %v766_v59 = vmul.f32 %v6097_v11, %v3715_v10  ;;  %v890_v38 = vmul.f32 %v6105_v63, %v3517_v37  ;;  %v898_v40 = vmul.f32 %v6106_v23, %v3515_v36 }
 0x15d   : >> { %v732_v29 = vadd.f32 %v730_v18, %v688_v0  ;;  %v736_v26 = vadd.f32 %v734_v46, %v692_v48  ;;  %v892_v60 = vmul.f32 %v6106_v23, %v3517_v37  ;;  %v902_v35 = vmul.f32 %v6108_v17, %v3515_v36  ;;  %v844_v18 = vpop.permute.xlu1 %843 }
 0x15e   : >> { %v3943_v2 = vmax.f32 %v791_v61, %v793_v55  ;;  %v3946_v11 = vadd.f32 %v584_v62, %v6110_v51  ;;  %v914_v9 = vmul.f32 %v6108_v17, %v6111_v14  ;;  %v3952_v39 = vrot.slane %v6112_v27, %v6102_v20  ;;  %v6119_v61 = vld [vmem:[#allocation59_spill] sm:$0xff] }
 0x15f   : >> { %v3955_v19 = vadd.f32 %v588_v7, %v6110_v51  ;;  %v748_v31 = vadd.f32 %v746_v49, %v732_v29  ;;  %v752_v58 = vadd.f32 %v750_v15, %v736_v26  ;;  %v918_v32 = vmul.f32 %v6114_v34, %v6111_v14  ;;  %v6120_v55 = vld [vmem:[#allocation43_spill] sm:$0xff]  ;;  %v6121_v49 = vld [vmem:[#allocation44_spill] sm:$0xff] }
 0x160   : >> { %6109 = vst [vmem:[#allocation60_spill] sm:$0xff] %v3943_v2  ;;  %6113 = vst [vmem:[#allocation34_spill] sm:$0xff] %v3952_v39  ;;  %v3960_v47 = vadd.f32 %v6115_v57, %v819_v16  ;;  %v3963_v12 = vadd.f32 %v6117_v44, %v818_v54  ;;  %v900_v46 = vadd.f32 %v898_v40, %v890_v38  ;;  %v6125_v57 = vld [vmem:[#allocation46_spill] sm:$0xff] }
 0x161   : >> { %v955_v62 = vmul.f32 %v6120_v55, %v6119_v61  ;;  %v764_v0 = vadd.f32 %v762_v21, %v748_v31  ;;  %v768_v48 = vadd.f32 %v766_v59, %v752_v58  ;;  %v904_v7 = vadd.f32 %v902_v35, %v892_v60  ;;  %v839_v21 = vpop.permute.xlu0 %838  ;;  %v6124_v60 = vld [vmem:[#allocation45_spill] sm:$0xff] }
 0x162   : >> { %6116 = vst [vmem:[#allocation37_spill] sm:$0xff] %v3960_v47  ;;  %6118 = vst [vmem:[#allocation38_spill] sm:$0xff] %v3963_v12  ;;  %v959_v15 = vmul.f32 %v6121_v49, %v6119_v61  ;;  %v3970_v29 = vmul.f32 %v830_v13, %v3943_v2  ;;  %v916_v26 = vadd.f32 %v914_v9, %v900_v46  ;;  %v6129_v12 = vld [vmem:[#allocation50_spill] sm:$0xff] }
 0x163   : >> { %v971_v54 = vmul.f32 %v6121_v49, %v3625_v28  ;;  %v3977_v40 = vmul.f32 %v844_v18, %v3859_v5  ;;  %v920_v59 = vadd.f32 %v918_v32, %v904_v7  ;;  %v975_v35 = vmul.f32 %v6124_v60, %v3625_v28 }
 0x164   : >> { %6122 = vst [vmem:[#allocation41_spill] sm:$0xff] %v3970_v29  ;;  %v957_v27 = vadd.f32 %v955_v62, %v916_v26  ;;  %v987_v13 = vmul.f32 %v6124_v60, %v3645_v33  ;;  %v1092_v9 = vmul.f32 %v6120_v55, %v3517_v37  ;;  %v1100_v31 = vmul.f32 %v6121_v49, %v3515_v36  ;;  %v6127_v62 = vld [vmem:[#allocation48_spill] sm:$0xff] }
 0x165   : >> { %6123 = vst [vmem:[#allocation35_spill] sm:$0xff] %v3977_v40  ;;  %v3988_v58 = vadd.f32 %v764_v0, %v6110_v51  ;;  %v3991_v5 = vadd.f32 %v768_v48, %v6110_v51  ;;  %v961_v32 = vadd.f32 %v959_v15, %v920_v59  ;;  %v991_v44 = vmul.f32 %v6125_v57, %v3645_v33  ;;  %v6128_v0 = vld [vmem:[#allocation49_spill] sm:$0xff] }
 0x166   : >> { %v3996_v18 = vmul.f32 %v839_v21, %v3861_v43  ;;  %v973_v46 = vadd.f32 %v971_v54, %v957_v27  ;;  %v1028_v7 = vmul.f32 %v6127_v62, %v3665_v24  ;;  %v1116_v26 = vmul.f32 %v6124_v60, %v6111_v14 }
 0x167   : >> { %v977_v38 = vadd.f32 %v975_v35, %v961_v32  ;;  %v1032_v16 = vmul.f32 %v6128_v0, %v3665_v24  ;;  %v1094_v48 = vmul.f32 %v6121_v49, %v3517_v37  ;;  %v1104_v15 = vmul.f32 %v6124_v60, %v3515_v36 }
 0x168   : >> { %6126 = vst [vmem:[#allocation42_spill] sm:$0xff] %v3996_v18  ;;  %v989_v59 = vadd.f32 %v987_v13, %v973_v46  ;;  %v1044_v43 = vmul.f32 %v6128_v0, %v3685_v6  ;;  %v1102_v54 = vadd.f32 %v1100_v31, %v1092_v9  ;;  %v1132_v21 = vmul.f32 %v6127_v62, %v6119_v61  ;;  %v6130_v31 = vld [vmem:[#allocation51_spill] sm:$0xff] }
 0x169   : >> { %v993_v32 = vadd.f32 %v991_v44, %v977_v38  ;;  %v1048_v41 = vmul.f32 %v6129_v12, %v3685_v6  ;;  %v1060_v29 = vmul.f32 %v6129_v12, %v3709_v1  ;;  %v1120_v46 = vmul.f32 %v6125_v57, %v6111_v14 }
 0x16a   : >> { %v1030_v18 = vadd.f32 %v1028_v7, %v989_v59  ;;  %v1118_v13 = vadd.f32 %v1116_v26, %v1102_v54  ;;  %v1064_v47 = vmul.f32 %v6130_v31, %v3709_v1  ;;  %v1106_v2 = vadd.f32 %v1104_v15, %v1094_v48 }
 0x16b   : >> { %v1034_v9 = vadd.f32 %v1032_v16, %v993_v32  ;;  %v1148_v35 = vmul.f32 %v6128_v0, %v3625_v28  ;;  %v1136_v7 = vmul.f32 %v6128_v0, %v6119_v61  ;;  %v889_v59 = vmul.f32 %v6105_v63, %v3462_v53 }
 0x16c   : >> { %v1046_v38 = vadd.f32 %v1044_v43, %v1030_v18  ;;  %v1134_v44 = vadd.f32 %v1132_v21, %v1118_v13  ;;  %v1164_v26 = vmul.f32 %v6129_v12, %v3645_v33  ;;  %v891_v16 = vmul.f32 %v6106_v23, %v3462_v53  ;;  %v6131_v13 = vld [vmem:[#allocation55_spill] sm:$0xff] }
 0x16d   : >> { %v897_v48 = vmul.f32 %v6106_v23, %v3460_v52  ;;  %v901_v15 = vmul.f32 %v6108_v17, %v3460_v52  ;;  %v1050_v18 = vadd.f32 %v1048_v41, %v1034_v9  ;;  %v1122_v43 = vadd.f32 %v1120_v46, %v1106_v2  ;;  %v6132_v9 = vld [vmem:[#allocation56_spill] sm:$0xff] }
 0x16e   : >> { %v1152_v54 = vmul.f32 %v6129_v12, %v3625_v28  ;;  %v913_v63 = vmul.f32 %v6108_v17, %v6098_v42  ;;  %v1062_v21 = vadd.f32 %v1060_v29, %v1046_v38  ;;  %v1150_v32 = vadd.f32 %v1148_v35, %v1134_v44 }
 0x16f   : >> { %v1205_v27 = vmul.f32 %v6131_v13, %v3665_v24  ;;  %v917_v40 = vmul.f32 %v6114_v34, %v6098_v42  ;;  %v1138_v23 = vadd.f32 %v1136_v7, %v1122_v43  ;;  %v1168_v4 = vmul.f32 %v6130_v31, %v3645_v33 }
 0x170   : >> { %v899_v41 = vadd.f32 %v897_v48, %v889_v59  ;;  %v954_v2 = vmul.f32 %v6120_v55, %v6099_v56  ;;  %v1166_v46 = vadd.f32 %v1164_v26, %v1150_v32  ;;  %v1221_v20 = vmul.f32 %v6132_v9, %v3685_v6  ;;  %v6133_v48 = vld [vmem:[#allocation57_spill] sm:$0xff] }
 0x171   : >> { %v903_v29 = vadd.f32 %v901_v15, %v891_v16  ;;  %v958_v35 = vmul.f32 %v6121_v49, %v6099_v56  ;;  %v1154_v38 = vadd.f32 %v1152_v54, %v1138_v23  ;;  %v1209_v44 = vmul.f32 %v6132_v9, %v3665_v24 }
 0x172   : >> { %v915_v7 = vadd.f32 %v913_v63, %v899_v41  ;;  %v970_v43 = vmul.f32 %v6121_v49, %v6103_v25  ;;  %v1207_v59 = vadd.f32 %v1205_v27, %v1166_v46  ;;  %v1237_v39 = vmul.f32 %v6133_v48, %v3709_v1  ;;  %v6134_v46 = vld [vmem:[#allocation58_spill] sm:$0xff] }
 0x173   : >> { %v919_v26 = vadd.f32 %v917_v40, %v903_v29  ;;  %v974_v32 = vmul.f32 %v6124_v60, %v6103_v25  ;;  %v1066_v16 = vadd.f32 %v1064_v47, %v1050_v18  ;;  %v4061_v15 = vadd.f32 %v1062_v21, %v6028_v22 }
 0x174   : >> { %v956_v54 = vadd.f32 %v954_v2, %v915_v7  ;;  %v986_v23 = vmul.f32 %v6124_v60, %v6104_v50  ;;  %v1170_v63 = vadd.f32 %v1168_v4, %v1154_v38  ;;  %v1223_v41 = vadd.f32 %v1221_v20, %v1207_v59 }
 0x175   : >> { %v960_v24 = vadd.f32 %v958_v35, %v919_v26  ;;  %v990_v27 = vmul.f32 %v6125_v57, %v6104_v50  ;;  %v1225_v40 = vmul.f32 %v6133_v48, %v3685_v6  ;;  %v1241_v29 = vmul.f32 %v6134_v46, %v3709_v1 }
 0x176   : >> { %v972_v47 = vadd.f32 %v970_v43, %v956_v54  ;;  %v1027_v18 = vmul.f32 %v6127_v62, %v3667_v30  ;;  %v1211_v21 = vadd.f32 %v1209_v44, %v1170_v63  ;;  %v1239_v2 = vadd.f32 %v1237_v39, %v1223_v41 }
 0x177   : >> { %v976_v7 = vadd.f32 %v974_v32, %v960_v24  ;;  %v1031_v4 = vmul.f32 %v6128_v0, %v3667_v30  ;;  %v1043_v35 = vmul.f32 %v6128_v0, %v3691_v45  ;;  %v1091_v38 = vmul.f32 %v6120_v55, %v3462_v53 }
 0x178   : >> { %v988_v20 = vadd.f32 %v986_v23, %v972_v47  ;;  %v1099_v59 = vmul.f32 %v6121_v49, %v3460_v52  ;;  %v1047_v26 = vmul.f32 %v6129_v12, %v3691_v45  ;;  %v1093_v24 = vmul.f32 %v6121_v49, %v3462_v53 }
 0x179   : >> { %v992_v43 = vadd.f32 %v990_v27, %v976_v7  ;;  %v1103_v39 = vmul.f32 %v6124_v60, %v3460_v52  ;;  %v1227_v44 = vadd.f32 %v1225_v40, %v1211_v21  ;;  %v1059_v54 = vmul.f32 %v6129_v12, %v3715_v10 }
 0x17a   : >> { %v1029_v32 = vadd.f32 %v1027_v18, %v988_v20  ;;  %v1115_v55 = vmul.f32 %v6124_v60, %v6098_v42  ;;  %v4092_v23 = vadd.f32 %v1066_v16, %v6028_v22  ;;  %v1063_v41 = vmul.f32 %v6130_v31, %v3715_v10 }
 0x17b   : >> { %v1033_v63 = vadd.f32 %v1031_v4, %v992_v43  ;;  %v1119_v49 = vmul.f32 %v6125_v57, %v6098_v42  ;;  %v1243_v27 = vadd.f32 %v1241_v29, %v1227_v44  ;;  %v1101_v40 = vadd.f32 %v1099_v59, %v1091_v38 }
 0x17c   : >> { %v1045_v47 = vadd.f32 %v1043_v35, %v1029_v32  ;;  %v1131_v18 = vmul.f32 %v6127_v62, %v6099_v56  ;;  %v4101_v21 = vadd.f32 %v1239_v2, %v6028_v22  ;;  %v1105_v20 = vadd.f32 %v1103_v39, %v1093_v24 }
 0x17d   : >> { %v1049_v7 = vadd.f32 %v1047_v26, %v1033_v63  ;;  %v1135_v16 = vmul.f32 %v6128_v0, %v6099_v56  ;;  %v6135_v4 = vmax.f32 %v3988_v58, 0.0  ;;  %v6136_v43 = vmax.f32 %v3946_v11, 0.0 }
 0x17e   : >> { %v1061_v29 = vadd.f32 %v1059_v54, %v1045_v47  ;;  %v1117_v35 = vadd.f32 %v1115_v55, %v1101_v40  ;;  %v1147_v38 = vmul.f32 %v6128_v0, %v6103_v25  ;;  %v6137_v62 = vmax.f32 %v3991_v5, 0.0 }
 0x17f   : >> { %v4109_v52 = vmax.f32 %v6136_v43, %v6135_v4  ;;  %v6138_v2 = vmax.f32 %v3955_v19, 0.0  ;;  %v1065_v26 = vadd.f32 %v1063_v41, %v1049_v7  ;;  %v1121_v24 = vadd.f32 %v1119_v49, %v1105_v20 }
 0x180   : >> { %v1151_v58 = vmul.f32 %v6129_v12, %v6103_v25  ;;  %v1133_v44 = vadd.f32 %v1131_v18, %v1117_v35  ;;  %v1163_v32 = vmul.f32 %v6129_v12, %v6104_v50  ;;  %v4127_v5 = vadd.f32 %v1243_v27, %v6028_v22 }
 0x181   : >> { %v4117_v59 = vmax.f32 %v6138_v2, %v6137_v62  ;;  %v1137_v19 = vadd.f32 %v1135_v16, %v1121_v24  ;;  %v1167_v54 = vmul.f32 %v6130_v31, %v6104_v50  ;;  %v4132_v55 = vadd.f32 %v1061_v29, %v6110_v51 }
 0x182   : >> { %v1149_v63 = vadd.f32 %v1147_v38, %v1133_v44  ;;  %v1204_v41 = vmul.f32 %v6131_v13, %v3667_v30  ;;  %v1208_v49 = vmul.f32 %v6132_v9, %v3667_v30  ;;  %v4139_v47 = vadd.f32 %v1065_v26, %v6110_v51  ;;  %v6141_v26 = vld [vmem:[#allocation31_spill] sm:$0xff] }
 0x183   : >> { %v1153_v40 = vadd.f32 %v1151_v58, %v1137_v19  ;;  %v894_v27 = vmul.f32 %v6108_v17, %v3517_v37  ;;  %v906_v18 = vmul.f32 %v6114_v34, %v3515_v36  ;;  %v1220_v20 = vmul.f32 %v6132_v9, %v3691_v45 }
 0x184   : >> { %v1165_v7 = vadd.f32 %v1163_v32, %v1149_v63  ;;  %v896_v13 = vmul.f32 %v6114_v34, %v3517_v37  ;;  %v910_v16 = vmul.f32 %v3865_v8, %v3515_v36  ;;  %v1224_v29 = vmul.f32 %v6133_v48, %v3691_v45 }
 0x185   : >> { %v1169_v43 = vadd.f32 %v1167_v54, %v1153_v40  ;;  %v922_v35 = vmul.f32 %v3865_v8, %v6111_v14  ;;  %v1236_v9 = vmul.f32 %v6133_v48, %v3715_v10  ;;  %v1240_v2 = vmul.f32 %v6134_v46, %v3715_v10 }
 0x186   : >> { %v1206_v62 = vadd.f32 %v1204_v41, %v1165_v7  ;;  %v908_v58 = vadd.f32 %v906_v18, %v894_v27  ;;  %v926_v44 = vmul.f32 %v3869_v3, %v6111_v14  ;;  %v912_v19 = vadd.f32 %v910_v16, %v896_v13  ;;  %v6139_v18 = vld [vmem:[#allocation47_spill] sm:$0xff] }
 0x187   : >> { %v1210_v24 = vadd.f32 %v1208_v49, %v1169_v43  ;;  %v963_v54 = vmul.f32 %v6124_v60, %v6119_v61  ;;  %v967_v63 = vmul.f32 %v6125_v57, %v6119_v61  ;;  %v979_v7 = vmul.f32 %v6125_v57, %v3625_v28 }
 0x188   : >> { %v1222_v32 = vadd.f32 %v1220_v20, %v1206_v62  ;;  %v924_v40 = vadd.f32 %v922_v35, %v908_v58  ;;  %v1096_v49 = vmul.f32 %v6124_v60, %v3517_v37  ;;  %v983_v20 = vmul.f32 %v6139_v18, %v3625_v28 }
 0x189   : >> { %v1226_v41 = vadd.f32 %v1224_v29, %v1210_v24  ;;  %v1098_v13 = vmul.f32 %v6125_v57, %v3517_v37  ;;  %v1108_v16 = vmul.f32 %v6125_v57, %v3515_v36  ;;  %v928_v43 = vadd.f32 %v926_v44, %v912_v19  ;;  %v6140_v24 = vld [vmem:[#allocation34_spill] sm:$0xff] }
 0x18a   : >> { %v1238_v27 = vadd.f32 %v1236_v9, %v1222_v32  ;;  %v995_v29 = vmul.f32 %v6139_v18, %v3645_v33  ;;  %v1112_v35 = vmul.f32 %v6139_v18, %v3515_v36  ;;  %v1124_v62 = vmul.f32 %v6139_v18, %v6111_v14  ;;  %v3088_v32 = vld [vmem:[%s3408_s12 + $0x34] sm:$0x3f] }
 0x18b   : >> { %v1242_v9 = vadd.f32 %v1240_v2, %v1226_v41  ;;  %v999_v58 = vmul.f32 %v6140_v24, %v3645_v33  ;;  %v4188_v38 = vrot.slane %v3088_v32, %v6141_v26  ;;  %v1128_v44 = vmul.f32 %v6140_v24, %v6111_v14  ;;  %v6142_v36 = vld [vmem:[#allocation65_spill] sm:$0xff] }
 0x18c   : >> { %v1110_v19 = vadd.f32 %v1108_v16, %v1096_v49  ;;  %v1114_v39 = vadd.f32 %v1112_v35, %v1098_v13  ;;  %v1140_v4 = vmul.f32 %v6129_v12, %v6119_v61  ;;  %v1144_v11 = vmul.f32 %v6130_v31, %v6119_v61  ;;  %v6143_v13 = vld [vmem:[#allocation52_spill] sm:$0xff] }
 0x18d   : >> { %v1252_v2 = vadd.f32 %v1238_v27, %v6110_v51  ;;  %v965_v41 = vadd.f32 %v963_v54, %v924_v40  ;;  %v969_v0 = vadd.f32 %v967_v63, %v928_v43  ;;  %v1036_v32 = vmul.f32 %v6129_v12, %v6142_v36  ;;  %v3089_v43 = vld [vmem:[%s3408_s12 + $0x4c] sm:$0x3f] }
 0x18e   : >> { %v1126_v37 = vadd.f32 %v1124_v62, %v1110_v19  ;;  %v1130_v10 = vadd.f32 %v1128_v44, %v1114_v39  ;;  %v1156_v49 = vmul.f32 %v6130_v31, %v3625_v28  ;;  %v1160_v16 = vmul.f32 %v6143_v13, %v3625_v28  ;;  %v6144_v62 = vld [vmem:[#allocation30_spill] sm:$0xff] }
 0x18f   : >> { %v1256_v35 = vadd.f32 %v1242_v9, %v6110_v51  ;;  %v1040_v61 = vmul.f32 %v6130_v31, %v6142_v36  ;;  %v1052_v54 = vmul.f32 %v6130_v31, %v3685_v6  ;;  %v1172_v63 = vmul.f32 %v6143_v13, %v3645_v33 }
 0x190   : >> { %v1142_v40 = vadd.f32 %v1140_v4, %v1126_v37  ;;  %v1146_v27 = vadd.f32 %v1144_v11, %v1130_v10  ;;  %v1176_v39 = vmul.f32 %v4188_v38, %v3645_v33  ;;  %v4214_v44 = vrot.slane %v3089_v43, %v6144_v62 }
 0x191   : >> { %v981_v19 = vadd.f32 %v979_v7, %v965_v41  ;;  %v985_v9 = vadd.f32 %v983_v20, %v969_v0  ;;  %v1056_v28 = vmul.f32 %v6143_v13, %v3685_v6  ;;  %v4219_v14 = vrot.slane %v3089_v43, %v6141_v26  ;;  %v858_v7 = vpop.permute.xlu1 %857  ;;  %v6147_v26 = vld [vmem:[#allocation60_spill] sm:$0xff] }
 0x192   : >> { %v1158_v51 = vadd.f32 %v1156_v49, %v1142_v40  ;;  %v1162_v45 = vadd.f32 %v1160_v16, %v1146_v27  ;;  %v1213_v37 = vmul.f32 %v6133_v48, %v6142_v36  ;;  %v1217_v10 = vmul.f32 %v6134_v46, %v6142_v36 }
 0x193   : >> { %v1254_v11 = vmax.f32 %v1252_v2, 0.0  ;;  %v997_v4 = vadd.f32 %v995_v29, %v981_v19  ;;  %v1001_v62 = vadd.f32 %v999_v58, %v985_v9  ;;  %v1068_v0 = vmul.f32 %v6143_v13, %v3709_v1  ;;  %v853_v29 = vpop.permute.xlu0 %852 }
 0x194   : >> { %v1174_v20 = vadd.f32 %v1172_v63, %v1158_v51  ;;  %v1178_v41 = vadd.f32 %v1176_v39, %v1162_v45  ;;  %v1229_v43 = vmul.f32 %v6134_v46, %v3685_v6  ;;  %v1233_v49 = vmul.f32 %v4214_v44, %v3685_v6  ;;  %v6145_v51 = vld [vmem:[#allocation35_spill] sm:$0xff]  ;;  %v6146_v63 = vld [vmem:[#allocation22_spill] sm:$0xff] }
 0x195   : >> { %v1258_v16 = vmax.f32 %v1256_v35, 0.0  ;;  %v1038_v40 = vadd.f32 %v1036_v32, %v997_v4  ;;  %v1042_v27 = vadd.f32 %v1040_v61, %v1001_v62  ;;  %v1072_v2 = vmul.f32 %v4188_v38, %v3709_v1 }
 0x196   : >> { %v1215_v58 = vadd.f32 %v1213_v37, %v1174_v20  ;;  %v1219_v19 = vadd.f32 %v1217_v10, %v1178_v41  ;;  %v1245_v9 = vmul.f32 %v4214_v44, %v3709_v1  ;;  %v1249_v45 = vmul.f32 %v4219_v14, %v3709_v1 }
 0x197   : >> { %v849_v39 = vadd.f32 %v6146_v63, %v6145_v51  ;;  %v861_v6 = vmul.f32 %v858_v7, %v6147_v26  ;;  %v1054_v35 = vadd.f32 %v1052_v54, %v1038_v40  ;;  %v1058_v32 = vadd.f32 %v1056_v28, %v1042_v27  ;;  %v6154_v7 = vld [vmem:[#allocation37_spill] sm:$0xff]  ;;  %v6157_v63 = vld [vmem:[#allocation23_spill] sm:$0xff] }
 0x198   : >> { %v6148_v61 = vmax.f32 %v4101_v21, 0.0  ;;  %v6149_v62 = vmax.f32 %v4061_v15, 0.0  ;;  %v6150_v37 = vmax.f32 %v4127_v5, 0.0  ;;  %v6151_v10 = vmax.f32 %v4092_v23, 0.0  ;;  %v6155_v21 = vld [vmem:[#allocation41_spill] sm:$0xff]  ;;  %v6156_v23 = vld [vmem:[#allocation42_spill] sm:$0xff] }
 0x199   : >> { %v1231_v41 = vadd.f32 %v1229_v43, %v1215_v58  ;;  %v1235_v36 = vadd.f32 %v1233_v49, %v1219_v19  ;;  %v6152_v1 = vmax.f32 %v4132_v55, 0.0  ;;  %v6153_v51 = vmax.f32 %v4139_v47, 0.0  ;;  %v6158_v55 = vld [vmem:[#allocation32_spill] sm:$0xff] }
 0x19a   : >> { %v1269_v4 = vmax.f32 %v6149_v62, %v6148_v61  ;;  %v1271_v20 = vmax.f32 %v6151_v10, %v6150_v37  ;;  %v1070_v54 = vadd.f32 %v1068_v0, %v1054_v35  ;;  %v1074_v28 = vadd.f32 %v1072_v2, %v1058_v32  ;;  %v1298_v0 = vpop.permute.xlu1 %1297  ;;  %v1293_v2 = vpop.permute.xlu0 %1292  ;;  %v6160_v61 = vld [vmem:[#allocation38_spill] sm:$0xff] }
 0x19b   : >> { %v1268_v33 = vmax.f32 %v6152_v1, %v1254_v11  ;;  %v1270_v26 = vmax.f32 %v6153_v51, %v1258_v16  ;;  %v835_v40 = vadd.f32 %v6155_v21, %v6154_v7  ;;  %v796_v15 = vmax.f32 %v4109_v52, %v4117_v59 }
 0x19c   : >> { %v1247_v5 = vadd.f32 %v1245_v9, %v1231_v41  ;;  %v1251_v27 = vadd.f32 %v1249_v45, %v1235_v36  ;;  %v848_v43 = vadd.f32 %v6157_v63, %v6156_v23  ;;  %v4258_v49 = vadd.f32 %v861_v6, %v849_v39 }
 0x19d   : >> { %v893_v1 = vmul.f32 %v6108_v17, %v3462_v53  ;;  %v905_v47 = vmul.f32 %v6114_v34, %v6158_v55  ;;  %v860_v11 = vmul.f32 %v853_v29, %v796_v15  ;;  %v4264_v16 = vmax.f32 %v1269_v4, %v1271_v20  ;;  %v6159_v29 = vld [vmem:[#allocation36_spill] sm:$0xff] }
 0x19e   : >> { %v895_v52 = vmul.f32 %v6114_v34, %v3462_v53  ;;  %v909_v36 = vmul.f32 %v3865_v8, %v6158_v55  ;;  %v4270_v59 = vmax.f32 %v1268_v33, %v1270_v26  ;;  %v1084_v6 = vadd.f32 %v1070_v54, %v6028_v22 }
 0x19f   : >> { %v1088_v17 = vadd.f32 %v1074_v28, %v6028_v22  ;;  %v921_v58 = vmul.f32 %v3865_v8, %v6098_v42  ;;  %v832_v19 = vmul.f32 %v6159_v29, %v796_v15  ;;  %v1261_v9 = vadd.f32 %v1247_v5, %v6028_v22  ;;  %v1312_v29 = vpop.permute.xlu1 %1311 }
 0x1a0   : >> { %v1265_v45 = vadd.f32 %v1251_v27, %v6028_v22  ;;  %v925_v34 = vmul.f32 %v3869_v3, %v6098_v42  ;;  %v1301_v39 = vmul.f32 %v1298_v0, %v4264_v16  ;;  %v1300_v33 = vmul.f32 %v1293_v2, %v4270_v59 }
 0x1a1   : >> { %v907_v35 = vadd.f32 %v905_v47, %v893_v1  ;;  %v962_v32 = vmul.f32 %v6124_v60, %v6099_v56  ;;  %v834_v62 = vadd.f32 %v832_v19, %v6160_v61  ;;  %v4286_v8 = vadd.f32 %v860_v11, %v848_v43 }
 0x1a2   : >> { %v911_v4 = vadd.f32 %v909_v36, %v895_v52  ;;  %v966_v37 = vmul.f32 %v6125_v57, %v6099_v56  ;;  %v1086_v10 = vmax.f32 %v1084_v6, 0.0  ;;  %v1090_v20 = vmax.f32 %v1088_v17, 0.0  ;;  %v6162_v17 = vld [vmem:[#allocation68_spill] sm:$0xff] }
 0x1a3   : >> { %v923_v41 = vadd.f32 %v921_v58, %v907_v35  ;;  %v978_v3 = vmul.f32 %v6125_v57, %v6103_v25  ;;  %v1263_v51 = vmax.f32 %v1261_v9, 0.0  ;;  %v1267_v26 = vmax.f32 %v1265_v45, 0.0  ;;  %v6163_v45 = vld [vmem:[#allocation70_spill] sm:$0xff] }
 0x1a4   : >> { %v927_v54 = vadd.f32 %v925_v34, %v911_v4  ;;  %v982_v28 = vmul.f32 %v6139_v18, %v6103_v25  ;;  %v1303_v7 = vadd.f32 %v1301_v39, %v835_v40  ;;  %v4294_v21 = vadd.f32 %v1300_v33, %v834_v62 }
 0x1a5   : >> { %v964_v15 = vadd.f32 %v962_v32, %v923_v41  ;;  %v994_v5 = vmul.f32 %v6139_v18, %v6104_v50  ;;  %v998_v23 = vmul.f32 %v6140_v24, %v6104_v50  ;;  %v1035_v63 = vmul.f32 %v6129_v12, %v3667_v30 }
 0x1a6   : >> { %6161 = vst [vmem:[#allocation24_spill] sm:$0xff] %v4294_v21  ;;  %v968_v27 = vadd.f32 %v966_v37, %v927_v54  ;;  %v1095_v43 = vmul.f32 %v6124_v60, %v3462_v53  ;;  %v1097_v40 = vmul.f32 %v6125_v57, %v3462_v53  ;;  %v1107_v47 = vmul.f32 %v6125_v57, %v6158_v55  ;;  %v4331_v37 = vld [vmem:[%s3408_s12 + $0x8] sm:$0x3f] }
 0x1a7   : >> { %v980_v1 = vadd.f32 %v978_v3, %v964_v15  ;;  %v1111_v11 = vmul.f32 %v6139_v18, %v6158_v55  ;;  %v1273_v0 = vmax.f32 %v1086_v10, %v1263_v51  ;;  %v1275_v2 = vmax.f32 %v1090_v20, %v1267_v26  ;;  %6164 = vst [vmem:[#allocation25_spill] sm:$0xff] %v4331_v37  ;;  %v4335_v26 = vpop.permute.xlu0 %1306 }
 0x1a8   : >> { %v984_v52 = vadd.f32 %v982_v28, %v968_v27  ;;  %v1039_v36 = vmul.f32 %v6130_v31, %v3667_v30  ;;  %v1051_v60 = vmul.f32 %v6130_v31, %v6162_v17  ;;  %v1123_v58 = vmul.f32 %v6139_v18, %v6098_v42  ;;  %6165 = vst [vmem:[#allocation43_spill] sm:$0xff] %v4335_v26  ;;  %v4417_v26 = vld [vmem:[%s3408_s12 + $0x38] sm:$0x3f] }
 0x1a9   : >> { %v996_v6 = vadd.f32 %v994_v5, %v980_v1  ;;  %v1127_v57 = vmul.f32 %v6140_v24, %v6098_v42  ;;  %v1055_v9 = vmul.f32 %v6143_v13, %v6162_v17  ;;  %v1067_v34 = vmul.f32 %v6143_v13, %v6163_v45  ;;  %v6166_v5 = vld [vmem:[#allocation26_spill] sm:$0xff]  ;;  %6178 = vst [vmem:[#allocation46_spill] sm:$0xff] %v4417_v26 }
 0x1aa   : >> { %v1000_v19 = vadd.f32 %v998_v23, %v984_v52  ;;  %v1071_v39 = vmul.f32 %v4188_v38, %v6163_v45  ;;  %v1109_v35 = vadd.f32 %v1107_v47, %v1095_v43  ;;  %v1113_v32 = vadd.f32 %v1111_v11, %v1097_v40  ;;  %v6167_v23 = vld [vmem:[#allocation27_spill] sm:$0xff]  ;;  %v1326_v47 = vpop.permute.xlu1 %1325 }
 0x1ab   : >> { %v1037_v33 = vadd.f32 %v1035_v63, %v996_v6  ;;  %v1139_v18 = vmul.f32 %v6129_v12, %v6099_v56  ;;  %v1279_v61 = vmax.f32 %v1273_v0, %v1275_v2  ;;  %v1143_v24 = vmul.f32 %v6130_v31, %v6099_v56  ;;  %v6169_v2 = vld [vmem:[#allocation40_spill] sm:$0xff] }
 0x1ac   : >> { %v1041_v62 = vadd.f32 %v1039_v36, %v1000_v19  ;;  %v1155_v4 = vmul.f32 %v6130_v31, %v6103_v25  ;;  %v1125_v20 = vadd.f32 %v1123_v58, %v1109_v35  ;;  %v1129_v41 = vadd.f32 %v1127_v57, %v1113_v32  ;;  %v6170_v36 = vld [vmem:[#allocation39_spill] sm:$0xff]  ;;  %v6172_v58 = vld [vmem:[#allocation29_spill] sm:$0xff]  ;;  %v6173_v19 = vld [vmem:[#allocation20_spill] sm:$0xff] }
 0x1ad   : >> { %v1053_v10 = vadd.f32 %v1051_v60, %v1037_v33  ;;  %v1159_v3 = vmul.f32 %v6143_v13, %v6103_v25  ;;  %v1315_v51 = vmul.f32 %v1312_v29, %v1279_v61  ;;  %v1171_v54 = vmul.f32 %v6143_v13, %v6104_v50  ;;  %v6168_v13 = vld [vmem:[#allocation28_spill] sm:$0xff]  ;;  %v4364_v60 = vld [vmem:[%s3408_s12 + $0x20] sm:$0x3f]  ;;  %v6174_v35 = vld [vmem:[#allocation53_spill] sm:$0xff] }
 0x1ae   : >> { %v1057_v12 = vadd.f32 %v1055_v9, %v1041_v62  ;;  %v1175_v28 = vmul.f32 %v4188_v38, %v6104_v50  ;;  %v1141_v15 = vadd.f32 %v1139_v18, %v1125_v20  ;;  %v4343_v27 = vrot.slane %v4331_v37, %v6166_v5 }
 0x1af   : >> { %v1069_v31 = vadd.f32 %v1067_v34, %v1053_v10  ;;  %v4347_v63 = vrot.slane %v4331_v37, %v6167_v23  ;;  %v1145_v1 = vadd.f32 %v1143_v24, %v1129_v41  ;;  %v1212_v40 = vmul.f32 %v6133_v48, %v3667_v30 }
 0x1b0   : >> { %v1073_v43 = vadd.f32 %v1071_v39, %v1057_v12  ;;  %v4353_v11 = vrot.slane %v4331_v37, %v6168_v13  ;;  %v1216_v38 = vmul.f32 %v6134_v46, %v3667_v30  ;;  %v1228_v0 = vmul.f32 %v6134_v46, %v6162_v17 }
 0x1b1   : >> { %v1372_v52 = vmul.f32 %v4343_v27, %v6169_v2  ;;  %v1380_v6 = vmul.f32 %v4347_v63, %v6170_v36  ;;  %v4366_v48 = vadd.f32 %v1315_v51, %v1303_v7  ;;  %v4370_v57 = vrot.slane %v4331_v37, %v6172_v58  ;;  %v1321_v7 = vpop.permute.xlu0 %1320 }
 0x1b2   : >> { %v1374_v29 = vmul.f32 %v4347_v63, %v6169_v2  ;;  %v1384_v46 = vmul.f32 %v4353_v11, %v6170_v36  ;;  %v4377_v9 = vadd.f32 %v1069_v31, %v6173_v19  ;;  %v1157_v34 = vadd.f32 %v1155_v4, %v1141_v15  ;;  %v6176_v31 = vld [vmem:[#allocation59_spill] sm:$0xff] }
 0x1b3   : >> { %6171 = vst [vmem:[#allocation44_spill] sm:$0xff] %v4366_v48  ;;  %v1161_v39 = vadd.f32 %v1159_v3, %v1145_v1  ;;  %v1232_v33 = vmul.f32 %v4214_v44, %v6162_v17  ;;  %v1396_v32 = vmul.f32 %v4353_v11, %v6174_v35  ;;  %v1400_v18 = vmul.f32 %v4370_v57, %v6174_v35  ;;  %v1340_v3 = vpop.permute.xlu1 %1339 }
 0x1b4   : >> { %v4387_v62 = vrot.slane %v4364_v60, %v6166_v5  ;;  %v4391_v24 = vrot.slane %v4364_v60, %v6167_v23  ;;  %v4394_v4 = vadd.f32 %v1073_v43, %v6173_v19  ;;  %v1244_v10 = vmul.f32 %v4214_v44, %v6163_v45 }
 0x1b5   : >> { %v1248_v20 = vmul.f32 %v4219_v14, %v6163_v45  ;;  %v1382_v41 = vadd.f32 %v1380_v6, %v1372_v52  ;;  %v1386_v51 = vadd.f32 %v1384_v46, %v1374_v29  ;;  %v4402_v12 = vrot.slane %v4364_v60, %v6168_v13  ;;  %v6177_v6 = vld [vmem:[#allocation61_spill] sm:$0xff] }
 0x1b6   : >> { %6175 = vst [vmem:[#allocation45_spill] sm:$0xff] %v4394_v4  ;;  %v1437_v15 = vmul.f32 %v4387_v62, %v6176_v31  ;;  %v1441_v43 = vmul.f32 %v4391_v24, %v6176_v31  ;;  %v1173_v1 = vadd.f32 %v1171_v54, %v1157_v34  ;;  %v1177_v48 = vadd.f32 %v1175_v28, %v1161_v39  ;;  %v6183_v4 = vld [vmem:[#allocation69_spill] sm:$0xff] }
 0x1b7   : >> { %v1329_v44 = vmul.f32 %v1326_v47, %v4264_v16  ;;  %v4410_v21 = vmul.f32 %v1321_v7, %v4270_v59  ;;  %v1398_v14 = vadd.f32 %v1396_v32, %v1382_v41  ;;  %v1402_v52 = vadd.f32 %v1400_v18, %v1386_v51  ;;  %v6180_v7 = vld [vmem:[#allocation63_spill] sm:$0xff] }
 0x1b8   : >> { %v1453_v29 = vmul.f32 %v4391_v24, %v6177_v6  ;;  %v1457_v46 = vmul.f32 %v4402_v12, %v6177_v6  ;;  %v4421_v28 = vmul.f32 %v1340_v3, %v1279_v61  ;;  %v4425_v16 = vrot.slane %v4364_v60, %v6172_v58 }
 0x1b9   : >> { %v1214_v59 = vadd.f32 %v1212_v40, %v1173_v1  ;;  %v1218_v47 = vadd.f32 %v1216_v38, %v1177_v48  ;;  %v1439_v34 = vadd.f32 %v1437_v15, %v1398_v14  ;;  %v1443_v39 = vadd.f32 %v1441_v43, %v1402_v52  ;;  %v6181_v48 = vld [vmem:[#allocation65_spill] sm:$0xff]  ;;  %v6182_v52 = vld [vmem:[#allocation67_spill] sm:$0xff] }
 0x1ba   : >> { %6179 = vst [vmem:[#allocation48_spill] sm:$0xff] %v4421_v28  ;;  %v1469_v32 = vmul.f32 %v4402_v12, %v6180_v7  ;;  %v1473_v18 = vmul.f32 %v4425_v16, %v6180_v7  ;;  %v4433_v41 = vrot.slane %v4417_v26, %v6166_v5  ;;  %v4437_v61 = vrot.slane %v4417_v26, %v6167_v23 }
 0x1bb   : >> { %v1230_v3 = vadd.f32 %v1228_v0, %v1214_v59  ;;  %v1455_v51 = vadd.f32 %v1453_v29, %v1439_v34  ;;  %v1459_v40 = vadd.f32 %v1457_v46, %v1443_v39  ;;  %v4441_v38 = vrot.slane %v4417_v26, %v6168_v13 }
 0x1bc   : >> { %v1510_v15 = vmul.f32 %v4433_v41, %v6181_v48  ;;  %v1514_v43 = vmul.f32 %v4437_v61, %v6181_v48  ;;  %v1574_v1 = vmul.f32 %v4387_v62, %v6169_v2  ;;  %v1582_v14 = vmul.f32 %v4391_v24, %v6170_v36 }
 0x1bd   : >> { %v4453_v0 = vrot.slane %v4417_v26, %v6172_v58  ;;  %v1526_v29 = vmul.f32 %v4437_v61, %v6182_v52  ;;  %v1576_v46 = vmul.f32 %v4391_v24, %v6169_v2  ;;  %v1586_v59 = vmul.f32 %v4402_v12, %v6170_v36 }
 0x1be   : >> { %v1471_v34 = vadd.f32 %v1469_v32, %v1455_v51  ;;  %v1475_v39 = vadd.f32 %v1473_v18, %v1459_v40  ;;  %v1530_v54 = vmul.f32 %v4441_v38, %v6182_v52  ;;  %v1598_v37 = vmul.f32 %v4402_v12, %v6174_v35  ;;  %v4472_v51 = vld [vmem:[%s3408_s12 + $0x50] sm:$0x3f] }
 0x1bf   : >> { %v1234_v28 = vadd.f32 %v1232_v33, %v1218_v47  ;;  %v1246_v26 = vadd.f32 %v1244_v10, %v1230_v3  ;;  %v1542_v45 = vmul.f32 %v4441_v38, %v6183_v4  ;;  %v1602_v17 = vmul.f32 %v4425_v16, %v6174_v35 }
 0x1c0   : >> { %v1512_v2 = vadd.f32 %v1510_v15, %v1471_v34  ;;  %v1516_v30 = vadd.f32 %v1514_v43, %v1475_v39  ;;  %v1546_v32 = vmul.f32 %v4453_v0, %v6183_v4  ;;  %v1584_v18 = vadd.f32 %v1582_v14, %v1574_v1 }
 0x1c1   : >> { %v1250_v40 = vadd.f32 %v1248_v20, %v1234_v28  ;;  %v1588_v36 = vadd.f32 %v1586_v59, %v1576_v46  ;;  %v1614_v33 = vmul.f32 %v4433_v41, %v6176_v31  ;;  %v1618_v10 = vmul.f32 %v4437_v61, %v6176_v31 }
 0x1c2   : >> { %v1528_v47 = vadd.f32 %v1526_v29, %v1512_v2  ;;  %v1532_v3 = vadd.f32 %v1530_v54, %v1516_v30  ;;  %v1600_v50 = vadd.f32 %v1598_v37, %v1584_v18  ;;  %v1630_v15 = vmul.f32 %v4437_v61, %v6177_v6 }
 0x1c3   : >> { %v1604_v43 = vadd.f32 %v1602_v17, %v1588_v36  ;;  %v1634_v1 = vmul.f32 %v4441_v38, %v6177_v6  ;;  %v4484_v20 = vrot.slane %v4472_v51, %v6166_v5  ;;  %v4488_v28 = vrot.slane %v4472_v51, %v6167_v23 }
 0x1c4   : >> { %v1260_v14 = vadd.f32 %v1246_v26, %v6173_v19  ;;  %v4492_v30 = vadd.f32 %v1329_v44, %v4258_v49  ;;  %v1544_v37 = vadd.f32 %v1542_v45, %v1528_v47  ;;  %v1548_v2 = vadd.f32 %v1546_v32, %v1532_v3  ;;  %v6186_v26 = vld [vmem:[#allocation30_spill] sm:$0xff] }
 0x1c5   : >> { %v1616_v54 = vadd.f32 %v1614_v33, %v1600_v50  ;;  %v1620_v17 = vadd.f32 %v1618_v10, %v1604_v43  ;;  %v1646_v36 = vmul.f32 %v4441_v38, %v6180_v7  ;;  %v1650_v29 = vmul.f32 %v4453_v0, %v6180_v7 }
 0x1c6   : >> { %6184 = vst [vmem:[#allocation49_spill] sm:$0xff] %v4492_v30  ;;  %v4499_v46 = vadd.f32 %v1250_v40, %v6173_v19  ;;  %v4503_v59 = vadd.f32 %v4410_v21, %v4286_v8  ;;  %v4507_v49 = vrot.slane %v4364_v60, %v6186_v26  ;;  %v4511_v50 = vrot.slane %v4472_v51, %v6168_v13 }
 0x1c7   : >> { %v1632_v45 = vadd.f32 %v1630_v15, %v1616_v54  ;;  %v1636_v44 = vadd.f32 %v1634_v1, %v1620_v17  ;;  %v1687_v34 = vmul.f32 %v4484_v20, %v6181_v48  ;;  %v1691_v39 = vmul.f32 %v4488_v28, %v6181_v48 }
 0x1c8   : >> { %6185 = vst [vmem:[#allocation50_spill] sm:$0xff] %v4503_v59  ;;  %v1262_v32 = vmax.f32 %v1260_v14, 0.0  ;;  %v4518_v8 = vadd.f32 %v1544_v37, %v6028_v22  ;;  %v4521_v21 = vadd.f32 %v1548_v2, %v6028_v22  ;;  %v4525_v18 = vrot.slane %v4472_v51, %v6172_v58 }
 0x1c9   : >> { %v1648_v40 = vadd.f32 %v1646_v36, %v1632_v45  ;;  %v1652_v33 = vadd.f32 %v1650_v29, %v1636_v44  ;;  %v1703_v10 = vmul.f32 %v4488_v28, %v6182_v52  ;;  %v1707_v47 = vmul.f32 %v4511_v50, %v6182_v52 }
 0x1ca   : >> { %v1371_v3 = vmul.f32 %v4343_v27, %v3462_v53  ;;  %v1373_v15 = vmul.f32 %v4347_v63, %v3462_v53  ;;  %v1379_v43 = vmul.f32 %v4347_v63, %v6158_v55  ;;  %v1383_v1 = vmul.f32 %v4353_v11, %v6158_v55 }
 0x1cb   : >> { %v1689_v14 = vadd.f32 %v1687_v34, %v1648_v40  ;;  %v1693_v37 = vadd.f32 %v1691_v39, %v1652_v33  ;;  %v1719_v2 = vmul.f32 %v4511_v50, %v6183_v4  ;;  %v1723_v54 = vmul.f32 %v4525_v18, %v6183_v4 }
 0x1cc   : >> { %v1266_v17 = vmax.f32 %v4499_v46, 0.0  ;;  %v6187_v27 = vmax.f32 %v4377_v9, 0.0  ;;  %v1395_v63 = vmul.f32 %v4353_v11, %v6098_v42  ;;  %v1399_v29 = vmul.f32 %v4370_v57, %v6098_v42 }
 0x1cd   : >> { %v1560_v45 = vmax.f32 %v4518_v8, 0.0  ;;  %v1564_v44 = vmax.f32 %v4521_v21, 0.0  ;;  %v1705_v34 = vadd.f32 %v1703_v10, %v1689_v14  ;;  %v1709_v39 = vadd.f32 %v1707_v47, %v1693_v37  ;;  %v6188_v10 = vld [vmem:[#allocation64_spill] sm:$0xff] }
 0x1ce   : >> { %v4546_v36 = vmax.f32 %v6187_v27, %v1262_v32  ;;  %v1381_v40 = vadd.f32 %v1379_v43, %v1371_v3  ;;  %v1385_v33 = vadd.f32 %v1383_v1, %v1373_v15  ;;  %v1436_v46 = vmul.f32 %v4387_v62, %v6099_v56  ;;  %v6189_v15 = vld [vmem:[#allocation66_spill] sm:$0xff] }
 0x1cf   : >> { %v1440_v9 = vmul.f32 %v4391_v24, %v6099_v56  ;;  %v1721_v32 = vadd.f32 %v1719_v2, %v1705_v34  ;;  %v1725_v27 = vadd.f32 %v1723_v54, %v1709_v39  ;;  %v1452_v58 = vmul.f32 %v4391_v24, %v6103_v25 }
 0x1d0   : >> { %v1456_v8 = vmul.f32 %v4402_v12, %v6103_v25  ;;  %v1397_v13 = vadd.f32 %v1395_v63, %v1381_v40  ;;  %v1401_v21 = vadd.f32 %v1399_v29, %v1385_v33  ;;  %v1468_v47 = vmul.f32 %v4402_v12, %v6188_v10  ;;  %v6190_v40 = vld [vmem:[#allocation68_spill] sm:$0xff] }
 0x1d1   : >> { %v1472_v3 = vmul.f32 %v4425_v16, %v6188_v10  ;;  %v1509_v43 = vmul.f32 %v4433_v41, %v6189_v15  ;;  %v1513_v1 = vmul.f32 %v4437_v61, %v6189_v15  ;;  %v1573_v14 = vmul.f32 %v4387_v62, %v3462_v53 }
 0x1d2   : >> { %v1581_v37 = vmul.f32 %v4391_v24, %v6158_v55  ;;  %v1438_v2 = vadd.f32 %v1436_v46, %v1397_v13  ;;  %v1442_v54 = vadd.f32 %v1440_v9, %v1401_v21  ;;  %v1575_v63 = vmul.f32 %v4391_v24, %v3462_v53  ;;  %v6191_v46 = vld [vmem:[#allocation70_spill] sm:$0xff] }
 0x1d3   : >> { %v1585_v29 = vmul.f32 %v4402_v12, %v6158_v55  ;;  %v1735_v34 = vadd.f32 %v1721_v32, %v6028_v22  ;;  %v1739_v39 = vadd.f32 %v1725_v27, %v6028_v22  ;;  %v1525_v33 = vmul.f32 %v4437_v61, %v6190_v40 }
 0x1d4   : >> { %v1597_v62 = vmul.f32 %v4402_v12, %v6098_v42  ;;  %v1454_v23 = vadd.f32 %v1452_v58, %v1438_v2  ;;  %v1458_v5 = vadd.f32 %v1456_v8, %v1442_v54  ;;  %v1529_v13 = vmul.f32 %v4441_v38, %v6190_v40 }
 0x1d5   : >> { %v1601_v24 = vmul.f32 %v4425_v16, %v6098_v42  ;;  %v1541_v9 = vmul.f32 %v4441_v38, %v6191_v46  ;;  %v1545_v32 = vmul.f32 %v4453_v0, %v6191_v46  ;;  %v1583_v27 = vadd.f32 %v1581_v37, %v1573_v14  ;;  %v6192_v37 = vld [vmem:[#allocation45_spill] sm:$0xff] }
 0x1d6   : >> { %v1613_v21 = vmul.f32 %v4433_v41, %v6099_v56  ;;  %v1470_v59 = vadd.f32 %v1468_v47, %v1454_v23  ;;  %v1474_v22 = vadd.f32 %v1472_v3, %v1458_v5  ;;  %v1587_v58 = vadd.f32 %v1585_v29, %v1575_v63  ;;  %v6194_v5 = vld [vmem:[#allocation46_spill] sm:$0xff] }
 0x1d7   : >> { %v1617_v8 = vmul.f32 %v4437_v61, %v6099_v56  ;;  %v1737_v2 = vmax.f32 %v1735_v34, 0.0  ;;  %v1741_v54 = vmax.f32 %v1739_v39, 0.0  ;;  %v1599_v30 = vadd.f32 %v1597_v62, %v1583_v27 }
 0x1d8   : >> { %v1629_v42 = vmul.f32 %v4437_v61, %v6103_v25  ;;  %v1511_v55 = vadd.f32 %v1509_v43, %v1470_v59  ;;  %v1515_v53 = vadd.f32 %v1513_v1, %v1474_v22  ;;  %v1603_v4 = vadd.f32 %v1601_v24, %v1587_v58 }
 0x1d9   : >> { %v1633_v14 = vmul.f32 %v4441_v38, %v6103_v25  ;;  %v6193_v41 = vmax.f32 %v6192_v37, 0.0  ;;  %v4604_v47 = vrot.slane %v6194_v5, %v6186_v26  ;;  %v1615_v3 = vadd.f32 %v1613_v21, %v1599_v30 }
 0x1da   : >> { %v1645_v63 = vmul.f32 %v4441_v38, %v6188_v10  ;;  %v1527_v29 = vadd.f32 %v1525_v33, %v1511_v55  ;;  %v1531_v34 = vadd.f32 %v1529_v13, %v1515_v53  ;;  %v1619_v61 = vadd.f32 %v1617_v8, %v1603_v4  ;;  %v6195_v4 = vld [vmem:[#allocation25_spill] sm:$0xff]  ;;  %v6197_v33 = vld [vmem:[#allocation40_spill] sm:$0xff] }
 0x1db   : >> { %v1274_v23 = vmax.f32 %v6193_v41, %v1266_v17  ;;  %v1649_v22 = vmul.f32 %v4453_v0, %v6188_v10  ;;  %v1751_v59 = vmax.f32 %v1560_v45, %v1737_v2  ;;  %v1753_v43 = vmax.f32 %v1564_v44, %v1741_v54  ;;  %v6196_v44 = vld [vmem:[#allocation31_spill] sm:$0xff] }
 0x1dc   : >> { %v1631_v1 = vadd.f32 %v1629_v42, %v1615_v3  ;;  %v1686_v17 = vmul.f32 %v4484_v20, %v6189_v15  ;;  %v1543_v39 = vadd.f32 %v1541_v9, %v1527_v29  ;;  %v1547_v62 = vadd.f32 %v1545_v32, %v1531_v34  ;;  %v6198_v9 = vld [vmem:[#allocation39_spill] sm:$0xff] }
 0x1dd   : >> { %v1635_v24 = vadd.f32 %v1633_v14, %v1619_v61  ;;  %v1690_v30 = vmul.f32 %v4488_v28, %v6189_v15  ;;  %v1702_v53 = vmul.f32 %v4488_v28, %v6190_v40  ;;  %v1706_v55 = vmul.f32 %v4511_v50, %v6190_v40 }
 0x1de   : >> { %v1647_v27 = vadd.f32 %v1645_v63, %v1631_v1  ;;  %v4620_v45 = vrot.slane %v6195_v4, %v6186_v26  ;;  %v4624_v20 = vrot.slane %v6195_v4, %v6196_v44  ;;  %v1376_v13 = vmul.f32 %v4353_v11, %v6197_v33 }
 0x1df   : >> { %v1651_v42 = vadd.f32 %v1649_v22, %v1635_v24  ;;  %v1388_v32 = vmul.f32 %v4370_v57, %v6198_v9  ;;  %v4631_v28 = vmax.f32 %v4546_v36, %v1274_v23  ;;  %v1378_v58 = vmul.f32 %v4370_v57, %v6197_v33 }
 0x1e0   : >> { %v1688_v21 = vadd.f32 %v1686_v17, %v1647_v27  ;;  %v1392_v8 = vmul.f32 %v4620_v45, %v6198_v9  ;;  %v4637_v2 = vmax.f32 %v1751_v59, %v1753_v43  ;;  %v4640_v54 = vadd.f32 %v1543_v39, %v6173_v19 }
 0x1e1   : >> { %v1692_v14 = vadd.f32 %v1690_v30, %v1651_v42  ;;  %v1718_v37 = vmul.f32 %v4511_v50, %v6191_v46  ;;  %v4645_v41 = vadd.f32 %v1547_v62, %v6173_v19  ;;  %v1722_v23 = vmul.f32 %v4525_v18, %v6191_v46 }
 0x1e2   : >> { %v1704_v36 = vadd.f32 %v1702_v53, %v1688_v21  ;;  %v4651_v3 = vrot.slane %v4364_v60, %v6196_v44  ;;  %v1390_v29 = vadd.f32 %v1388_v32, %v1376_v13  ;;  %v1404_v34 = vmul.f32 %v4620_v45, %v6174_v35 }
 0x1e3   : >> { %v1708_v63 = vadd.f32 %v1706_v55, %v1692_v14  ;;  %v1408_v61 = vmul.f32 %v4624_v20, %v6174_v35  ;;  %v1394_v22 = vadd.f32 %v1392_v8, %v1378_v58  ;;  %v1578_v59 = vmul.f32 %v4402_v12, %v6197_v33 }
 0x1e4   : >> { %v1580_v43 = vmul.f32 %v4425_v16, %v6197_v33  ;;  %v1590_v1 = vmul.f32 %v4425_v16, %v6198_v9  ;;  %v1720_v60 = vadd.f32 %v1718_v37, %v1704_v36  ;;  %v1445_v17 = vmul.f32 %v4402_v12, %v6176_v31 }
 0x1e5   : >> { %v1449_v39 = vmul.f32 %v4425_v16, %v6176_v31  ;;  %v1594_v62 = vmul.f32 %v4507_v49, %v6198_v9  ;;  %v1461_v24 = vmul.f32 %v4425_v16, %v6177_v6  ;;  %v1465_v30 = vmul.f32 %v4507_v49, %v6177_v6 }
 0x1e6   : >> { %v1606_v27 = vmul.f32 %v4507_v49, %v6174_v35  ;;  %v1610_v53 = vmul.f32 %v4651_v3, %v6174_v35  ;;  %v1724_v55 = vadd.f32 %v1722_v23, %v1708_v63  ;;  %v1406_v4 = vadd.f32 %v1404_v34, %v1390_v29 }
 0x1e7   : >> { %v1592_v42 = vadd.f32 %v1590_v1, %v1578_v59  ;;  %v1622_v13 = vmul.f32 %v4441_v38, %v6176_v31  ;;  %v1410_v32 = vadd.f32 %v1408_v61, %v1394_v22  ;;  %v4681_v21 = vrot.slane %v6194_v5, %v6196_v44 }
 0x1e8   : >> { %v1596_v58 = vadd.f32 %v1594_v62, %v1580_v43  ;;  %v1626_v8 = vmul.f32 %v4453_v0, %v6176_v31  ;;  %v4686_v14 = vadd.f32 %v1720_v60, %v6173_v19  ;;  %v1477_v37 = vmul.f32 %v4507_v49, %v6180_v7 }
 0x1e9   : >> { %v1608_v36 = vadd.f32 %v1606_v27, %v1592_v42  ;;  %v1638_v23 = vmul.f32 %v4453_v0, %v6177_v6  ;;  %v1481_v63 = vmul.f32 %v4651_v3, %v6180_v7  ;;  %v1518_v5 = vmul.f32 %v4441_v38, %v6181_v48 }
 0x1ea   : >> { %v1612_v29 = vadd.f32 %v1610_v53, %v1596_v58  ;;  %v1642_v34 = vmul.f32 %v4604_v47, %v6177_v6  ;;  %v1738_v61 = vadd.f32 %v1724_v55, %v6173_v19  ;;  %v1447_v22 = vadd.f32 %v1445_v17, %v1406_v4 }
 0x1eb   : >> { %v1451_v59 = vadd.f32 %v1449_v39, %v1410_v32  ;;  %v1624_v43 = vadd.f32 %v1622_v13, %v1608_v36  ;;  %v1654_v60 = vmul.f32 %v4604_v47, %v6180_v7  ;;  %v1658_v62 = vmul.f32 %v4681_v21, %v6180_v7 }
 0x1ec   : >> { %v1628_v1 = vadd.f32 %v1626_v8, %v1612_v29  ;;  %v4705_v27 = vrot.slane %v4472_v51, %v6186_v26  ;;  %v1463_v53 = vadd.f32 %v1461_v24, %v1447_v22  ;;  %v1522_v58 = vmul.f32 %v4453_v0, %v6181_v48 }
 0x1ed   : >> { %v1467_v42 = vadd.f32 %v1465_v30, %v1451_v59  ;;  %v1640_v55 = vadd.f32 %v1638_v23, %v1624_v43  ;;  %v4711_v39 = vrot.slane %v4472_v51, %v6196_v44  ;;  %v1695_v4 = vmul.f32 %v4511_v50, %v6181_v48  ;;  %v6199_v59 = vld [vmem:[#allocation69_spill] sm:$0xff] }
 0x1ee   : >> { %v1644_v17 = vadd.f32 %v1642_v34, %v1628_v1  ;;  %v1699_v13 = vmul.f32 %v4525_v18, %v6181_v48  ;;  %v1479_v32 = vadd.f32 %v1477_v37, %v1463_v53  ;;  %v1534_v24 = vmul.f32 %v4453_v0, %v6182_v52 }
 0x1ef   : >> { %v1483_v8 = vadd.f32 %v1481_v63, %v1467_v42  ;;  %v1538_v30 = vmul.f32 %v4604_v47, %v6182_v52  ;;  %v1656_v36 = vadd.f32 %v1654_v60, %v1640_v55  ;;  %v1711_v51 = vmul.f32 %v4525_v18, %v6182_v52  ;;  %v1335_v55 = vpop.permute.xlu0 %1334 }
 0x1f0   : >> { %v1660_v23 = vadd.f32 %v1658_v62, %v1644_v17  ;;  %v1715_v29 = vmul.f32 %v4705_v27, %v6182_v52  ;;  %v1520_v34 = vadd.f32 %v1518_v5, %v1479_v32  ;;  %v1550_v37 = vmul.f32 %v4604_v47, %v6199_v59  ;;  %v6201_v52 = vld [vmem:[#allocation32_spill] sm:$0xff] }
 0x1f1   : >> { %v1524_v22 = vadd.f32 %v1522_v58, %v1483_v8  ;;  %v1554_v63 = vmul.f32 %v4681_v21, %v6199_v59  ;;  %v1697_v43 = vadd.f32 %v1695_v4, %v1656_v36  ;;  %v1727_v60 = vmul.f32 %v4705_v27, %v6199_v59  ;;  %v1780_v4 = vpop.permute.xlu1 %1779 }
 0x1f2   : >> { %v1701_v1 = vadd.f32 %v1699_v13, %v1660_v23  ;;  %v1731_v62 = vmul.f32 %v4711_v39, %v6199_v59  ;;  %v1559_v53 = vmax.f32 %v4640_v54, 0.0  ;;  %v1563_v42 = vmax.f32 %v4645_v41, 0.0  ;;  %v6200_v23 = vld [vmem:[#allocation33_spill] sm:$0xff] }
 0x1f3   : >> { %v1536_v5 = vadd.f32 %v1534_v24, %v1520_v34  ;;  %v1540_v58 = vadd.f32 %v1538_v30, %v1524_v22  ;;  %v1736_v17 = vmax.f32 %v4686_v14, 0.0  ;;  %v1740_v32 = vmax.f32 %v1738_v61, 0.0  ;;  %v6202_v61 = vld [vmem:[#allocation43_spill] sm:$0xff]  ;;  %v6203_v30 = vld [vmem:[#allocation49_spill] sm:$0xff]  ;;  %v6205_v34 = vld [vmem:[#allocation54_spill] sm:$0xff] }
 0x1f4   : >> { %v1713_v8 = vadd.f32 %v1711_v51, %v1697_v43  ;;  %v1717_v44 = vadd.f32 %v1715_v29, %v1701_v1  ;;  %v1375_v26 = vmul.f32 %v4353_v11, %v6200_v23  ;;  %v1387_v59 = vmul.f32 %v4370_v57, %v6201_v52  ;;  %v6204_v51 = vld [vmem:[#allocation48_spill] sm:$0xff]  ;;  %v6206_v43 = vld [vmem:[#allocation21_spill] sm:$0xff] }
 0x1f5   : >> { %v1552_v13 = vadd.f32 %v1550_v37, %v1536_v5  ;;  %v1556_v36 = vadd.f32 %v1554_v63, %v1540_v58  ;;  %v1377_v41 = vmul.f32 %v4370_v57, %v6200_v23  ;;  %v1391_v14 = vmul.f32 %v4620_v45, %v6201_v52 }
 0x1f6   : >> { %v1729_v54 = vadd.f32 %v1727_v60, %v1713_v8  ;;  %v1733_v48 = vadd.f32 %v1731_v62, %v1717_v44  ;;  %v1314_v24 = vmul.f32 %v6202_v61, %v4631_v28  ;;  %v4748_v29 = vadd.f32 %v6204_v51, %v6203_v30 }
 0x1f7   : >> { %v1342_v11 = vmul.f32 %v1335_v55, %v4631_v28  ;;  %v1403_v22 = vmul.f32 %v4620_v45, %v6205_v34  ;;  %v1783_v44 = vmul.f32 %v1780_v4, %v4637_v2  ;;  %v1750_v37 = vmax.f32 %v1559_v53, %v1736_v17 }
 0x1f8   : >> { %v1752_v63 = vmax.f32 %v1563_v42, %v1740_v32  ;;  %v1407_v57 = vmul.f32 %v4624_v20, %v6205_v34  ;;  %v1566_v1 = vadd.f32 %v1552_v13, %v6206_v43  ;;  %v1570_v60 = vadd.f32 %v1556_v36, %v6206_v43  ;;  %v6207_v42 = vld [vmem:[#allocation24_spill] sm:$0xff]  ;;  %v6209_v20 = vld [vmem:[#allocation50_spill] sm:$0xff] }
 0x1f9   : >> { %v1389_v62 = vadd.f32 %v1387_v59, %v1375_v26  ;;  %v1444_v5 = vmul.f32 %v4402_v12, %v6099_v56  ;;  %v1743_v28 = vadd.f32 %v1729_v54, %v6206_v43  ;;  %v1747_v58 = vadd.f32 %v1733_v48, %v6206_v43  ;;  %v6211_v59 = vld [vmem:[#allocation44_spill] sm:$0xff] }
 0x1fa   : >> { %v1393_v45 = vadd.f32 %v1391_v14, %v1377_v41  ;;  %v1448_v53 = vmul.f32 %v4425_v16, %v6099_v56  ;;  %v4765_v55 = vadd.f32 %v1314_v24, %v6207_v42  ;;  %v4768_v17 = vadd.f32 %v1342_v11, %v6209_v20 }
 0x1fb   : >> { %v1405_v32 = vadd.f32 %v1403_v22, %v1389_v62  ;;  %v1460_v26 = vmul.f32 %v4425_v16, %v6103_v25  ;;  %v4773_v8 = vadd.f32 %v1783_v44, %v6211_v59  ;;  %v4775_v4 = vmax.f32 %v1750_v37, %v1752_v63 }
 0x1fc   : >> { %6208 = vst [vmem:[#allocation51_spill] sm:$0xff] %v4765_v55  ;;  %6210 = vst [vmem:[#allocation55_spill] sm:$0xff] %v4768_v17  ;;  %v1409_v48 = vadd.f32 %v1407_v57, %v1393_v45  ;;  %v1464_v13 = vmul.f32 %v4507_v49, %v6103_v25  ;;  %v1568_v36 = vmax.f32 %v1566_v1, 0.0  ;;  %v1572_v54 = vmax.f32 %v1570_v60, 0.0 }
 0x1fd   : >> { %6212 = vst [vmem:[#allocation56_spill] sm:$0xff] %v4775_v4  ;;  %v1446_v41 = vadd.f32 %v1444_v5, %v1405_v32  ;;  %v1476_v14 = vmul.f32 %v4507_v49, %v6188_v10  ;;  %v1745_v61 = vmax.f32 %v1743_v28, 0.0  ;;  %v1749_v24 = vmax.f32 %v1747_v58, 0.0  ;;  %v1775_v58 = vpop.permute.xlu0 %1774 }
 0x1fe   : >> { %v1450_v30 = vadd.f32 %v1448_v53, %v1409_v48  ;;  %v1480_v51 = vmul.f32 %v4651_v3, %v6188_v10  ;;  %v1517_v22 = vmul.f32 %v4441_v38, %v6189_v15  ;;  %v1577_v44 = vmul.f32 %v4402_v12, %v6200_v23 }
 0x1ff   : >> { %v1462_v11 = vadd.f32 %v1460_v26, %v1446_v41  ;;  %v1589_v37 = vmul.f32 %v4425_v16, %v6201_v52  ;;  %v1521_v57 = vmul.f32 %v4453_v0, %v6189_v15  ;;  %v1579_v1 = vmul.f32 %v4425_v16, %v6200_v23 }
 0x200   : >> { %v1466_v63 = vadd.f32 %v1464_v13, %v1450_v30  ;;  %v1593_v60 = vmul.f32 %v4507_v49, %v6201_v52  ;;  %v1533_v5 = vmul.f32 %v4453_v0, %v6190_v40  ;;  %v1537_v12 = vmul.f32 %v4604_v47, %v6190_v40 }
 0x201   : >> { %v1478_v62 = vadd.f32 %v1476_v14, %v1462_v11  ;;  %v1605_v28 = vmul.f32 %v4507_v49, %v6205_v34  ;;  %v1755_v45 = vmax.f32 %v1568_v36, %v1745_v61  ;;  %v1757_v53 = vmax.f32 %v1572_v54, %v1749_v24  ;;  %v4821_v11 = vld [vmem:[%s3408_s12 + $0xc] sm:$0x3f] }
 0x202   : >> { %v1482_v42 = vadd.f32 %v1480_v51, %v1466_v63  ;;  %v1609_v16 = vmul.f32 %v4651_v3, %v6205_v34  ;;  %v1549_v32 = vmul.f32 %v4604_v47, %v6191_v46  ;;  %v1591_v26 = vadd.f32 %v1589_v37, %v1577_v44  ;;  %v1794_v3 = vpop.permute.xlu1 %1793  ;;  %6214 = vst [vmem:[#allocation58_spill] sm:$0xff] %v4821_v11 }
 0x203   : >> { %v1519_v20 = vadd.f32 %v1517_v22, %v1478_v62  ;;  %v1621_v59 = vmul.f32 %v4441_v38, %v6099_v56  ;;  %v1553_v49 = vmul.f32 %v4681_v21, %v6191_v46  ;;  %v1595_v13 = vadd.f32 %v1593_v60, %v1579_v1 }
 0x204   : >> { %v1523_v48 = vadd.f32 %v1521_v57, %v1482_v42  ;;  %v1625_v36 = vmul.f32 %v4453_v0, %v6099_v56  ;;  %v4812_v54 = vmul.f32 %v1775_v58, %v4775_v4  ;;  %v1607_v14 = vadd.f32 %v1605_v28, %v1591_v26 }
 0x205   : >> { %v1535_v41 = vadd.f32 %v1533_v5, %v1519_v20  ;;  %v1637_v61 = vmul.f32 %v4453_v0, %v6103_v25  ;;  %v4816_v24 = vmax.f32 %v1755_v45, %v1757_v53  ;;  %v1611_v30 = vadd.f32 %v1609_v16, %v1595_v13  ;;  %v4851_v16 = vld [vmem:[%s3408_s12 + $0x24] sm:$0x3f] }
 0x206   : >> { %6213 = vst [vmem:[#allocation57_spill] sm:$0xff] %v4812_v54  ;;  %v1539_v38 = vadd.f32 %v1537_v12, %v1523_v48  ;;  %v1641_v51 = vmul.f32 %v4604_v47, %v6103_v25  ;;  %v1623_v44 = vadd.f32 %v1621_v59, %v1607_v14  ;;  %v1653_v37 = vmul.f32 %v4604_v47, %v6188_v10  ;;  %v6215_v12 = vld [vmem:[#allocation26_spill] sm:$0xff]  ;;  %v6216_v47 = vld [vmem:[#allocation27_spill] sm:$0xff]  ;;  %v6218_v48 = vld [vmem:[#allocation29_spill] sm:$0xff]  ;;  %v1808_v14 = vpop.permute.xlu1 %1807 }
 0x207   : >> { %v1551_v22 = vadd.f32 %v1549_v32, %v1535_v41  ;;  %v1657_v63 = vmul.f32 %v4681_v21, %v6188_v10  ;;  %v4828_v0 = vmul.f32 %v1794_v3, %v4816_v24  ;;  %v1627_v1 = vadd.f32 %v1625_v36, %v1611_v30 }
 0x208   : >> { %v1555_v57 = vadd.f32 %v1553_v49, %v1539_v38  ;;  %v1694_v60 = vmul.f32 %v4511_v50, %v6189_v15  ;;  %v1639_v62 = vadd.f32 %v1637_v61, %v1623_v44  ;;  %v1698_v5 = vmul.f32 %v4525_v18, %v6189_v15  ;;  %v6217_v50 = vld [vmem:[#allocation28_spill] sm:$0xff] }
 0x209   : >> { %v4836_v28 = vrot.slane %v4821_v11, %v6215_v12  ;;  %v4840_v58 = vrot.slane %v4821_v11, %v6216_v47  ;;  %v1643_v21 = vadd.f32 %v1641_v51, %v1627_v1  ;;  %v1710_v45 = vmul.f32 %v4525_v18, %v6190_v40 }
 0x20a   : >> { %v1714_v53 = vmul.f32 %v4705_v27, %v6190_v40  ;;  %v4848_v42 = vrot.slane %v4821_v11, %v6217_v50  ;;  %v4854_v20 = vadd.f32 %v1551_v22, %v6173_v19  ;;  %v1655_v32 = vadd.f32 %v1653_v37, %v1639_v62 }
 0x20b   : >> { %v1854_v26 = vmul.f32 %v4836_v28, %v6197_v33  ;;  %v1862_v59 = vmul.f32 %v4840_v58, %v6198_v9  ;;  %v1726_v18 = vmul.f32 %v4705_v27, %v6191_v46  ;;  %v4864_v49 = vrot.slane %v4821_v11, %v6218_v48 }
 0x20c   : >> { %v1856_v13 = vmul.f32 %v4840_v58, %v6197_v33  ;;  %v1866_v36 = vmul.f32 %v4848_v42, %v6198_v9  ;;  %v1659_v3 = vadd.f32 %v1657_v63, %v1643_v21  ;;  %v1696_v41 = vadd.f32 %v1694_v60, %v1655_v32  ;;  %v4901_v21 = vld [vmem:[%s3408_s12 + $0x3c] sm:$0x3f] }
 0x20d   : >> { %v1878_v61 = vmul.f32 %v4848_v42, %v6174_v35  ;;  %v4874_v27 = vrot.slane %v4851_v16, %v6215_v12  ;;  %v4877_v38 = vadd.f32 %v1555_v57, %v6173_v19  ;;  %v4881_v30 = vmul.f32 %v4711_v39, %v6191_v46 }
 0x20e   : >> { %v1882_v51 = vmul.f32 %v4864_v49, %v6174_v35  ;;  %v4887_v22 = vrot.slane %v4851_v16, %v6216_v47  ;;  %v1700_v44 = vadd.f32 %v1698_v5, %v1659_v3  ;;  %v1712_v37 = vadd.f32 %v1710_v45, %v1696_v41 }
 0x20f   : >> { %v1864_v63 = vadd.f32 %v1862_v59, %v1854_v26  ;;  %v1919_v1 = vmul.f32 %v4874_v27, %v6176_v31  ;;  %v4892_v57 = vmul.f32 %v1808_v14, %v4637_v2  ;;  %v1868_v60 = vadd.f32 %v1866_v36, %v1856_v13 }
 0x210   : >> { %v4896_v39 = vrot.slane %v4851_v16, %v6217_v50  ;;  %v1923_v62 = vmul.f32 %v4887_v22, %v6176_v31  ;;  %v1716_v32 = vadd.f32 %v1714_v53, %v1700_v44  ;;  %v4903_v5 = vadd.f32 %v1726_v18, %v1712_v37 }
 0x211   : >> { %v1880_v45 = vadd.f32 %v1878_v61, %v1864_v63  ;;  %v1935_v26 = vmul.f32 %v4887_v22, %v6177_v6  ;;  %v1884_v59 = vadd.f32 %v1882_v51, %v1868_v60  ;;  %v4909_v2 = vrot.slane %v4851_v16, %v6218_v48 }
 0x212   : >> { %6219 = vst [vmem:[#allocation47_spill] sm:$0xff] %v4896_v39  ;;  %v1939_v13 = vmul.f32 %v4896_v39, %v6177_v6  ;;  %v1951_v36 = vmul.f32 %v4896_v39, %v6180_v7  ;;  %v4917_v53 = vrot.slane %v4901_v21, %v6215_v12  ;;  %v4921_v18 = vrot.slane %v4901_v21, %v6216_v47 }
 0x213   : >> { %6220 = vst [vmem:[#allocation34_spill] sm:$0xff] %v4909_v2  ;;  %v1921_v3 = vadd.f32 %v1919_v1, %v1880_v45  ;;  %v2056_v41 = vmul.f32 %v4874_v27, %v6197_v33  ;;  %v1925_v14 = vadd.f32 %v1923_v62, %v1884_v59  ;;  %v1955_v61 = vmul.f32 %v4909_v2, %v6180_v7 }
 0x214   : >> { %6221 = vst [vmem:[#allocation52_spill] sm:$0xff] %v4921_v18  ;;  %v2058_v51 = vmul.f32 %v4887_v22, %v6197_v33  ;;  %v2064_v44 = vmul.f32 %v4887_v22, %v6198_v9  ;;  %v4933_v63 = vrot.slane %v4901_v21, %v6217_v50  ;;  %v2068_v1 = vmul.f32 %v4896_v39, %v6198_v9  ;;  %v6223_v9 = vld [vmem:[#allocation67_spill] sm:$0xff] }
 0x215   : >> { %v1937_v37 = vadd.f32 %v1935_v26, %v1921_v3  ;;  %v2080_v60 = vmul.f32 %v4896_v39, %v6174_v35  ;;  %v1941_v62 = vadd.f32 %v1939_v13, %v1925_v14  ;;  %v4941_v45 = vrot.slane %v4901_v21, %v6218_v48  ;;  %v4946_v26 = vld [vmem:[%s3408_s12 + $0x54] sm:$0x3f] }
 0x216   : >> { %v2066_v59 = vadd.f32 %v2064_v44, %v2056_v41  ;;  %v2084_v17 = vmul.f32 %v4909_v2, %v6174_v35  ;;  %v6222_v3 = vld [vmem:[#allocation65_spill] sm:$0xff]  ;;  %v2070_v55 = vadd.f32 %v2068_v1, %v2058_v51  ;;  %v2096_v4 = vmul.f32 %v4917_v53, %v6176_v31 }
 0x217   : >> { %v1992_v54 = vmul.f32 %v4917_v53, %v6222_v3  ;;  %v2100_v13 = vmul.f32 %v4921_v18, %v6176_v31  ;;  %v1996_v14 = vmul.f32 %v4921_v18, %v6222_v3  ;;  %v2008_v41 = vmul.f32 %v4921_v18, %v6223_v9 }
 0x218   : >> { %v2082_v44 = vadd.f32 %v2080_v60, %v2066_v59  ;;  %v2112_v35 = vmul.f32 %v4921_v18, %v6177_v6  ;;  %v1953_v33 = vadd.f32 %v1951_v36, %v1937_v37  ;;  %v2086_v11 = vadd.f32 %v2084_v17, %v2070_v55  ;;  %v6224_v55 = vld [vmem:[#allocation69_spill] sm:$0xff] }
 0x219   : >> { %v2116_v51 = vmul.f32 %v4933_v63, %v6177_v6  ;;  %v4964_v1 = vrot.slane %v4946_v26, %v6215_v12  ;;  %v1957_v31 = vadd.f32 %v1955_v61, %v1941_v62  ;;  %v2128_v40 = vmul.f32 %v4933_v63, %v6180_v7 }
 0x21a   : >> { %v2098_v46 = vadd.f32 %v2096_v4, %v2082_v44  ;;  %v4970_v60 = vrot.slane %v4946_v26, %v6216_v47  ;;  %v2012_v36 = vmul.f32 %v4933_v63, %v6223_v9  ;;  %v2024_v17 = vmul.f32 %v4933_v63, %v6224_v55  ;;  %v1822_v44 = vpop.permute.xlu1 %1821 }
 0x21b   : >> { %v2102_v37 = vadd.f32 %v2100_v13, %v2086_v11  ;;  %v2132_v59 = vmul.f32 %v4941_v45, %v6180_v7  ;;  %v1994_v12 = vadd.f32 %v1992_v54, %v1953_v33  ;;  %v2028_v4 = vmul.f32 %v4941_v45, %v6224_v55 }
 0x21c   : >> { %v2114_v61 = vadd.f32 %v2112_v35, %v2098_v46  ;;  %v2169_v62 = vmul.f32 %v4964_v1, %v6222_v3  ;;  %v1998_v47 = vadd.f32 %v1996_v14, %v1957_v31  ;;  %v4984_v18 = vrot.slane %v4946_v26, %v6217_v50  ;;  %v6228_v50 = vld [vmem:[#allocation68_spill] sm:$0xff] }
 0x21d   : >> { %v2118_v6 = vadd.f32 %v2116_v51, %v2102_v37  ;;  %v2173_v11 = vmul.f32 %v4970_v60, %v6222_v3  ;;  %v1732_v13 = vadd.f32 %v4881_v30, %v1716_v32  ;;  %v2010_v33 = vadd.f32 %v2008_v41, %v1994_v12 }
 0x21e   : >> { %v2130_v54 = vadd.f32 %v2128_v40, %v2114_v61  ;;  %v2185_v35 = vmul.f32 %v4970_v60, %v6223_v9  ;;  %v2014_v46 = vadd.f32 %v2012_v36, %v1998_v47  ;;  %v4993_v31 = vrot.slane %v4946_v26, %v6218_v48 }
 0x21f   : >> { %v2134_v7 = vadd.f32 %v2132_v59, %v2118_v6  ;;  %v2189_v14 = vmul.f32 %v4984_v18, %v6223_v9  ;;  %v4999_v51 = vadd.f32 %v4828_v0, %v4773_v8  ;;  %v1825_v30 = vmul.f32 %v1822_v44, %v4816_v24 }
 0x220   : >> { %v2171_v12 = vadd.f32 %v2169_v62, %v2130_v54  ;;  %v2201_v40 = vmul.f32 %v4984_v18, %v6224_v55  ;;  %v2026_v32 = vadd.f32 %v2024_v17, %v2010_v33  ;;  %v2030_v47 = vadd.f32 %v2028_v4, %v2014_v46 }
 0x221   : >> { %v2175_v6 = vadd.f32 %v2173_v11, %v2134_v7  ;;  %v2205_v41 = vmul.f32 %v4993_v31, %v6224_v55  ;;  %v5010_v8 = vadd.f32 %v4903_v5, %v6173_v19  ;;  %v5013_v24 = vadd.f32 %v1732_v13, %v6173_v19 }
 0x222   : >> { %v2187_v0 = vadd.f32 %v2185_v35, %v2171_v12  ;;  %v1813_v17 = vadd.f32 %v4892_v57, %v4748_v29  ;;  %v1853_v7 = vmul.f32 %v4836_v28, %v6200_v23  ;;  %v1855_v61 = vmul.f32 %v4840_v58, %v6200_v23  ;;  %v6226_v28 = vld [vmem:[#allocation30_spill] sm:$0xff] }
 0x223   : >> { %v2191_v59 = vadd.f32 %v2189_v14, %v2175_v6  ;;  %v1861_v62 = vmul.f32 %v4840_v58, %v6201_v52  ;;  %v1865_v5 = vmul.f32 %v4848_v42, %v6201_v52  ;;  %v2040_v11 = vadd.f32 %v2026_v32, %v6206_v43 }
 0x224   : >> { %v2203_v4 = vadd.f32 %v2201_v40, %v2187_v0  ;;  %v5025_v44 = vadd.f32 %v1825_v30, %v1813_v17  ;;  %v2044_v29 = vadd.f32 %v2030_v47, %v6206_v43  ;;  %v5032_v33 = vrot.slane %v4851_v16, %v6226_v28 }
 0x225   : >> { %v2207_v57 = vadd.f32 %v2205_v41, %v2191_v59  ;;  %v1877_v54 = vmul.f32 %v4848_v42, %v6205_v34  ;;  %v1881_v58 = vmul.f32 %v4864_v49, %v6205_v34  ;;  %v5041_v46 = vrot.slane %v4901_v21, %v6226_v28 }
 0x226   : >> { %6225 = vst [vmem:[#allocation35_spill] sm:$0xff] %v5025_v44  ;;  %v2217_v14 = vadd.f32 %v2203_v4, %v6206_v43  ;;  %v1863_v12 = vadd.f32 %v1861_v62, %v1853_v7  ;;  %v1867_v40 = vadd.f32 %v1865_v5, %v1855_v61  ;;  %v1918_v32 = vmul.f32 %v4874_v27, %v6099_v56 }
 0x227   : >> { %v2221_v30 = vadd.f32 %v2207_v57, %v6206_v43  ;;  %v1922_v47 = vmul.f32 %v4887_v22, %v6099_v56  ;;  %v2042_v6 = vmax.f32 %v2040_v11, 0.0  ;;  %v2046_v41 = vmax.f32 %v2044_v29, 0.0 }
 0x228   : >> { %v1934_v0 = vmul.f32 %v4887_v22, %v6103_v25  ;;  %v1938_v17 = vmul.f32 %v4896_v39, %v6103_v25  ;;  %v1879_v59 = vadd.f32 %v1877_v54, %v1863_v12  ;;  %v1883_v4 = vadd.f32 %v1881_v58, %v1867_v40 }
 0x229   : >> { %v2055_v7 = vmul.f32 %v4874_v27, %v6200_v23  ;;  %v2063_v61 = vmul.f32 %v4887_v22, %v6201_v52  ;;  %v2219_v62 = vmax.f32 %v2217_v14, 0.0  ;;  %v2223_v5 = vmax.f32 %v2221_v30, 0.0  ;;  %v6227_v30 = vld [vmem:[#allocation52_spill] sm:$0xff] }
 0x22a   : >> { %v2057_v11 = vmul.f32 %v4887_v22, %v6200_v23  ;;  %v2067_v29 = vmul.f32 %v4896_v39, %v6201_v52  ;;  %v1920_v57 = vadd.f32 %v1918_v32, %v1879_v59  ;;  %v1924_v37 = vadd.f32 %v1922_v47, %v1883_v4 }
 0x22b   : >> { %v1950_v54 = vmul.f32 %v4896_v39, %v6188_v10  ;;  %v2079_v58 = vmul.f32 %v4896_v39, %v6205_v34  ;;  %v1954_v27 = vmul.f32 %v4909_v2, %v6188_v10  ;;  %v1991_v14 = vmul.f32 %v4917_v53, %v6189_v15 }
 0x22c   : >> { %v1995_v22 = vmul.f32 %v6227_v30, %v6189_v15  ;;  %v2083_v12 = vmul.f32 %v4909_v2, %v6205_v34  ;;  %v1936_v40 = vadd.f32 %v1934_v0, %v1920_v57  ;;  %v1940_v32 = vadd.f32 %v1938_v17, %v1924_v37 }
 0x22d   : >> { %v2065_v47 = vadd.f32 %v2063_v61, %v2055_v7  ;;  %v2095_v59 = vmul.f32 %v4917_v53, %v6099_v56  ;;  %v2233_v4 = vmax.f32 %v2042_v6, %v2219_v62  ;;  %v2235_v35 = vmax.f32 %v2046_v41, %v2223_v5  ;;  %v6229_v41 = vld [vmem:[#allocation70_spill] sm:$0xff] }
 0x22e   : >> { %v2069_v36 = vadd.f32 %v2067_v29, %v2057_v11  ;;  %v2099_v13 = vmul.f32 %v6227_v30, %v6099_v56  ;;  %v1952_v48 = vadd.f32 %v1950_v54, %v1936_v40  ;;  %v2007_v44 = vmul.f32 %v6227_v30, %v6228_v50  ;;  %v2262_v54 = vpop.permute.xlu1 %2261 }
 0x22f   : >> { %v2081_v43 = vadd.f32 %v2079_v58, %v2065_v47  ;;  %v2111_v34 = vmul.f32 %v6227_v30, %v6103_v25  ;;  %v1956_v0 = vadd.f32 %v1954_v27, %v1940_v32  ;;  %v2011_v37 = vmul.f32 %v4933_v63, %v6228_v50 }
 0x230   : >> { %v2085_v17 = vadd.f32 %v2083_v12, %v2069_v36  ;;  %v2115_v53 = vmul.f32 %v4933_v63, %v6103_v25  ;;  %v1993_v6 = vadd.f32 %v1991_v14, %v1952_v48  ;;  %v2023_v7 = vmul.f32 %v4933_v63, %v6229_v41  ;;  %v6232_v12 = vld [vmem:[#allocation40_spill] sm:$0xff] }
 0x231   : >> { %v2097_v61 = vadd.f32 %v2095_v59, %v2081_v43  ;;  %v2127_v62 = vmul.f32 %v4933_v63, %v6188_v10  ;;  %v5089_v5 = vmax.f32 %v2233_v4, %v2235_v35  ;;  %v1997_v11 = vadd.f32 %v1995_v22, %v1956_v0  ;;  %v6230_v35 = vld [vmem:[#allocation58_spill] sm:$0xff]  ;;  %v6231_v22 = vld [vmem:[#allocation31_spill] sm:$0xff] }
 0x232   : >> { %v2027_v29 = vmul.f32 %v4941_v45, %v6229_v41  ;;  %v2101_v57 = vadd.f32 %v2099_v13, %v2085_v17  ;;  %v2009_v36 = vadd.f32 %v2007_v44, %v1993_v6  ;;  %v2131_v48 = vmul.f32 %v4941_v45, %v6188_v10  ;;  %v6234_v6 = vld [vmem:[#allocation53_spill] sm:$0xff] }
 0x233   : >> { %v2113_v58 = vadd.f32 %v2111_v34, %v2097_v61  ;;  %v2168_v27 = vmul.f32 %v4964_v1, %v6189_v15  ;;  %v2172_v14 = vmul.f32 %v4970_v60, %v6189_v15  ;;  %v5101_v30 = vrot.slane %v6230_v35, %v6226_v28  ;;  %v6233_v1 = vld [vmem:[#allocation39_spill] sm:$0xff] }
 0x234   : >> { %v2117_v43 = vadd.f32 %v2115_v53, %v2101_v57  ;;  %v5105_v13 = vrot.slane %v6230_v35, %v6231_v22  ;;  %v2184_v34 = vmul.f32 %v4970_v60, %v6228_v50  ;;  %v1858_v40 = vmul.f32 %v4848_v42, %v6232_v12 }
 0x235   : >> { %v2129_v44 = vadd.f32 %v2127_v62, %v2113_v58  ;;  %v1870_v32 = vmul.f32 %v4864_v49, %v6233_v1  ;;  %v5114_v47 = vmul.f32 %v2262_v54, %v5089_v5  ;;  %v2013_v59 = vadd.f32 %v2011_v37, %v1997_v11 }
 0x236   : >> { %v1860_v4 = vmul.f32 %v4864_v49, %v6232_v12  ;;  %v1874_v0 = vmul.f32 %v5101_v30, %v6233_v1  ;;  %v5120_v17 = vadd.f32 %v2023_v7, %v2009_v36  ;;  %v2133_v53 = vadd.f32 %v2131_v48, %v2117_v43 }
 0x237   : >> { %v2170_v60 = vadd.f32 %v2168_v27, %v2129_v44  ;;  %v1886_v61 = vmul.f32 %v5101_v30, %v6234_v6  ;;  %v5124_v62 = vadd.f32 %v2027_v29, %v2013_v59  ;;  %v5128_v57 = vmul.f32 %v4984_v18, %v6228_v50  ;;  %v6235_v27 = vld [vmem:[#allocation59_spill] sm:$0xff]  ;;  %v6236_v59 = vld [vmem:[#allocation61_spill] sm:$0xff] }
 0x238   : >> { %v2200_v37 = vmul.f32 %v4984_v18, %v6229_v41  ;;  %v1890_v11 = vmul.f32 %v5105_v13, %v6234_v6  ;;  %v2174_v54 = vadd.f32 %v2172_v14, %v2133_v53  ;;  %v5136_v36 = vmul.f32 %v4993_v31, %v6229_v41  ;;  %v6237_v53 = vld [vmem:[#allocation63_spill] sm:$0xff] }
 0x239   : >> { %v2186_v7 = vadd.f32 %v2184_v34, %v2170_v60  ;;  %v1872_v58 = vadd.f32 %v1870_v32, %v1858_v40  ;;  %v1876_v48 = vadd.f32 %v1874_v0, %v1860_v4  ;;  %v5140_v29 = vrot.slane %v4851_v16, %v6231_v22 }
 0x23a   : >> { %v1927_v43 = vmul.f32 %v4896_v39, %v6235_v27  ;;  %v1931_v35 = vmul.f32 %v4909_v2, %v6235_v27  ;;  %v1943_v14 = vmul.f32 %v4909_v2, %v6236_v59  ;;  %v1947_v34 = vmul.f32 %v5032_v33, %v6236_v59 }
 0x23b   : >> { %v1888_v44 = vadd.f32 %v1886_v61, %v1872_v58  ;;  %v1959_v40 = vmul.f32 %v5032_v33, %v6237_v53  ;;  %v1892_v32 = vadd.f32 %v1890_v11, %v1876_v48  ;;  %v1963_v16 = vmul.f32 %v5140_v29, %v6237_v53 }
 0x23c   : >> { %v5156_v4 = vrot.slane %v4901_v21, %v6231_v22  ;;  %v2060_v0 = vmul.f32 %v4896_v39, %v6232_v12  ;;  %v2000_v60 = vmul.f32 %v4933_v63, %v6222_v3  ;;  %v2062_v61 = vmul.f32 %v4909_v2, %v6232_v12 }
 0x23d   : >> { %v2072_v58 = vmul.f32 %v4909_v2, %v6233_v1  ;;  %v2076_v11 = vmul.f32 %v5032_v33, %v6233_v1  ;;  %v1929_v48 = vadd.f32 %v1927_v43, %v1888_v44  ;;  %v1933_v41 = vadd.f32 %v1931_v35, %v1892_v32 }
 0x23e   : >> { %v2088_v21 = vmul.f32 %v5032_v33, %v6234_v6  ;;  %v2092_v50 = vmul.f32 %v5140_v29, %v6234_v6  ;;  %v2004_v15 = vmul.f32 %v4941_v45, %v6222_v3  ;;  %v2104_v12 = vmul.f32 %v4933_v63, %v6235_v27 }
 0x23f   : >> { %v2074_v10 = vadd.f32 %v2072_v58, %v2060_v0  ;;  %v2078_v25 = vadd.f32 %v2076_v11, %v2062_v61  ;;  %v1945_v2 = vadd.f32 %v1943_v14, %v1929_v48  ;;  %v1949_v39 = vadd.f32 %v1947_v34, %v1933_v41 }
 0x240   : >> { %v2016_v43 = vmul.f32 %v4941_v45, %v6223_v9  ;;  %v2108_v35 = vmul.f32 %v4941_v45, %v6235_v27  ;;  %v2020_v44 = vmul.f32 %v5041_v46, %v6223_v9  ;;  %v2120_v0 = vmul.f32 %v4941_v45, %v6236_v59 }
 0x241   : >> { %v2090_v32 = vadd.f32 %v2088_v21, %v2074_v10  ;;  %v2094_v6 = vadd.f32 %v2092_v50, %v2078_v25  ;;  %v1961_v61 = vadd.f32 %v1959_v40, %v1945_v2  ;;  %v1965_v58 = vadd.f32 %v1963_v16, %v1949_v39 }
 0x242   : >> { %v2032_v14 = vmul.f32 %v5041_v46, %v6224_v55  ;;  %v2124_v41 = vmul.f32 %v5041_v46, %v6236_v59  ;;  %v2036_v34 = vmul.f32 %v5156_v4, %v6224_v55  ;;  %v2136_v10 = vmul.f32 %v5041_v46, %v6237_v53 }
 0x243   : >> { %v2106_v11 = vadd.f32 %v2104_v12, %v2090_v32  ;;  %v2110_v48 = vadd.f32 %v2108_v35, %v2094_v6  ;;  %v2002_v25 = vadd.f32 %v2000_v60, %v1961_v61  ;;  %v2006_v50 = vadd.f32 %v2004_v15, %v1965_v58 }
 0x244   : >> { %v2140_v2 = vmul.f32 %v5156_v4, %v6237_v53  ;;  %v5196_v39 = vrot.slane %v4946_v26, %v6226_v28  ;;  %v5200_v21 = vrot.slane %v4946_v26, %v6231_v22  ;;  %v2177_v12 = vmul.f32 %v4984_v18, %v6222_v3 }
 0x245   : >> { %v2122_v40 = vadd.f32 %v2120_v0, %v2106_v11  ;;  %v2126_v16 = vadd.f32 %v2124_v41, %v2110_v48  ;;  %v2202_v6 = vadd.f32 %v2200_v37, %v2186_v7  ;;  %v2018_v35 = vadd.f32 %v2016_v43, %v2002_v25 }
 0x246   : >> { %v2022_v60 = vadd.f32 %v2020_v44, %v2006_v50  ;;  %v2181_v15 = vmul.f32 %v4993_v31, %v6222_v3  ;;  %v2193_v58 = vmul.f32 %v4993_v31, %v6223_v9  ;;  %v2197_v0 = vmul.f32 %v5196_v39, %v6223_v9 }
 0x247   : >> { %v2138_v32 = vadd.f32 %v2136_v10, %v2122_v40  ;;  %v2142_v61 = vadd.f32 %v2140_v2, %v2126_v16  ;;  %v6238_v26 = vmax.f32 %v5010_v8, 0.0  ;;  %v6239_v41 = vmax.f32 %v4854_v20, 0.0  ;;  %v2290_v40 = vpop.permute.xlu1 %2289 }
 0x248   : >> { %v2190_v37 = vadd.f32 %v5128_v57, %v2174_v54  ;;  %v2034_v7 = vadd.f32 %v2032_v14, %v2018_v35  ;;  %v2038_v43 = vadd.f32 %v2036_v34, %v2022_v60  ;;  %v2209_v10 = vmul.f32 %v5196_v39, %v6224_v55 }
 0x249   : >> { %v5214_v11 = vmax.f32 %v6239_v41, %v6238_v26  ;;  %v2179_v44 = vadd.f32 %v2177_v12, %v2138_v32  ;;  %v2183_v48 = vadd.f32 %v2181_v15, %v2142_v61  ;;  %v2213_v25 = vmul.f32 %v5200_v21, %v6224_v55  ;;  %v6245_v32 = vld [vmem:[#allocation54_spill] sm:$0xff] }
 0x24a   : >> { %v6241_v50 = vmax.f32 %v5013_v24, 0.0  ;;  %v6242_v8 = vmax.f32 %v4877_v38, 0.0  ;;  %v5229_v20 = vadd.f32 %v5114_v47, %v4999_v51  ;;  %v2039_v57 = vadd.f32 %v5120_v17, %v6173_v19 }
 0x24b   : >> { %6240 = vst [vmem:[#allocation22_spill] sm:$0xff] %v5214_v11  ;;  %v2043_v54 = vadd.f32 %v5124_v62, %v6173_v19  ;;  %v2206_v14 = vadd.f32 %v5136_v36, %v2190_v37  ;;  %v2216_v34 = vadd.f32 %v2202_v6, %v6173_v19  ;;  %v2195_v24 = vadd.f32 %v2193_v58, %v2179_v44  ;;  %v6244_v62 = vld [vmem:[#allocation21_spill] sm:$0xff] }
 0x24c   : >> { %v5225_v2 = vmax.f32 %v6242_v8, %v6241_v50  ;;  %v2199_v16 = vadd.f32 %v2197_v0, %v2183_v48  ;;  %v1857_v38 = vmul.f32 %v4848_v42, %v6200_v23  ;;  %v1859_v51 = vmul.f32 %v4864_v49, %v6200_v23 }
 0x24d   : >> { %v1869_v47 = vmul.f32 %v4864_v49, %v6201_v52  ;;  %v1873_v17 = vmul.f32 %v5101_v30, %v6201_v52  ;;  %v2048_v12 = vadd.f32 %v2034_v7, %v6244_v62  ;;  %v2052_v36 = vadd.f32 %v2038_v43, %v6244_v62  ;;  %v6246_v7 = vld [vmem:[#allocation47_spill] sm:$0xff] }
 0x24e   : >> { %6243 = vst [vmem:[#allocation60_spill] sm:$0xff] %v5225_v2  ;;  %v2211_v6 = vadd.f32 %v2209_v10, %v2195_v24  ;;  %v2215_v35 = vadd.f32 %v2213_v25, %v2199_v16  ;;  %v2041_v60 = vmax.f32 %v2039_v57, 0.0  ;;  %v2293_v15 = vmul.f32 %v2290_v40, %v5089_v5  ;;  %v6247_v5 = vld [vmem:[#allocation34_spill] sm:$0xff]  ;;  %v6250_v24 = vld [vmem:[#allocation35_spill] sm:$0xff] }
 0x24f   : >> { %v1885_v42 = vmul.f32 %v5101_v30, %v6245_v32  ;;  %v1889_v61 = vmul.f32 %v5105_v13, %v6245_v32  ;;  %v2218_v58 = vmax.f32 %v2216_v34, 0.0  ;;  %v2220_v49 = vadd.f32 %v2206_v14, %v6173_v19  ;;  %v6248_v57 = vld [vmem:[#allocation62_spill] sm:$0xff] }
 0x250   : >> { %v2225_v0 = vadd.f32 %v2211_v6, %v6244_v62  ;;  %v2229_v26 = vadd.f32 %v2215_v35, %v6244_v62  ;;  %v1871_v41 = vadd.f32 %v1869_v47, %v1857_v38  ;;  %v1875_v37 = vadd.f32 %v1873_v17, %v1859_v51  ;;  %v6251_v17 = vld [vmem:[#allocation64_spill] sm:$0xff] }
 0x251   : >> { %v1926_v43 = vmul.f32 %v6246_v7, %v6099_v56  ;;  %v1930_v44 = vmul.f32 %v6247_v5, %v6099_v56  ;;  %v2050_v48 = vmax.f32 %v2048_v12, 0.0  ;;  %v2054_v30 = vmax.f32 %v2052_v36, 0.0 }
 0x252   : >> { %v2227_v10 = vmax.f32 %v2225_v0, 0.0  ;;  %v2231_v25 = vmax.f32 %v2229_v26, 0.0  ;;  %v2045_v13 = vmax.f32 %v2043_v54, 0.0  ;;  %v1887_v50 = vadd.f32 %v1885_v42, %v1871_v41  ;;  %v6252_v42 = vld [vmem:[#allocation66_spill] sm:$0xff] }
 0x253   : >> { %v1891_v8 = vadd.f32 %v1889_v61, %v1875_v37  ;;  %v1942_v14 = vmul.f32 %v6247_v5, %v6248_v57  ;;  %v2222_v34 = vmax.f32 %v2220_v49, 0.0  ;;  %v5261_v40 = vmax.f32 %v2041_v60, %v2218_v58 }
 0x254   : >> { %v5264_v16 = vadd.f32 %v2293_v15, %v6250_v24  ;;  %v1946_v38 = vmul.f32 %v5032_v33, %v6248_v57  ;;  %v1928_v51 = vadd.f32 %v1926_v43, %v1887_v50  ;;  %v1958_v12 = vmul.f32 %v5032_v33, %v6251_v17 }
 0x255   : >> { %6249 = vst [vmem:[#allocation37_spill] sm:$0xff] %v5261_v40  ;;  %v1932_v47 = vadd.f32 %v1930_v44, %v1891_v8  ;;  %v1962_v54 = vmul.f32 %v5140_v29, %v6251_v17  ;;  %v2237_v36 = vmax.f32 %v2050_v48, %v2227_v10  ;;  %v2239_v6 = vmax.f32 %v2054_v30, %v2231_v25  ;;  %v6254_v44 = vld [vmem:[#allocation68_spill] sm:$0xff] }
 0x256   : >> { %v2059_v35 = vmul.f32 %v6246_v7, %v6200_v23  ;;  %v2071_v60 = vmul.f32 %v6247_v5, %v6201_v52  ;;  %v1944_v15 = vadd.f32 %v1942_v14, %v1928_v51  ;;  %v1999_v61 = vmul.f32 %v4933_v63, %v6252_v42  ;;  %v2276_v7 = vpop.permute.xlu1 %2275 }
 0x257   : >> { %v2061_v58 = vmul.f32 %v6247_v5, %v6200_v23  ;;  %v2075_v49 = vmul.f32 %v5032_v33, %v6201_v52  ;;  %v5282_v0 = vmax.f32 %v2045_v13, %v2222_v34  ;;  %v1948_v26 = vadd.f32 %v1946_v38, %v1932_v47 }
 0x258   : >> { %v2003_v41 = vmul.f32 %v4941_v45, %v6252_v42  ;;  %v2087_v37 = vmul.f32 %v5032_v33, %v6245_v32  ;;  %v1960_v43 = vadd.f32 %v1958_v12, %v1944_v15  ;;  %v2015_v48 = vmul.f32 %v4941_v45, %v6254_v44  ;;  %v6255_v33 = vld [vmem:[#allocation70_spill] sm:$0xff]  ;;  %v5303_v12 = vld [vmem:[%s3408_s12 + $0x10] sm:$0x3f] }
 0x259   : >> { %6253 = vst [vmem:[#allocation41_spill] sm:$0xff] %v5282_v0  ;;  %v2019_v5 = vmul.f32 %v5041_v46, %v6254_v44  ;;  %v2091_v30 = vmul.f32 %v5140_v29, %v6245_v32  ;;  %v2243_v10 = vmax.f32 %v2237_v36, %v2239_v6  ;;  %v1964_v25 = vadd.f32 %v1962_v54, %v1948_v26  ;;  %v6256_v26 = vld [vmem:[#allocation26_spill] sm:$0xff] }
 0x25a   : >> { %v2073_v13 = vadd.f32 %v2071_v60, %v2059_v35  ;;  %v2103_v50 = vmul.f32 %v4933_v63, %v6099_v56  ;;  %v2001_v8 = vadd.f32 %v1999_v61, %v1960_v43  ;;  %v2031_v14 = vmul.f32 %v5041_v46, %v6255_v33 }
 0x25b   : >> { %v2077_v34 = vadd.f32 %v2075_v49, %v2061_v58  ;;  %v2107_v24 = vmul.f32 %v4941_v45, %v6099_v56  ;;  %v2279_v38 = vmul.f32 %v2276_v7, %v2243_v10  ;;  %v2005_v51 = vadd.f32 %v2003_v41, %v1964_v25  ;;  %v6260_v25 = vld [vmem:[#allocation40_spill] sm:$0xff] }
 0x25c   : >> { %v2035_v47 = vmul.f32 %v5156_v4, %v6255_v33  ;;  %v2089_v29 = vadd.f32 %v2087_v37, %v2073_v13  ;;  %v2017_v54 = vadd.f32 %v2015_v48, %v2001_v8  ;;  %v2119_v63 = vmul.f32 %v4941_v45, %v6248_v57  ;;  %v6257_v45 = vld [vmem:[#allocation27_spill] sm:$0xff] }
 0x25d   : >> { %v2093_v36 = vadd.f32 %v2091_v30, %v2077_v34  ;;  %v2123_v6 = vmul.f32 %v5041_v46, %v6248_v57  ;;  %v2021_v35 = vadd.f32 %v2019_v5, %v2005_v51  ;;  %v2135_v15 = vmul.f32 %v5041_v46, %v6251_v17  ;;  %v6261_v51 = vld [vmem:[#allocation29_spill] sm:$0xff] }
 0x25e   : >> { %v2105_v60 = vadd.f32 %v2103_v50, %v2089_v29  ;;  %v2139_v61 = vmul.f32 %v5156_v4, %v6251_v17  ;;  %v2176_v49 = vmul.f32 %v4984_v18, %v6252_v42  ;;  %v5317_v41 = vrot.slane %v5303_v12, %v6256_v26  ;;  %v6259_v4 = vld [vmem:[#allocation28_spill] sm:$0xff]  ;;  %v5333_v18 = vld [vmem:[%s3408_s12 + $0x28] sm:$0x3f] }
 0x25f   : >> { %v2109_v58 = vadd.f32 %v2107_v24, %v2093_v36  ;;  %v5321_v37 = vrot.slane %v5303_v12, %v6257_v45  ;;  %v5324_v7 = vadd.f32 %v2279_v38, %v5229_v20  ;;  %v2033_v43 = vadd.f32 %v2031_v14, %v2017_v54  ;;  %v2304_v38 = vpop.permute.xlu1 %2303 }
 0x260   : >> { %v2180_v46 = vmul.f32 %v4993_v31, %v6252_v42  ;;  %v5330_v48 = vrot.slane %v5303_v12, %v6259_v4  ;;  %v2037_v5 = vadd.f32 %v2035_v47, %v2021_v35  ;;  %v2192_v30 = vmul.f32 %v4993_v31, %v6254_v44  ;;  %v6262_v47 = vld [vmem:[#allocation53_spill] sm:$0xff] }
 0x261   : >> { %6258 = vst [vmem:[#allocation42_spill] sm:$0xff] %v5324_v7  ;;  %v2336_v13 = vmul.f32 %v5317_v41, %v6260_v25  ;;  %v2344_v20 = vmul.f32 %v5321_v37, %v6233_v1  ;;  %v2121_v50 = vadd.f32 %v2119_v63, %v2105_v60  ;;  %v2125_v8 = vadd.f32 %v2123_v6, %v2109_v58 }
 0x262   : >> { %v2338_v14 = vmul.f32 %v5321_v37, %v6260_v25  ;;  %v2348_v34 = vmul.f32 %v5330_v48, %v6233_v1  ;;  %v2196_v24 = vmul.f32 %v5196_v39, %v6254_v44  ;;  %v5349_v31 = vrot.slane %v5303_v12, %v6261_v51 }
 0x263   : >> { %v2360_v29 = vmul.f32 %v5330_v48, %v6262_v47  ;;  %v5355_v54 = vrot.slane %v5333_v18, %v6256_v26  ;;  %v5358_v36 = vadd.f32 %v2033_v43, %v6173_v19  ;;  %v2137_v63 = vadd.f32 %v2135_v15, %v2121_v50 }
 0x264   : >> { %v2208_v6 = vmul.f32 %v5196_v39, %v6255_v33  ;;  %v5364_v35 = vmul.f32 %v5200_v21, %v6255_v33  ;;  %v2346_v60 = vadd.f32 %v2344_v20, %v2336_v13  ;;  %v2364_v58 = vmul.f32 %v5349_v31, %v6262_v47 }
 0x265   : >> { %6263 = vst [vmem:[#allocation23_spill] sm:$0xff] %v5358_v36  ;;  %v5370_v40 = vrot.slane %v5333_v18, %v6257_v45  ;;  %v2401_v43 = vmul.f32 %v5355_v54, %v6235_v27  ;;  %v2141_v15 = vadd.f32 %v2139_v61, %v2125_v8  ;;  %v2178_v50 = vadd.f32 %v2176_v49, %v2137_v63 }
 0x266   : >> { %v2307_v0 = vmul.f32 %v2304_v38, %v2243_v10  ;;  %v2350_v39 = vadd.f32 %v2348_v34, %v2338_v14  ;;  %v2362_v11 = vadd.f32 %v2360_v29, %v2346_v60  ;;  %v5376_v21 = vrot.slane %v5333_v18, %v6259_v4  ;;  %v5387_v10 = vld [vmem:[%s3408_s12 + $0x40] sm:$0x3f] }
 0x267   : >> { %v2405_v13 = vmul.f32 %v5370_v40, %v6235_v27  ;;  %v2417_v20 = vmul.f32 %v5370_v40, %v6236_v59  ;;  %v5384_v7 = vadd.f32 %v2037_v5, %v6173_v19  ;;  %v2182_v61 = vadd.f32 %v2180_v46, %v2141_v15 }
 0x268   : >> { %v2194_v49 = vadd.f32 %v2192_v30, %v2178_v50  ;;  %v2366_v8 = vadd.f32 %v2364_v58, %v2350_v39  ;;  %v5391_v14 = vrot.slane %v5333_v18, %v6261_v51  ;;  %v2403_v34 = vadd.f32 %v2401_v43, %v2362_v11 }
 0x269   : >> { %6264 = vst [vmem:[#allocation36_spill] sm:$0xff] %v5384_v7  ;;  %v2421_v38 = vmul.f32 %v5376_v21, %v6236_v59  ;;  %v2198_v29 = vadd.f32 %v2196_v24, %v2182_v61  ;;  %v5396_v60 = vadd.f32 %v2307_v0, %v5264_v16  ;;  %v2433_v46 = vmul.f32 %v5376_v21, %v6237_v53 }
 0x26a   : >> { %v2210_v63 = vadd.f32 %v2208_v6, %v2194_v49  ;;  %v2407_v5 = vadd.f32 %v2405_v13, %v2366_v8  ;;  %v2419_v30 = vadd.f32 %v2417_v20, %v2403_v34  ;;  %v2437_v58 = vmul.f32 %v5391_v14, %v6237_v53 }
 0x26b   : >> { %6265 = vst [vmem:[#allocation38_spill] sm:$0xff] %v5396_v60  ;;  %v5404_v15 = vrot.slane %v5387_v10, %v6256_v26  ;;  %v5408_v11 = vrot.slane %v5387_v10, %v6257_v45  ;;  %v5412_v16 = vrot.slane %v5387_v10, %v6259_v4  ;;  %v2538_v0 = vmul.f32 %v5355_v54, %v6260_v25 }
 0x26c   : >> { %v2540_v24 = vmul.f32 %v5370_v40, %v6260_v25  ;;  %v2423_v6 = vadd.f32 %v2421_v38, %v2407_v5  ;;  %v5420_v43 = vrot.slane %v5387_v10, %v6261_v51  ;;  %v2546_v39 = vmul.f32 %v5370_v40, %v6233_v1  ;;  %v5443_v25 = vld [vmem:[%s3408_s12 + $0x58] sm:$0x3f] }
 0x26d   : >> { %v2474_v50 = vmul.f32 %v5404_v15, %v6222_v3  ;;  %v2478_v13 = vmul.f32 %v5408_v11, %v6222_v3  ;;  %v2550_v20 = vmul.f32 %v5376_v21, %v6233_v1  ;;  %v2562_v61 = vmul.f32 %v5376_v21, %v6262_v47 }
 0x26e   : >> { %v2566_v49 = vmul.f32 %v5391_v14, %v6262_v47  ;;  %v2435_v8 = vadd.f32 %v2433_v46, %v2419_v30  ;;  %v2439_v34 = vadd.f32 %v2437_v58, %v2423_v6  ;;  %v2490_v38 = vmul.f32 %v5408_v11, %v6223_v9 }
 0x26f   : >> { %v2548_v5 = vadd.f32 %v2546_v39, %v2538_v0  ;;  %v2494_v2 = vmul.f32 %v5412_v16, %v6223_v9  ;;  %v2552_v36 = vadd.f32 %v2550_v20, %v2540_v24  ;;  %v2578_v60 = vmul.f32 %v5404_v15, %v6235_v27 }
 0x270   : >> { %v2582_v1 = vmul.f32 %v5408_v11, %v6235_v27  ;;  %v2476_v22 = vadd.f32 %v2474_v50, %v2435_v8  ;;  %v2506_v46 = vmul.f32 %v5412_v16, %v6224_v55  ;;  %v2594_v58 = vmul.f32 %v5408_v11, %v6236_v59 }
 0x271   : >> { %v2564_v30 = vadd.f32 %v2562_v61, %v2548_v5  ;;  %v2480_v0 = vadd.f32 %v2478_v13, %v2439_v34  ;;  %v2510_v24 = vmul.f32 %v5420_v43, %v6224_v55  ;;  %v2568_v6 = vadd.f32 %v2566_v49, %v2552_v36 }
 0x272   : >> { %v2598_v39 = vmul.f32 %v5412_v16, %v6236_v59  ;;  %v2610_v27 = vmul.f32 %v5412_v16, %v6237_v53  ;;  %v5457_v50 = vrot.slane %v5443_v25, %v6256_v26  ;;  %v5461_v61 = vrot.slane %v5443_v25, %v6257_v45 }
 0x273   : >> { %v2580_v20 = vadd.f32 %v2578_v60, %v2564_v30  ;;  %v2214_v13 = vadd.f32 %v5364_v35, %v2198_v29  ;;  %v2492_v8 = vadd.f32 %v2490_v38, %v2476_v22  ;;  %v2584_v34 = vadd.f32 %v2582_v1, %v2568_v6 }
 0x274   : >> { %v2614_v36 = vmul.f32 %v5420_v43, %v6237_v53  ;;  %v5467_v60 = vadd.f32 %v2210_v63, %v6173_v19  ;;  %v2496_v49 = vadd.f32 %v2494_v2, %v2480_v0  ;;  %v2651_v26 = vmul.f32 %v5457_v50, %v6222_v3 }
 0x275   : >> { %v2596_v5 = vadd.f32 %v2594_v58, %v2580_v20  ;;  %v2508_v30 = vadd.f32 %v2506_v46, %v2492_v8  ;;  %v2600_v59 = vadd.f32 %v2598_v39, %v2584_v34  ;;  %v5473_v45 = vrot.slane %v5443_v25, %v6259_v4 }
 0x276   : >> { %6266 = vst [vmem:[#allocation45_spill] sm:$0xff] %v5467_v60  ;;  %v2655_v22 = vmul.f32 %v5461_v61, %v6222_v3  ;;  %v2512_v1 = vadd.f32 %v2510_v24, %v2496_v49  ;;  %v5479_v29 = vrot.slane %v5443_v25, %v6261_v51  ;;  %v2667_v2 = vmul.f32 %v5461_v61, %v6223_v9 }
 0x277   : >> { %v2612_v35 = vadd.f32 %v2610_v27, %v2596_v5  ;;  %v2616_v63 = vadd.f32 %v2614_v36, %v2600_v59  ;;  %v2671_v38 = vmul.f32 %v5473_v45, %v6223_v9  ;;  %v2335_v4 = vmul.f32 %v5317_v41, %v6200_v23 }
 0x278   : >> { %v2343_v46 = vmul.f32 %v5321_v37, %v6201_v52  ;;  %v2683_v27 = vmul.f32 %v5473_v45, %v6224_v55  ;;  %v2337_v51 = vmul.f32 %v5321_v37, %v6200_v23  ;;  %v2347_v0 = vmul.f32 %v5330_v48, %v6201_v52 }
 0x279   : >> { %v2653_v58 = vadd.f32 %v2651_v26, %v2612_v35  ;;  %v2522_v59 = vadd.f32 %v2508_v30, %v6244_v62  ;;  %v2657_v24 = vadd.f32 %v2655_v22, %v2616_v63  ;;  %v2687_v6 = vmul.f32 %v5479_v29, %v6224_v55  ;;  %v6275_v26 = vld [vmem:[#allocation42_spill] sm:$0xff] }
 0x27a   : >> { %v2359_v41 = vmul.f32 %v5330_v48, %v6245_v32  ;;  %v5503_v20 = vrot.slane %v5333_v18, %v6226_v28  ;;  %v2363_v37 = vmul.f32 %v5349_v31, %v6245_v32  ;;  %v5508_v34 = vadd.f32 %v2214_v13, %v6173_v19 }
 0x27b   : >> { %v2669_v8 = vadd.f32 %v2667_v2, %v2653_v58  ;;  %v2673_v36 = vadd.f32 %v2671_v38, %v2657_v24  ;;  %v2345_v49 = vadd.f32 %v2343_v46, %v2335_v4  ;;  %v2400_v5 = vmul.f32 %v5355_v54, %v6099_v56 }
 0x27c   : >> { %6267 = vst [vmem:[#allocation46_spill] sm:$0xff] %v5508_v34  ;;  %v2349_v22 = vadd.f32 %v2347_v0, %v2337_v51  ;;  %v2404_v35 = vmul.f32 %v5370_v40, %v6099_v56  ;;  %v2524_v63 = vmax.f32 %v2522_v59, 0.0  ;;  %v2526_v2 = vadd.f32 %v2512_v1, %v6244_v62 }
 0x27d   : >> { %v2685_v30 = vadd.f32 %v2683_v27, %v2669_v8  ;;  %v2689_v58 = vadd.f32 %v2687_v6, %v2673_v36  ;;  %v2361_v39 = vadd.f32 %v2359_v41, %v2345_v49  ;;  %v2416_v38 = vmul.f32 %v5370_v40, %v6248_v57 }
 0x27e   : >> { %v2365_v7 = vadd.f32 %v2363_v37, %v2349_v22  ;;  %v2420_v4 = vmul.f32 %v5376_v21, %v6248_v57  ;;  %v2432_v51 = vmul.f32 %v5376_v21, %v6251_v17  ;;  %v2436_v1 = vmul.f32 %v5391_v14, %v6251_v17 }
 0x27f   : >> { %v2699_v13 = vadd.f32 %v2685_v30, %v6244_v62  ;;  %v2703_v46 = vadd.f32 %v2689_v58, %v6244_v62  ;;  %v2402_v27 = vadd.f32 %v2400_v5, %v2361_v39  ;;  %v2537_v24 = vmul.f32 %v5355_v54, %v6200_v23 }
 0x280   : >> { %v2406_v59 = vadd.f32 %v2404_v35, %v2365_v7  ;;  %v2545_v6 = vmul.f32 %v5370_v40, %v6201_v52  ;;  %v2528_v41 = vmax.f32 %v2526_v2, 0.0  ;;  %v2539_v37 = vmul.f32 %v5370_v40, %v6200_v23 }
 0x281   : >> { %v2701_v0 = vmax.f32 %v2699_v13, 0.0  ;;  %v2705_v8 = vmax.f32 %v2703_v46, 0.0  ;;  %v2549_v39 = vmul.f32 %v5376_v21, %v6201_v52  ;;  %v2418_v36 = vadd.f32 %v2416_v38, %v2402_v27 }
 0x282   : >> { %v2422_v49 = vadd.f32 %v2420_v4, %v2406_v59  ;;  %v2473_v5 = vmul.f32 %v5404_v15, %v6252_v42  ;;  %v2477_v7 = vmul.f32 %v5408_v11, %v6252_v42  ;;  %v2489_v54 = vmul.f32 %v5408_v11, %v6254_v44  ;;  %v5550_v59 = vpop.permute.xlu0 %1788 }
 0x283   : >> { %v2493_v30 = vmul.f32 %v5412_v16, %v6254_v44  ;;  %v2561_v40 = vmul.f32 %v5376_v21, %v6245_v32  ;;  %v2565_v22 = vmul.f32 %v5391_v14, %v6245_v32  ;;  %v2715_v35 = vmax.f32 %v2524_v63, %v2701_v0  ;;  %6268 = vst [vmem:[#allocation25_spill] sm:$0xff] %v5550_v59 }
 0x284   : >> { %v2434_v2 = vadd.f32 %v2432_v51, %v2418_v36  ;;  %v2438_v58 = vadd.f32 %v2436_v1, %v2422_v49  ;;  %v2547_v13 = vadd.f32 %v2545_v6, %v2537_v24  ;;  %v2717_v38 = vmax.f32 %v2528_v41, %v2705_v8  ;;  %v2744_v6 = vpop.permute.xlu1 %2743 }
 0x285   : >> { %v2551_v4 = vadd.f32 %v2549_v39, %v2539_v37  ;;  %v2577_v46 = vmul.f32 %v5404_v15, %v6099_v56  ;;  %v2581_v27 = vmul.f32 %v5408_v11, %v6099_v56  ;;  %v5555_v60 = vrot.slane %v5387_v10, %v6226_v28 }
 0x286   : >> { %v2475_v63 = vadd.f32 %v2473_v5, %v2434_v2  ;;  %v2505_v51 = vmul.f32 %v5412_v16, %v6255_v33  ;;  %v2479_v1 = vadd.f32 %v2477_v7, %v2438_v58  ;;  %v2509_v0 = vmul.f32 %v5420_v43, %v6255_v33 }
 0x287   : >> { %v2563_v15 = vadd.f32 %v2561_v40, %v2547_v13  ;;  %v2567_v24 = vadd.f32 %v2565_v22, %v2551_v4  ;;  %v2593_v8 = vmul.f32 %v5408_v11, %v6248_v57  ;;  %v2597_v37 = vmul.f32 %v5412_v16, %v6248_v57 }
 0x288   : >> { %v2491_v41 = vadd.f32 %v2489_v54, %v2475_v63  ;;  %v2609_v39 = vmul.f32 %v5412_v16, %v6251_v17  ;;  %v2723_v36 = vmax.f32 %v2715_v35, %v2717_v38  ;;  %v2495_v49 = vadd.f32 %v2493_v30, %v2479_v1  ;;  %v6269_v30 = vld [vmem:[#allocation31_spill] sm:$0xff]  ;;  %v5583_v38 = vpop.permute.xlu0 %1802 }
 0x289   : >> { %v2579_v5 = vadd.f32 %v2577_v46, %v2563_v15  ;;  %v2583_v7 = vadd.f32 %v2581_v27, %v2567_v24  ;;  %v2613_v40 = vmul.f32 %v5420_v43, %v6251_v17  ;;  %v2650_v54 = vmul.f32 %v5457_v50, %v6252_v42  ;;  %6270 = vst [vmem:[#allocation33_spill] sm:$0xff] %v5583_v38  ;;  %v6271_v27 = vld [vmem:[#allocation40_spill] sm:$0xff]  ;;  %v6272_v1 = vld [vmem:[#allocation39_spill] sm:$0xff] }
 0x28a   : >> { %v2507_v2 = vadd.f32 %v2505_v51, %v2491_v41  ;;  %v5573_v11 = vmul.f32 %v5461_v61, %v6252_v42  ;;  %v2747_v22 = vmul.f32 %v2744_v6, %v2723_v36  ;;  %v2511_v58 = vadd.f32 %v2509_v0, %v2495_v49 }
 0x28b   : >> { %v5577_v13 = vrot.slane %v5303_v12, %v6226_v28  ;;  %v5581_v35 = vrot.slane %v5303_v12, %v6269_v30  ;;  %v2595_v4 = vadd.f32 %v2593_v8, %v2579_v5  ;;  %v2599_v46 = vadd.f32 %v2597_v37, %v2583_v7  ;;  %v2772_v8 = vpop.permute.xlu1 %2771  ;;  %v6274_v5 = vld [vmem:[#allocation59_spill] sm:$0xff] }
 0x28c   : >> { %v2340_v50 = vmul.f32 %v5330_v48, %v6271_v27  ;;  %v2342_v63 = vmul.f32 %v5349_v31, %v6271_v27  ;;  %v2666_v51 = vmul.f32 %v5461_v61, %v6254_v44  ;;  %v2352_v0 = vmul.f32 %v5349_v31, %v6272_v1  ;;  %v5626_v17 = vpop.permute.xlu0 %1816 }
 0x28d   : >> { %v2356_v12 = vmul.f32 %v5577_v13, %v6272_v1  ;;  %v2368_v15 = vmul.f32 %v5577_v13, %v6262_v47  ;;  %v5598_v24 = vadd.f32 %v2507_v2, %v6173_v19  ;;  %v2670_v6 = vmul.f32 %v5473_v45, %v6254_v44  ;;  %6278 = vst [vmem:[#allocation49_spill] sm:$0xff] %v5626_v17 }
 0x28e   : >> { %v5604_v41 = vmul.f32 %v5473_v45, %v6255_v33  ;;  %v2372_v61 = vmul.f32 %v5581_v35, %v6262_v47  ;;  %v2354_v37 = vadd.f32 %v2352_v0, %v2340_v50  ;;  %v2409_v7 = vmul.f32 %v5376_v21, %v6274_v5 }
 0x28f   : >> { %6273 = vst [vmem:[#allocation32_spill] sm:$0xff] %v5598_v24  ;;  %v2358_v49 = vadd.f32 %v2356_v12, %v2342_v63  ;;  %v2413_v2 = vmul.f32 %v5391_v14, %v6274_v5  ;;  %v5613_v59 = vadd.f32 %v2747_v22, %v6275_v26  ;;  %v5616_v34 = vadd.f32 %v2511_v58, %v6173_v19  ;;  %v6277_v63 = vld [vmem:[#allocation61_spill] sm:$0xff] }
 0x290   : >> { %v2611_v38 = vadd.f32 %v2609_v39, %v2595_v4  ;;  %v5620_v44 = vrot.slane %v5333_v18, %v6269_v30  ;;  %v2370_v42 = vadd.f32 %v2368_v15, %v2354_v37  ;;  %v2425_v0 = vmul.f32 %v5391_v14, %v6277_v63 }
 0x291   : >> { %6276 = vst [vmem:[#allocation43_spill] sm:$0xff] %v5616_v34  ;;  %v2374_v50 = vadd.f32 %v2372_v61, %v2358_v49  ;;  %v2429_v12 = vmul.f32 %v5503_v20, %v6277_v63  ;;  %v2615_v22 = vadd.f32 %v2613_v40, %v2599_v46  ;;  %v2686_v39 = vmul.f32 %v5479_v29, %v6255_v33 }
 0x292   : >> { %v5631_v58 = vmul.f32 %v2772_v8, %v2723_v36  ;;  %v2411_v18 = vadd.f32 %v2409_v7, %v2370_v42  ;;  %v2441_v15 = vmul.f32 %v5503_v20, %v6237_v53  ;;  %v2445_v61 = vmul.f32 %v5620_v44, %v6237_v53 }
 0x293   : >> { %v2415_v4 = vadd.f32 %v2413_v2, %v2374_v50  ;;  %v2652_v37 = vadd.f32 %v2650_v54, %v2611_v38  ;;  %v5639_v49 = vrot.slane %v5387_v10, %v6269_v30  ;;  %v2482_v40 = vmul.f32 %v5412_v16, %v6222_v3 }
 0x294   : >> { %6279 = vst [vmem:[#allocation48_spill] sm:$0xff] %v5631_v58  ;;  %v2486_v36 = vmul.f32 %v5420_v43, %v6222_v3  ;;  %v2427_v46 = vadd.f32 %v2425_v0, %v2411_v18  ;;  %v2498_v8 = vmul.f32 %v5420_v43, %v6223_v9  ;;  %v2542_v7 = vmul.f32 %v5376_v21, %v6271_v27 }
 0x295   : >> { %v2431_v42 = vadd.f32 %v2429_v12, %v2415_v4  ;;  %v2502_v54 = vmul.f32 %v5555_v60, %v6223_v9  ;;  %v2544_v10 = vmul.f32 %v5391_v14, %v6271_v27  ;;  %v2554_v38 = vmul.f32 %v5391_v14, %v6272_v1  ;;  %v5661_v4 = vpop.permute.xlu0 %2256 }
 0x296   : >> { %v2558_v2 = vmul.f32 %v5503_v20, %v6272_v1  ;;  %v2443_v50 = vadd.f32 %v2441_v15, %v2427_v46  ;;  %v2570_v12 = vmul.f32 %v5503_v20, %v6262_v47  ;;  %v2574_v18 = vmul.f32 %v5620_v44, %v6262_v47  ;;  %6280 = vst [vmem:[#allocation24_spill] sm:$0xff] %v5661_v4 }
 0x297   : >> { %v2447_v0 = vadd.f32 %v2445_v61, %v2431_v42  ;;  %v2514_v26 = vmul.f32 %v5555_v60, %v6224_v55  ;;  %v2556_v27 = vadd.f32 %v2554_v38, %v2542_v7  ;;  %v2586_v17 = vmul.f32 %v5412_v16, %v6274_v5 }
 0x298   : >> { %v2560_v24 = vadd.f32 %v2558_v2, %v2544_v10  ;;  %v2484_v34 = vadd.f32 %v2482_v40, %v2443_v50  ;;  %v2518_v15 = vmul.f32 %v5639_v49, %v6224_v55  ;;  %v2590_v61 = vmul.f32 %v5420_v43, %v6274_v5 }
 0x299   : >> { %v2488_v1 = vadd.f32 %v2486_v36, %v2447_v0  ;;  %v2656_v47 = vadd.f32 %v5573_v11, %v2615_v22  ;;  %v2572_v46 = vadd.f32 %v2570_v12, %v2556_v27  ;;  %v2602_v4 = vmul.f32 %v5420_v43, %v6277_v63 }
 0x29a   : >> { %v2576_v42 = vadd.f32 %v2574_v18, %v2560_v24  ;;  %v2668_v7 = vadd.f32 %v2666_v51, %v2652_v37  ;;  %v2500_v10 = vadd.f32 %v2498_v8, %v2484_v34  ;;  %v2606_v40 = vmul.f32 %v5555_v60, %v6277_v63  ;;  %v5684_v34 = vpop.permute.xlu0 %2284 }
 0x29b   : >> { %v2504_v38 = vadd.f32 %v2502_v54, %v2488_v1  ;;  %v2672_v36 = vadd.f32 %v2670_v6, %v2656_v47  ;;  %v2588_v2 = vadd.f32 %v2586_v17, %v2572_v46  ;;  %v2618_v0 = vmul.f32 %v5555_v60, %v6237_v53 }
 0x29c   : >> { %v2592_v50 = vadd.f32 %v2590_v61, %v2576_v42  ;;  %v2516_v5 = vadd.f32 %v2514_v26, %v2500_v10  ;;  %v2622_v11 = vmul.f32 %v5639_v49, %v6237_v53  ;;  %v5682_v24 = vrot.slane %v5443_v25, %v6226_v28 }
 0x29d   : >> { %v2520_v58 = vadd.f32 %v2518_v15, %v2504_v38  ;;  %v2604_v51 = vadd.f32 %v2602_v4, %v2588_v2  ;;  %v5688_v17 = vrot.slane %v5443_v25, %v6269_v30  ;;  %v2659_v6 = vmul.f32 %v5473_v45, %v6222_v3 }
 0x29e   : >> { %v2608_v22 = vadd.f32 %v2606_v40, %v2592_v50  ;;  %v2684_v63 = vadd.f32 %v5604_v41, %v2668_v7  ;;  %v2530_v26 = vadd.f32 %v2516_v5, %v6244_v62  ;;  %v2663_v28 = vmul.f32 %v5479_v29, %v6222_v3  ;;  %v5722_v1 = vpop.permute.xlu0 %2270  ;;  %v6281_v50 = vld [vmem:[#allocation64_spill] sm:$0xff] }
 0x29f   : >> { %v2534_v53 = vadd.f32 %v2520_v58, %v6244_v62  ;;  %v2620_v37 = vadd.f32 %v2618_v0, %v2604_v51  ;;  %v2675_v54 = vmul.f32 %v5479_v29, %v6223_v9  ;;  %v2679_v25 = vmul.f32 %v5682_v24, %v6223_v9 }
 0x2a0   : >> { %v2624_v8 = vadd.f32 %v2622_v11, %v2608_v22  ;;  %v5701_v30 = vadd.f32 %v2686_v39, %v2672_v36  ;;  %v2691_v41 = vmul.f32 %v5682_v24, %v6224_v55  ;;  %v2695_v12 = vmul.f32 %v5688_v17, %v6224_v55  ;;  %v6282_v22 = vld [vmem:[#allocation66_spill] sm:$0xff] }
 0x2a1   : >> { %v2339_v58 = vmul.f32 %v5330_v48, %v6200_v23  ;;  %v2661_v3 = vadd.f32 %v2659_v6, %v2620_v37  ;;  %v2341_v4 = vmul.f32 %v5349_v31, %v6200_v23  ;;  %v2351_v27 = vmul.f32 %v5349_v31, %v6201_v52 }
 0x2a2   : >> { %v2665_v18 = vadd.f32 %v2663_v28, %v2624_v8  ;;  %v5714_v9 = vadd.f32 %v2684_v63, %v6173_v19  ;;  %v2355_v39 = vmul.f32 %v5577_v13, %v6201_v52  ;;  %v2367_v55 = vmul.f32 %v5577_v13, %v6245_v32 }
 0x2a3   : >> { %v2371_v48 = vmul.f32 %v5581_v35, %v6245_v32  ;;  %v2532_v15 = vmax.f32 %v2530_v26, 0.0  ;;  %v2536_v61 = vmax.f32 %v2534_v53, 0.0  ;;  %v2677_v47 = vadd.f32 %v2675_v54, %v2661_v3  ;;  %v6283_v53 = vld [vmem:[#allocation68_spill] sm:$0xff]  ;;  %v5748_v54 = vpop.permute.xlu0 %2298 }
 0x2a4   : >> { %v2681_v46 = vadd.f32 %v2679_v25, %v2665_v18  ;;  %v2353_v42 = vadd.f32 %v2351_v27, %v2339_v58  ;;  %v2357_v31 = vadd.f32 %v2355_v39, %v2341_v4  ;;  %v2408_v7 = vmul.f32 %v5376_v21, %v6099_v56  ;;  %v2758_v58 = vpop.permute.xlu1 %2757 }
 0x2a5   : >> { %v2412_v10 = vmul.f32 %v5391_v14, %v6099_v56  ;;  %v2693_v38 = vadd.f32 %v2691_v41, %v2677_v47  ;;  %v2424_v13 = vmul.f32 %v5391_v14, %v6248_v57  ;;  %v2428_v35 = vmul.f32 %v5503_v20, %v6248_v57 }
 0x2a6   : >> { %v2697_v40 = vadd.f32 %v2695_v12, %v2681_v46  ;;  %v2369_v36 = vadd.f32 %v2367_v55, %v2353_v42  ;;  %v2373_v2 = vadd.f32 %v2371_v48, %v2357_v31  ;;  %v2440_v0 = vmul.f32 %v5503_v20, %v6281_v50 }
 0x2a7   : >> { %v2444_v5 = vmul.f32 %v5620_v44, %v6281_v50  ;;  %v2707_v11 = vadd.f32 %v2693_v38, %v6244_v62  ;;  %v2481_v6 = vmul.f32 %v5412_v16, %v6282_v22  ;;  %v2485_v63 = vmul.f32 %v5420_v43, %v6282_v22 }
 0x2a8   : >> { %v2711_v51 = vadd.f32 %v2697_v40, %v6244_v62  ;;  %v2410_v26 = vadd.f32 %v2408_v7, %v2369_v36  ;;  %v2497_v28 = vmul.f32 %v5420_v43, %v6283_v53  ;;  %v2501_v37 = vmul.f32 %v5555_v60, %v6283_v53 }
 0x2a9   : >> { %v2541_v8 = vmul.f32 %v5376_v21, %v6200_v23  ;;  %v2709_v25 = vmax.f32 %v2707_v11, 0.0  ;;  %v2414_v41 = vadd.f32 %v2412_v10, %v2373_v2  ;;  %v2543_v12 = vmul.f32 %v5391_v14, %v6200_v23 }
 0x2aa   : >> { %v2713_v62 = vmax.f32 %v2711_v51, 0.0  ;;  %v2426_v3 = vadd.f32 %v2424_v13, %v2410_v26  ;;  %v2553_v18 = vmul.f32 %v5391_v14, %v6201_v52  ;;  %v2557_v4 = vmul.f32 %v5503_v20, %v6201_v52  ;;  %v6286_v26 = vld [vmem:[#allocation48_spill] sm:$0xff] }
 0x2ab   : >> { %v2569_v27 = vmul.f32 %v5503_v20, %v6245_v32  ;;  %v2719_v21 = vmax.f32 %v2532_v15, %v2709_v25  ;;  %v2430_v55 = vadd.f32 %v2428_v35, %v2414_v41  ;;  %v2573_v48 = vmul.f32 %v5620_v44, %v6245_v32  ;;  %v5770_v44 = vpop.permute.xlu0 %2738 }
 0x2ac   : >> { %v2721_v39 = vmax.f32 %v2536_v61, %v2713_v62  ;;  %v2513_v23 = vmul.f32 %v5555_v60, %v6255_v33  ;;  %v2555_v47 = vadd.f32 %v2553_v18, %v2541_v8  ;;  %v2559_v46 = vadd.f32 %v2557_v4, %v2543_v12  ;;  %v6287_v62 = vld [vmem:[#allocation43_spill] sm:$0xff] }
 0x2ad   : >> { %v2585_v14 = vmul.f32 %v5412_v16, %v6099_v56  ;;  %v2442_v31 = vadd.f32 %v2440_v0, %v2426_v3  ;;  %v2446_v52 = vadd.f32 %v2444_v5, %v2430_v55  ;;  %v2589_v20 = vmul.f32 %v5420_v43, %v6099_v56  ;;  %v6292_v55 = vld [vmem:[#allocation33_spill] sm:$0xff] }
 0x2ae   : >> { %v2725_v42 = vmax.f32 %v2719_v21, %v2721_v39  ;;  %v2571_v15 = vadd.f32 %v2569_v27, %v2555_v47  ;;  %v2575_v61 = vadd.f32 %v2573_v48, %v2559_v46  ;;  %v2601_v7 = vmul.f32 %v5420_v43, %v6248_v57  ;;  %v2786_v43 = vpop.permute.xlu1 %2785  ;;  %v6289_v27 = vld [vmem:[#allocation60_spill] sm:$0xff]  ;;  %v6290_v21 = vld [vmem:[#allocation22_spill] sm:$0xff]  ;;  %v6293_v47 = vld [vmem:[#allocation45_spill] sm:$0xff] }
 0x2af   : >> { %v2605_v32 = vmul.f32 %v5555_v60, %v6248_v57  ;;  %v2483_v38 = vadd.f32 %v2481_v6, %v2442_v31  ;;  %v2487_v40 = vadd.f32 %v2485_v63, %v2446_v52  ;;  %v2517_v16 = vmul.f32 %v5639_v49, %v6255_v33  ;;  %v6285_v63 = vld [vmem:[#allocation38_spill] sm:$0xff]  ;;  %v6295_v46 = vld [vmem:[#allocation23_spill] sm:$0xff]  ;;  %v6299_v52 = vld [vmem:[#allocation36_spill] sm:$0xff] }
 0x2b0   : >> { %v2761_v10 = vmul.f32 %v2758_v58, %v2725_v42  ;;  %v2587_v13 = vadd.f32 %v2585_v14, %v2571_v15  ;;  %v2591_v35 = vadd.f32 %v2589_v20, %v2575_v61  ;;  %v2617_v56 = vmul.f32 %v5555_v60, %v6281_v50 }
 0x2b1   : >> { %v2621_v36 = vmul.f32 %v5639_v49, %v6281_v50  ;;  %v2702_v57 = vadd.f32 %v5701_v30, %v6173_v19  ;;  %v2499_v0 = vadd.f32 %v2497_v28, %v2483_v38  ;;  %v2503_v5 = vadd.f32 %v2501_v37, %v2487_v40  ;;  %v6303_v38 = vld [vmem:[#allocation25_spill] sm:$0xff] }
 0x2b2   : >> { %v5781_v25 = vadd.f32 %v2761_v10, %v5613_v59   ;;  %v2603_v11 = vadd.f32 %v2601_v7, %v2587_v13  ;;  %v2607_v51 = vadd.f32 %v2605_v32, %v2591_v35  ;;  %v2658_v6 = vmul.f32 %v5473_v45, %v6282_v22  ;;  %v6301_v7 = vld [vmem:[#allocation51_spill] sm:$0xff]  ;;  %v6302_v32 = vld [vmem:[#allocation57_spill] sm:$0xff] }
 0x2b3   : >> { %v2662_v60 = vmul.f32 %v5479_v29, %v6282_v22  ;;  %v2777_v49 = vadd.f32 %v6286_v26, %v6285_v63  ;;  %v2515_v50 = vadd.f32 %v2513_v23, %v2499_v0  ;;  %v2674_v30 = vmul.f32 %v5479_v29, %v6283_v53  ;;  %v2767_v22 = vpop.permute.xlu0 %2766  ;;  %v6305_v35 = vld [vmem:[#allocation41_spill] sm:$0xff]  ;;  %v6310_v63 = vld [vmem:[#allocation24_spill] sm:$0xff] }
 0x2b4   : >> { %v6284_v2 = vmov %v5781_v25  ;;  %v2789_v8 = vmul.f32 %v2786_v43, %v2725_v42  ;;  %v2519_v59 = vadd.f32 %v2517_v16, %v2503_v5  ;;  %v2619_v25 = vadd.f32 %v2617_v56, %v2603_v11  ;;  %v6304_v16 = vld [vmem:[#allocation49_spill] sm:$0xff]  ;;  %v6307_v43 = vld [vmem:[#allocation32_spill] sm:$0xff] }
 0x2b5   : >> { %v2623_v28 = vadd.f32 %v2621_v36, %v2607_v51  ;;  %v2678_v37 = vmul.f32 %v5682_v24, %v6283_v53  ;;  %v2527_v41 = vmax.f32 %v6287_v62, 0.0  ;;  %v2700_v45 = vmax.f32 %v5714_v9, 0.0  ;;  %v6291_v53 = vld [vmem:[#allocation56_spill] sm:$0xff]  ;;  %v6306_v56 = vld [vmem:[#allocation37_spill] sm:$0xff] }
 0x2b6   : >> { %v2704_v12 = vmax.f32 %v2702_v57, 0.0  ;;  %v5795_v23 = vadd.f32 %v2789_v8, %v2777_v49   ;;  %v2660_v3 = vadd.f32 %v2658_v6, %v2619_v25  ;;  %v2690_v29 = vmul.f32 %v5682_v24, %v6255_v33  ;;  %v6309_v6 = vld [vmem:[#allocation55_spill] sm:$0xff] }
 0x2b7   : >> { %v2664_v18 = vadd.f32 %v2662_v60, %v2623_v28  ;;  %v2694_v4 = vmul.f32 %v5688_v17, %v6255_v33  ;;  %v1760_v39 = vmax.f32 %v6290_v21, %v6289_v27  ;;  %v1810_v48 = vmul.f32 %v6292_v55, %v6291_v53 }
 0x2b8   : >> { %v6288_v58 = vmov %v5795_v23  ;;  %v6294_v9 = vmax.f32 %v6293_v47, 0.0  ;;  %v6296_v14 = vmax.f32 %v6295_v46, 0.0  ;;  %v6297_v23 = vld [vmem:[#allocation46_spill] sm:$0xff]  ;;  %v6300_v20 = vmax.f32 %v6299_v52, 0.0 }
 0x2b9   : >> { %v6298_v31 = vmax.f32 %v6297_v23, 0.0  ;;  %v2529_v24 = vadd.f32 %v2515_v50, %v6173_v19  ;;  %v2533_v33 = vadd.f32 %v2519_v59, %v6173_v19  ;;  %v2676_v17 = vadd.f32 %v2674_v30, %v2660_v3  ;;  %v2753_v30 = vpop.permute.xlu0 %2752 }
 0x2ba   : >> { %v2236_v42 = vmax.f32 %v6296_v14, %v6294_v9  ;;  %v2680_v61 = vadd.f32 %v2678_v37, %v2664_v18  ;;  %v1784_v10 = vadd.f32 %v6302_v32, %v6301_v7  ;;  %v1796_v40 = vmul.f32 %v6303_v38, %v1760_v39 }
 0x2bb   : >> { %v2238_v15 = vmax.f32 %v6300_v20, %v6298_v31  ;;  %v1824_v13 = vmul.f32 %v6304_v16, %v1760_v39  ;;  %v2240_v36 = vmax.f32 %v6306_v56, %v6305_v35  ;;  %v6308_v57 = vmax.f32 %v6307_v43, 0.0 }
 0x2bc   : >> { %v2716_v5 = vmax.f32 %v2527_v41, %v2704_v12  ;;  %v2692_v11 = vadd.f32 %v2690_v29, %v2676_v17  ;;  %v2696_v51 = vadd.f32 %v2694_v4, %v2680_v61  ;;  %v1812_v60 = vadd.f32 %v1810_v48, %v6309_v6 }
 0x2bd   : >> { %v2714_v0 = vmax.f32 %v6308_v57, %v2700_v45  ;;  %v2264_v26 = vmul.f32 %v6310_v63, %v2240_v36  ;;  %v2292_v49 = vmul.f32 %v5684_v34, %v2240_v36  ;;  %v2242_v50 = vmax.f32 %v2236_v42, %v2238_v15  ;;  %v2781_v53 = vpop.permute.xlu0 %2780 }
 0x2be   : >> { %v2531_v8 = vmax.f32 %v2529_v24, 0.0  ;;  %v2535_v59 = vmax.f32 %v2533_v33, 0.0  ;;  %v2706_v25 = vadd.f32 %v2692_v11, %v6173_v19  ;;  %v2710_v28 = vadd.f32 %v2696_v51, %v6173_v19 }
 0x2bf   : >> { %v1798_v37 = vadd.f32 %v1796_v40, %v1784_v10  ;;  %v1826_v62 = vadd.f32 %v1824_v13, %v1812_v60  ;;  %v2278_v41 = vmul.f32 %v5722_v1, %v2242_v50  ;;  %v2306_v45 = vmul.f32 %v5748_v54, %v2242_v50 }
 0x2c0   : >> { %v2722_v12 = vmax.f32 %v2714_v0, %v2716_v5  ;;  %v2708_v3 = vmax.f32 %v2706_v25, 0.0  ;;  %v2712_v18 = vmax.f32 %v2710_v28, 0.0  ;;  %v6311_v23 = vmov %v6288_v58 }
 0x2c1   : >> { %v2266_v29 = vadd.f32 %v2264_v26, %v1798_v37  ;;  %v2294_v4 = vadd.f32 %v2292_v49, %v1826_v62  ;;  %v6313_v25 = vmov %v6284_v2  ;;  %v2804_v31 = vsel (%p271_p6), %vm2794_vm1, %v6288_v58, 0.0 }
 0x2c2   : >> { %v2746_v34 = vmul.f32 %v5770_v44, %v2722_v12  ;;  %v2774_v27 = vmul.f32 %v2767_v22, %v2722_v12  ;;  %v2718_v21 = vmax.f32 %v2531_v8, %v2708_v3  ;;  %v2720_v39 = vmax.f32 %v2535_v59, %v2712_v18 }
 0x2c3   : >> { %v2280_v55 = vadd.f32 %v2278_v41, %v2266_v29  ;;  %v2308_v48 = vadd.f32 %v2306_v45, %v2294_v4  ;;  %v2795_v22 = vsel (%p271_p6), %vm2794_vm1, %v6284_v2, 0.0 }
 0x2c4   : >> { %v2724_v19 = vmax.f32 %v2718_v21, %v2720_v39 }
 0x2c5   : >> { %v2748_v47 = vadd.f32 %v2746_v34, %v2280_v55  ;;  %v2776_v9 = vadd.f32 %v2774_v27, %v2308_v48 }
 0x2c6   : >> { %v2760_v46 = vmul.f32 %v2753_v30, %v2724_v19  ;;  %v2788_v1 = vmul.f32 %v2781_v53, %v2724_v19  ;;  %273 = sbr.rel (!%p271_p6) target bundleno = 143 (0x8f), region = 85 }
 0x2c8   : >> { %v2762_v14 = vadd.f32 %v2760_v46, %v2748_v47   ;;  %v2790_v54 = vadd.f32 %v2788_v1, %v2776_v9  }
 0x2ca   : >> { %v6312_v24 = vmov %v2790_v54  ;;  %v6314_v26 = vmov %v2762_v14  ;;  %v2793_v44 = vsel (%p271_p6), %vm2792_vm0, %v2762_v14, 0.0  ;;  %v2803_v42 = vsel (%p271_p6), %vm2792_vm0, %v2790_v54, 0.0 }
 0x2cb   : > { %v2796_v52 = vadd.f32 %v2795_v22, %v2793_v44  ;;  %v2805_v20 = vadd.f32 %v2804_v31, %v2803_v42 }
 0x2cd   : > { %v2797_v15 = vrot.slane %v2796_v52, 4  ;;  %v2806_v33 = vrot.slane %v2805_v20, 4 }
 0x2cf   : > { %v2798_v17 = vadd.f32 %v2797_v15, %v2796_v52  ;;  %v2807_v61 = vadd.f32 %v2806_v33, %v2805_v20 }
 0x2d1   : > { %v2799_v7 = vrot.slane %v2798_v17, 2  ;;  %v2808_v32 = vrot.slane %v2807_v61, 2 }
 0x2d3   : > { %v2800_v10 = vadd.f32 %v2799_v7, %v2798_v17  ;;  %v2809_v38 = vadd.f32 %v2808_v32, %v2807_v61 }
 0x2d5   : > { %v2801_v40 = vrot.slane %v2800_v10, 1  ;;  %v2810_v23 = vrot.slane %v2809_v38, 1 }
 0x2d7   : > { %v2802_v24 = vadd.f32 %v2801_v40, %v2800_v10  ;;  %v2811_v16 = vadd.f32 %v2810_v23, %v2809_v38 }
 0x2d9   : > { %v2813_v2 = vsel %vm2812_vm2, %v2802_v24, %v2811_v16 }
 0x2da   : > { %2815 = vst.msk [vmem:[%s3289_s11] sm:$0x3] %vm2814_vm3, %v2813_v2 }
 0x2db PF: > { %s14_s17 = sadd.s32 1, %s3132_s17   ;;  %s6315_s15 = smov %s3128_s16 }
 0x2dc   : > { %p11_p7 = scmp.ge.s32.totalorder %s14_s17, 4   ;;  %s6316_s16 = smov %s6318_s18 }
 0x2de   :  { %13 = sbr.rel (!%p11_p7) target bundleno = 2 (0x2), region = 96 }

</bundles_post_ra>
